<compile_context>
chip_gen: v7x
topology: tpu7x:2x2x1
jax: 0.10.0
libtpu: 0.0.40
codegen_flags: <defaults>
</compile_context>

<pallas_src>
import jax
import jax.numpy as jnp
from jax.experimental import pallas as pl
from jax.experimental.pallas import tpu as pltpu

C_HEAD = 264        # 256 noise channels + 1 label channel + 7 zero pad (8-aligned)
NZ = 100            # noise vector size (fixed by nn.Linear(100, 256*7*7))
EPS = 1e-5


# ----------------------------------------------------------------------------
# Pallas kernels -- each is a single grid point with all operands VMEM-resident
# (largest call holds ~5.5 MB, under every generation's default scoped VMEM).
# ----------------------------------------------------------------------------

def head_kernel(z_ref, w_ref, mask_ref, o_ref):
    """[noise | emb | 1] @ w_head -> NHWC head [B, 49*C_HEAD].
    ReLU only on the noise channels (mask==1); the label-branch bias is folded
    into the matmul via the constant-1 input column."""
    y = jnp.dot(z_ref[...], w_ref[...], preferred_element_type=jnp.float32)
    o_ref[...] = jnp.where(mask_ref[...] != 0.0, jnp.maximum(y, 0.0), y).astype(o_ref.dtype)


def conv1_bn_relu_kernel(p_ref, w_ref, g_ref, b_ref, o_ref):
    """im2col conv (one matmul) + training-mode BatchNorm + ReLU, fused."""
    y = jnp.dot(p_ref[...], w_ref[...], preferred_element_type=jnp.float32)
    inv_n = 1.0 / y.shape[0]
    mean = jnp.sum(y, axis=0, keepdims=True) * inv_n
    var = jnp.sum(y * y, axis=0, keepdims=True) * inv_n - mean * mean
    scale = g_ref[...] * jax.lax.rsqrt(var + EPS)
    shift = b_ref[...] - mean * scale
    o_ref[...] = jnp.maximum(y * scale + shift, 0.0).astype(o_ref.dtype)


def conv2_bn_relu_kernel(p_ref, w_ref, fold_ref, g_ref, b_ref, o_ref):
    """Sub-pixel ConvTranspose2d(128->64, 4x4, s=2, p=1): all 4 output phases are
    packed along lanes -> one lane-dense [B*49, 256] matmul.  Training-mode BN
    statistics (per channel, over B*14*14) are folded across the 4 phase lane
    groups with a constant 256x256 0/1 matrix, then ReLU."""
    y = jnp.dot(p_ref[...], w_ref[...], preferred_element_type=jnp.float32)
    inv_n = 1.0 / (4 * y.shape[0])
    s = jnp.dot(jnp.sum(y, axis=0, keepdims=True), fold_ref[...],
                preferred_element_type=jnp.float32)
    sq = jnp.dot(jnp.sum(y * y, axis=0, keepdims=True), fold_ref[...],
                 preferred_element_type=jnp.float32)
    mean = s * inv_n
    var = sq * inv_n - mean * mean
    scale = g_ref[...] * jax.lax.rsqrt(var + EPS)
    shift = b_ref[...] - mean * scale
    o_ref[...] = jnp.maximum(y * scale + shift, 0.0).astype(o_ref.dtype)


def conv3_sigmoid_kernel(p_ref, w_ref, o_ref):
    """Sub-pixel ConvTranspose2d(64->1, 4x4, s=2, p=1) + Sigmoid.  NHWC patches;
    the 4 output phases are the 4 output columns (tiny masked store is free)."""
    y = jnp.dot(p_ref[...], w_ref[...], preferred_element_type=jnp.float32)
    o_ref[...] = jax.nn.sigmoid(y)


def _call(kernel, out_shape, cost, *args):
    return pl.pallas_call(
        kernel,
        out_shape=out_shape,
        in_specs=[pl.BlockSpec(memory_space=pltpu.MemorySpace.VMEM)] * len(args),
        out_specs=pl.BlockSpec(memory_space=pltpu.MemorySpace.VMEM),
        compiler_params=pltpu.CompilerParams(vmem_limit_bytes=32 * 1024 * 1024),
        cost_estimate=cost,
    )(*args)


# ----------------------------------------------------------------------------
# Parameters in PyTorch layout + one-time repack into fused matmul form
# ----------------------------------------------------------------------------

def init_params(key, embedding_dim=100):
    ks = jax.random.split(key, 11)
    n = jax.random.normal
    return {
        # nn.Linear(100, 256*7*7, bias=False).weight  [out, in]
        "w_noise": 0.05 * n(ks[0], (256 * 49, NZ), jnp.float32),
        # nn.Embedding(10, embedding_dim).weight
        "emb": n(ks[1], (10, embedding_dim), jnp.float32),
        # nn.Linear(embedding_dim, 49).weight / .bias
        "w_lab": 0.1 * n(ks[2], (49, embedding_dim), jnp.float32),
        "b_lab": 0.1 * n(ks[3], (49,), jnp.float32),
        # ConvTranspose2d weights, PyTorch layout [in_c, out_c, kH, kW] (bias=False)
        "w_ct1": 0.02 * n(ks[4], (257, 128, 3, 3), jnp.float32),
        "w_ct2": 0.02 * n(ks[5], (128, 64, 4, 4), jnp.float32),
        "w_ct3": 0.03 * n(ks[6], (64, 1, 4, 4), jnp.float32),
        # BatchNorm2d affine params (randomized here to exercise the fused path)
        "g1": 1.0 + 0.1 * n(ks[7], (128,), jnp.float32),
        "b1": 0.1 * n(ks[8], (128,), jnp.float32),
        "g2": 1.0 + 0.1 * n(ks[9], (64,), jnp.float32),
        "b2": 0.1 * n(ks[10], (64,), jnp.float32),
    }


def prepare_weights(p):
    """One-time repack of PyTorch-layout params into NHWC fused matmul form."""
    E = p["emb"].shape[1]
    K_lin = NZ + E + 1                        # noise | embedding | constant-1 (bias)
    K_pad = ((K_lin + 15) // 16) * 16         # 208 for E=100 (bf16 sublane packing)

    # --- fused head weight: columns ordered (pixel=(h*7+w), channel) NHWC,
    #     channels 0..255 = noise, 256 = label, 257..263 = zero pad.
    wn = p["w_noise"].T.reshape(NZ, 256, 49).transpose(0, 2, 1)      # [k, pix, c]
    w_head = jnp.zeros((K_pad, 49, C_HEAD), jnp.float32)
    w_head = w_head.at[0:NZ, :, 0:256].set(wn)
    w_head = w_head.at[NZ:NZ + E, :, 256].set(p["w_lab"].T)
    w_head = w_head.at[NZ + E, :, 256].set(p["b_lab"])               # folded bias row
    w_head = w_head.reshape(K_pad, 49 * C_HEAD)
    head_mask = jnp.zeros((49, C_HEAD), jnp.float32).at[:, 0:256].set(1.0)

    # --- conv1: ConvTranspose2d(257->128, 3x3, s=1, p=1) == stride-1 conv with the
    #     spatially flipped kernel over the 1-padded input; im2col rows ordered
    #     window-(r,s)-major, channel-minor.
    w1 = p["w_ct1"][:, :, ::-1, ::-1].transpose(2, 3, 0, 1)          # [r, s, ic, oc]
    w1 = jnp.pad(w1, ((0, 0), (0, 0), (0, C_HEAD - 257), (0, 0)))
    w1 = w1.reshape(9 * C_HEAD, 128)

    # --- stride-2 deconvs: 4-phase sub-pixel decomposition.  Output phase (dy,dx)
    #     at pixel (2u+dy, 2v+dx) sums kernel taps (3-dy-2a, 3-dx-2b), a,b in {0,1},
    #     applied to the 1-padded input window starting at (dy+a, dx+b).  All phases
    #     share the same 9 shifted windows, so pack the phase dim along output lanes.
    w2 = jnp.zeros((3, 3, 128, 4, 64), jnp.float32)    # [wy, wx, ic, phase, oc]
    w3 = jnp.zeros((3, 3, 64, 4), jnp.float32)         # [wy, wx, ic, phase]
    for dy in range(2):
        for dx in range(2):
            ph = dy * 2 + dx
            for a in range(2):
                for b in range(2):
                    w2 = w2.at[dy + a, dx + b, :, ph, :].set(
                        p["w_ct2"][:, :, 3 - dy - 2 * a, 3 - dx - 2 * b])
                    w3 = w3.at[dy + a, dx + b, :, ph].set(
                        p["w_ct3"][:, 0, 3 - dy - 2 * a, 3 - dx - 2 * b])
    w2 = w2.reshape(9 * 128, 4 * 64)
    w3 = w3.reshape(9 * 64, 4)

    # --- BN2 phase-group fold: per-channel stats also sum over the 4 phase lane
    #     groups; fold[i, j] = 1 iff i % 64 == j % 64 (folds and re-broadcasts).
    idx = jnp.arange(256)
    fold = (idx[:, None] % 64 == idx[None, :] % 64).astype(jnp.float32)

    bf16 = jnp.bfloat16
    return {
        "emb": p["emb"],
        "w_head": w_head.astype(bf16),
        "head_mask": head_mask.reshape(1, 49 * C_HEAD),
        "w1": w1.astype(bf16),
        "w2": w2.astype(bf16),
        "w3": w3.astype(bf16),
        "fold": fold,
        "g1": p["g1"].reshape(1, 128), "b1": p["b1"].reshape(1, 128),
        "g2": jnp.tile(p["g2"], 4).reshape(1, 256),
        "b2": jnp.tile(p["b2"], 4).reshape(1, 256),
    }


# ----------------------------------------------------------------------------
# Forward pass (XLA glue = gather / zero-pad / transpose-free window concat /
# one tiny pixel-shuffle reshape only)
# ----------------------------------------------------------------------------

def cgan_generator_forward(prep, noises, labels):
    B = noises.shape[0]
    bf16 = jnp.bfloat16
    E = prep["emb"].shape[1]
    K_pad = prep["w_head"].shape[0]

    # ---- fused head: noise Linear+ReLU, label Embedding+Linear(+bias), concat
    emb = prep["emb"][labels]                                        # gather (glue)
    z = jnp.zeros((B, K_pad), jnp.float32)
    z = z.at[:, 0:NZ].set(noises)
    z = z.at[:, NZ:NZ + E].set(emb)
    z = z.at[:, NZ + E].set(1.0)                                     # bias column
    cost = pl.CostEstimate(
        flops=2 * B * K_pad * 49 * C_HEAD, transcendentals=0,
        bytes_accessed=2 * B * K_pad + 2 * K_pad * 49 * C_HEAD
                       + 4 * 49 * C_HEAD + 2 * B * 49 * C_HEAD)
    head = _call(head_kernel, jax.ShapeDtypeStruct((B, 49 * C_HEAD), bf16), cost,
                 z.astype(bf16), prep["w_head"], prep["head_mask"])
    x = head.reshape(B, 7, 7, C_HEAD)                                # NHWC

    # ---- ConvTranspose2d(257->128, 3x3, s=1, p=1) + BN + ReLU
    xp = jnp.pad(x, ((0, 0), (1, 1), (1, 1), (0, 0)))                # [B, 9, 9, C]
    patches = jnp.concatenate(
        [xp[:, r:r + 7, s:s + 7, :] for r in range(3) for s in range(3)],
        axis=-1).reshape(B * 49, 9 * C_HEAD)
    cost = pl.CostEstimate(
        flops=2 * B * 49 * 9 * C_HEAD * 128, transcendentals=0,
        bytes_accessed=2 * B * 49 * 9 * C_HEAD + 2 * 9 * C_HEAD * 128
                       + 8 * 128 + 2 * B * 49 * 128)
    x = _call(conv1_bn_relu_kernel, jax.ShapeDtypeStruct((B * 49, 128), bf16), cost,
              patches, prep["w1"], prep["g1"], prep["b1"])
    x = x.reshape(B, 7, 7, 128)

    # ---- ConvTranspose2d(128->64, 4x4, s=2, p=1) + BN + ReLU
    #      (4 sub-pixel phases packed along lanes; 9 shared windows)
    xp = jnp.pad(x, ((0, 0), (1, 1), (1, 1), (0, 0)))                # [B, 9, 9, 128]
    patches2 = jnp.concatenate(
        [xp[:, wy:wy + 7, wx:wx + 7, :] for wy in range(3) for wx in range(3)],
        axis=-1).reshape(B * 49, 9 * 128)
    cost = pl.CostEstimate(
        flops=2 * B * 49 * 9 * 128 * 256 + 2 * 2 * 256 * 256, transcendentals=0,
        bytes_accessed=2 * B * 49 * 9 * 128 + 2 * 9 * 128 * 256 + 4 * 256 * 256
                       + 8 * 256 + 2 * B * 49 * 256)
    y = _call(conv2_bn_relu_kernel, jax.ShapeDtypeStruct((B * 49, 256), bf16), cost,
              patches2, prep["w2"], prep["fold"], prep["g2"], prep["b2"])
    # pixel shuffle: lanes (dy, dx, oc) -> NHWC [B, 14, 14, 64]   (tiny, in XLA)
    y = y.reshape(B, 7, 7, 2, 2, 64).transpose(0, 1, 3, 2, 4, 5).reshape(B, 14, 14, 64)

    # ---- ConvTranspose2d(64->1, 4x4, s=2, p=1) + Sigmoid (NHWC patches, 4 phase lanes)
    yp = jnp.pad(y, ((0, 0), (1, 1), (1, 1), (0, 0)))                # [B, 16, 16, 64]
    patches3 = jnp.concatenate(
        [yp[:, wy:wy + 14, wx:wx + 14, :] for wy in range(3) for wx in range(3)],
        axis=-1).reshape(B * 196, 9 * 64)
    cost = pl.CostEstimate(
        flops=2 * B * 196 * 9 * 64 * 4, transcendentals=B * 196 * 4,
        bytes_accessed=2 * B * 196 * 9 * 64 + 2 * 9 * 64 * 4 + 4 * B * 196 * 4)
    o = _call(conv3_sigmoid_kernel, jax.ShapeDtypeStruct((B * 196, 4), jnp.float32),
              cost, patches3, prep["w3"])
    # un-shuffle phases to the NCHW image PyTorch returns: [B, 1, 28, 28]
    return o.reshape(B, 14, 14, 2, 2).transpose(0, 1, 3, 2, 4).reshape(B, 1, 28, 28)


# ----------------------------------------------------------------------------
# Pure-JAX f32 reference with the PyTorch module's semantics (for parity check)
# ----------------------------------------------------------------------------

def _conv_transpose_ref(x, w_pt, stride, padding):
    """PyTorch ConvTranspose2d forward (NCHW, weight [in_c, out_c, kH, kW], no bias)."""
    k = w_pt.shape[2]
    w = jnp.flip(w_pt, (2, 3)).transpose(1, 0, 2, 3)                 # [oc, ic, kh, kw]
    pad = k - 1 - padding
    return jax.lax.conv_general_dilated(
        x, w, window_strides=(1, 1), padding=[(pad, pad), (pad, pad)],
        lhs_dilation=(stride, stride),
        dimension_numbers=("NCHW", "OIHW", "NCHW"))


def _bn_ref(x, g, b):
    mu = jnp.mean(x, axis=(0, 2, 3), keepdims=True)
    var = jnp.mean((x - mu) ** 2, axis=(0, 2, 3), keepdims=True)
    return (g[None, :, None, None] * (x - mu) * jax.lax.rsqrt(var + EPS)
            + b[None, :, None, None])


def reference_forward(p, noises, labels):
    B = noises.shape[0]
    h = jnp.maximum(noises @ p["w_noise"].T, 0.0).reshape(B, 256, 7, 7)
    lab = (p["emb"][labels] @ p["w_lab"].T + p["b_lab"]).reshape(B, 1, 7, 7)
    x = jnp.concatenate([h, lab], axis=1)                            # [B, 257, 7, 7]
    x = jnp.maximum(_bn_ref(_conv_transpose_ref(x, p["w_ct1"], 1, 1),
                            p["g1"], p["b1"]), 0.0)
    x = jnp.maximum(_bn_ref(_conv_transpose_ref(x, p["w_ct2"], 2, 1),
                            p["g2"], p["b2"]), 0.0)
    return jax.nn.sigmoid(_conv_transpose_ref(x, p["w_ct3"], 2, 1))


if __name__ == "__main__":
    key = jax.random.PRNGKey(0)
    k_par, k_noise, k_lab = jax.random.split(key, 3)

    params = init_params(k_par)
    prep = prepare_weights(params)

    B = 2
    noises = jax.random.normal(k_noise, (B, 100), jnp.float32)
    labels = jax.random.randint(k_lab, (B,), 0, 10)

    fwd = jax.jit(cgan_generator_forward)
    out = jax.block_until_ready(fwd(prep, noises, labels))

    assert out.shape == (B, 1, 28, 28), out.shape
    assert out.dtype == jnp.float32
    assert bool(jnp.all(jnp.isfinite(out)))
    assert bool(jnp.all((out >= 0.0) & (out <= 1.0)))

    # numerical parity vs. the f32 reference (kernel path uses bf16 weights/acts)
    with jax.default_matmul_precision("highest"):
        ref = jax.block_until_ready(jax.jit(reference_forward)(params, noises, labels))
    max_diff = float(jnp.max(jnp.abs(out - ref)))
    mean_diff = float(jnp.mean(jnp.abs(out - ref)))
    assert max_diff < 5e-2 and mean_diff < 1e-2, (max_diff, mean_diff)

    print("KERNEL_OK")
</pallas_src>

<mosaic_0001>
module attributes {stable_mosaic.version = 11 : i64} {
  func.func @head_kernel(%arg0: memref<2x208xbf16, #tpu.memory_space<vmem>>, %arg1: memref<208x12936xbf16, #tpu.memory_space<vmem>>, %arg2: memref<1x12936xf32, #tpu.memory_space<vmem>>, %arg3: memref<2x12936xbf16, #tpu.memory_space<vmem>>) attributes {dimension_semantics = [], scalar_prefetch = 0 : i64, scratch_operands = 0 : i64, tpu.core_type = #tpu.core_type<tc>} {
    %c0 = arith.constant 0 : index
    %c0_0 = arith.constant 0 : index
    %0 = vector.load %arg0[%c0, %c0_0] : memref<2x208xbf16, #tpu.memory_space<vmem>>, vector<2x208xbf16>
    %c0_1 = arith.constant 0 : index
    %c0_2 = arith.constant 0 : index
    %1 = vector.load %arg1[%c0_1, %c0_2] : memref<208x12936xbf16, #tpu.memory_space<vmem>>, vector<208x12936xbf16>
    %cst = arith.constant dense<0.000000e+00> : vector<2x12936xf32>
    %2 = tpu.matmul %0, %1, %cst {dimension_numbers = #tpu.dot_dimension_numbers<[1], [0], [0], [1], [0, 0, 1, 1], [], []>} : vector<2x208xbf16>, vector<208x12936xbf16>, vector<2x12936xf32> -> vector<2x12936xf32>
    %c0_3 = arith.constant 0 : index
    %c0_4 = arith.constant 0 : index
    %3 = vector.load %arg2[%c0_3, %c0_4] : memref<1x12936xf32, #tpu.memory_space<vmem>>, vector<1x12936xf32>
    %cst_5 = arith.constant 0.000000e+00 : f32
    %4 = vector.broadcast %cst_5 : f32 to vector<1x12936xf32>
    %5 = arith.cmpf one, %3, %4 : vector<1x12936xf32>
    %cst_6 = arith.constant 0.000000e+00 : f32
    %6 = vector.broadcast %cst_6 : f32 to vector<2x12936xf32>
    %7 = arith.maximumf %2, %6 : vector<2x12936xf32>
    %8 = vector.shape_cast %5 : vector<1x12936xi1> to vector<1x12936xi1>
    %9 = vector.broadcast %8 : vector<1x12936xi1> to vector<2x12936xi1>
    %10 = arith.select %9, %7, %2 : vector<2x12936xi1>, vector<2x12936xf32>
    %11 = arith.truncf %10 : vector<2x12936xf32> to vector<2x12936xbf16>
    %c0_7 = arith.constant 0 : index
    %c0_8 = arith.constant 0 : index
    %12 = vector.load %arg3[%c0_7, %c0_8] : memref<2x12936xbf16, #tpu.memory_space<vmem>>, vector<2x12936xbf16>
    tpu.vector_store %arg3[%c0_7, %c0_8], %11 {strides = array<i32>} : memref<2x12936xbf16, #tpu.memory_space<vmem>>, vector<2x12936xbf16>,
    return
  }
}

module attributes {stable_mosaic.version = 11 : i64} {
  func.func @conv1_bn_relu_kernel(%arg0: memref<98x2376xbf16, #tpu.memory_space<vmem>>, %arg1: memref<2376x128xbf16, #tpu.memory_space<vmem>>, %arg2: memref<1x128xf32, #tpu.memory_space<vmem>>, %arg3: memref<1x128xf32, #tpu.memory_space<vmem>>, %arg4: memref<98x128xbf16, #tpu.memory_space<vmem>>) attributes {dimension_semantics = [], scalar_prefetch = 0 : i64, scratch_operands = 0 : i64, tpu.core_type = #tpu.core_type<tc>} {
    %c0 = arith.constant 0 : index
    %c0_0 = arith.constant 0 : index
    %0 = vector.load %arg0[%c0, %c0_0] : memref<98x2376xbf16, #tpu.memory_space<vmem>>, vector<98x2376xbf16>
    %c0_1 = arith.constant 0 : index
    %c0_2 = arith.constant 0 : index
    %1 = vector.load %arg1[%c0_1, %c0_2] : memref<2376x128xbf16, #tpu.memory_space<vmem>>, vector<2376x128xbf16>
    %cst = arith.constant dense<0.000000e+00> : vector<98x128xf32>
    %2 = tpu.matmul %0, %1, %cst {dimension_numbers = #tpu.dot_dimension_numbers<[1], [0], [0], [1], [0, 0, 1, 1], [], []>} : vector<98x2376xbf16>, vector<2376x128xbf16>, vector<98x128xf32> -> vector<98x128xf32>
    %cst_3 = arith.constant dense<0.000000e+00> : vector<128xf32>
    %3 = vector.multi_reduction <add>, %2, %cst_3 [0] : vector<98x128xf32> to vector<128xf32>
    %4 = vector.shape_cast %3 : vector<128xf32> to vector<1x128xf32>
    %cst_4 = arith.constant 0.0102040814 : f32
    %5 = vector.broadcast %cst_4 : f32 to vector<1x128xf32>
    %6 = arith.mulf %4, %5 : vector<1x128xf32>
    %7 = arith.mulf %2, %2 : vector<98x128xf32>
    %cst_5 = arith.constant dense<0.000000e+00> : vector<128xf32>
    %8 = vector.multi_reduction <add>, %7, %cst_5 [0] : vector<98x128xf32> to vector<128xf32>
    %9 = vector.shape_cast %8 : vector<128xf32> to vector<1x128xf32>
    %cst_6 = arith.constant 0.0102040814 : f32
    %10 = vector.broadcast %cst_6 : f32 to vector<1x128xf32>
    %11 = arith.mulf %9, %10 : vector<1x128xf32>
    %12 = arith.mulf %6, %6 : vector<1x128xf32>
    %13 = arith.subf %11, %12 : vector<1x128xf32>
    %c0_7 = arith.constant 0 : index
    %c0_8 = arith.constant 0 : index
    %14 = vector.load %arg2[%c0_7, %c0_8] : memref<1x128xf32, #tpu.memory_space<vmem>>, vector<1x128xf32>
    %cst_9 = arith.constant 9.99999974E-6 : f32
    %15 = vector.broadcast %cst_9 : f32 to vector<1x128xf32>
    %16 = arith.addf %13, %15 : vector<1x128xf32>
    %17 = math.rsqrt %16 : vector<1x128xf32>
    %18 = arith.mulf %14, %17 : vector<1x128xf32>
    %c0_10 = arith.constant 0 : index
    %c0_11 = arith.constant 0 : index
    %19 = vector.load %arg3[%c0_10, %c0_11] : memref<1x128xf32, #tpu.memory_space<vmem>>, vector<1x128xf32>
    %20 = arith.mulf %6, %18 : vector<1x128xf32>
    %21 = arith.subf %19, %20 : vector<1x128xf32>
    %22 = vector.broadcast %18 : vector<1x128xf32> to vector<98x128xf32>
    %23 = arith.mulf %2, %22 : vector<98x128xf32>
    %24 = vector.broadcast %21 : vector<1x128xf32> to vector<98x128xf32>
    %25 = arith.addf %23, %24 : vector<98x128xf32>
    %cst_12 = arith.constant 0.000000e+00 : f32
    %26 = vector.broadcast %cst_12 : f32 to vector<98x128xf32>
    %27 = arith.maximumf %25, %26 : vector<98x128xf32>
    %28 = arith.truncf %27 : vector<98x128xf32> to vector<98x128xbf16>
    %c0_13 = arith.constant 0 : index
    %c0_14 = arith.constant 0 : index
    %29 = vector.load %arg4[%c0_13, %c0_14] : memref<98x128xbf16, #tpu.memory_space<vmem>>, vector<98x128xbf16>
    tpu.vector_store %arg4[%c0_13, %c0_14], %28 {strides = array<i32>} : memref<98x128xbf16, #tpu.memory_space<vmem>>, vector<98x128xbf16>,
    return
  }
}

module attributes {stable_mosaic.version = 11 : i64} {
  func.func @conv2_bn_relu_kernel(%arg0: memref<98x1152xbf16, #tpu.memory_space<vmem>>, %arg1: memref<1152x256xbf16, #tpu.memory_space<vmem>>, %arg2: memref<256x256xf32, #tpu.memory_space<vmem>>, %arg3: memref<1x256xf32, #tpu.memory_space<vmem>>, %arg4: memref<1x256xf32, #tpu.memory_space<vmem>>, %arg5: memref<98x256xbf16, #tpu.memory_space<vmem>>) attributes {dimension_semantics = [], scalar_prefetch = 0 : i64, scratch_operands = 0 : i64, tpu.core_type = #tpu.core_type<tc>} {
    %c0 = arith.constant 0 : index
    %c0_0 = arith.constant 0 : index
    %0 = vector.load %arg0[%c0, %c0_0] : memref<98x1152xbf16, #tpu.memory_space<vmem>>, vector<98x1152xbf16>
    %c0_1 = arith.constant 0 : index
    %c0_2 = arith.constant 0 : index
    %1 = vector.load %arg1[%c0_1, %c0_2] : memref<1152x256xbf16, #tpu.memory_space<vmem>>, vector<1152x256xbf16>
    %cst = arith.constant dense<0.000000e+00> : vector<98x256xf32>
    %2 = tpu.matmul %0, %1, %cst {dimension_numbers = #tpu.dot_dimension_numbers<[1], [0], [0], [1], [0, 0, 1, 1], [], []>} : vector<98x1152xbf16>, vector<1152x256xbf16>, vector<98x256xf32> -> vector<98x256xf32>
    %cst_3 = arith.constant dense<0.000000e+00> : vector<256xf32>
    %3 = vector.multi_reduction <add>, %2, %cst_3 [0] : vector<98x256xf32> to vector<256xf32>
    %4 = vector.shape_cast %3 : vector<256xf32> to vector<1x256xf32>
    %c0_4 = arith.constant 0 : index
    %c0_5 = arith.constant 0 : index
    %5 = vector.load %arg2[%c0_4, %c0_5] : memref<256x256xf32, #tpu.memory_space<vmem>>, vector<256x256xf32>
    %cst_6 = arith.constant dense<0.000000e+00> : vector<1x256xf32>
    %6 = tpu.matmul %4, %5, %cst_6 {dimension_numbers = #tpu.dot_dimension_numbers<[1], [0], [0], [1], [0, 0, 1, 1], [], []>} : vector<1x256xf32>, vector<256x256xf32>, vector<1x256xf32> -> vector<1x256xf32>
    %7 = arith.mulf %2, %2 : vector<98x256xf32>
    %cst_7 = arith.constant dense<0.000000e+00> : vector<256xf32>
    %8 = vector.multi_reduction <add>, %7, %cst_7 [0] : vector<98x256xf32> to vector<256xf32>
    %9 = vector.shape_cast %8 : vector<256xf32> to vector<1x256xf32>
    %c0_8 = arith.constant 0 : index
    %c0_9 = arith.constant 0 : index
    %10 = vector.load %arg2[%c0_8, %c0_9] : memref<256x256xf32, #tpu.memory_space<vmem>>, vector<256x256xf32>
    %cst_10 = arith.constant dense<0.000000e+00> : vector<1x256xf32>
    %11 = tpu.matmul %9, %10, %cst_10 {dimension_numbers = #tpu.dot_dimension_numbers<[1], [0], [0], [1], [0, 0, 1, 1], [], []>} : vector<1x256xf32>, vector<256x256xf32>, vector<1x256xf32> -> vector<1x256xf32>
    %cst_11 = arith.constant 0.00255102036 : f32
    %12 = vector.broadcast %cst_11 : f32 to vector<1x256xf32>
    %13 = arith.mulf %6, %12 : vector<1x256xf32>
    %cst_12 = arith.constant 0.00255102036 : f32
    %14 = vector.broadcast %cst_12 : f32 to vector<1x256xf32>
    %15 = arith.mulf %11, %14 : vector<1x256xf32>
    %16 = arith.mulf %13, %13 : vector<1x256xf32>
    %17 = arith.subf %15, %16 : vector<1x256xf32>
    %c0_13 = arith.constant 0 : index
    %c0_14 = arith.constant 0 : index
    %18 = vector.load %arg3[%c0_13, %c0_14] : memref<1x256xf32, #tpu.memory_space<vmem>>, vector<1x256xf32>
    %cst_15 = arith.constant 9.99999974E-6 : f32
    %19 = vector.broadcast %cst_15 : f32 to vector<1x256xf32>
    %20 = arith.addf %17, %19 : vector<1x256xf32>
    %21 = math.rsqrt %20 : vector<1x256xf32>
    %22 = arith.mulf %18, %21 : vector<1x256xf32>
    %c0_16 = arith.constant 0 : index
    %c0_17 = arith.constant 0 : index
    %23 = vector.load %arg4[%c0_16, %c0_17] : memref<1x256xf32, #tpu.memory_space<vmem>>, vector<1x256xf32>
    %24 = arith.mulf %13, %22 : vector<1x256xf32>
    %25 = arith.subf %23, %24 : vector<1x256xf32>
    %26 = vector.broadcast %22 : vector<1x256xf32> to vector<98x256xf32>
    %27 = arith.mulf %2, %26 : vector<98x256xf32>
    %28 = vector.broadcast %25 : vector<1x256xf32> to vector<98x256xf32>
    %29 = arith.addf %27, %28 : vector<98x256xf32>
    %cst_18 = arith.constant 0.000000e+00 : f32
    %30 = vector.broadcast %cst_18 : f32 to vector<98x256xf32>
    %31 = arith.maximumf %29, %30 : vector<98x256xf32>
    %32 = arith.truncf %31 : vector<98x256xf32> to vector<98x256xbf16>
    %c0_19 = arith.constant 0 : index
    %c0_20 = arith.constant 0 : index
    %33 = vector.load %arg5[%c0_19, %c0_20] : memref<98x256xbf16, #tpu.memory_space<vmem>>, vector<98x256xbf16>
    tpu.vector_store %arg5[%c0_19, %c0_20], %32 {strides = array<i32>} : memref<98x256xbf16, #tpu.memory_space<vmem>>, vector<98x256xbf16>,
    return
  }
}

module attributes {stable_mosaic.version = 11 : i64} {
  func.func @conv3_sigmoid_kernel(%arg0: memref<392x576xbf16, #tpu.memory_space<vmem>>, %arg1: memref<576x4xbf16, #tpu.memory_space<vmem>>, %arg2: memref<392x4xf32, #tpu.memory_space<vmem>>) attributes {dimension_semantics = [], scalar_prefetch = 0 : i64, scratch_operands = 0 : i64, tpu.core_type = #tpu.core_type<tc>} {
    %c0 = arith.constant 0 : index
    %c0_0 = arith.constant 0 : index
    %0 = vector.load %arg0[%c0, %c0_0] : memref<392x576xbf16, #tpu.memory_space<vmem>>, vector<392x576xbf16>
    %c0_1 = arith.constant 0 : index
    %c0_2 = arith.constant 0 : index
    %1 = vector.load %arg1[%c0_1, %c0_2] : memref<576x4xbf16, #tpu.memory_space<vmem>>, vector<576x4xbf16>
    %cst = arith.constant dense<0.000000e+00> : vector<392x4xf32>
    %2 = tpu.matmul %0, %1, %cst {dimension_numbers = #tpu.dot_dimension_numbers<[1], [0], [0], [1], [0, 0, 1, 1], [], []>} : vector<392x576xbf16>, vector<576x4xbf16>, vector<392x4xf32> -> vector<392x4xf32>
    %3 = arith.negf %2 : vector<392x4xf32>
    %4 = math.exp %3 : vector<392x4xf32>
    %cst_3 = arith.constant 1.000000e+00 : f32
    %5 = vector.broadcast %cst_3 : f32 to vector<392x4xf32>
    %6 = arith.addf %5, %4 : vector<392x4xf32>
    %7 = arith.divf %5, %6 : vector<392x4xf32>
    %c0_4 = arith.constant 0 : index
    %c0_5 = arith.constant 0 : index
    %8 = vector.load %arg2[%c0_4, %c0_5] : memref<392x4xf32, #tpu.memory_space<vmem>>, vector<392x4xf32>
    tpu.vector_store %arg2[%c0_4, %c0_5], %7 {strides = array<i32>} : memref<392x4xf32, #tpu.memory_space<vmem>>, vector<392x4xf32>,
    return
  }
}

</mosaic_0001>

<bundles_post_ra>
// kernel: cgan_generator_forward.5
= control target key start
LH: loop header
LB: loop body
LE: loop exit
PB: predicated region body
PF: predicated region fallthrough
CT: control target
= control target key end

     0   :  { %vm1994_vm0 = vcmask 1043456   ;;  %vm4325_vm1 = vmmov 0   ;;  %vm1972_vm2 = vcmask 588800   ;;  %vm2889_vm3 = vcmask 1041408   ;;  %s5451_s1 = inlined_call_operand.vmem [shape: bf16[2376,128], index: 1, kind: input, shape index: {}]   ;;  %s5452_s0 = inlined_call_operand.vmem [shape: bf16[98,2376], index: 0, kind: input, shape index: {}]   ;;  %s5453_s2 = inlined_call_operand.vmem [shape: f32[1,128], index: 2, kind: input, shape index: {}]   ;;  %s5454_s3 = inlined_call_operand.vmem [shape: f32[1,128], index: 3, kind: input, shape index: {}]   ;;  %s5455_s4 = inlined_call_operand.vmem [shape: bf16[98,128], index: 4, kind: output, shape index: {}]  }
   0x1   :  { %v3986_v0 = vld [vmem:[%s5451_s1 + $0x40] sm:$0xff]   ;;  %v3990_v4 = vld [vmem:[%s5451_s1 + $0x48] sm:$0xff]   ;;  %v3994_v8 = vld [vmem:[%s5451_s1 + $0x50] sm:$0xff]  }
   0x2   :  { %v3987_v1 = vld [vmem:[%s5451_s1 + $0xc0] sm:$0xff]   ;;  %3412 = vmatprep.subr.bf16.mxu0 %v3986_v0  ;;  %v3991_v5 = vld [vmem:[%s5451_s1 + $0xc8] sm:$0xff]   ;;  %v3995_v9 = vld [vmem:[%s5451_s1 + $0xd0] sm:$0xff]  }
   0x3   :  { %v3988_v2 = vld [vmem:[%s5451_s1] sm:$0xff]   ;;  %3470 = vmatprep.subr.bf16.mxu1 %v3987_v1  ;;  %v3992_v6 = vld [vmem:[%s5451_s1 + $0x8] sm:$0xff]   ;;  %v3996_v10 = vld [vmem:[%s5451_s1 + $0x10] sm:$0xff]  }
   0x4   :  { %v3989_v3 = vld [vmem:[%s5451_s1 + $0x80] sm:$0xff]   ;;  %3413 = vmatpush3.bf16.msra.mxu0 %v3988_v2  ;;  %v3993_v7 = vld [vmem:[%s5451_s1 + $0x88] sm:$0xff]   ;;  %v3997_v11 = vld [vmem:[%s5451_s1 + $0x90] sm:$0xff]  }
   0x5   :  { %3471 = vmatpush3.bf16.msra.mxu1 %v3989_v3  ;;  %3414 = vmatprep.subr.bf16.mxu0 %v3990_v4  ;;  %v3998_v12 = vld [vmem:[%s5451_s1 + $0x58] sm:$0xff]   ;;  %v4002_v16 = vld [vmem:[%s5451_s1 + $0x60] sm:$0xff]   ;;  %v4006_v20 = vld [vmem:[%s5451_s1 + $0x68] sm:$0xff]  }
   0x6   :  { %3472 = vmatprep.subr.bf16.mxu1 %v3991_v5  ;;  %v3999_v13 = vld [vmem:[%s5451_s1 + $0xd8] sm:$0xff]   ;;  %v4003_v17 = vld [vmem:[%s5451_s1 + $0xe0] sm:$0xff]   ;;  %v4007_v21 = vld [vmem:[%s5451_s1 + $0xe8] sm:$0xff]  }
   0x7   :  { %v4000_v14 = vld [vmem:[%s5451_s1 + $0x18] sm:$0xff]   ;;  %v4004_v18 = vld [vmem:[%s5451_s1 + $0x20] sm:$0xff]   ;;  %v4008_v22 = vld [vmem:[%s5451_s1 + $0x28] sm:$0xff]  }
   0x8   :  { %3415 = vmatpush3.bf16.msra.mxu0 %v3992_v6  ;;  %v4001_v15 = vld [vmem:[%s5451_s1 + $0x98] sm:$0xff]   ;;  %v4005_v19 = vld [vmem:[%s5451_s1 + $0xa0] sm:$0xff]   ;;  %v4009_v23 = vld [vmem:[%s5451_s1 + $0xa8] sm:$0xff]  }
   0x9   :  { %3473 = vmatpush3.bf16.msra.mxu1 %v3993_v7  ;;  %3416 = vmatprep.subr.bf16.mxu0 %v3994_v8  ;;  %v4010_v24 = vld [vmem:[%s5451_s1 + $0x70] sm:$0xff]   ;;  %v4014_v28 = vld [vmem:[%s5451_s1 + $0x78] sm:$0xff]   ;;  %v4018_v32 = vld [vmem:[%s5452_s0] ss:$76 sps:$4 sm:$0xff]  }
   0xa   :  { %3474 = vmatprep.subr.bf16.mxu1 %v3995_v9  ;;  %v4011_v25 = vld [vmem:[%s5451_s1 + $0xf0] sm:$0xff]   ;;  %v4015_v29 = vld [vmem:[%s5451_s1 + $0xf8] sm:$0xff]   ;;  %v4024_v36 = vld [vmem:[%s5451_s1 + $0x140] sm:$0xff]  }
   0xb   :  { %v4012_v26 = vld [vmem:[%s5451_s1 + $0x30] sm:$0xff]   ;;  %v4016_v30 = vld [vmem:[%s5451_s1 + $0x38] sm:$0xff]   ;;  %v4025_v37 = vld [vmem:[%s5451_s1 + $0x100] sm:$0xff]  }
   0xc   :  { %3417 = vmatpush3.bf16.msra.mxu0 %v3996_v10  ;;  %v4013_v27 = vld [vmem:[%s5451_s1 + $0xb0] sm:$0xff]   ;;  %v4017_v31 = vld [vmem:[%s5451_s1 + $0xb8] sm:$0xff]   ;;  %v4026_v38 = vld [vmem:[%s5451_s1 + $0x1c0] sm:$0xff]  }
   0xd   :  { %3475 = vmatpush3.bf16.msra.mxu1 %v3997_v11  ;;  %3418 = vmatprep.subr.bf16.mxu0 %v3998_v12  ;;  %v4020_v33 = vld [vmem:[%s5452_s0 + $0x4] ss:$76 sps:$4 sm:$0xff]   ;;  %v4021_v34 = vld [vmem:[%s5452_s0 + $0x8] ss:$76 sps:$4 sm:$0xff]   ;;  %v4023_v35 = vld [vmem:[%s5452_s0 + $0xc] ss:$76 sps:$4 sm:$0xff]  }
   0xe   :  { %3476 = vmatprep.subr.bf16.mxu1 %v3999_v13  ;;  %2030 = vmatprep.mubr.bf16.mxu0 %v4020_v33  ;;  %v4027_v39 = vld [vmem:[%s5451_s1 + $0x180] sm:$0xff]   ;;  %v4028_v40 = vld [vmem:[%s5452_s0 + $0x9c] ss:$76 sps:$4 sm:$0xff]   ;;  %v4038_v48 = vld [vmem:[%s5451_s1 + $0x150] sm:$0xff]  }
   0xf   :  { %2118 = vmatprep.mubr.bf16.mxu1 %v4023_v35  ;;  %v4030_v41 = vld [vmem:[%s5452_s0 + $0xa4] ss:$76 sps:$4 sm:$0xff]   ;;  %v4032_v42 = vld [vmem:[%s5451_s1 + $0x148] sm:$0xff]   ;;  %v4039_v49 = vld [vmem:[%s5452_s0 + $0x134] ss:$76 sps:$4 sm:$0xff]  }
  0x10   :  { %3419 = vmatpush3.bf16.msra.mxu0 %v4000_v14  ;;  %v4033_v43 = vld [vmem:[%s5452_s0 + $0x98] ss:$76 sps:$4 sm:$0xff]   ;;  %v4034_v44 = vld [vmem:[%s5452_s0 + $0xa0] ss:$76 sps:$4 sm:$0xff]   ;;  %v4041_v50 = vld [vmem:[%s5452_s0 + $0x13c] ss:$76 sps:$4 sm:$0xff]  }
  0x11   :  { %3477 = vmatpush3.bf16.msra.mxu1 %v4001_v15  ;;  %3420 = vmatprep.subr.bf16.mxu0 %v4002_v16  ;;  %v4035_v45 = vld [vmem:[%s5451_s1 + $0x108] sm:$0xff]   ;;  %v4043_v51 = vld [vmem:[%s5451_s1 + $0x110] sm:$0xff]   ;;  %v4045_v53 = vld [vmem:[%s5452_s0 + $0x138] ss:$76 sps:$4 sm:$0xff]  }
  0x12   :  { %3478 = vmatprep.subr.bf16.mxu1 %v4003_v17  ;;  %v4036_v46 = vld [vmem:[%s5451_s1 + $0x1c8] sm:$0xff]   ;;  %v4044_v52 = vld [vmem:[%s5452_s0 + $0x130] ss:$76 sps:$4 sm:$0xff]   ;;  %v4052_v59 = vld [vmem:[%s5452_s0 + $0x1d4] ss:$76 sps:$4 sm:$0xff]  }
  0x13   :  { %v4037_v47 = vld [vmem:[%s5451_s1 + $0x188] sm:$0xff]   ;;  %v4046_v54 = vld [vmem:[%s5451_s1 + $0x1d0] sm:$0xff]   ;;  %v4048_v56 = vld [vmem:[%s5451_s1 + $0x158] sm:$0xff]  }
  0x14   :  { %3421 = vmatpush3.bf16.msra.mxu0 %v4004_v18  ;;  %v4047_v55 = vld [vmem:[%s5451_s1 + $0x190] sm:$0xff]   ;;  %v4049_v57 = vld [vmem:[%s5451_s1 + $0x118] sm:$0xff]   ;;  %v4058_v0 = vld [vmem:[%s5451_s1 + $0x160] sm:$0xff]  }
  0x15   :  { %3479 = vmatpush3.bf16.msra.mxu1 %v4005_v19  ;;  %3422 = vmatprep.subr.bf16.mxu0 %v4006_v20  ;;  %v4050_v58 = vld [vmem:[%s5452_s0 + $0x1cc] ss:$76 sps:$4 sm:$0xff]   ;;  %v4054_v60 = vld [vmem:[%s5452_s0 + $0x1c8] ss:$76 sps:$4 sm:$0xff]   ;;  %v4055_v61 = vld [vmem:[%s5452_s0 + $0x1d0] ss:$76 sps:$4 sm:$0xff]  }
  0x16   :  { %3480 = vmatprep.subr.bf16.mxu1 %v4007_v21  ;;  %v4056_v62 = vld [vmem:[%s5451_s1 + $0x1d8] sm:$0xff]   ;;  %v4059_v1 = vld [vmem:[%s5451_s1 + $0x120] sm:$0xff]   ;;  %v4065_v5 = vld [vmem:[%s5452_s0 + $0x268] ss:$76 sps:$4 sm:$0xff]  }
  0x17   :  { %v4057_v63 = vld [vmem:[%s5451_s1 + $0x198] sm:$0xff]   ;;  %v4060_v2 = vld [vmem:[%s5452_s0 + $0x264] ss:$76 sps:$4 sm:$0xff]   ;;  %v4064_v4 = vld [vmem:[%s5452_s0 + $0x260] ss:$76 sps:$4 sm:$0xff]  }
  0x18   :  { %3423 = vmatpush3.bf16.msra.mxu0 %v4008_v22  ;;  %v4062_v3 = vld [vmem:[%s5452_s0 + $0x26c] ss:$76 sps:$4 sm:$0xff]   ;;  %v4066_v6 = vld [vmem:[%s5451_s1 + $0x1e0] sm:$0xff]   ;;  %v4070_v10 = vld [vmem:[%s5452_s0 + $0x2fc] ss:$76 sps:$4 sm:$0xff]  }
  0x19   :  { %3481 = vmatpush3.bf16.msra.mxu1 %v4009_v23  ;;  %3424 = vmatprep.subr.bf16.mxu0 %v4010_v24  ;;  %v4067_v7 = vld [vmem:[%s5451_s1 + $0x1a0] sm:$0xff]   ;;  %v4068_v8 = vld [vmem:[%s5451_s1 + $0x168] sm:$0xff]   ;;  %v4078_v16 = vld [vmem:[%s5451_s1 + $0x170] sm:$0xff]  }
  0x1a   :  { %3482 = vmatprep.subr.bf16.mxu1 %v4011_v25  ;;  %v4069_v9 = vld [vmem:[%s5451_s1 + $0x128] sm:$0xff]   ;;  %v4072_v11 = vld [vmem:[%s5452_s0 + $0x304] ss:$76 sps:$4 sm:$0xff]   ;;  %v139_v19 = vld [vmem:[%s5452_s0 + $0x398] sm:$0x11] }
  0x1b   :  { %v4074_v12 = vld [vmem:[%s5452_s0 + $0x2f8] ss:$76 sps:$4 sm:$0xff]   ;;  %v4076_v13 = vld [vmem:[%s5451_s1 + $0x1e8] sm:$0xff]   ;;  %v4079_v17 = vld [vmem:[%s5451_s1 + $0x130] sm:$0xff]   ;;  %v3179_v21 = vcombine.high %v139_v19, %v139_v19 }
  0x1c   :  { %3425 = vmatpush3.bf16.msra.mxu0 %v4012_v26  ;;  %v4075_v14 = vld [vmem:[%s5452_s0 + $0x300] ss:$76 sps:$4 sm:$0xff]   ;;  %v138_v18 = vld [vmem:[%s5452_s0 + $0x390] sm:$0x11]  ;;  %v4086_v24 = vld [vmem:[%s5451_s1 + $0x178] sm:$0xff]  }
  0x1d   :  { %3483 = vmatpush3.bf16.msra.mxu1 %v4013_v27  ;;  %3426 = vmatprep.subr.bf16.mxu0 %v4014_v28  ;;  %v4077_v15 = vld [vmem:[%s5451_s1 + $0x1a8] sm:$0xff]   ;;  %v3177_v20 = vcombine.high %v138_v18, %v138_v18  ;;  %v4082_v22 = vld [vmem:[%s5451_s1 + $0x1f0] sm:$0xff]   ;;  %v4087_v25 = vld [vmem:[%s5451_s1 + $0x138] sm:$0xff]   ;;  %v3176_v27 = vcombine.low %v138_v18, %v138_v18 }
  0x1e   :  { %3484 = vmatprep.subr.bf16.mxu1 %v4015_v29  ;;  %v4085_v23 = vld [vmem:[%s5451_s1 + $0x1b0] sm:$0xff]   ;;  %v4088_v26 = vld [vmem:[%s5451_s1 + $0x1f8] sm:$0xff]   ;;  %v3178_v29 = vcombine.low %v139_v19, %v139_v19 }
  0x1f   :  { %v4091_v28 = vld [vmem:[%s5452_s0 + $0x14] ss:$76 sps:$4 sm:$0xff]   ;;  %v4089_v33 = vld [vmem:[%s5452_s0 + $0x10] ss:$76 sps:$4 sm:$0xff]   ;;  %v4094_v35 = vld [vmem:[%s5452_s0 + $0x18] ss:$76 sps:$4 sm:$0xff]  }
  0x20   :  { %3427 = vmatpush3.bf16.msra.mxu0 %v4016_v30  ;;  %v4092_v30 = vld [vmem:[%s5451_s1 + $0x1b8] sm:$0xff]   ;;  %v4144_v18 = vld [vmem:[%s5452_s0 + $0x308] ss:$76 sps:$4 sm:$0xff]  }
  0x21   :  { %3485 = vmatpush3.bf16.msra.mxu1 %v4017_v31  ;;  %3528 = vmatprep.subr.bf16.mxu0 %v4024_v36  ;;  %v4093_v31 = vld [vmem:[%s5451_s1 + $0x240] sm:$0xff]   ;;  %v4157_v19 = vld [vmem:[%s5451_s1 + $0x278] sm:$0xff]  }
  0x22   :  { %3586 = vmatprep.subr.bf16.mxu1 %v4026_v38  ;;  %v4097_v36 = vld [vmem:[%s5451_s1 + $0x200] sm:$0xff]   ;;  %v4100_v38 = vld [vmem:[%s5452_s0 + $0xac] ss:$76 sps:$4 sm:$0xff]  }
  0x23   :  { %2031 = vmatmul.mubr.bf16.vlgmr.msra.gmra.mrb[0].mxu0 %v4018_v32  ;;  %v4096_v32 = vld [vmem:[%s5452_s0 + $0x1c] ss:$76 sps:$4 sm:$0xff]  }
  0x24   :  { %2119 = vmatmul.mubr.bf16.vlgmr.msra.gmra.mrb[0].mxu1 %v4021_v34  ;;  %3529 = vmatpush3.bf16.msra.mxu0 %v4025_v37  ;;  %v4098_v34 = vld [vmem:[%s5451_s1 + $0x2c0] sm:$0xff]  }
  0x25   :  { %3587 = vmatpush3.bf16.msra.mxu1 %v4027_v39  ;;  %2038 = vmatprep.mubr.bf16.mxu0 %v4028_v40  ;;  %v4099_v37 = vld [vmem:[%s5451_s1 + $0x280] sm:$0xff]   ;;  %v4102_v39 = vld [vmem:[%s5451_s1 + $0x248] sm:$0xff]  }
  0x26   :  { %2126 = vmatprep.mubr.bf16.mxu1 %v4030_v41  ;;  %3530 = vmatprep.subr.bf16.mxu0 %v4032_v42  ;;  %v4104_v40 = vld [vmem:[%s5451_s1 + $0x208] sm:$0xff]   ;;  %v4105_v41 = vld [vmem:[%s5452_s0 + $0xb4] ss:$76 sps:$4 sm:$0xff]  }
  0x27   :  { %3588 = vmatprep.subr.bf16.mxu1 %v4036_v46  ;;  %v4108_v42 = vld [vmem:[%s5451_s1 + $0x2c8] sm:$0xff]   ;;  %v4107_v46 = vld [vmem:[%s5452_s0 + $0xb0] ss:$76 sps:$4 sm:$0xff]  }
  0x28   :  { %3531 = vmatpush3.bf16.msra.mxu0 %v4035_v45  ;;  %v4103_v45 = vld [vmem:[%s5452_s0 + $0xa8] ss:$76 sps:$4 sm:$0xff]  }
  0x29   :  { %3589 = vmatpush3.bf16.msra.mxu1 %v4037_v47  ;;  %3532 = vmatprep.subr.bf16.mxu0 %v4038_v48  ;;  %v4111_v47 = vld [vmem:[%s5452_s0 + $0x144] ss:$76 sps:$4 sm:$0xff]  }
  0x2a   :  { %3590 = vmatprep.subr.bf16.mxu1 %v4046_v54  ;;  %v4113_v48 = vld [vmem:[%s5451_s1 + $0x210] sm:$0xff]   ;;  %v4114_v54 = vld [vmem:[%s5452_s0 + $0x140] ss:$76 sps:$4 sm:$0xff]  }
  0x2b   :  { %2039 = vmatmul.mubr.bf16.gmra.mrb[4].mxu0 %v4033_v43  ;;  %v4109_v43 = vld [vmem:[%s5451_s1 + $0x288] sm:$0xff]  }
  0x2c   :  { %2127 = vmatmul.mubr.bf16.gmra.mrb[4].mxu1 %v4034_v44  ;;  %2046 = vmatprep.mubr.bf16.mxu0 %v4039_v49  ;;  %v4110_v44 = vld [vmem:[%s5451_s1 + $0x250] sm:$0xff]   ;;  %v4115_v49 = vld [vmem:[%s5452_s0 + $0x14c] ss:$76 sps:$4 sm:$0xff]  }
  0x2d   :  { %2134 = vmatprep.mubr.bf16.mxu1 %v4041_v50  ;;  %3533 = vmatpush3.bf16.msra.mxu0 %v4043_v51  ;;  %v4118_v50 = vld [vmem:[%s5451_s1 + $0x2d0] sm:$0xff]  }
  0x2e   :  { %3591 = vmatpush3.bf16.msra.mxu1 %v4047_v55  ;;  %3534 = vmatprep.subr.bf16.mxu0 %v4048_v56  ;;  %v4119_v51 = vld [vmem:[%s5451_s1 + $0x290] sm:$0xff]   ;;  %v4122_v56 = vld [vmem:[%s5452_s0 + $0x1dc] ss:$76 sps:$4 sm:$0xff]  }
  0x2f   :  { %3592 = vmatprep.subr.bf16.mxu1 %v4056_v62  ;;  %v4117_v55 = vld [vmem:[%s5452_s0 + $0x148] ss:$76 sps:$4 sm:$0xff]   ;;  %v4124_v62 = vld [vmem:[%s5452_s0 + $0x1d8] ss:$76 sps:$4 sm:$0xff]  }
  0x31   :  { %3535 = vmatpush3.bf16.msra.mxu0 %v4049_v57  ;;  %v4125_v57 = vld [vmem:[%s5452_s0 + $0x1e4] ss:$76 sps:$4 sm:$0xff]  }
  0x32   :  { %3593 = vmatpush3.bf16.msra.mxu1 %v4057_v63  ;;  %3536 = vmatprep.subr.bf16.mxu0 %v4058_v0  ;;  %v4127_v63 = vld [vmem:[%s5452_s0 + $0x1e0] ss:$76 sps:$4 sm:$0xff]  }
  0x33   :  { %2047 = vmatmul.mubr.bf16.gmra.mrb[8].mxu0 %v4044_v52  ;;  %3594 = vmatprep.subr.bf16.mxu1 %v4066_v6  ;;  %v4120_v52 = vld [vmem:[%s5451_s1 + $0x258] sm:$0xff]   ;;  %v4132_v0 = vld [vmem:[%s5452_s0 + $0x274] ss:$76 sps:$4 sm:$0xff]  }
  0x34   :  { %2135 = vmatmul.mubr.bf16.gmra.mrb[8].mxu1 %v4045_v53  ;;  %2054 = vmatprep.mubr.bf16.mxu0 %v4050_v58  ;;  %v4121_v53 = vld [vmem:[%s5451_s1 + $0x218] sm:$0xff]  }
  0x35   :  { %2142 = vmatprep.mubr.bf16.mxu1 %v4052_v59  ;;  %3537 = vmatpush3.bf16.msra.mxu0 %v4059_v1  ;;  %v4128_v58 = vld [vmem:[%s5451_s1 + $0x2d8] sm:$0xff]  }
  0x36   :  { %3595 = vmatpush3.bf16.msra.mxu1 %v4067_v7  ;;  %3538 = vmatprep.subr.bf16.mxu0 %v4068_v8  ;;  %v4129_v59 = vld [vmem:[%s5451_s1 + $0x298] sm:$0xff]   ;;  %v4145_v7 = vld [vmem:[%s5451_s1 + $0x2e8] sm:$0xff]  }
  0x37   :  { %3596 = vmatprep.subr.bf16.mxu1 %v4076_v13  ;;  %v4135_v1 = vld [vmem:[%s5452_s0 + $0x27c] ss:$76 sps:$4 sm:$0xff]   ;;  %v4138_v8 = vld [vmem:[%s5452_s0 + $0x278] ss:$76 sps:$4 sm:$0xff]   ;;  %v4151_v13 = vld [vmem:[%s5451_s1 + $0x230] sm:$0xff]  }
  0x38   :  { %v4134_v6 = vld [vmem:[%s5452_s0 + $0x270] ss:$76 sps:$4 sm:$0xff]  }
  0x39   :  { %3539 = vmatpush3.bf16.msra.mxu0 %v4069_v9  ;;  %v4142_v9 = vld [vmem:[%s5452_s0 + $0x30c] ss:$76 sps:$4 sm:$0xff]  }
  0x3a   :  { %3597 = vmatpush3.bf16.msra.mxu1 %v4077_v15  ;;  %3540 = vmatprep.subr.bf16.mxu0 %v4078_v16  ;;  %v140_v15 = vld [vmem:[%s5452_s0 + $0x3a0] sm:$0x11]  ;;  %v4155_v16 = vld [vmem:[%s5451_s1 + $0x2b0] sm:$0xff]  }
  0x3b   :  { %2055 = vmatmul.mubr.bf16.gmra.mrb[12].mxu0 %v4054_v60  ;;  %3598 = vmatprep.subr.bf16.mxu1 %v4082_v22  ;;  %v4130_v60 = vld [vmem:[%s5451_s1 + $0x260] sm:$0xff]   ;;  %v4149_v22 = vld [vmem:[%s5452_s0 + $0x310] ss:$76 sps:$4 sm:$0xff]  }
  0x3c   :  { %2143 = vmatmul.mubr.bf16.gmra.mrb[12].mxu1 %v4055_v61  ;;  %2062 = vmatprep.mubr.bf16.mxu0 %v4060_v2  ;;  %v4131_v61 = vld [vmem:[%s5451_s1 + $0x220] sm:$0xff]  }
  0x3d   :  { %2150 = vmatprep.mubr.bf16.mxu1 %v4062_v3  ;;  %3541 = vmatpush3.bf16.msra.mxu0 %v4079_v17  ;;  %v4137_v2 = vld [vmem:[%s5451_s1 + $0x2e0] sm:$0xff]   ;;  %v141_v17 = vld [vmem:[%s5452_s0 + $0x3a8] sm:$0x11] }
  0x3e   :  { %3599 = vmatpush3.bf16.msra.mxu1 %v4085_v23  ;;  %3542 = vmatprep.subr.bf16.mxu0 %v4086_v24  ;;  %v4139_v3 = vld [vmem:[%s5451_s1 + $0x2a0] sm:$0xff]   ;;  %v3181_v23 = vcombine.high %v140_v15, %v140_v15  ;;  %v3183_v24 = vcombine.high %v141_v17, %v141_v17 }
  0x3f   :  { %3600 = vmatprep.subr.bf16.mxu1 %v4088_v26  ;;  %v4165_v26 = vld [vmem:[%s5451_s1 + $0x340] sm:$0xff]  }
  0x41   :  { %3543 = vmatpush3.bf16.msra.mxu0 %v4087_v25  ;;  %v4164_v25 = vld [vmem:[%s5451_s1 + $0x2b8] sm:$0xff]  }
  0x42   :  { %3601 = vmatpush3.bf16.msra.mxu1 %v4092_v30  ;;  %3644 = vmatprep.subr.bf16.mxu0 %v4093_v31  ;;  %v4163_v30 = vld [vmem:[%s5452_s0 + $0x24] ss:$76 sps:$4 sm:$0xff]   ;;  %v4168_v31 = vld [vmem:[%s5452_s0 + $0x2c] ss:$76 sps:$4 sm:$0xff]  }
  0x43   :  { %2063 = vmatmul.mubr.bf16.gmra.mrb[16].mxu0 %v4064_v4  ;;  %3702 = vmatprep.subr.bf16.mxu1 %v4098_v34  ;;  %v4140_v4 = vld [vmem:[%s5451_s1 + $0x268] sm:$0xff]   ;;  %v4169_v34 = vld [vmem:[%s5451_s1 + $0x300] sm:$0xff]  }
  0x44   :  { %2151 = vmatmul.mubr.bf16.gmra.mrb[16].mxu1 %v4065_v5  ;;  %2070 = vmatprep.mubr.bf16.mxu0 %v4070_v10  ;;  %v4141_v5 = vld [vmem:[%s5451_s1 + $0x228] sm:$0xff]  }
  0x45   :  { %2158 = vmatprep.mubr.bf16.mxu1 %v4072_v11  ;;  %v4148_v10 = vld [vmem:[%s5451_s1 + $0x2a8] sm:$0xff]   ;;  %v4150_v11 = vld [vmem:[%s5451_s1 + $0x270] sm:$0xff]  }
  0x4b   :  { %2071 = vmatmul.mubr.bf16.gmra.mrb[20].mxu0 %v4074_v12  ;;  %v4146_v12 = vld [vmem:[%s5452_s0 + $0x314] ss:$76 sps:$4 sm:$0xff]  }
  0x4c   :  { %2159 = vmatmul.mubr.bf16.gmra.mrb[20].mxu1 %v4075_v14  ;;  %2078 = vmatprep.mubr.bf16.mxu0 %v3177_v20  ;;  %v4153_v14 = vld [vmem:[%s5451_s1 + $0x2f0] sm:$0xff]   ;;  %v4159_v20 = vld [vmem:[%s5451_s1 + $0x238] sm:$0xff]  }
  0x4d   :  { %2166 = vmatprep.mubr.bf16.mxu1 %v3179_v21  ;;  %v4160_v21 = vld [vmem:[%s5451_s1 + $0x2f8] sm:$0xff]  }
  0x53   :  { %2079 = vmatmul.mubr.bf16.gmra.mrb[24].mxu0 %v3176_v27  ;;  %v4170_v27 = vld [vmem:[%s5451_s1 + $0x3c0] sm:$0xff]  }
  0x54   :  { %2167 = vmatmul.mubr.bf16.gmra.mrb[24].mxu1 %v3178_v29  ;;  %2206 = vmatprep.mubr.bf16.mxu0 %v4091_v28  ;;  %v3180_v28 = vcombine.low %v140_v15, %v140_v15  ;;  %v3182_v29 = vcombine.low %v141_v17, %v141_v17  ;;  %v4214_v15 = vld [vmem:[%s5452_s0 + $0x31c] ss:$76 sps:$4 sm:$0xff]  }
  0x55   :  { %2294 = vmatprep.mubr.bf16.mxu1 %v4096_v32  ;;  %v4161_v32 = vld [vmem:[%s5452_s0 + $0x20] ss:$76 sps:$4 sm:$0xff]   ;;  %v4236_v17 = vld [vmem:[%s5451_s1 + $0x3b8] sm:$0xff]  }
  0x5b   :  { %2207 = vmatmul.mubr.bf16.vlgmr.msra.gmra.mrb[28].mxu0 %v4089_v33  ;;  %v4166_v33 = vld [vmem:[%s5452_s0 + $0x28] ss:$76 sps:$4 sm:$0xff]  }
  0x5c   :  { %3645 = vmatpush3.bf16.msra.mxu0 %v4097_v36  ;;  %2295 = vmatmul.mubr.bf16.vlgmr.msra.gmra.mrb[28].mxu1 %v4094_v35  ;;  %v4171_v35 = vld [vmem:[%s5451_s1 + $0x380] sm:$0xff]   ;;  %v4172_v36 = vld [vmem:[%s5452_s0 + $0xbc] ss:$76 sps:$4 sm:$0xff]  }
  0x5d   :  { %3703 = vmatpush3.bf16.msra.mxu1 %v4099_v37  ;;  %2214 = vmatprep.mubr.bf16.mxu0 %v4100_v38  ;;  %v4174_v37 = vld [vmem:[%s5451_s1 + $0x348] sm:$0xff]  }
  0x5e   :  { %3646 = vmatprep.subr.bf16.mxu0 %v4102_v39  ;;  %2302 = vmatprep.mubr.bf16.mxu1 %v4105_v41  ;;  %v4176_v38 = vld [vmem:[%s5451_s1 + $0x308] sm:$0xff]   ;;  %v4177_v39 = vld [vmem:[%s5452_s0 + $0xc4] ss:$76 sps:$4 sm:$0xff]  }
  0x5f   :  { %3704 = vmatprep.subr.bf16.mxu1 %v4108_v42  ;;  %v4181_v41 = vld [vmem:[%s5451_s1 + $0x388] sm:$0xff]   ;;  %v4175_v42 = vld [vmem:[%s5452_s0 + $0xb8] ss:$76 sps:$4 sm:$0xff]  }
  0x60   :  { %3647 = vmatpush3.bf16.msra.mxu0 %v4104_v40  ;;  %v4180_v40 = vld [vmem:[%s5451_s1 + $0x3c8] sm:$0xff]  }
  0x61   :  { %3705 = vmatpush3.bf16.msra.mxu1 %v4109_v43  ;;  %3648 = vmatprep.subr.bf16.mxu0 %v4110_v44  ;;  %v4182_v43 = vld [vmem:[%s5451_s1 + $0x350] sm:$0xff]  }
  0x62   :  { %3706 = vmatprep.subr.bf16.mxu1 %v4118_v50  ;;  %v4190_v44 = vld [vmem:[%s5451_s1 + $0x3d0] sm:$0xff]   ;;  %v4192_v50 = vld [vmem:[%s5451_s1 + $0x358] sm:$0xff]  }
  0x63   :  { %2215 = vmatmul.mubr.bf16.gmra.mrb[32].mxu0 %v4103_v45  ;;  %v4179_v45 = vld [vmem:[%s5452_s0 + $0xc0] ss:$76 sps:$4 sm:$0xff]  }
  0x64   :  { %2303 = vmatmul.mubr.bf16.gmra.mrb[32].mxu1 %v4107_v46  ;;  %2222 = vmatprep.mubr.bf16.mxu0 %v4111_v47  ;;  %v4183_v46 = vld [vmem:[%s5452_s0 + $0x154] ss:$76 sps:$4 sm:$0xff]  }
  0x65   :  { %3649 = vmatpush3.bf16.msra.mxu0 %v4113_v48  ;;  %2310 = vmatprep.mubr.bf16.mxu1 %v4115_v49  ;;  %v4185_v47 = vld [vmem:[%s5451_s1 + $0x310] sm:$0xff]   ;;  %v4187_v48 = vld [vmem:[%s5452_s0 + $0x15c] ss:$76 sps:$4 sm:$0xff]  }
  0x66   :  { %3650 = vmatprep.subr.bf16.mxu0 %v4120_v52  ;;  %3707 = vmatpush3.bf16.msra.mxu1 %v4119_v51  ;;  %v4191_v49 = vld [vmem:[%s5451_s1 + $0x390] sm:$0xff]   ;;  %v4200_v51 = vld [vmem:[%s5451_s1 + $0x3d8] sm:$0xff]  }
  0x67   :  { %3708 = vmatprep.subr.bf16.mxu1 %v4128_v58  ;;  %v4193_v52 = vld [vmem:[%s5451_s1 + $0x318] sm:$0xff]   ;;  %v4197_v58 = vld [vmem:[%s5452_s0 + $0x1f4] ss:$76 sps:$4 sm:$0xff]  }
  0x69   :  { %3651 = vmatpush3.bf16.msra.mxu0 %v4121_v53  ;;  %v4186_v53 = vld [vmem:[%s5452_s0 + $0x150] ss:$76 sps:$4 sm:$0xff]  }
  0x6a   :  { %3709 = vmatpush3.bf16.msra.mxu1 %v4129_v59  ;;  %3652 = vmatprep.subr.bf16.mxu0 %v4130_v60  ;;  %v4203_v59 = vld [vmem:[%s5451_s1 + $0x320] sm:$0xff]  }
  0x6b   :  { %2223 = vmatmul.mubr.bf16.gmra.mrb[36].mxu0 %v4114_v54  ;;  %3710 = vmatprep.subr.bf16.mxu1 %v4137_v2  ;;  %v4201_v54 = vld [vmem:[%s5451_s1 + $0x398] sm:$0xff]   ;;  %v4209_v60 = vld [vmem:[%s5451_s1 + $0x3e0] sm:$0xff]  }
  0x6c   :  { %2311 = vmatmul.mubr.bf16.gmra.mrb[36].mxu1 %v4117_v55  ;;  %2230 = vmatprep.mubr.bf16.mxu0 %v4122_v56  ;;  %v4189_v55 = vld [vmem:[%s5452_s0 + $0x158] ss:$76 sps:$4 sm:$0xff]   ;;  %v4199_v2 = vld [vmem:[%s5452_s0 + $0x1f0] ss:$76 sps:$4 sm:$0xff]  }
  0x6d   :  { %2318 = vmatprep.mubr.bf16.mxu1 %v4125_v57  ;;  %3653 = vmatpush3.bf16.msra.mxu0 %v4131_v61  ;;  %v4194_v56 = vld [vmem:[%s5452_s0 + $0x1ec] ss:$76 sps:$4 sm:$0xff]   ;;  %v4202_v57 = vld [vmem:[%s5451_s1 + $0x360] sm:$0xff]  }
  0x6e   :  { %3711 = vmatpush3.bf16.msra.mxu1 %v4139_v3  ;;  %3654 = vmatprep.subr.bf16.mxu0 %v4140_v4  ;;  %v4211_v61 = vld [vmem:[%s5451_s1 + $0x3a0] sm:$0xff]   ;;  %v4220_v4 = vld [vmem:[%s5451_s1 + $0x3a8] sm:$0xff]  }
  0x6f   :  { %3712 = vmatprep.subr.bf16.mxu1 %v4145_v7  ;;  %v4204_v3 = vld [vmem:[%s5452_s0 + $0x284] ss:$76 sps:$4 sm:$0xff]  }
  0x70   :  { %v4223_v7 = vld [vmem:[%s5451_s1 + $0x330] sm:$0xff]  }
  0x71   :  { %3655 = vmatpush3.bf16.msra.mxu0 %v4141_v5  ;;  %v4207_v5 = vld [vmem:[%s5452_s0 + $0x28c] ss:$76 sps:$4 sm:$0xff]  }
  0x72   :  { %3713 = vmatpush3.bf16.msra.mxu1 %v4148_v10  ;;  %3656 = vmatprep.subr.bf16.mxu0 %v4150_v11  ;;  %v4206_v10 = vld [vmem:[%s5452_s0 + $0x280] ss:$76 sps:$4 sm:$0xff]   ;;  %v4229_v11 = vld [vmem:[%s5451_s1 + $0x378] sm:$0xff]  }
  0x73   :  { %2231 = vmatmul.mubr.bf16.gmra.mrb[40].mxu0 %v4124_v62  ;;  %3714 = vmatprep.subr.bf16.mxu1 %v4153_v14  ;;  %v4212_v62 = vld [vmem:[%s5451_s1 + $0x368] sm:$0xff]   ;;  %v4232_v14 = vld [vmem:[%s5451_s1 + $0x3f8] sm:$0xff]  }
  0x74   :  { %2319 = vmatmul.mubr.bf16.gmra.mrb[40].mxu1 %v4127_v63  ;;  %2238 = vmatprep.mubr.bf16.mxu0 %v4132_v0  ;;  %v4213_v63 = vld [vmem:[%s5451_s1 + $0x328] sm:$0xff]  }
  0x75   :  { %2326 = vmatprep.mubr.bf16.mxu1 %v4135_v1  ;;  %3657 = vmatpush3.bf16.msra.mxu0 %v4151_v13  ;;  %v4196_v0 = vld [vmem:[%s5452_s0 + $0x1e8] ss:$76 sps:$4 sm:$0xff]   ;;  %v4231_v13 = vld [vmem:[%s5451_s1 + $0x338] sm:$0xff]  }
  0x76   :  { %3715 = vmatpush3.bf16.msra.mxu1 %v4155_v16  ;;  %3658 = vmatprep.subr.bf16.mxu0 %v4157_v19  ;;  %v4217_v1 = vld [vmem:[%s5451_s1 + $0x3e8] sm:$0xff]   ;;  %v4218_v16 = vld [vmem:[%s5452_s0 + $0x324] ss:$76 sps:$4 sm:$0xff]  }
  0x77   :  { %3716 = vmatprep.subr.bf16.mxu1 %v4160_v21  ;;  %v142_v19 = vld [vmem:[%s5452_s0 + $0x3b0] sm:$0x11]  ;;  %v4324_v21 = vmov 0.0  }
  0x79   :  { %3659 = vmatpush3.bf16.msra.mxu0 %v4159_v20  ;;  %v143_v20 = vld [vmem:[%s5452_s0 + $0x3b8] sm:$0x11] }
  0x7a   :  { %3717 = vmatpush3.bf16.msra.mxu1 %v4164_v25  ;;  %3760 = vmatprep.subr.bf16.mxu0 %v4165_v26  ;;  %v3187_v25 = vcombine.high %v143_v20, %v143_v20  ;;  %v3184_v26 = vcombine.low %v142_v19, %v142_v19 }
  0x7b   :  { %2239 = vmatmul.mubr.bf16.gmra.mrb[44].mxu0 %v4134_v6  ;;  %3818 = vmatprep.subr.bf16.mxu1 %v4170_v27  ;;  %v4222_v6 = vld [vmem:[%s5451_s1 + $0x370] sm:$0xff]   ;;  %v3186_v27 = vcombine.low %v143_v20, %v143_v20 }
  0x7c   :  { %2327 = vmatmul.mubr.bf16.gmra.mrb[44].mxu1 %v4138_v8  ;;  %2246 = vmatprep.mubr.bf16.mxu0 %v4142_v9  ;;  %v4225_v8 = vld [vmem:[%s5451_s1 + $0x3f0] sm:$0xff]  }
  0x7d   :  { %2334 = vmatprep.mubr.bf16.mxu1 %v4146_v12  ;;  %v4227_v9 = vld [vmem:[%s5451_s1 + $0x3b0] sm:$0xff]  }
  0x7e   :  { %v4210_v12 = vld [vmem:[%s5452_s0 + $0x288] ss:$76 sps:$4 sm:$0xff]  }
  0x83   :  { %2247 = vmatmul.mubr.bf16.gmra.mrb[48].mxu0 %v4144_v18  ;;  %v4237_v18 = vld [vmem:[%s5451_s1 + $0x440] sm:$0xff]  }
  0x84   :  { %2335 = vmatmul.mubr.bf16.gmra.mrb[48].mxu1 %v4149_v22  ;;  %2254 = vmatprep.mubr.bf16.mxu0 %v3181_v23  ;;  %v4216_v22 = vld [vmem:[%s5452_s0 + $0x318] ss:$76 sps:$4 sm:$0xff]   ;;  %v4221_v23 = vld [vmem:[%s5452_s0 + $0x320] ss:$76 sps:$4 sm:$0xff]  }
  0x85   :  { %2342 = vmatprep.mubr.bf16.mxu1 %v3183_v24  ;;  %v3185_v24 = vcombine.high %v142_v19, %v142_v19 }
  0x8b   :  { %2255 = vmatmul.mubr.bf16.gmra.mrb[52].mxu0 %v3180_v28  ;;  %v4235_v28 = vld [vmem:[%s5452_s0 + $0x34] ss:$76 sps:$4 sm:$0xff]  }
  0x8c   :  { %2343 = vmatmul.mubr.bf16.gmra.mrb[52].mxu1 %v3182_v29  ;;  %2382 = vmatprep.mubr.bf16.mxu0 %v4163_v30  ;;  %v4240_v29 = vld [vmem:[%s5452_s0 + $0x3c] ss:$76 sps:$4 sm:$0xff]  }
  0x8d   :  { %2470 = vmatprep.mubr.bf16.mxu1 %v4168_v31  ;;  %v4233_v30 = vld [vmem:[%s5452_s0 + $0x30] ss:$76 sps:$4 sm:$0xff]   ;;  %v4238_v31 = vld [vmem:[%s5452_s0 + $0x38] ss:$76 sps:$4 sm:$0xff]  }
  0x93   :  { %2383 = vmatmul.mubr.bf16.vlgmr.msra.gmra.mrb[56].mxu0 %v4161_v32  ;;  %v4241_v32 = vld [vmem:[%s5451_s1 + $0x400] sm:$0xff]  }
  0x94   :  { %3761 = vmatpush3.bf16.msra.mxu0 %v4169_v34  ;;  %2471 = vmatmul.mubr.bf16.vlgmr.msra.gmra.mrb[56].mxu1 %v4166_v33  ;;  %v4242_v33 = vld [vmem:[%s5451_s1 + $0x480] sm:$0xff]   ;;  %v4243_v34 = vld [vmem:[%s5452_s0 + $0xcc] ss:$76 sps:$4 sm:$0xff]  }
  0x95   :  { %3819 = vmatpush3.bf16.msra.mxu1 %v4171_v35  ;;  %2390 = vmatprep.mubr.bf16.mxu0 %v4172_v36  ;;  %v4245_v35 = vld [vmem:[%s5451_s1 + $0x448] sm:$0xff]   ;;  %v4248_v36 = vld [vmem:[%s5452_s0 + $0xd4] ss:$76 sps:$4 sm:$0xff]  }
  0x96   :  { %3762 = vmatprep.subr.bf16.mxu0 %v4174_v37  ;;  %2478 = vmatprep.mubr.bf16.mxu1 %v4177_v39  ;;  %v4247_v37 = vld [vmem:[%s5451_s1 + $0x408] sm:$0xff]  }
  0x97   :  { %3820 = vmatprep.subr.bf16.mxu1 %v4180_v40  ;;  %v4259_v39 = vld [vmem:[%s5451_s1 + $0x488] sm:$0xff]  }
  0x98   :  { %3763 = vmatpush3.bf16.msra.mxu0 %v4176_v38  ;;  %v4251_v38 = vld [vmem:[%s5451_s1 + $0x450] sm:$0xff]  }
  0x99   :  { %3821 = vmatpush3.bf16.msra.mxu1 %v4181_v41  ;;  %3764 = vmatprep.subr.bf16.mxu0 %v4182_v43  ;;  %v4246_v40 = vld [vmem:[%s5452_s0 + $0xc8] ss:$76 sps:$4 sm:$0xff]   ;;  %v4250_v41 = vld [vmem:[%s5452_s0 + $0xd0] ss:$76 sps:$4 sm:$0xff]  }
  0x9a   :  { %3822 = vmatprep.subr.bf16.mxu1 %v4190_v44  ;;  %v4254_v43 = vld [vmem:[%s5451_s1 + $0x410] sm:$0xff]   ;;  %v4256_v44 = vld [vmem:[%s5452_s0 + $0x16c] ss:$76 sps:$4 sm:$0xff]  }
  0x9b   :  { %2391 = vmatmul.mubr.bf16.gmra.mrb[60].mxu0 %v4175_v42  ;;  %v4252_v42 = vld [vmem:[%s5452_s0 + $0x164] ss:$76 sps:$4 sm:$0xff]  }
  0x9c   :  { %2479 = vmatmul.mubr.bf16.gmra.mrb[60].mxu1 %v4179_v45  ;;  %2398 = vmatprep.mubr.bf16.mxu0 %v4183_v46  ;;  %v4260_v45 = vld [vmem:[%s5451_s1 + $0x458] sm:$0xff]   ;;  %v4270_v46 = vld [vmem:[%s5451_s1 + $0x490] sm:$0xff]  }
  0x9d   :  { %3765 = vmatpush3.bf16.msra.mxu0 %v4185_v47  ;;  %2486 = vmatprep.mubr.bf16.mxu1 %v4187_v48  ;;  %v4261_v47 = vld [vmem:[%s5451_s1 + $0x418] sm:$0xff]   ;;  %v4255_v48 = vld [vmem:[%s5452_s0 + $0x160] ss:$76 sps:$4 sm:$0xff]  }
  0x9e   :  { %3823 = vmatpush3.bf16.msra.mxu1 %v4191_v49  ;;  %3766 = vmatprep.subr.bf16.mxu0 %v4192_v50  ;;  %v4268_v49 = vld [vmem:[%s5451_s1 + $0x460] sm:$0xff]   ;;  %v4282_v50 = vld [vmem:[%s5451_s1 + $0x498] sm:$0xff]  }
  0x9f   :  { %3824 = vmatprep.subr.bf16.mxu1 %v4200_v51  ;;  %v4258_v51 = vld [vmem:[%s5452_s0 + $0x168] ss:$76 sps:$4 sm:$0xff]  }
  0xa1   :  { %3767 = vmatpush3.bf16.msra.mxu0 %v4193_v52  ;;  %v4294_v52 = vld [vmem:[%s5451_s1 + $0x4a0] ss:$0 sps:$4 sm:$0xff]  }
  0xa2   :  { %3825 = vmatpush3.bf16.msra.mxu1 %v4201_v54  ;;  %3768 = vmatprep.subr.bf16.mxu0 %v4202_v57  ;;  %v4265_v54 = vld [vmem:[%s5452_s0 + $0x204] ss:$76 sps:$4 sm:$0xff]   ;;  %v1996_v57 = vsel %vm1994_vm0, %v4294_v52, 0 }
  0xa3   :  { %2399 = vmatmul.mubr.bf16.gmra.mrb[64].mxu0 %v4186_v53  ;;  %3826 = vmatprep.subr.bf16.mxu1 %v4209_v60  ;;  %v4262_v53 = vld [vmem:[%s5452_s0 + $0x1fc] ss:$76 sps:$4 sm:$0xff]   ;;  %v4286_v60 = vld [vmem:[%s5451_s1 + $0x470] sm:$0xff]  }
  0xa4   :  { %2487 = vmatmul.mubr.bf16.gmra.mrb[64].mxu1 %v4189_v55  ;;  %2406 = vmatprep.mubr.bf16.mxu0 %v4194_v56  ;;  %v4269_v55 = vld [vmem:[%s5451_s1 + $0x420] sm:$0xff]   ;;  %v4277_v56 = vld [vmem:[%s5451_s1 + $0x468] sm:$0xff]  }
  0xa5   :  { %2494 = vmatprep.mubr.bf16.mxu1 %v4197_v58  ;;  %3769 = vmatpush3.bf16.msra.mxu0 %v4203_v59  ;;  %v4278_v58 = vld [vmem:[%s5451_s1 + $0x428] sm:$0xff]   ;;  %v4264_v59 = vld [vmem:[%s5452_s0 + $0x1f8] ss:$76 sps:$4 sm:$0xff]  }
  0xa6   :  { %3827 = vmatpush3.bf16.msra.mxu1 %v4211_v61  ;;  %3770 = vmatprep.subr.bf16.mxu0 %v4212_v62  ;;  %v4267_v61 = vld [vmem:[%s5452_s0 + $0x200] ss:$76 sps:$4 sm:$0xff]  }
  0xa7   :  { %3828 = vmatprep.subr.bf16.mxu1 %v4217_v1  ;;  %v4271_v62 = vld [vmem:[%s5452_s0 + $0x294] ss:$76 sps:$4 sm:$0xff]   ;;  %v4291_v1 = vld [vmem:[%s5451_s1 + $0x478] sm:$0xff]  }
  0xa9   :  { %3771 = vmatpush3.bf16.msra.mxu0 %v4213_v63  ;;  %v4274_v63 = vld [vmem:[%s5452_s0 + $0x29c] ss:$76 sps:$4 sm:$0xff]  }
  0xaa   :  { %3829 = vmatpush3.bf16.msra.mxu1 %v4220_v4  ;;  %3772 = vmatprep.subr.bf16.mxu0 %v4222_v6  ;;  %v4276_v4 = vld [vmem:[%s5452_s0 + $0x298] ss:$76 sps:$4 sm:$0xff]   ;;  %v4283_v6 = vld [vmem:[%s5452_s0 + $0x334] ss:$76 sps:$4 sm:$0xff]  }
  0xab   :  { %2407 = vmatmul.mubr.bf16.gmra.mrb[68].mxu0 %v4196_v0  ;;  %3830 = vmatprep.subr.bf16.mxu1 %v4225_v8  ;;  %v4287_v0 = vld [vmem:[%s5451_s1 + $0x430] sm:$0xff]   ;;  %v145_v8 = vld [vmem:[%s5452_s0 + $0x3c8] sm:$0x11] }
  0xac   :  { %2495 = vmatmul.mubr.bf16.gmra.mrb[68].mxu1 %v4199_v2  ;;  %2414 = vmatprep.mubr.bf16.mxu0 %v4204_v3  ;;  %v4293_v2 = vld [vmem:[%s5451_s1 + $0x438] sm:$0xff]   ;;  %v3190_v20 = vcombine.low %v145_v8, %v145_v8 }
  0xad   :  { %2502 = vmatprep.mubr.bf16.mxu1 %v4207_v5  ;;  %3773 = vmatpush3.bf16.msra.mxu0 %v4223_v7  ;;  %v4273_v3 = vld [vmem:[%s5452_s0 + $0x290] ss:$76 sps:$4 sm:$0xff]   ;;  %v4279_v5 = vld [vmem:[%s5452_s0 + $0x32c] ss:$76 sps:$4 sm:$0xff]   ;;  %v144_v7 = vld [vmem:[%s5452_s0 + $0x3c0] sm:$0x11] }
  0xae   :  { %3831 = vmatpush3.bf16.msra.mxu1 %v4227_v9  ;;  %3774 = vmatprep.subr.bf16.mxu0 %v4229_v11  ;;  %v4281_v9 = vld [vmem:[%s5452_s0 + $0x328] ss:$76 sps:$4 sm:$0xff]   ;;  %v3189_v11 = vcombine.high %v144_v7, %v144_v7 }
  0xaf   :  { %3832 = vmatprep.subr.bf16.mxu1 %v4232_v14 }
  0xb1   :  { %3775 = vmatpush3.bf16.msra.mxu0 %v4231_v13 }
  0xb2   :  { %3833 = vmatpush3.bf16.msra.mxu1 %v4236_v17  ;;  %3876 = vmatprep.subr.bf16.mxu0 %v4237_v18 }
  0xb3   :  { %2415 = vmatmul.mubr.bf16.gmra.mrb[72].mxu0 %v4206_v10  ;;  %3946 = vmatprep.subr.bf16.mxu1 %v4324_v21  ;;  %v4285_v10 = vld [vmem:[%s5452_s0 + $0x330] ss:$76 sps:$4 sm:$0xff]  }
  0xb4   :  { %2503 = vmatmul.mubr.bf16.gmra.mrb[72].mxu1 %v4210_v12  ;;  %2422 = vmatprep.mubr.bf16.mxu0 %v4214_v15  ;;  %v3191_v12 = vcombine.high %v145_v8, %v145_v8  ;;  %v4306_v8 = vld [vmem:[%s5452_s0 + $0x178] ss:$76 sps:$4 sm:$0xff]  }
  0xb5   :  { %2510 = vmatprep.mubr.bf16.mxu1 %v4218_v16  ;;  %v3188_v16 = vcombine.low %v144_v7, %v144_v7 }
  0xbb   :  { %2423 = vmatmul.mubr.bf16.gmra.mrb[76].mxu0 %v4216_v22  ;;  %v4297_v22 = vld [vmem:[%s5452_s0 + $0x44] ss:$76 sps:$4 sm:$0xff]  }
  0xbc   :  { %2511 = vmatmul.mubr.bf16.gmra.mrb[76].mxu1 %v4221_v23  ;;  %2430 = vmatprep.mubr.bf16.mxu0 %v3185_v24 }
  0xbd   :  { %2518 = vmatprep.mubr.bf16.mxu1 %v3187_v25 }
  0xc3   :  { %2431 = vmatmul.mubr.bf16.gmra.mrb[80].mxu0 %v3184_v26 }
  0xc4   :  { %2519 = vmatmul.mubr.bf16.gmra.mrb[80].mxu1 %v3186_v27  ;;  %2558 = vmatprep.mubr.bf16.mxu0 %v4235_v28 }
  0xc5   :  { %2646 = vmatprep.mubr.bf16.mxu1 %v4240_v29 }
  0xcb   :  { %2559 = vmatmul.mubr.bf16.vlgmr.msra.gmra.mrb[84].mxu0 %v4233_v30 }
  0xcc   :  { %3877 = vmatpush3.bf16.msra.mxu0 %v4241_v32  ;;  %2647 = vmatmul.mubr.bf16.vlgmr.msra.gmra.mrb[84].mxu1 %v4238_v31 }
  0xcd   :  { %3947 = vmatpush3.bf16.msra.mxu1 %v4242_v33  ;;  %2566 = vmatprep.mubr.bf16.mxu0 %v4243_v34  ;;  %v4295_v34 = vld [vmem:[%s5452_s0 + $0x40] ss:$76 sps:$4 sm:$0xff]  }
  0xce   :  { %3878 = vmatprep.subr.bf16.mxu0 %v4245_v35  ;;  %2654 = vmatprep.mubr.bf16.mxu1 %v4248_v36 }
  0xcf   :  { %3948 = vmatprep.subr.bf16.mxu1 %v4324_v21 }
  0xd0   :  { %3879 = vmatpush3.bf16.msra.mxu0 %v4247_v37 }
  0xd1   :  { %3880 = vmatprep.subr.bf16.mxu0 %v4251_v38  ;;  %3949 = vmatpush3.bf16.msra.mxu1 %v4259_v39  ;;  %v4298_v38 = vld [vmem:[%s5452_s0 + $0x48] ss:$76 sps:$4 sm:$0xff]  }
  0xd2   :  { %3950 = vmatprep.subr.bf16.mxu1 %v4324_v21  ;;  %v4299_v39 = vld [vmem:[%s5452_s0 + $0xdc] ss:$76 sps:$4 sm:$0xff]  }
  0xd3   :  { %2567 = vmatmul.mubr.bf16.gmra.mrb[88].mxu0 %v4246_v40 }
  0xd4   :  { %2655 = vmatmul.mubr.bf16.gmra.mrb[88].mxu1 %v4250_v41  ;;  %2574 = vmatprep.mubr.bf16.mxu0 %v4252_v42 }
  0xd5   :  { %3881 = vmatpush3.bf16.msra.mxu0 %v4254_v43  ;;  %2662 = vmatprep.mubr.bf16.mxu1 %v4256_v44 }
  0xd6   :  { %3882 = vmatprep.subr.bf16.mxu0 %v4260_v45  ;;  %3951 = vmatpush3.bf16.msra.mxu1 %v4270_v46 }
  0xd7   :  { %3952 = vmatprep.subr.bf16.mxu1 %v4324_v21 }
  0xd9   :  { %3883 = vmatpush3.bf16.msra.mxu0 %v4261_v47 }
  0xda   :  { %3884 = vmatprep.subr.bf16.mxu0 %v4268_v49  ;;  %3953 = vmatpush3.bf16.msra.mxu1 %v4282_v50 }
  0xdb   :  { %2575 = vmatmul.mubr.bf16.gmra.mrb[92].mxu0 %v4255_v48  ;;  %3954 = vmatprep.subr.bf16.mxu1 %v4324_v21 }
  0xdc   :  { %2663 = vmatmul.mubr.bf16.gmra.mrb[92].mxu1 %v4258_v51  ;;  %2582 = vmatprep.mubr.bf16.mxu0 %v4262_v53  ;;  %v4301_v51 = vld [vmem:[%s5452_s0 + $0xd8] ss:$76 sps:$4 sm:$0xff]  }
  0xdd   :  { %2670 = vmatprep.mubr.bf16.mxu1 %v4265_v54  ;;  %3885 = vmatpush3.bf16.msra.mxu0 %v4269_v55  ;;  %v4302_v55 = vld [vmem:[%s5452_s0 + $0xe0] ss:$76 sps:$4 sm:$0xff]  }
  0xde   :  { %3886 = vmatprep.subr.bf16.mxu0 %v4277_v56  ;;  %3955 = vmatpush3.bf16.msra.mxu1 %v1996_v57  ;;  %v4303_v56 = vld [vmem:[%s5452_s0 + $0x174] ss:$76 sps:$4 sm:$0xff]  }
  0xe1   :  { %3887 = vmatpush3.bf16.msra.mxu0 %v4278_v58 }
  0xe2   :  { %3888 = vmatprep.subr.bf16.mxu0 %v4286_v60 }
  0xe3   :  { %2583 = vmatmul.mubr.bf16.gmra.mrb[96].mxu0 %v4264_v59 }
  0xe4   :  { %2671 = vmatmul.mubr.bf16.gmra.mrb[96].mxu1 %v4267_v61  ;;  %2590 = vmatprep.mubr.bf16.mxu0 %v4271_v62 }
  0xe5   :  { %2678 = vmatprep.mubr.bf16.mxu1 %v4274_v63  ;;  %3889 = vmatpush3.bf16.msra.mxu0 %v4287_v0 }
  0xe6   :  { %3890 = vmatprep.subr.bf16.mxu0 %v4291_v1 }
  0xe9   :  { %3891 = vmatpush3.bf16.msra.mxu0 %v4293_v2 }
  0xeb   :  { %2591 = vmatmul.mubr.bf16.gmra.mrb[100].mxu0 %v4273_v3 }
  0xec   :  { %2679 = vmatmul.mubr.bf16.gmra.mrb[100].mxu1 %v4276_v4  ;;  %2598 = vmatprep.mubr.bf16.mxu0 %v4279_v5  ;;  %v4305_v4 = vld [vmem:[%s5452_s0 + $0x170] ss:$76 sps:$4 sm:$0xff]  }
  0xed   :  { %2686 = vmatprep.mubr.bf16.mxu1 %v4283_v6 }
  0xf3   :  { %2599 = vmatmul.mubr.bf16.gmra.mrb[104].mxu0 %v4281_v9  ;;  %v4307_v9 = vld [vmem:[%s5452_s0 + $0x20c] ss:$76 sps:$4 sm:$0xff]  }
  0xf4   :  { %2687 = vmatmul.mubr.bf16.gmra.mrb[104].mxu1 %v4285_v10  ;;  %2606 = vmatprep.mubr.bf16.mxu0 %v3189_v11 }
  0xf5   :  { %2694 = vmatprep.mubr.bf16.mxu1 %v3191_v12 }
  0xf6   :  { %v3428_v13 = vpop.f32.mrb[0].mxu0 }
  0xf7   :  { %v3486_v14 = vpop.f32.mrb[0].mxu1  ;;  %v3429_v15 = vpop.f32.mrb[1].mxu0 }
  0xf8   :  { %v3430_v17 = vadd.f32 %v3429_v15, %v3428_v13  ;;  %v3487_v18 = vpop.f32.mrb[1].mxu1  ;;  %v3431_v19 = vpop.f32.mrb[2].mxu0 }
  0xf9   :  { %v3488_v23 = vadd.f32 %v3487_v18, %v3486_v14  ;;  %v3489_v24 = vpop.f32.mrb[2].mxu1  ;;  %v3432_v25 = vpop.f32.mrb[3].mxu0 }
  0xfa   :  { %v3433_v26 = vadd.f32 %v3432_v25, %v3431_v19  ;;  %v3490_v27 = vpop.f32.mrb[3].mxu1 }
  0xfb   :  { %v5118_v28 = vadd.f32 %v3488_v23, %v3430_v17  ;;  %v3491_v29 = vadd.f32 %v3490_v27, %v3489_v24  ;;  %2607 = vmatmul.mubr.bf16.gmra.mrb[108].mxu0 %v3188_v16  ;;  %v4311_v27 = vld [vmem:[%s5452_s0 + $0x2a4] ss:$76 sps:$4 sm:$0xff]  }
  0xfc   :  { %2695 = vmatmul.mubr.bf16.gmra.mrb[108].mxu1 %v3190_v20  ;;  %2734 = vmatprep.mubr.bf16.mxu0 %v4297_v22  ;;  %v4309_v22 = vld [vmem:[%s5452_s0 + $0x208] ss:$76 sps:$4 sm:$0xff]  }
  0xfd   :  { %v5120_v30 = vadd.f32 %v3491_v29, %v3433_v26  ;;  %3956 = vmatprep.mubr.msk.bf16.mxu1 %vm4325_vm1, %v4324_v21  ;;  %v4310_v26 = vld [vmem:[%s5452_s0 + $0x210] ss:$76 sps:$4 sm:$0xff]  }
  0xfe   :  { %v3434_v31 = vpop.f32.mrb[4].mxu0 }
  0xff   :  { %v3492_v32 = vpop.f32.mrb[4].mxu1  ;;  %v3435_v33 = vpop.f32.mrb[5].mxu0 }
 0x100   :  { %v3436_v35 = vadd.f32 %v3435_v33, %v3434_v31  ;;  %v3493_v36 = vpop.f32.mrb[5].mxu1  ;;  %v3437_v37 = vpop.f32.mrb[6].mxu0 }
 0x101   :  { %v3494_v40 = vadd.f32 %v3493_v36, %v3492_v32  ;;  %v3495_v41 = vpop.f32.mrb[6].mxu1  ;;  %v3438_v42 = vpop.f32.mrb[7].mxu0 }
 0x102   :  { %v3439_v43 = vadd.f32 %v3438_v42, %v3437_v37  ;;  %v3496_v44 = vpop.f32.mrb[7].mxu1 }
 0x103   :  { %v5133_v45 = vadd.f32 %v3494_v40, %v3436_v35  ;;  %v3497_v46 = vadd.f32 %v3496_v44, %v3495_v41  ;;  %2735 = vmatmul.mubr.bf16.vlgmr.msra.gmra.mrb[112].mxu0 %v4295_v34  ;;  %v4313_v41 = vld [vmem:[%s5452_s0 + $0x2a0] ss:$76 sps:$4 sm:$0xff]  }
 0x104   :  { %3957 = vmatmul.mubr.msk.bf16.vlgmr.msra.gmra.mrb[112].mxu1 %vm1972_vm2, %v4298_v38  ;;  %2742 = vmatprep.mubr.bf16.mxu0 %v4299_v39 }
 0x105   :  { %v5136_v47 = vadd.f32 %v3497_v46, %v3439_v43  ;;  %3960 = vmatprep.mubr.msk.bf16.mxu1 %vm4325_vm1, %v4324_v21  ;;  %v4314_v46 = vld [vmem:[%s5452_s0 + $0x2a8] ss:$76 sps:$4 sm:$0xff]  }
 0x106   :  { %v3440_v48 = vpop.f32.mrb[8].mxu0 }
 0x107   :  { %v3498_v49 = vpop.f32.mrb[8].mxu1  ;;  %v3441_v50 = vpop.f32.mrb[9].mxu0 }
 0x108   :  { %v3442_v52 = vadd.f32 %v3441_v50, %v3440_v48  ;;  %v3499_v53 = vpop.f32.mrb[9].mxu1  ;;  %v3443_v54 = vpop.f32.mrb[10].mxu0  ;;  %v4315_v48 = vld [vmem:[%s5452_s0 + $0x33c] ss:$76 sps:$4 sm:$0xff]  }
 0x109   :  { %v3500_v57 = vadd.f32 %v3499_v53, %v3498_v49  ;;  %v3501_v58 = vpop.f32.mrb[10].mxu1  ;;  %v3444_v59 = vpop.f32.mrb[11].mxu0 }
 0x10a   :  { %v3445_v60 = vadd.f32 %v3444_v59, %v3443_v54  ;;  %v3502_v61 = vpop.f32.mrb[11].mxu1 }
 0x10b   :  { %v5149_v62 = vadd.f32 %v3500_v57, %v3442_v52  ;;  %v3503_v63 = vadd.f32 %v3502_v61, %v3501_v58  ;;  %2743 = vmatmul.mubr.bf16.gmra.mrb[116].mxu0 %v4301_v51  ;;  %v146_v57 = vld [vmem:[%s5452_s0 + $0x3d0] sm:$0x11]  ;;  %v4317_v61 = vld [vmem:[%s5452_s0 + $0x338] ss:$76 sps:$4 sm:$0xff]  }
 0x10c   :  { %3961 = vmatmul.mubr.msk.bf16.gmra.mrb[116].mxu1 %vm1972_vm2, %v4302_v55  ;;  %2750 = vmatprep.mubr.bf16.mxu0 %v4303_v56 }
 0x10d   :  { %v5152_v0 = vadd.f32 %v3503_v63, %v3445_v60  ;;  %3964 = vmatprep.mubr.msk.bf16.mxu1 %vm4325_vm1, %v4324_v21 }
 0x10e   :  { %v3446_v1 = vpop.f32.mrb[12].mxu0 }
 0x10f   :  { %v3504_v2 = vpop.f32.mrb[12].mxu1  ;;  %v3447_v3 = vpop.f32.mrb[13].mxu0 }
 0x110   :  { %v3448_v5 = vadd.f32 %v3447_v3, %v3446_v1  ;;  %v3505_v6 = vpop.f32.mrb[13].mxu1  ;;  %v3449_v7 = vpop.f32.mrb[14].mxu0  ;;  %v4318_v3 = vld [vmem:[%s5452_s0 + $0x340] ss:$76 sps:$4 sm:$0xff]  }
 0x111   :  { %v3506_v10 = vadd.f32 %v3505_v6, %v3504_v2  ;;  %v3507_v11 = vpop.f32.mrb[14].mxu1  ;;  %v3450_v12 = vpop.f32.mrb[15].mxu0 }
 0x112   :  { %v3451_v13 = vadd.f32 %v3450_v12, %v3449_v7  ;;  %v3508_v14 = vpop.f32.mrb[15].mxu1 }
 0x113   :  { %v5165_v15 = vadd.f32 %v3506_v10, %v3448_v5  ;;  %v3509_v16 = vadd.f32 %v3508_v14, %v3507_v11  ;;  %2751 = vmatmul.mubr.bf16.gmra.mrb[120].mxu0 %v4305_v4  ;;  %v3193_v4 = vcombine.high %v146_v57, %v146_v57 }
 0x114   :  { %3965 = vmatmul.mubr.msk.bf16.gmra.mrb[120].mxu1 %vm1972_vm2, %v4306_v8  ;;  %2758 = vmatprep.mubr.bf16.mxu0 %v4307_v9 }
 0x115   :  { %v5168_v17 = vadd.f32 %v3509_v16, %v3451_v13  ;;  %3968 = vmatprep.mubr.msk.bf16.mxu1 %vm4325_vm1, %v4324_v21  ;;  %v3192_v13 = vcombine.low %v146_v57, %v146_v57 }
 0x116   :  { %v3452_v18 = vpop.f32.mrb[16].mxu0 }
 0x117   :  { %v3510_v19 = vpop.f32.mrb[16].mxu1  ;;  %v3453_v20 = vpop.f32.mrb[17].mxu0 }
 0x118   :  { %v3454_v23 = vadd.f32 %v3453_v20, %v3452_v18  ;;  %v3511_v24 = vpop.f32.mrb[17].mxu1  ;;  %v3455_v25 = vpop.f32.mrb[18].mxu0 }
 0x119   :  { %v3512_v29 = vadd.f32 %v3511_v24, %v3510_v19  ;;  %v3513_v31 = vpop.f32.mrb[18].mxu1  ;;  %v3456_v32 = vpop.f32.mrb[19].mxu0  ;;  %v4321_v19 = vld [vmem:[%s5452_s0 + $0x3d8] ss:$0 sps:$4 sm:$0x11]  }
 0x11a   :  { %v3457_v33 = vadd.f32 %v3456_v32, %v3455_v25  ;;  %v3514_v34 = vpop.f32.mrb[19].mxu1 }
 0x11b   :  { %v5181_v35 = vadd.f32 %v3512_v29, %v3454_v23  ;;  %v3515_v36 = vadd.f32 %v3514_v34, %v3513_v31  ;;  %2759 = vmatmul.mubr.bf16.gmra.mrb[124].mxu0 %v4309_v22 }
 0x11c   :  { %3969 = vmatmul.mubr.msk.bf16.gmra.mrb[124].mxu1 %vm1972_vm2, %v4310_v26  ;;  %2766 = vmatprep.mubr.bf16.mxu0 %v4311_v27 }
 0x11d   :  { %v5184_v37 = vadd.f32 %v3515_v36, %v3457_v33  ;;  %3972 = vmatprep.mubr.msk.bf16.mxu1 %vm4325_vm1, %v4324_v21 }
 0x11e   :  { %v3458_v38 = vpop.f32.mrb[20].mxu0 }
 0x11f   :  { %v3516_v39 = vpop.f32.mrb[20].mxu1  ;;  %v3459_v40 = vpop.f32.mrb[21].mxu0 }
 0x120   :  { %v3460_v42 = vadd.f32 %v3459_v40, %v3458_v38  ;;  %v3517_v43 = vpop.f32.mrb[21].mxu1  ;;  %v3461_v44 = vpop.f32.mrb[22].mxu0 }
 0x121   :  { %v3518_v49 = vadd.f32 %v3517_v43, %v3516_v39  ;;  %v3519_v50 = vpop.f32.mrb[22].mxu1  ;;  %v3462_v51 = vpop.f32.mrb[23].mxu0 }
 0x122   :  { %v3463_v52 = vadd.f32 %v3462_v51, %v3461_v44  ;;  %v3520_v53 = vpop.f32.mrb[23].mxu1 }
 0x123   :  { %v5197_v54 = vadd.f32 %v3518_v49, %v3460_v42  ;;  %v3521_v55 = vadd.f32 %v3520_v53, %v3519_v50  ;;  %2767 = vmatmul.mubr.bf16.gmra.mrb[128].mxu0 %v4313_v41 }
 0x124   :  { %3973 = vmatmul.mubr.msk.bf16.gmra.mrb[128].mxu1 %vm1972_vm2, %v4314_v46  ;;  %2774 = vmatprep.mubr.bf16.mxu0 %v4315_v48 }
 0x125   :  { %v5200_v56 = vadd.f32 %v3521_v55, %v3463_v52  ;;  %3976 = vmatprep.mubr.msk.bf16.mxu1 %vm4325_vm1, %v4324_v21 }
 0x126   :  { %v3464_v58 = vpop.f32.mrb[24].mxu0 }
 0x127   :  { %v3522_v59 = vpop.f32.mrb[24].mxu1  ;;  %v3465_v60 = vpop.f32.mrb[25].mxu0 }
 0x128   :  { %v3466_v63 = vadd.f32 %v3465_v60, %v3464_v58  ;;  %v3523_v1 = vpop.f32.mrb[25].mxu1  ;;  %v3467_v2 = vpop.f32.mrb[26].mxu0 }
 0x129   :  { %v3524_v5 = vadd.f32 %v3523_v1, %v3522_v59  ;;  %v3468_v6 = vpop.f32.mrb[27].mxu0  ;;  %v3525_v7 = vpop.f32.mrb[26].mxu1 }
 0x12a   :  { %v3526_v8 = vpop.f32.mrb[27].mxu1 }
 0x12b   :  { %v5213_v9 = vadd.f32 %v3524_v5, %v3466_v63  ;;  %2775 = vmatmul.mubr.bf16.gmra.mrb[132].mxu0 %v4317_v61 }
 0x12c   :  { %3977 = vmatmul.mubr.msk.bf16.gmra.mrb[132].mxu1 %vm1972_vm2, %v4318_v3  ;;  %2782 = vmatprep.mubr.bf16.mxu0 %v3193_v4 }
 0x12d   :  { %3980 = vmatprep.mubr.msk.bf16.mxu1 %vm4325_vm1, %v4324_v21 }
 0x12e   :  { %v3544_v10 = vpop.f32.mrb[28].mxu0 }
 0x12f   :  { %v3545_v11 = vpop.f32.mrb[29].mxu0  ;;  %v3602_v12 = vpop.f32.mrb[28].mxu1 }
 0x130   :  { %v3546_v14 = vadd.f32 %v3545_v11, %v3544_v10  ;;  %v3547_v16 = vpop.f32.mrb[30].mxu0  ;;  %v3603_v18 = vpop.f32.mrb[29].mxu1 }
 0x131   :  { %v3548_v20 = vpop.f32.mrb[31].mxu0  ;;  %v3604_v22 = vadd.f32 %v3603_v18, %v3602_v12  ;;  %v3605_v23 = vpop.f32.mrb[30].mxu1 }
 0x132   :  { %v2209_v24 = vadd.f32 %v3546_v14, %v5118_v28  ;;  %v3549_v25 = vadd.f32 %v3548_v20, %v3547_v16  ;;  %v3606_v26 = vpop.f32.mrb[31].mxu1 }
 0x133   :  { %v3607_v27 = vadd.f32 %v3606_v26, %v3605_v23  ;;  %2783 = vmatmul.mubr.bf16.gmra.mrb[136].mxu0 %v3192_v13 }
 0x134   :  { %v2212_v21 = vadd.f32 %v3549_v25, %v5120_v30  ;;  %v5223_v29 = vadd.f32 %v3604_v22, %v2209_v24  ;;  %3981 = vmatmul.mubr.msk.bf16.gmra.mrb[136].mxu1 %vm1972_vm2, %v4321_v19 }
 0x136   :  { %v5226_v31 = vadd.f32 %v3607_v27, %v2212_v21  ;;  %v3550_v32 = vpop.f32.mrb[32].mxu0 }
 0x137   :  { %v3551_v33 = vpop.f32.mrb[33].mxu0  ;;  %v3608_v34 = vpop.f32.mrb[32].mxu1 }
 0x138   :  { %v3552_v36 = vadd.f32 %v3551_v33, %v3550_v32  ;;  %v3553_v38 = vpop.f32.mrb[34].mxu0  ;;  %v3609_v39 = vpop.f32.mrb[33].mxu1 }
 0x139   :  { %v3554_v40 = vpop.f32.mrb[35].mxu0  ;;  %v3610_v28 = vadd.f32 %v3609_v39, %v3608_v34  ;;  %v3611_v41 = vpop.f32.mrb[34].mxu1 }
 0x13a   :  { %v2217_v42 = vadd.f32 %v3552_v36, %v5133_v45  ;;  %v3555_v43 = vadd.f32 %v3554_v40, %v3553_v38  ;;  %v3612_v44 = vpop.f32.mrb[35].mxu1 }
 0x13b   :  { %v3613_v30 = vadd.f32 %v3612_v44, %v3611_v41 }
 0x13c   :  { %v2220_v46 = vadd.f32 %v3555_v43, %v5136_v47  ;;  %v5230_v48 = vadd.f32 %v3610_v28, %v2217_v42 }
 0x13e   :  { %v5232_v49 = vadd.f32 %v3613_v30, %v2220_v46  ;;  %v3556_v50 = vpop.f32.mrb[36].mxu0 }
 0x13f   :  { %v3557_v51 = vpop.f32.mrb[37].mxu0  ;;  %v3614_v52 = vpop.f32.mrb[36].mxu1 }
 0x140   :  { %v3558_v53 = vadd.f32 %v3557_v51, %v3556_v50  ;;  %v3559_v55 = vpop.f32.mrb[38].mxu0  ;;  %v3615_v57 = vpop.f32.mrb[37].mxu1 }
 0x141   :  { %v3560_v58 = vpop.f32.mrb[39].mxu0  ;;  %v3616_v59 = vadd.f32 %v3615_v57, %v3614_v52  ;;  %v3617_v60 = vpop.f32.mrb[38].mxu1 }
 0x142   :  { %v2225_v45 = vadd.f32 %v3558_v53, %v5149_v62  ;;  %v3561_v61 = vadd.f32 %v3560_v58, %v3559_v55  ;;  %v3618_v63 = vpop.f32.mrb[39].mxu1 }
 0x143   :  { %v3619_v1 = vadd.f32 %v3618_v63, %v3617_v60 }
 0x144   :  { %v2228_v47 = vadd.f32 %v3561_v61, %v5152_v0  ;;  %v5236_v2 = vadd.f32 %v3616_v59, %v2225_v45 }
 0x146   :  { %v5238_v3 = vadd.f32 %v3619_v1, %v2228_v47  ;;  %v3562_v4 = vpop.f32.mrb[40].mxu0 }
 0x147   :  { %v3563_v5 = vpop.f32.mrb[41].mxu0  ;;  %v3620_v6 = vpop.f32.mrb[40].mxu1 }
 0x148   :  { %v3564_v7 = vadd.f32 %v3563_v5, %v3562_v4  ;;  %v3565_v8 = vpop.f32.mrb[42].mxu0  ;;  %v3621_v10 = vpop.f32.mrb[41].mxu1 }
 0x149   :  { %v3566_v11 = vpop.f32.mrb[43].mxu0  ;;  %v3622_v12 = vadd.f32 %v3621_v10, %v3620_v6  ;;  %v3623_v13 = vpop.f32.mrb[42].mxu1 }
 0x14a   :  { %v2233_v62 = vadd.f32 %v3564_v7, %v5165_v15  ;;  %v3567_v14 = vadd.f32 %v3566_v11, %v3565_v8  ;;  %v3624_v16 = vpop.f32.mrb[43].mxu1 }
 0x14b   :  { %v3625_v18 = vadd.f32 %v3624_v16, %v3623_v13 }
 0x14c   :  { %v2236_v0 = vadd.f32 %v3567_v14, %v5168_v17  ;;  %v5242_v19 = vadd.f32 %v3622_v12, %v2233_v62 }
 0x14e   :  { %v5244_v20 = vadd.f32 %v3625_v18, %v2236_v0  ;;  %v3568_v22 = vpop.f32.mrb[44].mxu0 }
 0x14f   :  { %v3569_v23 = vpop.f32.mrb[45].mxu0  ;;  %v3626_v24 = vpop.f32.mrb[44].mxu1 }
 0x150   :  { %v3570_v25 = vadd.f32 %v3569_v23, %v3568_v22  ;;  %v3571_v26 = vpop.f32.mrb[46].mxu0  ;;  %v3627_v27 = vpop.f32.mrb[45].mxu1 }
 0x151   :  { %v3572_v21 = vpop.f32.mrb[47].mxu0  ;;  %v3628_v32 = vadd.f32 %v3627_v27, %v3626_v24  ;;  %v3629_v33 = vpop.f32.mrb[46].mxu1 }
 0x152   :  { %v2241_v15 = vadd.f32 %v3570_v25, %v5181_v35  ;;  %v3573_v34 = vadd.f32 %v3572_v21, %v3571_v26  ;;  %v3630_v36 = vpop.f32.mrb[47].mxu1 }
 0x153   :  { %v3631_v38 = vadd.f32 %v3630_v36, %v3629_v33 }
 0x154   :  { %v2244_v17 = vadd.f32 %v3573_v34, %v5184_v37  ;;  %v5248_v39 = vadd.f32 %v3628_v32, %v2241_v15 }
 0x156   :  { %v5250_v40 = vadd.f32 %v3631_v38, %v2244_v17  ;;  %v3574_v28 = vpop.f32.mrb[48].mxu0 }
 0x157   :  { %v3575_v41 = vpop.f32.mrb[49].mxu0  ;;  %v3632_v42 = vpop.f32.mrb[48].mxu1 }
 0x158   :  { %v3576_v43 = vadd.f32 %v3575_v41, %v3574_v28  ;;  %v3577_v44 = vpop.f32.mrb[50].mxu0  ;;  %v3633_v30 = vpop.f32.mrb[49].mxu1 }
 0x159   :  { %v3578_v46 = vpop.f32.mrb[51].mxu0  ;;  %v3634_v50 = vadd.f32 %v3633_v30, %v3632_v42  ;;  %v3635_v51 = vpop.f32.mrb[50].mxu1 }
 0x15a   :  { %v2249_v35 = vadd.f32 %v3576_v43, %v5197_v54  ;;  %v3579_v52 = vadd.f32 %v3578_v46, %v3577_v44  ;;  %v3636_v53 = vpop.f32.mrb[51].mxu1 }
 0x15b   :  { %v3637_v55 = vadd.f32 %v3636_v53, %v3635_v51 }
 0x15c   :  { %v2252_v37 = vadd.f32 %v3579_v52, %v5200_v56  ;;  %v5254_v57 = vadd.f32 %v3634_v50, %v2249_v35 }
 0x15e   :  { %v5256_v58 = vadd.f32 %v3637_v55, %v2252_v37  ;;  %v3580_v59 = vpop.f32.mrb[52].mxu0 }
 0x15f   :  { %v3581_v60 = vpop.f32.mrb[53].mxu0  ;;  %v3638_v45 = vpop.f32.mrb[52].mxu1 }
 0x160   :  { %v3582_v61 = vadd.f32 %v3581_v60, %v3580_v59  ;;  %v3583_v63 = vpop.f32.mrb[54].mxu0  ;;  %v3639_v1 = vpop.f32.mrb[53].mxu1 }
 0x161   :  { %v3584_v47 = vpop.f32.mrb[55].mxu0  ;;  %v3640_v4 = vadd.f32 %v3639_v1, %v3638_v45  ;;  %v3641_v5 = vpop.f32.mrb[54].mxu1 }
 0x162   :  { %v2257_v54 = vadd.f32 %v3582_v61, %v5213_v9  ;;  %v3642_v6 = vpop.f32.mrb[55].mxu1 }
 0x164   :  { %v5259_v7 = vadd.f32 %v3640_v4, %v2257_v54 }
 0x166   :  { %v3660_v8 = vpop.f32.mrb[56].mxu0 }
 0x167   :  { %v3661_v56 = vpop.f32.mrb[57].mxu0  ;;  %v3718_v10 = vpop.f32.mrb[56].mxu1 }
 0x168   :  { %v3662_v11 = vadd.f32 %v3661_v56, %v3660_v8  ;;  %v3663_v12 = vpop.f32.mrb[58].mxu0  ;;  %v3719_v13 = vpop.f32.mrb[57].mxu1 }
 0x169   :  { %v3664_v62 = vpop.f32.mrb[59].mxu0  ;;  %v3720_v14 = vadd.f32 %v3719_v13, %v3718_v10  ;;  %v3721_v16 = vpop.f32.mrb[58].mxu1 }
 0x16a   :  { %v2385_v18 = vadd.f32 %v3662_v11, %v5223_v29  ;;  %v3665_v0 = vadd.f32 %v3664_v62, %v3663_v12  ;;  %v3722_v22 = vpop.f32.mrb[59].mxu1 }
 0x16b   :  { %v3723_v23 = vadd.f32 %v3722_v22, %v3721_v16 }
 0x16c   :  { %v2388_v24 = vadd.f32 %v3665_v0, %v5226_v31  ;;  %v5263_v9 = vadd.f32 %v3720_v14, %v2385_v18 }
 0x16e   :  { %v5265_v25 = vadd.f32 %v3723_v23, %v2388_v24  ;;  %v3666_v26 = vpop.f32.mrb[60].mxu0 }
 0x16f   :  { %v3667_v27 = vpop.f32.mrb[61].mxu0  ;;  %v3724_v21 = vpop.f32.mrb[60].mxu1 }
 0x170   :  { %v3668_v32 = vadd.f32 %v3667_v27, %v3666_v26  ;;  %v3669_v33 = vpop.f32.mrb[62].mxu0  ;;  %v3725_v15 = vpop.f32.mrb[61].mxu1 }
 0x171   :  { %v3670_v34 = vpop.f32.mrb[63].mxu0  ;;  %v3726_v36 = vadd.f32 %v3725_v15, %v3724_v21  ;;  %v3727_v38 = vpop.f32.mrb[62].mxu1 }
 0x172   :  { %v2393_v29 = vadd.f32 %v3668_v32, %v5230_v48  ;;  %v3671_v17 = vadd.f32 %v3670_v34, %v3669_v33  ;;  %v3728_v28 = vpop.f32.mrb[63].mxu1 }
 0x173   :  { %v3729_v41 = vadd.f32 %v3728_v28, %v3727_v38 }
 0x174   :  { %v2396_v31 = vadd.f32 %v3671_v17, %v5232_v49  ;;  %v5269_v42 = vadd.f32 %v3726_v36, %v2393_v29 }
 0x176   :  { %v5271_v43 = vadd.f32 %v3729_v41, %v2396_v31  ;;  %v3672_v44 = vpop.f32.mrb[64].mxu0 }
 0x177   :  { %v3673_v30 = vpop.f32.mrb[65].mxu0  ;;  %v3730_v46 = vpop.f32.mrb[64].mxu1 }
 0x178   :  { %v3674_v50 = vadd.f32 %v3673_v30, %v3672_v44  ;;  %v3675_v51 = vpop.f32.mrb[66].mxu0  ;;  %v3731_v35 = vpop.f32.mrb[65].mxu1 }
 0x179   :  { %v3676_v52 = vpop.f32.mrb[67].mxu0  ;;  %v3732_v53 = vadd.f32 %v3731_v35, %v3730_v46  ;;  %v3733_v55 = vpop.f32.mrb[66].mxu1 }
 0x17a   :  { %v2401_v48 = vadd.f32 %v3674_v50, %v5236_v2  ;;  %v3677_v37 = vadd.f32 %v3676_v52, %v3675_v51  ;;  %v3734_v59 = vpop.f32.mrb[67].mxu1 }
 0x17b   :  { %v3735_v60 = vadd.f32 %v3734_v59, %v3733_v55 }
 0x17c   :  { %v2404_v49 = vadd.f32 %v3677_v37, %v5238_v3  ;;  %v5275_v45 = vadd.f32 %v3732_v53, %v2401_v48 }
 0x17e   :  { %v5277_v61 = vadd.f32 %v3735_v60, %v2404_v49  ;;  %v3678_v63 = vpop.f32.mrb[68].mxu0 }
 0x17f   :  { %v3679_v1 = vpop.f32.mrb[69].mxu0  ;;  %v3736_v47 = vpop.f32.mrb[68].mxu1 }
 0x180   :  { %v3680_v4 = vadd.f32 %v3679_v1, %v3678_v63  ;;  %v3681_v5 = vpop.f32.mrb[70].mxu0  ;;  %v3737_v54 = vpop.f32.mrb[69].mxu1 }
 0x181   :  { %v3682_v6 = vpop.f32.mrb[71].mxu0  ;;  %v3738_v8 = vadd.f32 %v3737_v54, %v3736_v47  ;;  %v3739_v56 = vpop.f32.mrb[70].mxu1 }
 0x182   :  { %v2409_v2 = vadd.f32 %v3680_v4, %v5242_v19  ;;  %v3683_v10 = vadd.f32 %v3682_v6, %v3681_v5  ;;  %v3740_v11 = vpop.f32.mrb[71].mxu1 }
 0x183   :  { %v3741_v12 = vadd.f32 %v3740_v11, %v3739_v56 }
 0x184   :  { %v2412_v3 = vadd.f32 %v3683_v10, %v5244_v20  ;;  %v5281_v13 = vadd.f32 %v3738_v8, %v2409_v2 }
 0x186   :  { %v5283_v62 = vadd.f32 %v3741_v12, %v2412_v3  ;;  %v3684_v14 = vpop.f32.mrb[72].mxu0 }
 0x187   :  { %v3685_v16 = vpop.f32.mrb[73].mxu0  ;;  %v3742_v18 = vpop.f32.mrb[72].mxu1 }
 0x188   :  { %v3686_v0 = vadd.f32 %v3685_v16, %v3684_v14  ;;  %v3687_v22 = vpop.f32.mrb[74].mxu0  ;;  %v3743_v23 = vpop.f32.mrb[73].mxu1 }
 0x189   :  { %v3688_v24 = vpop.f32.mrb[75].mxu0  ;;  %v3744_v26 = vadd.f32 %v3743_v23, %v3742_v18  ;;  %v3745_v27 = vpop.f32.mrb[74].mxu1 }
 0x18a   :  { %v2417_v19 = vadd.f32 %v3686_v0, %v5248_v39  ;;  %v3689_v21 = vadd.f32 %v3688_v24, %v3687_v22  ;;  %v3746_v32 = vpop.f32.mrb[75].mxu1 }
 0x18b   :  { %v3747_v33 = vadd.f32 %v3746_v32, %v3745_v27 }
 0x18c   :  { %v2420_v20 = vadd.f32 %v3689_v21, %v5250_v40  ;;  %v5287_v15 = vadd.f32 %v3744_v26, %v2417_v19 }
 0x18e   :  { %v5289_v34 = vadd.f32 %v3747_v33, %v2420_v20  ;;  %v3690_v36 = vpop.f32.mrb[76].mxu0 }
 0x18f   :  { %v3691_v38 = vpop.f32.mrb[77].mxu0  ;;  %v3748_v29 = vpop.f32.mrb[76].mxu1 }
 0x190   :  { %v3692_v17 = vadd.f32 %v3691_v38, %v3690_v36  ;;  %v3693_v28 = vpop.f32.mrb[78].mxu0  ;;  %v3749_v41 = vpop.f32.mrb[77].mxu1 }
 0x191   :  { %v3694_v31 = vpop.f32.mrb[79].mxu0  ;;  %v3750_v44 = vadd.f32 %v3749_v41, %v3748_v29  ;;  %v3751_v30 = vpop.f32.mrb[78].mxu1 }
 0x192   :  { %v2425_v39 = vadd.f32 %v3692_v17, %v5254_v57  ;;  %v3695_v46 = vadd.f32 %v3694_v31, %v3693_v28  ;;  %v3752_v50 = vpop.f32.mrb[79].mxu1 }
 0x193   :  { %v3753_v51 = vadd.f32 %v3752_v50, %v3751_v30 }
 0x194   :  { %v2428_v40 = vadd.f32 %v3695_v46, %v5256_v58  ;;  %v5293_v35 = vadd.f32 %v3750_v44, %v2425_v39 }
 0x196   :  { %v5295_v52 = vadd.f32 %v3753_v51, %v2428_v40  ;;  %v3696_v53 = vpop.f32.mrb[80].mxu0 }
 0x197   :  { %v3697_v55 = vpop.f32.mrb[81].mxu0  ;;  %v3754_v48 = vpop.f32.mrb[80].mxu1 }
 0x198   :  { %v3698_v37 = vadd.f32 %v3697_v55, %v3696_v53  ;;  %v3699_v59 = vpop.f32.mrb[82].mxu0  ;;  %v3755_v60 = vpop.f32.mrb[81].mxu1 }
 0x199   :  { %v3700_v49 = vpop.f32.mrb[83].mxu0  ;;  %v3756_v63 = vadd.f32 %v3755_v60, %v3754_v48  ;;  %v3757_v1 = vpop.f32.mrb[82].mxu1 }
 0x19a   :  { %v2433_v57 = vadd.f32 %v3698_v37, %v5259_v7  ;;  %v3758_v47 = vpop.f32.mrb[83].mxu1 }
 0x19c   :  { %v5298_v4 = vadd.f32 %v3756_v63, %v2433_v57 }
 0x19e   :  { %v3776_v5 = vpop.f32.mrb[84].mxu0 }
 0x19f   :  { %v3777_v58 = vpop.f32.mrb[85].mxu0  ;;  %v3834_v54 = vpop.f32.mrb[84].mxu1 }
 0x1a0   :  { %v3778_v6 = vadd.f32 %v3777_v58, %v3776_v5  ;;  %v3779_v8 = vpop.f32.mrb[86].mxu0  ;;  %v3835_v56 = vpop.f32.mrb[85].mxu1 }
 0x1a1   :  { %v3780_v2 = vpop.f32.mrb[87].mxu0  ;;  %v3836_v10 = vadd.f32 %v3835_v56, %v3834_v54  ;;  %v3837_v11 = vpop.f32.mrb[86].mxu1 }
 0x1a2   :  { %v2561_v12 = vadd.f32 %v3778_v6, %v5263_v9  ;;  %v3781_v3 = vadd.f32 %v3780_v2, %v3779_v8  ;;  %v3838_v14 = vpop.f32.mrb[87].mxu1 }
 0x1a3   :  { %v3839_v16 = vadd.f32 %v3838_v14, %v3837_v11 }
 0x1a4   :  { %v2564_v18 = vadd.f32 %v3781_v3, %v5265_v25  ;;  %v5302_v7 = vadd.f32 %v3836_v10, %v2561_v12 }
 0x1a6   :  { %v5304_v0 = vadd.f32 %v3839_v16, %v2564_v18  ;;  %v3782_v22 = vpop.f32.mrb[88].mxu0 }
 0x1a7   :  { %v3783_v23 = vpop.f32.mrb[89].mxu0  ;;  %v3840_v24 = vpop.f32.mrb[88].mxu1 }
 0x1a8   :  { %v3784_v26 = vadd.f32 %v3783_v23, %v3782_v22  ;;  %v3785_v27 = vpop.f32.mrb[90].mxu0  ;;  %v3841_v19 = vpop.f32.mrb[89].mxu1 }
 0x1a9   :  { %v3786_v21 = vpop.f32.mrb[91].mxu0  ;;  %v3842_v32 = vadd.f32 %v3841_v19, %v3840_v24  ;;  %v3843_v33 = vpop.f32.mrb[90].mxu1 }
 0x1aa   :  { %v2569_v9 = vadd.f32 %v3784_v26, %v5269_v42  ;;  %v3787_v20 = vadd.f32 %v3786_v21, %v3785_v27  ;;  %v3844_v36 = vpop.f32.mrb[91].mxu1 }
 0x1ab   :  { %v3845_v38 = vadd.f32 %v3844_v36, %v3843_v33 }
 0x1ac   :  { %v2572_v25 = vadd.f32 %v3787_v20, %v5271_v43  ;;  %v5308_v29 = vadd.f32 %v3842_v32, %v2569_v9 }
 0x1ae   :  { %v5310_v17 = vadd.f32 %v3845_v38, %v2572_v25  ;;  %v3788_v28 = vpop.f32.mrb[92].mxu0 }
 0x1af   :  { %v3789_v41 = vpop.f32.mrb[93].mxu0  ;;  %v3846_v31 = vpop.f32.mrb[92].mxu1 }
 0x1b0   :  { %v3790_v44 = vadd.f32 %v3789_v41, %v3788_v28  ;;  %v3791_v30 = vpop.f32.mrb[94].mxu0  ;;  %v3847_v39 = vpop.f32.mrb[93].mxu1 }
 0x1b1   :  { %v3792_v46 = vpop.f32.mrb[95].mxu0  ;;  %v3848_v50 = vadd.f32 %v3847_v39, %v3846_v31  ;;  %v3849_v51 = vpop.f32.mrb[94].mxu1 }
 0x1b2   :  { %v2577_v42 = vadd.f32 %v3790_v44, %v5275_v45  ;;  %v3793_v40 = vadd.f32 %v3792_v46, %v3791_v30  ;;  %v3850_v53 = vpop.f32.mrb[95].mxu1 }
 0x1b3   :  { %v3851_v55 = vadd.f32 %v3850_v53, %v3849_v51 }
 0x1b4   :  { %v2580_v43 = vadd.f32 %v3793_v40, %v5277_v61  ;;  %v5314_v48 = vadd.f32 %v3848_v50, %v2577_v42 }
 0x1b6   :  { %v5316_v37 = vadd.f32 %v3851_v55, %v2580_v43  ;;  %v3794_v59 = vpop.f32.mrb[96].mxu0 }
 0x1b7   :  { %v3795_v60 = vpop.f32.mrb[97].mxu0  ;;  %v3852_v49 = vpop.f32.mrb[96].mxu1 }
 0x1b8   :  { %v3796_v63 = vadd.f32 %v3795_v60, %v3794_v59  ;;  %v3797_v1 = vpop.f32.mrb[98].mxu0  ;;  %v3853_v57 = vpop.f32.mrb[97].mxu1 }
 0x1b9   :  { %v3798_v47 = vpop.f32.mrb[99].mxu0  ;;  %v3854_v5 = vadd.f32 %v3853_v57, %v3852_v49  ;;  %v3855_v58 = vpop.f32.mrb[98].mxu1 }
 0x1ba   :  { %v2585_v45 = vadd.f32 %v3796_v63, %v5281_v13  ;;  %v3799_v54 = vadd.f32 %v3798_v47, %v3797_v1  ;;  %v3856_v6 = vpop.f32.mrb[99].mxu1 }
 0x1bb   :  { %v3857_v8 = vadd.f32 %v3856_v6, %v3855_v58 }
 0x1bc   :  { %v2588_v61 = vadd.f32 %v3799_v54, %v5283_v62  ;;  %v5320_v56 = vadd.f32 %v3854_v5, %v2585_v45 }
 0x1be   :  { %v5322_v2 = vadd.f32 %v3857_v8, %v2588_v61  ;;  %v3800_v10 = vpop.f32.mrb[100].mxu0 }
 0x1bf   :  { %v3801_v11 = vpop.f32.mrb[101].mxu0  ;;  %v3858_v12 = vpop.f32.mrb[100].mxu1 }
 0x1c0   :  { %v3802_v3 = vadd.f32 %v3801_v11, %v3800_v10  ;;  %v3803_v14 = vpop.f32.mrb[102].mxu0  ;;  %v3859_v16 = vpop.f32.mrb[101].mxu1 }
 0x1c1   :  { %v3804_v18 = vpop.f32.mrb[103].mxu0  ;;  %v3860_v22 = vadd.f32 %v3859_v16, %v3858_v12  ;;  %v3861_v23 = vpop.f32.mrb[102].mxu1 }
 0x1c2   :  { %v2593_v13 = vadd.f32 %v3802_v3, %v5287_v15  ;;  %v3805_v24 = vadd.f32 %v3804_v18, %v3803_v14  ;;  %v3862_v26 = vpop.f32.mrb[103].mxu1 }
 0x1c3   :  { %v3863_v27 = vadd.f32 %v3862_v26, %v3861_v23 }
 0x1c4   :  { %v2596_v62 = vadd.f32 %v3805_v24, %v5289_v34  ;;  %v5326_v19 = vadd.f32 %v3860_v22, %v2593_v13 }
 0x1c6   :  { %v5328_v21 = vadd.f32 %v3863_v27, %v2596_v62  ;;  %v3806_v32 = vpop.f32.mrb[104].mxu0 }
 0x1c7   :  { %v3807_v33 = vpop.f32.mrb[105].mxu0  ;;  %v3864_v9 = vpop.f32.mrb[104].mxu1 }
 0x1c8   :  { %v3808_v20 = vadd.f32 %v3807_v33, %v3806_v32  ;;  %v3809_v36 = vpop.f32.mrb[106].mxu0  ;;  %v3865_v38 = vpop.f32.mrb[105].mxu1 }
 0x1c9   :  { %v3810_v25 = vpop.f32.mrb[107].mxu0  ;;  %v3866_v28 = vadd.f32 %v3865_v38, %v3864_v9  ;;  %v3867_v41 = vpop.f32.mrb[106].mxu1 }
 0x1ca   :  { %v2601_v15 = vadd.f32 %v3808_v20, %v5293_v35  ;;  %v3811_v31 = vadd.f32 %v3810_v25, %v3809_v36  ;;  %v3868_v44 = vpop.f32.mrb[107].mxu1 }
 0x1cb   :  { %v3869_v30 = vadd.f32 %v3868_v44, %v3867_v41 }
 0x1cc   :  { %v2604_v34 = vadd.f32 %v3811_v31, %v5295_v52  ;;  %v5332_v39 = vadd.f32 %v3866_v28, %v2601_v15 }
 0x1ce   :  { %v5334_v46 = vadd.f32 %v3869_v30, %v2604_v34  ;;  %v3812_v50 = vpop.f32.mrb[108].mxu0 }
 0x1cf   :  { %v3813_v51 = vpop.f32.mrb[109].mxu0  ;;  %v3870_v42 = vpop.f32.mrb[108].mxu1 }
 0x1d0   :  { %v3814_v40 = vadd.f32 %v3813_v51, %v3812_v50  ;;  %v3815_v53 = vpop.f32.mrb[110].mxu0  ;;  %v3871_v55 = vpop.f32.mrb[109].mxu1 }
 0x1d1   :  { %v3816_v43 = vpop.f32.mrb[111].mxu0  ;;  %v3872_v59 = vadd.f32 %v3871_v55, %v3870_v42  ;;  %v3873_v60 = vpop.f32.mrb[110].mxu1 }
 0x1d2   :  { %v2609_v35 = vadd.f32 %v3814_v40, %v5298_v4  ;;  %v3874_v49 = vpop.f32.mrb[111].mxu1 }
 0x1d4   :  { %v5337_v63 = vadd.f32 %v3872_v59, %v2609_v35 }
 0x1d6   :  { %v3892_v1 = vpop.f32.mrb[112].mxu0 }
 0x1d7   :  { %v3893_v52 = vpop.f32.mrb[113].mxu0  ;;  %v2824_v57 = vpop.f32.mrb[112].mxu1 }
 0x1d8   :  { %v3894_v47 = vadd.f32 %v3893_v52, %v3892_v1  ;;  %v3895_v5 = vpop.f32.mrb[114].mxu0  ;;  %v3958_v58 = vpop.f32.mrb[113].mxu1 }
 0x1d9   :  { %v3896_v45 = vpop.f32.mrb[115].mxu0  ;;  %v2827_v54 = vpop.f32.mrb[114].mxu1 }
 0x1da   :  { %v3897_v6 = vadd.f32 %v3896_v45, %v3895_v5  ;;  %v2737_v8 = vadd.f32 %v3894_v47, %v5302_v7  ;;  %v3959_v61 = vpop.f32.mrb[115].mxu1 }
 0x1dc   :  { %v5340_v10 = vadd.f32 %v2824_v57, %v2737_v8  ;;  %v2740_v11 = vadd.f32 %v3897_v6, %v5304_v0 }
 0x1de   :  { %v5343_v4 = vadd.f32 %v2827_v54, %v2740_v11  ;;  %v3898_v12 = vpop.f32.mrb[116].mxu0  ;;  %v2899_v16 = vmul.f32 %v5340_v10, %v5340_v10 }
 0x1df   :  { %v3899_v3 = vpop.f32.mrb[117].mxu0  ;;  %v2832_v14 = vpop.f32.mrb[116].mxu1 }
 0x1e0   :  { %v2878_v18 = vadd.f32 %v5343_v4, %v5340_v10  ;;  %v2900_v22 = vmul.f32 %v5343_v4, %v5343_v4  ;;  %v3900_v7 = vadd.f32 %v3899_v3, %v3898_v12  ;;  %v3901_v23 = vpop.f32.mrb[118].mxu0  ;;  %v3962_v13 = vpop.f32.mrb[117].mxu1 }
 0x1e1   :  { %v3902_v24 = vpop.f32.mrb[119].mxu0  ;;  %v2835_v26 = vpop.f32.mrb[118].mxu1 }
 0x1e2   :  { %v2912_v0 = vadd.f32 %v2900_v22, %v2899_v16  ;;  %v3903_v27 = vadd.f32 %v3902_v24, %v3901_v23  ;;  %v2745_v62 = vadd.f32 %v3900_v7, %v5308_v29  ;;  %v3963_v32 = vpop.f32.mrb[119].mxu1 }
 0x1e4   :  { %v5352_v33 = vadd.f32 %v2832_v14, %v2745_v62  ;;  %v2748_v9 = vadd.f32 %v3903_v27, %v5310_v17 }
 0x1e6   :  { %v2879_v20 = vadd.f32 %v2878_v18, %v5352_v33  ;;  %v2901_v36 = vmul.f32 %v5352_v33, %v5352_v33  ;;  %v5358_v38 = vadd.f32 %v2835_v26, %v2748_v9  ;;  %v3904_v25 = vpop.f32.mrb[120].mxu0 }
 0x1e7   :  { %v3905_v28 = vpop.f32.mrb[121].mxu0  ;;  %v2840_v41 = vpop.f32.mrb[120].mxu1 }
 0x1e8   :  { %v2913_v15 = vadd.f32 %v2912_v0, %v2901_v36  ;;  %v2880_v31 = vadd.f32 %v2879_v20, %v5358_v38  ;;  %v2902_v29 = vmul.f32 %v5358_v38, %v5358_v38  ;;  %v3906_v44 = vadd.f32 %v3905_v28, %v3904_v25  ;;  %v3907_v30 = vpop.f32.mrb[122].mxu0  ;;  %v3966_v34 = vpop.f32.mrb[121].mxu1 }
 0x1e9   :  { %v3908_v17 = vpop.f32.mrb[123].mxu0  ;;  %v2843_v50 = vpop.f32.mrb[122].mxu1 }
 0x1ea   :  { %v2914_v51 = vadd.f32 %v2913_v15, %v2902_v29  ;;  %v3909_v42 = vadd.f32 %v3908_v17, %v3907_v30  ;;  %v2753_v40 = vadd.f32 %v3906_v44, %v5314_v48  ;;  %v3967_v53 = vpop.f32.mrb[123].mxu1 }
 0x1ec   :  { %v5364_v55 = vadd.f32 %v2840_v41, %v2753_v40  ;;  %v2756_v43 = vadd.f32 %v3909_v42, %v5316_v37 }
 0x1ee   :  { %v2881_v59 = vadd.f32 %v2880_v31, %v5364_v55  ;;  %v2903_v60 = vmul.f32 %v5364_v55, %v5364_v55  ;;  %v5370_v35 = vadd.f32 %v2843_v50, %v2756_v43  ;;  %v3910_v49 = vpop.f32.mrb[124].mxu0 }
 0x1ef   :  { %v3911_v1 = vpop.f32.mrb[125].mxu0  ;;  %v2848_v52 = vpop.f32.mrb[124].mxu1 }
 0x1f0   :  { %v2915_v57 = vadd.f32 %v2914_v51, %v2903_v60  ;;  %v2882_v47 = vadd.f32 %v2881_v59, %v5370_v35  ;;  %v2904_v48 = vmul.f32 %v5370_v35, %v5370_v35  ;;  %v3912_v5 = vadd.f32 %v3911_v1, %v3910_v49  ;;  %v3913_v58 = vpop.f32.mrb[126].mxu0  ;;  %v3970_v45 = vpop.f32.mrb[125].mxu1 }
 0x1f1   :  { %v3914_v37 = vpop.f32.mrb[127].mxu0  ;;  %v2851_v54 = vpop.f32.mrb[126].mxu1 }
 0x1f2   :  { %v2916_v6 = vadd.f32 %v2915_v57, %v2904_v48  ;;  %v3915_v8 = vadd.f32 %v3914_v37, %v3913_v58  ;;  %v2761_v61 = vadd.f32 %v3912_v5, %v5320_v56  ;;  %v3971_v11 = vpop.f32.mrb[127].mxu1 }
 0x1f4   :  { %v5376_v12 = vadd.f32 %v2848_v52, %v2761_v61  ;;  %v2764_v3 = vadd.f32 %v3915_v8, %v5322_v2 }
 0x1f6   :  { %v2883_v14 = vadd.f32 %v2882_v47, %v5376_v12  ;;  %v2905_v16 = vmul.f32 %v5376_v12, %v5376_v12  ;;  %v5382_v18 = vadd.f32 %v2851_v54, %v2764_v3  ;;  %v3916_v22 = vpop.f32.mrb[128].mxu0 }
 0x1f7   :  { %v3917_v7 = vpop.f32.mrb[129].mxu0  ;;  %v2856_v23 = vpop.f32.mrb[128].mxu1 }
 0x1f8   :  { %v2917_v13 = vadd.f32 %v2916_v6, %v2905_v16  ;;  %v2884_v24 = vadd.f32 %v2883_v14, %v5382_v18  ;;  %v2906_v56 = vmul.f32 %v5382_v18, %v5382_v18  ;;  %v3918_v26 = vadd.f32 %v3917_v7, %v3916_v22  ;;  %v3919_v0 = vpop.f32.mrb[130].mxu0  ;;  %v3974_v27 = vpop.f32.mrb[129].mxu1 }
 0x1f9   :  { %v3920_v2 = vpop.f32.mrb[131].mxu0  ;;  %v2859_v62 = vpop.f32.mrb[130].mxu1 }
 0x1fa   :  { %v2918_v32 = vadd.f32 %v2917_v13, %v2906_v56  ;;  %v3921_v9 = vadd.f32 %v3920_v2, %v3919_v0  ;;  %v2769_v20 = vadd.f32 %v3918_v26, %v5326_v19  ;;  %v3975_v36 = vpop.f32.mrb[131].mxu1 }
 0x1fc   :  { %v5388_v25 = vadd.f32 %v2856_v23, %v2769_v20  ;;  %v2772_v28 = vadd.f32 %v3921_v9, %v5328_v21 }
 0x1fe   :  { %v2885_v41 = vadd.f32 %v2884_v24, %v5388_v25  ;;  %v2907_v15 = vmul.f32 %v5388_v25, %v5388_v25  ;;  %v5394_v31 = vadd.f32 %v2859_v62, %v2772_v28  ;;  %v3922_v29 = vpop.f32.mrb[132].mxu0 }
 0x1ff   :  { %v3923_v44 = vpop.f32.mrb[133].mxu0  ;;  %v2864_v30 = vpop.f32.mrb[132].mxu1 }
 0x200   :  { %v2919_v34 = vadd.f32 %v2918_v32, %v2907_v15  ;;  %v2886_v17 = vadd.f32 %v2885_v41, %v5394_v31  ;;  %v2908_v19 = vmul.f32 %v5394_v31, %v5394_v31  ;;  %v3924_v50 = vadd.f32 %v3923_v44, %v3922_v29  ;;  %v3925_v51 = vpop.f32.mrb[134].mxu0  ;;  %v3978_v42 = vpop.f32.mrb[133].mxu1 }
 0x201   :  { %v3926_v21 = vpop.f32.mrb[135].mxu0  ;;  %v2867_v40 = vpop.f32.mrb[134].mxu1 }
 0x202   :  { %v2920_v53 = vadd.f32 %v2919_v34, %v2908_v19  ;;  %v3927_v43 = vadd.f32 %v3926_v21, %v3925_v51  ;;  %v2777_v59 = vadd.f32 %v3924_v50, %v5332_v39  ;;  %v3979_v60 = vpop.f32.mrb[135].mxu1  ;;  %v2942_v34 = vlaneseq  ;;  %v2934_v19 = vld [vmem:[%s5453_s2] sm:$0x1] }
 0x203   :  { %v2938_v21 = vld [vmem:[%s5454_s3] sm:$0x1] }
 0x204   :  { %v5400_v49 = vadd.f32 %v2864_v30, %v2777_v59  ;;  %v2780_v1 = vadd.f32 %v3927_v43, %v5334_v46 }
 0x206   :  { %v2887_v52 = vadd.f32 %v2886_v17, %v5400_v49  ;;  %v2909_v57 = vmul.f32 %v5400_v49, %v5400_v49  ;;  %v5406_v47 = vadd.f32 %v2867_v40, %v2780_v1  ;;  %v3928_v48 = vpop.f32.mrb[136].mxu0  ;;  %v2943_v17 = vshrl.u32 %v2942_v34, 7 }
 0x207   :  { %v3929_v5 = vpop.f32.mrb[137].mxu0  ;;  %v2872_v58 = vpop.f32.mrb[136].mxu1 }
 0x208   :  { %v2921_v45 = vadd.f32 %v2920_v53, %v2909_v57  ;;  %v2888_v37 = vadd.f32 %v2887_v52, %v5406_v47  ;;  %v2910_v39 = vmul.f32 %v5406_v47, %v5406_v47  ;;  %v3930_v54 = vadd.f32 %v3929_v5, %v3928_v48  ;;  %v3931_v6 = vpop.f32.mrb[138].mxu0  ;;  %v3982_v8 = vpop.f32.mrb[137].mxu1 }
 0x209   :  { %v3932_v46 = vpop.f32.mrb[139].mxu0  ;;  %v2875_v61 = vpop.f32.mrb[138].mxu1  ;;  %v2944_v50 = vsub.s32 0, %v2943_v17 }
 0x20a   :  { %v2922_v11 = vadd.f32 %v2921_v45, %v2910_v39  ;;  %v2785_v3 = vadd.f32 %v3930_v54, %v5337_v63  ;;  %v3983_v14 = vpop.f32.mrb[139].mxu1 }
 0x20c   :  { %v2873_v16 = vadd.f32 %v2872_v58, %v2785_v3 }
 0x20e   :  { %v2890_v22 = vsel %vm2889_vm3, %v2873_v16, 0.0  ;;  %v2911_v7 = vmul.f32 %v2873_v16, %v2873_v16 }
 0x20f   :  { %v2891_v23 = vadd.f32 %v2890_v22, %v2888_v37 }
 0x210   :  { %v2923_v13 = vsel %vm2889_vm3, %v2911_v7, 0.0 }
 0x211   :  { %v2892_v24 = vrot.slane %v2891_v23, 4  ;;  %v2924_v56 = vadd.f32 %v2923_v13, %v2922_v11 }
 0x213   :  { %v2893_v26 = vadd.f32 %v2892_v24, %v2891_v23  ;;  %v2925_v0 = vrot.slane %v2924_v56, 4 }
 0x215   :  { %v2894_v27 = vrot.slane %v2893_v26, 2  ;;  %v2926_v2 = vadd.f32 %v2925_v0, %v2924_v56 }
 0x217   :  { %v2895_v62 = vadd.f32 %v2894_v27, %v2893_v26  ;;  %v2927_v32 = vrot.slane %v2926_v2, 2 }
 0x219   :  { %v2896_v9 = vrot.slane %v2895_v62, 1  ;;  %v2928_v20 = vadd.f32 %v2927_v32, %v2926_v2 }
 0x21b   :  { %v2897_v36 = vadd.f32 %v2896_v9, %v2895_v62  ;;  %v2929_v28 = vrot.slane %v2928_v20, 1 }
 0x21d   :  { %v2898_v63 = vmul.f32 0.010204081, %v2897_v36  ;;  %v2930_v41 = vadd.f32 %v2929_v28, %v2928_v20 }
 0x21f   :  { %v2931_v15 = vmul.f32 0.010204081, %v2930_v41  ;;  %v2932_v29 = vmul.f32 %v2898_v63, %v2898_v63 }
 0x221   :  { %v2933_v44 = vsub.f32 %v2931_v15, %v2932_v29 }
 0x223   :  { %v2935_v30 = vadd.f32 1e-05, %v2933_v44 }
 0x225   :  { %4322 = vrsqrt.f32 %v2935_v30 }
 0x22f   :  { %v4323_v51 = vpop.eup %4322 }
 0x230   :  { %v2937_v42 = vmul.f32 %v4323_v51, %v2934_v19 }
 0x232   :  { %v2939_v40 = vmul.f32 %v2937_v42, %v2898_v63  ;;  %v2945_v53 = vrot.slane %v2937_v42, %v2944_v50 }
 0x234   :  { %v2940_v43 = vsub.f32 %v2938_v21, %v2939_v40  ;;  %v2947_v59 = vmul.f32 %v2945_v53, %v5340_v10  ;;  %v2948_v60 = vmul.f32 %v2945_v53, %v5343_v4  ;;  %v2949_v1 = vmul.f32 %v2945_v53, %v5352_v33 }
 0x235   :  { %v2950_v52 = vmul.f32 %v2945_v53, %v5358_v38  ;;  %v2951_v57 = vmul.f32 %v2945_v53, %v5364_v55  ;;  %v2952_v48 = vmul.f32 %v2945_v53, %v5370_v35  ;;  %v2953_v5 = vmul.f32 %v2945_v53, %v5376_v12 }
 0x236   :  { %v2954_v58 = vmul.f32 %v2945_v53, %v5382_v18  ;;  %v2955_v45 = vmul.f32 %v2945_v53, %v5388_v25  ;;  %v2956_v37 = vmul.f32 %v2945_v53, %v5394_v31  ;;  %v2957_v10 = vmul.f32 %v2945_v53, %v5400_v49 }
 0x237   :  { %v2958_v4 = vmul.f32 %v2945_v53, %v5406_v47  ;;  %v2959_v39 = vmul.f32 %v2945_v53, %v2873_v16  ;;  %v2964_v33 = vrot.slane %v2940_v43, %v2944_v50 }
 0x239   :  { %v2966_v54 = vadd.f32 %v2964_v33, %v2947_v59  ;;  %v2967_v38 = vadd.f32 %v2964_v33, %v2948_v60  ;;  %v2968_v6 = vadd.f32 %v2964_v33, %v2949_v1  ;;  %v2969_v55 = vadd.f32 %v2964_v33, %v2950_v52 }
 0x23a   :  { %v2970_v8 = vadd.f32 %v2964_v33, %v2951_v57  ;;  %v2971_v35 = vadd.f32 %v2964_v33, %v2952_v48  ;;  %v2972_v46 = vadd.f32 %v2964_v33, %v2953_v5  ;;  %v2973_v12 = vadd.f32 %v2964_v33, %v2954_v58 }
 0x23b   :  { %v2974_v61 = vadd.f32 %v2964_v33, %v2955_v45  ;;  %v2975_v18 = vadd.f32 %v2964_v33, %v2956_v37  ;;  %v2976_v11 = vadd.f32 %v2964_v33, %v2957_v10  ;;  %v2977_v25 = vadd.f32 %v2964_v33, %v2958_v4 }
 0x23c   :  { %v2978_v3 = vadd.f32 %v2964_v33, %v2959_v39  ;;  %v2979_v31 = vmax.f32 %v2966_v54, 0.0  ;;  %v2980_v14 = vmax.f32 %v2967_v38, 0.0  ;;  %v2981_v49 = vmax.f32 %v2968_v6, 0.0 }
 0x23d   :  { %v2982_v22 = vmax.f32 %v2969_v55, 0.0  ;;  %v2983_v47 = vmax.f32 %v2970_v8, 0.0  ;;  %v2984_v16 = vmax.f32 %v2971_v35, 0.0  ;;  %v2985_v7 = vmax.f32 %v2972_v46, 0.0 }
 0x23e   :  { %v2986_v23 = vmax.f32 %v2973_v12, 0.0  ;;  %v2987_v13 = vmax.f32 %v2974_v61, 0.0  ;;  %v2988_v24 = vmax.f32 %v2975_v18, 0.0  ;;  %v2989_v56 = vmax.f32 %v2976_v11, 0.0 }
 0x23f   :  { %v2990_v26 = vmax.f32 %v2977_v25, 0.0  ;;  %v2991_v0 = vmax.f32 %v2978_v3, 0.0  ;;  %v3380_v27 = vpack.c.bf16 %v2980_v14, %v2979_v31  ;;  %v3385_v2 = vpack.c.bf16 %v2982_v22, %v2981_v49 }
 0x240   :  { %v3390_v62 = vpack.c.bf16 %v2984_v16, %v2983_v47  ;;  %v3395_v32 = vpack.c.bf16 %v2986_v23, %v2985_v7  ;;  %v3400_v9 = vpack.c.bf16 %v2988_v24, %v2987_v13 }
 0x241   :  { %v3376_v20 = vpack.c.bf16 %v2991_v0, %v2991_v0  ;;  %3381 = vst [vmem:[%s5455_s4] sm:$0xff] %v3380_v27   ;;  %3407 = vst [vmem:[%s5455_s4 + $0x8] sm:$0xff] %v3385_v2   ;;  %v3405_v36 = vpack.c.bf16 %v2990_v26, %v2989_v56 }
 0x242   :  { %3408 = vst [vmem:[%s5455_s4 + $0x10] sm:$0xff] %v3390_v62   ;;  %3409 = vst [vmem:[%s5455_s4 + $0x18] sm:$0xff] %v3395_v32  }
 0x243   :  { %3410 = vst [vmem:[%s5455_s4 + $0x20] sm:$0xff] %v3400_v9   ;;  %3411 = vst [vmem:[%s5455_s4 + $0x28] sm:$0xff] %v3405_v36  }
 0x244   :  { %3057 = vst [vmem:[%s5455_s4 + $0x30] sm:$0x1] %v3376_v20 }

// kernel: cgan_generator_forward.6
= control target key start
LH: loop header
LB: loop body
LE: loop exit
PB: predicated region body
PF: predicated region fallthrough
CT: control target
= control target key end

     0   :  { %vm1774_vm0 = vcmask 1041408   ;;  %s4394_s1 = inlined_call_operand.vmem [shape: bf16[1152,256], index: 1, kind: input, shape index: {}]   ;;  %s4395_s0 = inlined_call_operand.vmem [shape: bf16[98,1152], index: 0, kind: input, shape index: {}]   ;;  %s4396_s2 = inlined_call_operand.vmem [shape: f32[256,256], index: 2, kind: input, shape index: {}]   ;;  %s4397_s3 = inlined_call_operand.vmem [shape: f32[1,256], index: 3, kind: input, shape index: {}]   ;;  %s4398_s4 = inlined_call_operand.vmem [shape: f32[1,256], index: 4, kind: input, shape index: {}]   ;;  %s4399_s5 = inlined_call_operand.vmem [shape: bf16[98,256], index: 5, kind: output, shape index: {}]  }
   0x1   :  { %v2794_v0 = vld [vmem:[%s4394_s1 + $0x104] ss:$8 sps:$4 sm:$0xff]   ;;  %v2796_v1 = vld [vmem:[%s4394_s1 + $0x100] ss:$8 sps:$4 sm:$0xff]   ;;  %v2797_v2 = vld [vmem:[%s4394_s1 + $0x114] ss:$8 sps:$4 sm:$0xff]  }
   0x2   :  { %1359 = vmatprep.subr.bf16.mxu0 %v2794_v0  ;;  %v2799_v3 = vld [vmem:[%s4394_s1 + $0x110] ss:$8 sps:$4 sm:$0xff]   ;;  %v2800_v4 = vld [vmem:[%s4394_s1 + $0x124] ss:$8 sps:$4 sm:$0xff]   ;;  %v2802_v5 = vld [vmem:[%s4394_s1 + $0x120] ss:$8 sps:$4 sm:$0xff]  }
   0x3   :  { %1360 = vmatpush1.bf16.msra.mxu0 %v2796_v1  ;;  %v2803_v6 = vld [vmem:[%s4394_s1 + $0x134] ss:$8 sps:$4 sm:$0xff]   ;;  %v2805_v7 = vld [vmem:[%s4394_s1 + $0x130] ss:$8 sps:$4 sm:$0xff]   ;;  %v2806_v8 = vld [vmem:[%s4394_s1 + $0x144] ss:$8 sps:$4 sm:$0xff]  }
   0x4   :  { %1361 = vmatprep.subr.bf16.mxu0 %v2797_v2  ;;  %v2808_v9 = vld [vmem:[%s4394_s1 + $0x140] ss:$8 sps:$4 sm:$0xff]   ;;  %v2809_v10 = vld [vmem:[%s4394_s1 + $0x154] ss:$8 sps:$4 sm:$0xff]   ;;  %v2811_v11 = vld [vmem:[%s4394_s1 + $0x150] ss:$8 sps:$4 sm:$0xff]  }
   0x5   :  { %v2812_v12 = vld [vmem:[%s4394_s1 + $0x164] ss:$8 sps:$4 sm:$0xff]   ;;  %v2814_v14 = vld [vmem:[%s4394_s1 + $0x160] ss:$8 sps:$4 sm:$0xff]   ;;  %v2815_v15 = vld [vmem:[%s4394_s1 + $0x174] ss:$8 sps:$4 sm:$0xff]  }
   0x6   :  { %v2844_v13 = vld [vmem:[%s4395_s0 + $0xc] ss:$36 sps:$4 sm:$0xff]   ;;  %v2853_v17 = vld [vmem:[%s4394_s1] ss:$8 sps:$4 sm:$0xff]   ;;  %v2857_v20 = vld [vmem:[%s4394_s1 + $0x14] ss:$8 sps:$4 sm:$0xff]  }
   0x7   :  { %1362 = vmatpush1.bf16.msra.mxu0 %v2799_v3  ;;  %1391 = vmatprep.mubr.bf16.mxu0 %v2844_v13  ;;  %v2851_v16 = vld [vmem:[%s4394_s1 + $0x4] ss:$8 sps:$4 sm:$0xff]   ;;  %v2817_v18 = vld [vmem:[%s4394_s1 + $0x170] ss:$8 sps:$4 sm:$0xff]   ;;  %v2820_v22 = vld [vmem:[%s4394_s1 + $0x180] ss:$8 sps:$4 sm:$0xff]  }
   0x8   :  { %1363 = vmatprep.subr.bf16.mxu0 %v2800_v4  ;;  %v2818_v19 = vld [vmem:[%s4394_s1 + $0x184] ss:$8 sps:$4 sm:$0xff]   ;;  %1258 = vmatprep.subr.bf16.mxu1 %v2851_v16  ;;  %v2859_v21 = vld [vmem:[%s4394_s1 + $0x10] ss:$8 sps:$4 sm:$0xff]   ;;  %v2821_v24 = vld [vmem:[%s4394_s1 + $0x194] ss:$8 sps:$4 sm:$0xff]  }
   0x9   :  { %1259 = vmatpush1.bf16.msra.mxu1 %v2853_v17  ;;  %v2863_v23 = vld [vmem:[%s4394_s1 + $0x24] ss:$8 sps:$4 sm:$0xff]   ;;  %v2865_v25 = vld [vmem:[%s4394_s1 + $0x20] ss:$8 sps:$4 sm:$0xff]   ;;  %v2823_v26 = vld [vmem:[%s4394_s1 + $0x190] ss:$8 sps:$4 sm:$0xff]  }
   0xa   :  { %1260 = vmatprep.subr.bf16.mxu1 %v2857_v20  ;;  %v2872_v27 = vld [vmem:[%s4394_s1 + $0x34] ss:$8 sps:$4 sm:$0xff]   ;;  %v2824_v28 = vld [vmem:[%s4394_s1 + $0x1a4] ss:$8 sps:$4 sm:$0xff]   ;;  %v2874_v29 = vld [vmem:[%s4394_s1 + $0x30] ss:$8 sps:$4 sm:$0xff]  }
   0xb   :  { %1364 = vmatpush1.bf16.msra.mxu0 %v2802_v5  ;;  %v2878_v30 = vld [vmem:[%s4394_s1 + $0x44] ss:$8 sps:$4 sm:$0xff]   ;;  %v2826_v31 = vld [vmem:[%s4394_s1 + $0x1a0] ss:$8 sps:$4 sm:$0xff]   ;;  %v2827_v32 = vld [vmem:[%s4394_s1 + $0x1b4] ss:$8 sps:$4 sm:$0xff]  }
   0xc   :  { %1365 = vmatprep.subr.bf16.mxu0 %v2803_v6  ;;  %v2880_v33 = vld [vmem:[%s4394_s1 + $0x40] ss:$8 sps:$4 sm:$0xff]   ;;  %v2887_v34 = vld [vmem:[%s4394_s1 + $0x54] ss:$8 sps:$4 sm:$0xff]   ;;  %v2829_v35 = vld [vmem:[%s4394_s1 + $0x1b0] ss:$8 sps:$4 sm:$0xff]  }
   0xd   :  { %1261 = vmatpush1.bf16.msra.mxu1 %v2859_v21  ;;  %v2830_v36 = vld [vmem:[%s4394_s1 + $0x1c4] ss:$8 sps:$4 sm:$0xff]   ;;  %v2889_v37 = vld [vmem:[%s4394_s1 + $0x50] ss:$8 sps:$4 sm:$0xff]   ;;  %v2832_v39 = vld [vmem:[%s4394_s1 + $0x1c0] ss:$8 sps:$4 sm:$0xff]  }
   0xe   :  { %1262 = vmatprep.subr.bf16.mxu1 %v2863_v23  ;;  %v2893_v38 = vld [vmem:[%s4394_s1 + $0x64] ss:$8 sps:$4 sm:$0xff]   ;;  %v2833_v40 = vld [vmem:[%s4394_s1 + $0x1d4] ss:$8 sps:$4 sm:$0xff]   ;;  %v2895_v41 = vld [vmem:[%s4394_s1 + $0x60] ss:$8 sps:$4 sm:$0xff]  }
   0xf   :  { %1366 = vmatpush1.bf16.msra.mxu0 %v2805_v7  ;;  %v2902_v42 = vld [vmem:[%s4394_s1 + $0x74] ss:$8 sps:$4 sm:$0xff]   ;;  %v2835_v43 = vld [vmem:[%s4394_s1 + $0x1d0] ss:$8 sps:$4 sm:$0xff]   ;;  %v2836_v44 = vld [vmem:[%s4394_s1 + $0x1e4] ss:$8 sps:$4 sm:$0xff]  }
  0x10   :  { %1367 = vmatprep.subr.bf16.mxu0 %v2806_v8  ;;  %v2904_v45 = vld [vmem:[%s4394_s1 + $0x70] ss:$8 sps:$4 sm:$0xff]   ;;  %v2908_v46 = vld [vmem:[%s4394_s1 + $0x84] ss:$8 sps:$4 sm:$0xff]   ;;  %v2838_v47 = vld [vmem:[%s4394_s1 + $0x1e0] ss:$8 sps:$4 sm:$0xff]  }
  0x11   :  { %1263 = vmatpush1.bf16.msra.mxu1 %v2865_v25  ;;  %v2839_v48 = vld [vmem:[%s4394_s1 + $0x1f4] ss:$8 sps:$4 sm:$0xff]   ;;  %v2910_v49 = vld [vmem:[%s4394_s1 + $0x80] ss:$8 sps:$4 sm:$0xff]   ;;  %v2841_v51 = vld [vmem:[%s4394_s1 + $0x1f0] ss:$8 sps:$4 sm:$0xff]  }
  0x12   :  { %1264 = vmatprep.subr.bf16.mxu1 %v2872_v27  ;;  %v2917_v50 = vld [vmem:[%s4394_s1 + $0x94] ss:$8 sps:$4 sm:$0xff]   ;;  %v2847_v52 = vld [vmem:[%s4394_s1 + $0x204] ss:$8 sps:$4 sm:$0xff]   ;;  %v2919_v53 = vld [vmem:[%s4394_s1 + $0x90] ss:$8 sps:$4 sm:$0xff]  }
  0x13   :  { %1368 = vmatpush1.bf16.msra.mxu0 %v2808_v9  ;;  %v2842_v54 = vld [vmem:[%s4395_s0 + $0x8] ss:$36 sps:$4 sm:$0xff]   ;;  %v2866_v57 = vld [vmem:[%s4395_s0 + $0x54] ss:$36 sps:$4 sm:$0xff]   ;;  %v2881_v3 = vld [vmem:[%s4395_s0 + $0x9c] ss:$36 sps:$4 sm:$0xff]  }
  0x14   :  { %1369 = vmatprep.subr.bf16.mxu0 %v2809_v10  ;;  %v2923_v55 = vld [vmem:[%s4394_s1 + $0xa4] ss:$8 sps:$4 sm:$0xff]   ;;  %v2845_v56 = vld [vmem:[%s4394_s1 + $0x200] ss:$8 sps:$4 sm:$0xff]   ;;  %v2850_v58 = vld [vmem:[%s4394_s1 + $0x214] ss:$8 sps:$4 sm:$0xff]  }
  0x15   :  { %1265 = vmatpush1.bf16.msra.mxu1 %v2874_v29  ;;  %v2925_v59 = vld [vmem:[%s4394_s1 + $0xa0] ss:$8 sps:$4 sm:$0xff]   ;;  %v2932_v60 = vld [vmem:[%s4394_s1 + $0xb4] ss:$8 sps:$4 sm:$0xff]   ;;  %v2848_v61 = vld [vmem:[%s4394_s1 + $0x210] ss:$8 sps:$4 sm:$0xff]  }
  0x16   :  { %1266 = vmatprep.subr.bf16.mxu1 %v2878_v30  ;;  %v2856_v62 = vld [vmem:[%s4394_s1 + $0x224] ss:$8 sps:$4 sm:$0xff]   ;;  %v2854_v63 = vld [vmem:[%s4394_s1 + $0x220] ss:$8 sps:$4 sm:$0xff]   ;;  %v2934_v0 = vld [vmem:[%s4394_s1 + $0xb0] ss:$8 sps:$4 sm:$0xff]  }
  0x17   :  { %1370 = vmatpush1.bf16.msra.mxu0 %v2811_v11  ;;  %v2871_v1 = vld [vmem:[%s4395_s0 + $0x50] ss:$36 sps:$4 sm:$0xff]   ;;  %v2938_v2 = vld [vmem:[%s4394_s1 + $0xc4] ss:$8 sps:$4 sm:$0xff]   ;;  %v2940_v5 = vld [vmem:[%s4394_s1 + $0xc0] ss:$8 sps:$4 sm:$0xff]  }
  0x18   :  { %1371 = vmatprep.subr.bf16.mxu0 %v2812_v12  ;;  %v2862_v4 = vld [vmem:[%s4394_s1 + $0x234] ss:$8 sps:$4 sm:$0xff]   ;;  %v2860_v7 = vld [vmem:[%s4394_s1 + $0x230] ss:$8 sps:$4 sm:$0xff]   ;;  %v2870_v8 = vld [vmem:[%s4394_s1 + $0x244] ss:$8 sps:$4 sm:$0xff]  }
  0x19   :  { %1267 = vmatpush1.bf16.msra.mxu1 %v2880_v33  ;;  %v2946_v6 = vld [vmem:[%s4394_s1 + $0xd4] ss:$8 sps:$4 sm:$0xff]   ;;  %v2868_v9 = vld [vmem:[%s4394_s1 + $0x240] ss:$8 sps:$4 sm:$0xff]   ;;  %v2948_v10 = vld [vmem:[%s4394_s1 + $0xd0] ss:$8 sps:$4 sm:$0xff]  }
  0x1a   :  { %1268 = vmatprep.subr.bf16.mxu1 %v2887_v34  ;;  %v2969_v11 = vld [vmem:[%s4395_s0 + $0x4] ss:$36 sps:$4 sm:$0xff]   ;;  %v2886_v12 = vld [vmem:[%s4395_s0 + $0x98] ss:$36 sps:$4 sm:$0xff]   ;;  %v2911_v25 = vld [vmem:[%s4395_s0 + $0x12c] ss:$36 sps:$4 sm:$0xff]  }
  0x1b   :  { %1372 = vmatpush1.bf16.msra.mxu0 %v2814_v14  ;;  %v2952_v13 = vld [vmem:[%s4394_s1 + $0xe4] ss:$8 sps:$4 sm:$0xff]   ;;  %1290 = vmatprep.mubr.bf16.mxu1 %v2969_v11  ;;  %v2954_v16 = vld [vmem:[%s4394_s1 + $0xe0] ss:$8 sps:$4 sm:$0xff]   ;;  %v2961_v17 = vld [vmem:[%s4394_s1 + $0xf4] ss:$8 sps:$4 sm:$0xff]  }
  0x1c   :  { %1373 = vmatprep.subr.bf16.mxu0 %v2815_v15  ;;  %v2896_v14 = vld [vmem:[%s4395_s0 + $0xe4] ss:$36 sps:$4 sm:$0xff]   ;;  %v2877_v15 = vld [vmem:[%s4394_s1 + $0x254] ss:$8 sps:$4 sm:$0xff]   ;;  %v2963_v21 = vld [vmem:[%s4394_s1 + $0xf0] ss:$8 sps:$4 sm:$0xff]  }
  0x1d   :  { %1269 = vmatpush1.bf16.msra.mxu1 %v2889_v37  ;;  %v2883_v20 = vld [vmem:[%s4394_s1 + $0x260] ss:$8 sps:$4 sm:$0xff]   ;;  %v2990_v29 = vld [vmem:[%s4394_s1 + $0x414] ss:$8 sps:$4 sm:$0xff]   ;;  %v2890_v30 = vld [vmem:[%s4394_s1 + $0x270] ss:$8 sps:$4 sm:$0xff]  }
  0x1e   :  { %1270 = vmatprep.subr.bf16.mxu1 %v2893_v38  ;;  %v2901_v23 = vld [vmem:[%s4395_s0 + $0xe0] ss:$36 sps:$4 sm:$0xff]   ;;  %v2988_v33 = vld [vmem:[%s4394_s1 + $0x410] ss:$8 sps:$4 sm:$0xff]   ;;  %v2907_v34 = vld [vmem:[%s4394_s1 + $0x294] ss:$8 sps:$4 sm:$0xff]  }
  0x1f   :  { %1374 = vmatpush1.bf16.msra.mxu0 %v2817_v18  ;;  %v2875_v18 = vld [vmem:[%s4394_s1 + $0x250] ss:$8 sps:$4 sm:$0xff]   ;;  %v2973_v27 = vld [vmem:[%s4394_s1 + $0x400] ss:$8 sps:$4 sm:$0xff]   ;;  %v2960_v11 = vld [vmem:[%s4394_s1 + $0x304] ss:$8 sps:$4 sm:$0xff]  }
  0x20   :  { %1375 = vmatprep.subr.bf16.mxu0 %v2818_v19  ;;  %v2885_v19 = vld [vmem:[%s4394_s1 + $0x264] ss:$8 sps:$4 sm:$0xff]   ;;  %v2926_v37 = vld [vmem:[%s4395_s0 + $0x174] ss:$36 sps:$4 sm:$0xff]  }
  0x21   :  { %1271 = vmatpush1.bf16.msra.mxu1 %v2895_v41  ;;  %v2981_v38 = vld [vmem:[%s4395_s0 + $0x48] ss:$36 sps:$4 sm:$0xff]   ;;  %v2905_v41 = vld [vmem:[%s4394_s1 + $0x290] ss:$8 sps:$4 sm:$0xff]  }
  0x22   :  { %1272 = vmatprep.subr.bf16.mxu1 %v2902_v42  ;;  %v3013_v42 = vld [vmem:[%s4394_s1 + $0x434] ss:$8 sps:$4 sm:$0xff]  }
  0x23   :  { %1376 = vmatpush1.bf16.msra.mxu0 %v2820_v22  ;;  %v2892_v22 = vld [vmem:[%s4394_s1 + $0x274] ss:$8 sps:$4 sm:$0xff]  }
  0x24   :  { %1377 = vmatprep.subr.bf16.mxu0 %v2821_v24  ;;  %v2975_v24 = vld [vmem:[%s4394_s1 + $0x404] ss:$8 sps:$4 sm:$0xff]  }
  0x25   :  { %1273 = vmatpush1.bf16.msra.mxu1 %v2904_v45  ;;  %v2913_v45 = vld [vmem:[%s4394_s1 + $0x2a0] ss:$8 sps:$4 sm:$0xff]  }
  0x26   :  { %1274 = vmatprep.subr.bf16.mxu1 %v2908_v46  ;;  %v3011_v46 = vld [vmem:[%s4394_s1 + $0x430] ss:$8 sps:$4 sm:$0xff]  }
  0x27   :  { %1378 = vmatpush1.bf16.msra.mxu0 %v2823_v26  ;;  %v2967_v26 = vld [vmem:[%s4395_s0] ss:$36 sps:$4 sm:$0xff]  }
  0x28   :  { %1379 = vmatprep.subr.bf16.mxu0 %v2824_v28  ;;  %v2979_v28 = vld [vmem:[%s4395_s0 + $0x4c] ss:$36 sps:$4 sm:$0xff]  }
  0x29   :  { %1275 = vmatpush1.bf16.msra.mxu1 %v2910_v49  ;;  %v2922_v49 = vld [vmem:[%s4394_s1 + $0x2b4] ss:$8 sps:$4 sm:$0xff]  }
  0x2a   :  { %1276 = vmatprep.subr.bf16.mxu1 %v2917_v50 }
  0x2b   :  { %1380 = vmatpush1.bf16.msra.mxu0 %v2826_v31  ;;  %v2900_v31 = vld [vmem:[%s4394_s1 + $0x284] ss:$8 sps:$4 sm:$0xff]  }
  0x2c   :  { %1381 = vmatprep.subr.bf16.mxu0 %v2827_v32  ;;  %v2898_v32 = vld [vmem:[%s4394_s1 + $0x280] ss:$8 sps:$4 sm:$0xff]  }
  0x2d   :  { %1277 = vmatpush1.bf16.msra.mxu1 %v2919_v53  ;;  %v3024_v53 = vld [vmem:[%s4394_s1 + $0x440] ss:$8 sps:$4 sm:$0xff]  }
  0x2e   :  { %1278 = vmatprep.subr.bf16.mxu1 %v2923_v55  ;;  %v2930_v55 = vld [vmem:[%s4394_s1 + $0x2c4] ss:$8 sps:$4 sm:$0xff]  }
  0x2f   :  { %1382 = vmatpush1.bf16.msra.mxu0 %v2829_v35  ;;  %v2916_v35 = vld [vmem:[%s4395_s0 + $0x128] ss:$36 sps:$4 sm:$0xff]  }
  0x30   :  { %1383 = vmatprep.subr.bf16.mxu0 %v2830_v36  ;;  %v3001_v36 = vld [vmem:[%s4394_s1 + $0x424] ss:$8 sps:$4 sm:$0xff]  }
  0x31   :  { %1279 = vmatpush1.bf16.msra.mxu1 %v2925_v59  ;;  %v2937_v59 = vld [vmem:[%s4394_s1 + $0x2d4] ss:$8 sps:$4 sm:$0xff]  }
  0x32   :  { %1280 = vmatprep.subr.bf16.mxu1 %v2932_v60 }
  0x33   :  { %1384 = vmatpush1.bf16.msra.mxu0 %v2832_v39  ;;  %v2994_v39 = vld [vmem:[%s4395_s0 + $0x94] ss:$36 sps:$4 sm:$0xff]  }
  0x34   :  { %1385 = vmatprep.subr.bf16.mxu0 %v2833_v40  ;;  %v2999_v40 = vld [vmem:[%s4394_s1 + $0x420] ss:$8 sps:$4 sm:$0xff]  }
  0x35   :  { %1281 = vmatpush1.bf16.msra.mxu1 %v2934_v0  ;;  %v3051_v0 = vld [vmem:[%s4394_s1 + $0x460] ss:$8 sps:$4 sm:$0xff]  }
  0x36   :  { %1282 = vmatprep.subr.bf16.mxu1 %v2938_v2  ;;  %v2935_v2 = vld [vmem:[%s4394_s1 + $0x2d0] ss:$8 sps:$4 sm:$0xff]  }
  0x37   :  { %1386 = vmatpush1.bf16.msra.mxu0 %v2835_v43  ;;  %v2915_v43 = vld [vmem:[%s4394_s1 + $0x2a4] ss:$8 sps:$4 sm:$0xff]  }
  0x38   :  { %1387 = vmatprep.subr.bf16.mxu0 %v2836_v44  ;;  %v82_v44 = vld [vmem:[%s4395_s0 + $0x1b8] sm:$0x11] }
  0x39   :  { %1283 = vmatpush1.bf16.msra.mxu1 %v2940_v5  ;;  %v2380_v50 = vcombine.high %v82_v44, %v82_v44  ;;  %v2379_v60 = vcombine.low %v82_v44, %v82_v44  ;;  %v3064_v5 = vld [vmem:[%s4394_s1 + $0x470] ss:$8 sps:$4 sm:$0xff]   ;;  %v3018_v44 = vld [vmem:[%s4394_s1 + $0x380] ss:$8 sps:$4 sm:$0xff]  }
  0x3a   :  { %1284 = vmatprep.subr.bf16.mxu1 %v2946_v6  ;;  %v3066_v6 = vld [vmem:[%s4394_s1 + $0x474] ss:$8 sps:$4 sm:$0xff]  }
  0x3b   :  { %1388 = vmatpush1.bf16.msra.mxu0 %v2838_v47  ;;  %v2931_v47 = vld [vmem:[%s4395_s0 + $0x170] ss:$36 sps:$4 sm:$0xff]  }
  0x3c   :  { %1389 = vmatprep.subr.bf16.mxu0 %v2839_v48  ;;  %v3026_v48 = vld [vmem:[%s4394_s1 + $0x444] ss:$8 sps:$4 sm:$0xff]  }
  0x3d   :  { %1285 = vmatpush1.bf16.msra.mxu1 %v2948_v10  ;;  %v2949_v10 = vld [vmem:[%s4394_s1 + $0x2f0] ss:$8 sps:$4 sm:$0xff]  }
  0x3e   :  { %1286 = vmatprep.subr.bf16.mxu1 %v2952_v13  ;;  %v2958_v13 = vld [vmem:[%s4394_s1 + $0x300] ss:$8 sps:$4 sm:$0xff]  }
  0x3f   :  { %1390 = vmatpush1.bf16.msra.mxu0 %v2841_v51  ;;  %v2996_v51 = vld [vmem:[%s4395_s0 + $0x90] ss:$36 sps:$4 sm:$0xff]  }
  0x40   :  { %1460 = vmatprep.subr.bf16.mxu0 %v2847_v52  ;;  %v3009_v52 = vld [vmem:[%s4395_s0 + $0xdc] ss:$36 sps:$4 sm:$0xff]  }
  0x41   :  { %1287 = vmatpush1.bf16.msra.mxu1 %v2954_v16  ;;  %v2982_v16 = vld [vmem:[%s4395_s0 + $0x5c] ss:$36 sps:$4 sm:$0xff]  }
  0x42   :  { %1392 = vmatmul.mubr.bf16.vlgmr.msra.gmra.mrb[0].mxu0 %v2842_v54  ;;  %1288 = vmatprep.subr.bf16.mxu1 %v2961_v17  ;;  %v2920_v54 = vld [vmem:[%s4394_s1 + $0x2b0] ss:$8 sps:$4 sm:$0xff]   ;;  %v3044_v17 = vld [vmem:[%s4395_s0 + $0x168] ss:$36 sps:$4 sm:$0xff]  }
  0x43   :  { %1461 = vmatpush1.bf16.msra.mxu0 %v2845_v56  ;;  %1401 = vmatprep.mubr.bf16.mxu0 %v2866_v57  ;;  %v3039_v56 = vld [vmem:[%s4394_s1 + $0x450] ss:$8 sps:$4 sm:$0xff]   ;;  %v3041_v57 = vld [vmem:[%s4394_s1 + $0x454] ss:$8 sps:$4 sm:$0xff]  }
  0x44   :  { %1462 = vmatprep.subr.bf16.mxu0 %v2850_v58  ;;  %v2928_v58 = vld [vmem:[%s4394_s1 + $0x2c0] ss:$8 sps:$4 sm:$0xff]  }
  0x45   :  { %1289 = vmatpush1.bf16.msra.mxu1 %v2963_v21  ;;  %v2984_v21 = vld [vmem:[%s4395_s0 + $0x58] ss:$36 sps:$4 sm:$0xff]  }
  0x46   :  { %1662 = vmatprep.subr.bf16.mxu1 %v2975_v24  ;;  %v2978_v24 = vld [vmem:[%s4394_s1 + $0x334] ss:$8 sps:$4 sm:$0xff]  }
  0x47   :  { %1463 = vmatpush1.bf16.msra.mxu0 %v2848_v61  ;;  %v2957_v61 = vld [vmem:[%s4395_s0 + $0x14] ss:$36 sps:$4 sm:$0xff]  }
  0x48   :  { %1464 = vmatprep.subr.bf16.mxu0 %v2856_v62  ;;  %1291 = vmatmul.mubr.bf16.vlgmr.msra.gmra.mrb[0].mxu1 %v2967_v26  ;;  %v3014_v62 = vld [vmem:[%s4395_s0 + $0xd8] ss:$36 sps:$4 sm:$0xff]  }
  0x49   :  { %1663 = vmatpush1.bf16.msra.mxu1 %v2973_v27  ;;  %1300 = vmatprep.mubr.bf16.mxu1 %v2979_v28  ;;  %v2976_v26 = vld [vmem:[%s4394_s1 + $0x330] ss:$8 sps:$4 sm:$0xff]   ;;  %v2987_v27 = vld [vmem:[%s4394_s1 + $0x344] ss:$8 sps:$4 sm:$0xff]   ;;  %v3101_v28 = vmov 0  }
  0x4a   :  { %1402 = vmatmul.mubr.bf16.gmra.mrb[4].mxu0 %v2871_v1  ;;  %1664 = vmatprep.subr.bf16.mxu1 %v2990_v29  ;;  %v3053_v1 = vld [vmem:[%s4394_s1 + $0x464] ss:$8 sps:$4 sm:$0xff]  }
  0x4b   :  { %1465 = vmatpush1.bf16.msra.mxu0 %v2854_v63  ;;  %1411 = vmatprep.mubr.bf16.mxu0 %v2881_v3  ;;  %v3027_v63 = vld [vmem:[%s4395_s0 + $0x124] ss:$36 sps:$4 sm:$0xff]  }
  0x4c   :  { %1466 = vmatprep.subr.bf16.mxu0 %v2862_v4  ;;  %v2944_v3 = vld [vmem:[%s4394_s1 + $0x2e4] ss:$8 sps:$4 sm:$0xff]   ;;  %v2942_v4 = vld [vmem:[%s4394_s1 + $0x2e0] ss:$8 sps:$4 sm:$0xff]  }
  0x4d   :  { %1665 = vmatpush1.bf16.msra.mxu1 %v2988_v33  ;;  %v3002_v29 = vld [vmem:[%s4395_s0 + $0xa0] ss:$36 sps:$4 sm:$0xff]  }
  0x4e   :  { %1666 = vmatprep.subr.bf16.mxu1 %v3001_v36  ;;  %v3073_v33 = vld [vmem:[%s4395_s0 + $0x20] ss:$36 sps:$4 sm:$0xff]   ;;  %v3017_v36 = vld [vmem:[%s4395_s0 + $0xe8] ss:$36 sps:$4 sm:$0xff]  }
  0x4f   :  { %1467 = vmatpush1.bf16.msra.mxu0 %v2860_v7  ;;  %v2951_v7 = vld [vmem:[%s4394_s1 + $0x2f4] ss:$8 sps:$4 sm:$0xff]  }
  0x50   :  { %1468 = vmatprep.subr.bf16.mxu0 %v2870_v8  ;;  %1301 = vmatmul.mubr.bf16.gmra.mrb[4].mxu1 %v2981_v38  ;;  %v3029_v8 = vld [vmem:[%s4395_s0 + $0x120] ss:$36 sps:$4 sm:$0xff]   ;;  %v3030_v38 = vld [vmem:[%s4395_s0 + $0x134] ss:$36 sps:$4 sm:$0xff]  }
  0x51   :  { %1310 = vmatprep.mubr.bf16.mxu1 %v2994_v39  ;;  %1667 = vmatpush1.bf16.msra.mxu1 %v2999_v40  ;;  %v3008_v39 = vld [vmem:[%s4394_s1 + $0x374] ss:$8 sps:$4 sm:$0xff]   ;;  %v3076_v40 = vld [vmem:[%s4395_s0 + $0x68] ss:$36 sps:$4 sm:$0xff]  }
  0x52   :  { %1412 = vmatmul.mubr.bf16.gmra.mrb[8].mxu0 %v2886_v12  ;;  %1668 = vmatprep.subr.bf16.mxu1 %v3013_v42  ;;  %v2955_v12 = vld [vmem:[%s4395_s0 + $0x10] ss:$36 sps:$4 sm:$0xff]   ;;  %v3020_v42 = vld [vmem:[%s4394_s1 + $0x384] ss:$8 sps:$4 sm:$0xff]  }
  0x53   :  { %1469 = vmatpush1.bf16.msra.mxu0 %v2868_v9  ;;  %1421 = vmatprep.mubr.bf16.mxu0 %v2896_v14  ;;  %v3042_v9 = vld [vmem:[%s4395_s0 + $0x16c] ss:$36 sps:$4 sm:$0xff]  }
  0x54   :  { %1470 = vmatprep.subr.bf16.mxu0 %v2877_v15  ;;  %v81_v14 = vld [vmem:[%s4395_s0 + $0x1b0] sm:$0x11] }
  0x55   :  { %1669 = vmatpush1.bf16.msra.mxu1 %v3011_v46  ;;  %v2966_v15 = vld [vmem:[%s4394_s1 + $0x314] ss:$8 sps:$4 sm:$0xff]  }
  0x56   :  { %1670 = vmatprep.subr.bf16.mxu1 %v3026_v48  ;;  %v3023_v46 = vld [vmem:[%s4394_s1 + $0x394] ss:$8 sps:$4 sm:$0xff]   ;;  %v3021_v48 = vld [vmem:[%s4394_s1 + $0x390] ss:$8 sps:$4 sm:$0xff]  }
  0x57   :  { %1471 = vmatpush1.bf16.msra.mxu0 %v2875_v18  ;;  %v2378_v18 = vcombine.high %v81_v14, %v81_v14 }
  0x58   :  { %1472 = vmatprep.subr.bf16.mxu0 %v2885_v19  ;;  %1311 = vmatmul.mubr.bf16.gmra.mrb[8].mxu1 %v2996_v51  ;;  %v2964_v19 = vld [vmem:[%s4394_s1 + $0x310] ss:$8 sps:$4 sm:$0xff]  }
  0x59   :  { %1320 = vmatprep.mubr.bf16.mxu1 %v3009_v52  ;;  %1671 = vmatpush1.bf16.msra.mxu1 %v3024_v53  ;;  %v3047_v51 = vld [vmem:[%s4395_s0 + $0x178] ss:$36 sps:$4 sm:$0xff]   ;;  %v3033_v52 = vld [vmem:[%s4394_s1 + $0x3a0] ss:$8 sps:$4 sm:$0xff]  }
  0x5a   :  { %1422 = vmatmul.mubr.bf16.gmra.mrb[12].mxu0 %v2901_v23  ;;  %1672 = vmatprep.subr.bf16.mxu1 %v3041_v57  ;;  %v2997_v23 = vld [vmem:[%s4395_s0 + $0xa4] ss:$36 sps:$4 sm:$0xff]  }
  0x5b   :  { %1473 = vmatpush1.bf16.msra.mxu0 %v2883_v20  ;;  %1431 = vmatprep.mubr.bf16.mxu0 %v2911_v25  ;;  %v2972_v20 = vld [vmem:[%s4394_s1 + $0x324] ss:$8 sps:$4 sm:$0xff]   ;;  %v2377_v25 = vcombine.low %v81_v14, %v81_v14  ;;  %v3089_v14 = vld [vmem:[%s4395_s0 + $0x138] ss:$36 sps:$4 sm:$0xff]  }
  0x5c   :  { %1474 = vmatprep.subr.bf16.mxu0 %v2892_v22  ;;  %v2970_v22 = vld [vmem:[%s4394_s1 + $0x320] ss:$8 sps:$4 sm:$0xff]   ;;  %v3050_v57 = vld [vmem:[%s4394_s1 + $0x3c4] ss:$8 sps:$4 sm:$0xff]  }
  0x5d   :  { %1673 = vmatpush1.bf16.msra.mxu1 %v3039_v56  ;;  %v3036_v56 = vld [vmem:[%s4394_s1 + $0x3b0] ss:$8 sps:$4 sm:$0xff]  }
  0x5e   :  { %1674 = vmatprep.subr.bf16.mxu1 %v3053_v1  ;;  %v3061_v1 = vld [vmem:[%s4394_s1 + $0x3e0] ss:$8 sps:$4 sm:$0xff]  }
  0x5f   :  { %1475 = vmatpush1.bf16.msra.mxu0 %v2890_v30  ;;  %v2985_v30 = vld [vmem:[%s4394_s1 + $0x340] ss:$8 sps:$4 sm:$0xff]  }
  0x60   :  { %1476 = vmatprep.subr.bf16.mxu0 %v2900_v31  ;;  %1321 = vmatmul.mubr.bf16.gmra.mrb[12].mxu1 %v3014_v62  ;;  %v3015_v31 = vld [vmem:[%s4395_s0 + $0xec] ss:$36 sps:$4 sm:$0xff]   ;;  %v3088_v62 = vld [vmem:[%s4395_s0 + $0x140] ss:$36 sps:$4 sm:$0xff]  }
  0x61   :  { %1330 = vmatprep.mubr.bf16.mxu1 %v3027_v63  ;;  %1675 = vmatpush1.bf16.msra.mxu1 %v3051_v0  ;;  %v3054_v63 = vld [vmem:[%s4394_s1 + $0x3d0] ss:$8 sps:$4 sm:$0xff]   ;;  %v3063_v0 = vld [vmem:[%s4394_s1 + $0x3e4] ss:$8 sps:$4 sm:$0xff]  }
  0x62   :  { %1432 = vmatmul.mubr.bf16.gmra.mrb[16].mxu0 %v2916_v35  ;;  %1676 = vmatprep.subr.bf16.mxu1 %v3066_v6  ;;  %v3005_v35 = vld [vmem:[%s4394_s1 + $0x364] ss:$8 sps:$4 sm:$0xff]  }
  0x63   :  { %1477 = vmatpush1.bf16.msra.mxu0 %v2898_v32  ;;  %1441 = vmatprep.mubr.bf16.mxu0 %v2926_v37  ;;  %v2993_v32 = vld [vmem:[%s4394_s1 + $0x354] ss:$8 sps:$4 sm:$0xff]   ;;  %v3003_v37 = vld [vmem:[%s4394_s1 + $0x360] ss:$8 sps:$4 sm:$0xff]  }
  0x64   :  { %1478 = vmatprep.subr.bf16.mxu0 %v2907_v34  ;;  %v2991_v34 = vld [vmem:[%s4394_s1 + $0x350] ss:$8 sps:$4 sm:$0xff]   ;;  %v3074_v6 = vld [vmem:[%s4395_s0 + $0x64] ss:$36 sps:$4 sm:$0xff]  }
  0x65   :  { %1677 = vmatpush1.bf16.msra.mxu1 %v3064_v5  ;;  %v3070_v5 = vld [vmem:[%s4395_s0 + $0x18] ss:$36 sps:$4 sm:$0xff]  }
  0x67   :  { %1479 = vmatpush1.bf16.msra.mxu0 %v2905_v41  ;;  %v3006_v41 = vld [vmem:[%s4394_s1 + $0x370] ss:$8 sps:$4 sm:$0xff]  }
  0x68   :  { %1480 = vmatprep.subr.bf16.mxu0 %v2915_v43  ;;  %1331 = vmatmul.mubr.bf16.gmra.mrb[16].mxu1 %v3029_v8  ;;  %v3032_v43 = vld [vmem:[%s4395_s0 + $0x130] ss:$36 sps:$4 sm:$0xff]   ;;  %v3077_v8 = vld [vmem:[%s4395_s0 + $0x60] ss:$36 sps:$4 sm:$0xff]  }
  0x69   :  { %1340 = vmatprep.mubr.bf16.mxu1 %v3042_v9  ;;  %v3078_v9 = vld [vmem:[%s4395_s0 + $0xac] ss:$36 sps:$4 sm:$0xff]  }
  0x6a   :  { %1442 = vmatmul.mubr.bf16.gmra.mrb[20].mxu0 %v2931_v47  ;;  %v3080_v47 = vld [vmem:[%s4395_s0 + $0xb0] ss:$36 sps:$4 sm:$0xff]  }
  0x6b   :  { %1481 = vmatpush1.bf16.msra.mxu0 %v2913_v45  ;;  %1451 = vmatprep.mubr.bf16.mxu0 %v2380_v50  ;;  %v3045_v45 = vld [vmem:[%s4395_s0 + $0x17c] ss:$36 sps:$4 sm:$0xff]  }
  0x6c   :  { %1482 = vmatprep.subr.bf16.mxu0 %v2922_v49  ;;  %v3035_v49 = vld [vmem:[%s4394_s1 + $0x3a4] ss:$8 sps:$4 sm:$0xff]  }
  0x6d   :  { %v83_v50 = vld [vmem:[%s4395_s0 + $0x1c0] sm:$0x11] }
  0x6e   :  { %v2382_v53 = vcombine.high %v83_v50, %v83_v50 }
  0x6f   :  { %1483 = vmatpush1.bf16.msra.mxu0 %v2920_v54  ;;  %v3038_v54 = vld [vmem:[%s4394_s1 + $0x3b4] ss:$8 sps:$4 sm:$0xff]  }
  0x70   :  { %1484 = vmatprep.subr.bf16.mxu0 %v2930_v55  ;;  %1341 = vmatmul.mubr.bf16.gmra.mrb[20].mxu1 %v3044_v17  ;;  %v3084_v55 = vld [vmem:[%s4395_s0 + $0xf8] ss:$36 sps:$4 sm:$0xff]   ;;  %v3093_v17 = vld [vmem:[%s4395_s0 + $0x180] ss:$36 sps:$4 sm:$0xff]  }
  0x71   :  { %1350 = vmatprep.mubr.bf16.mxu1 %v2378_v18 }
  0x72   :  { %1452 = vmatmul.mubr.bf16.gmra.mrb[24].mxu0 %v2379_v60  ;;  %v3072_v60 = vld [vmem:[%s4395_s0 + $0x1c] ss:$36 sps:$4 sm:$0xff]  }
  0x73   :  { %1485 = vmatpush1.bf16.msra.mxu0 %v2928_v58  ;;  %1492 = vmatprep.mubr.bf16.mxu0 %v2957_v61  ;;  %v2381_v58 = vcombine.low %v83_v50, %v83_v50  ;;  %v3056_v61 = vld [vmem:[%s4394_s1 + $0x3d4] ss:$8 sps:$4 sm:$0xff]   ;;  %v1823_v50 = vld [vmem:[%s4396_s2 + $0xa8] sm:$0xff] }
  0x74   :  { %1486 = vmatprep.subr.bf16.mxu0 %v2937_v59  ;;  %v3048_v59 = vld [vmem:[%s4394_s1 + $0x3c0] ss:$8 sps:$4 sm:$0xff]  }
  0x77   :  { %1487 = vmatpush1.bf16.msra.mxu0 %v2935_v2  ;;  %v3069_v2 = vld [vmem:[%s4394_s1 + $0x3f4] ss:$8 sps:$4 sm:$0xff]  }
  0x78   :  { %1488 = vmatprep.subr.bf16.mxu0 %v2944_v3  ;;  %1351 = vmatmul.mubr.bf16.gmra.mrb[24].mxu1 %v2377_v25  ;;  %v3092_v3 = vld [vmem:[%s4395_s0 + $0x188] ss:$36 sps:$4 sm:$0xff]  }
  0x79   :  { %1694 = vmatprep.mubr.bf16.mxu1 %v3101_v28 }
  0x7b   :  { %1489 = vmatpush1.bf16.msra.mxu0 %v2942_v4  ;;  %v3067_v4 = vld [vmem:[%s4394_s1 + $0x3f0] ss:$8 sps:$4 sm:$0xff]  }
  0x7c   :  { %1490 = vmatprep.subr.bf16.mxu0 %v2951_v7  ;;  %v3095_v7 = vld [vmem:[%s4395_s0 + $0x1d0] ss:$0 sps:$4 sm:$0x11]  }
  0x7f   :  { %1491 = vmatpush1.bf16.msra.mxu0 %v2949_v10  ;;  %v3081_v10 = vld [vmem:[%s4395_s0 + $0xa8] ss:$36 sps:$4 sm:$0xff]  }
  0x80   :  { %1561 = vmatprep.subr.bf16.mxu0 %v2960_v11  ;;  %1695 = vmatmul.mubr.bf16.vlgmr.msra.gmra.mrb[28].mxu1 %v3073_v33  ;;  %v3082_v11 = vld [vmem:[%s4395_s0 + $0xf4] ss:$36 sps:$4 sm:$0xff]  }
  0x81   :  { %1704 = vmatprep.mubr.bf16.mxu1 %v3101_v28  ;;  %v1813_v33 = vld [vmem:[%s4396_s2 + $0x58] sm:$0xff] }
  0x82   :  { %1493 = vmatmul.mubr.bf16.vlgmr.msra.gmra.mrb[0].mxu0 %v2955_v12  ;;  %v3085_v12 = vld [vmem:[%s4395_s0 + $0xf0] ss:$36 sps:$4 sm:$0xff]  }
  0x83   :  { %1562 = vmatpush1.bf16.msra.mxu0 %v2958_v13  ;;  %1502 = vmatprep.mubr.bf16.mxu0 %v2982_v16  ;;  %v3086_v13 = vld [vmem:[%s4395_s0 + $0x13c] ss:$36 sps:$4 sm:$0xff]   ;;  %v84_v16 = vld [vmem:[%s4395_s0 + $0x1c8] sm:$0x11] }
  0x84   :  { %1563 = vmatprep.subr.bf16.mxu0 %v2966_v15  ;;  %v3090_v15 = vld [vmem:[%s4395_s0 + $0x184] ss:$36 sps:$4 sm:$0xff]   ;;  %v2384_v18 = vcombine.high %v84_v16, %v84_v16 }
  0x87   :  { %1564 = vmatpush1.bf16.msra.mxu0 %v2964_v19  ;;  %v2383_v19 = vcombine.low %v84_v16, %v84_v16 }
  0x88   :  { %1565 = vmatprep.subr.bf16.mxu0 %v2972_v20  ;;  %1705 = vmatmul.mubr.bf16.gmra.mrb[32].mxu1 %v3076_v40  ;;  %v1803_v20 = vld [vmem:[%s4396_s2 + $0x8] sm:$0xff] }
  0x89   :  { %1714 = vmatprep.mubr.bf16.mxu1 %v3101_v28 }
  0x8a   :  { %1503 = vmatmul.mubr.bf16.gmra.mrb[4].mxu0 %v2984_v21  ;;  %v1805_v21 = vld [vmem:[%s4396_s2 + $0x18] sm:$0xff] }
  0x8b   :  { %1566 = vmatpush1.bf16.msra.mxu0 %v2970_v22  ;;  %1512 = vmatprep.mubr.bf16.mxu0 %v2997_v23  ;;  %v3755_v22 = vpack.c.bf16 %v1805_v21, %v1803_v20  ;;  %v1802_v23 = vld [vmem:[%s4396_s2] sm:$0xff] }
  0x8c   :  { %1567 = vmatprep.subr.bf16.mxu0 %v2978_v24  ;;  %v1804_v24 = vld [vmem:[%s4396_s2 + $0x10] sm:$0xff]  ;;  %v1838_v21 = vld [vmem:[%s4396_s2 + $0x120] sm:$0xff] }
  0x8d   :  { %v3763_v25 = vpack.c.bf16 %v1804_v24, %v1802_v23  ;;  %2557 = vmatprep.subr.bf16.mxu1 %v3755_v22  ;;  %v1840_v23 = vld [vmem:[%s4396_s2 + $0x130] sm:$0xff] }
  0x8e   :  { %v3941_v24 = vpack.c.bf16 %v1840_v23, %v1838_v21  ;;  %v1861_v21 = vld [vmem:[%s4396_s2 + $0x1d8] sm:$0xff] }
  0x8f   :  { %1568 = vmatpush1.bf16.msra.mxu0 %v2976_v26  ;;  %4431 = vst [vmem:[#allocation2_spill] sm:$0xff] %v3763_v25  ;;  %2559 = vmatpush1.bf16.msra.mxu1 %v3763_v25  ;;  %v1807_v26 = vld [vmem:[%s4396_s2 + $0x28] sm:$0xff] }
  0x90   :  { %1569 = vmatprep.subr.bf16.mxu0 %v2987_v27  ;;  %1715 = vmatmul.mubr.bf16.gmra.mrb[36].mxu1 %v3080_v47  ;;  %v1809_v27 = vld [vmem:[%s4396_s2 + $0x38] sm:$0xff]  ;;  %v1818_v47 = vld [vmem:[%s4396_s2 + $0x80] sm:$0xff]  ;;  %4449 = vst [vmem:[#allocation20_spill] sm:$0xff] %v3941_v24 }
  0x91   :  { %1724 = vmatprep.mubr.bf16.mxu1 %v3101_v28 }
  0x92   :  { %1513 = vmatmul.mubr.bf16.gmra.mrb[8].mxu0 %v3002_v29  ;;  %v1806_v29 = vld [vmem:[%s4396_s2 + $0x20] sm:$0xff] }
  0x93   :  { %1570 = vmatpush1.bf16.msra.mxu0 %v2985_v30  ;;  %1522 = vmatprep.mubr.bf16.mxu0 %v3015_v31  ;;  %v1808_v30 = vld [vmem:[%s4396_s2 + $0x30] sm:$0xff] }
  0x94   :  { %1571 = vmatprep.subr.bf16.mxu0 %v2993_v32  ;;  %v3781_v31 = vpack.c.bf16 %v1808_v30, %v1806_v29  ;;  %v1811_v32 = vld [vmem:[%s4396_s2 + $0x48] sm:$0xff]  ;;  %v1845_v29 = vld [vmem:[%s4396_s2 + $0x158] sm:$0xff] }
  0x96   :  { %4433 = vst [vmem:[#allocation4_spill] sm:$0xff] %v3781_v31 }
  0x97   :  { %1572 = vmatpush1.bf16.msra.mxu0 %v2991_v34  ;;  %v3791_v34 = vpack.c.bf16 %v1813_v33, %v1811_v32  ;;  %v1842_v33 = vld [vmem:[%s4396_s2 + $0x140] sm:$0xff] }
  0x98   :  { %1573 = vmatprep.subr.bf16.mxu0 %v3005_v35  ;;  %1725 = vmatmul.mubr.bf16.gmra.mrb[40].mxu1 %v3084_v55  ;;  %v1810_v35 = vld [vmem:[%s4396_s2 + $0x40] sm:$0xff] }
  0x99   :  { %1734 = vmatprep.mubr.bf16.mxu1 %v3101_v28  ;;  %4434 = vst [vmem:[#allocation5_spill] sm:$0xff] %v3791_v34 }
  0x9a   :  { %1523 = vmatmul.mubr.bf16.gmra.mrb[12].mxu0 %v3017_v36  ;;  %v1812_v36 = vld [vmem:[%s4396_s2 + $0x50] sm:$0xff] }
  0x9b   :  { %1574 = vmatpush1.bf16.msra.mxu0 %v3003_v37  ;;  %1532 = vmatprep.mubr.bf16.mxu0 %v3030_v38  ;;  %v3799_v37 = vpack.c.bf16 %v1812_v36, %v1810_v35  ;;  %v1815_v38 = vld [vmem:[%s4396_s2 + $0x68] sm:$0xff]  ;;  %v1844_v35 = vld [vmem:[%s4396_s2 + $0x150] sm:$0xff] }
  0x9c   :  { %1575 = vmatprep.subr.bf16.mxu0 %v3008_v39  ;;  %v1817_v39 = vld [vmem:[%s4396_s2 + $0x78] sm:$0xff] }
  0x9d   :  { %4435 = vst [vmem:[#allocation6_spill] sm:$0xff] %v3799_v37  ;;  %v3809_v40 = vpack.c.bf16 %v1817_v39, %v1815_v38  ;;  %v3965_v38 = vpack.c.bf16 %v1844_v35, %v1842_v33  ;;  %v1860_v33 = vld [vmem:[%s4396_s2 + $0x1d0] sm:$0xff] }
  0x9f   :  { %1576 = vmatpush1.bf16.msra.mxu0 %v3006_v41  ;;  %4436 = vst [vmem:[#allocation7_spill] sm:$0xff] %v3809_v40  ;;  %v1814_v41 = vld [vmem:[%s4396_s2 + $0x60] sm:$0xff]  ;;  %4451 = vst [vmem:[#allocation22_spill] sm:$0xff] %v3965_v38 }
  0xa0   :  { %1577 = vmatprep.subr.bf16.mxu0 %v3020_v42  ;;  %1735 = vmatmul.mubr.bf16.gmra.mrb[44].mxu1 %v3088_v62  ;;  %v1816_v42 = vld [vmem:[%s4396_s2 + $0x70] sm:$0xff] }
  0xa1   :  { %1744 = vmatprep.mubr.bf16.mxu1 %v3101_v28  ;;  %v1828_v62 = vld [vmem:[%s4396_s2 + $0xd0] sm:$0xff] }
  0xa2   :  { %1533 = vmatmul.mubr.bf16.gmra.mrb[16].mxu0 %v3032_v43  ;;  %v3817_v43 = vpack.c.bf16 %v1816_v42, %v1814_v41  ;;  %v1847_v41 = vld [vmem:[%s4396_s2 + $0x168] sm:$0xff]  ;;  %v1849_v42 = vld [vmem:[%s4396_s2 + $0x178] sm:$0xff] }
  0xa3   :  { %1578 = vmatpush1.bf16.msra.mxu0 %v3018_v44  ;;  %1542 = vmatprep.mubr.bf16.mxu0 %v3045_v45  ;;  %v1819_v44 = vld [vmem:[%s4396_s2 + $0x88] sm:$0xff]  ;;  %v1821_v45 = vld [vmem:[%s4396_s2 + $0x98] sm:$0xff] }
  0xa4   :  { %1579 = vmatprep.subr.bf16.mxu0 %v3023_v46  ;;  %4437 = vst [vmem:[#allocation8_spill] sm:$0xff] %v3817_v43  ;;  %v3827_v46 = vpack.c.bf16 %v1821_v45, %v1819_v44  ;;  %v3977_v44 = vpack.c.bf16 %v1849_v42, %v1847_v41  ;;  %v1846_v45 = vld [vmem:[%s4396_s2 + $0x160] sm:$0xff] }
  0xa6   :  { %4438 = vst [vmem:[#allocation9_spill] sm:$0xff] %v3827_v46  ;;  %4452 = vst [vmem:[#allocation23_spill] sm:$0xff] %v3977_v44 }
  0xa7   :  { %1580 = vmatpush1.bf16.msra.mxu0 %v3021_v48  ;;  %v1820_v48 = vld [vmem:[%s4396_s2 + $0x90] sm:$0xff] }
  0xa8   :  { %1581 = vmatprep.subr.bf16.mxu0 %v3035_v49  ;;  %1745 = vmatmul.mubr.bf16.gmra.mrb[48].mxu1 %v3092_v3  ;;  %v3835_v49 = vpack.c.bf16 %v1820_v48, %v1818_v47  ;;  %v1833_v3 = vld [vmem:[%s4396_s2 + $0xf8] sm:$0xff]  ;;  %v1848_v47 = vld [vmem:[%s4396_s2 + $0x170] sm:$0xff] }
  0xa9   :  { %1754 = vmatprep.mubr.bf16.mxu1 %v3101_v28  ;;  %v3773_v28 = vpack.c.bf16 %v1809_v27, %v1807_v26  ;;  %v1843_v27 = vld [vmem:[%s4396_s2 + $0x148] sm:$0xff]  ;;  %v3985_v48 = vpack.c.bf16 %v1848_v47, %v1846_v45  ;;  %v1865_v47 = vld [vmem:[%s4396_s2 + $0x1f8] sm:$0xff] }
  0xaa   :  { %1543 = vmatmul.mubr.bf16.gmra.mrb[20].mxu0 %v3047_v51  ;;  %4439 = vst [vmem:[#allocation10_spill] sm:$0xff] %v3835_v49  ;;  %v1825_v51 = vld [vmem:[%s4396_s2 + $0xb8] sm:$0xff]  ;;  %v3955_v32 = vpack.c.bf16 %v1845_v29, %v1843_v27  ;;  %v1858_v29 = vld [vmem:[%s4396_s2 + $0x1c0] sm:$0xff]  ;;  %v1863_v45 = vld [vmem:[%s4396_s2 + $0x1e8] sm:$0xff] }
  0xab   :  { %1582 = vmatpush1.bf16.msra.mxu0 %v3033_v52  ;;  %1552 = vmatprep.mubr.bf16.mxu0 %v2382_v53  ;;  %4432 = vst [vmem:[#allocation3_spill] sm:$0xff] %v3773_v28  ;;  %v3845_v52 = vpack.c.bf16 %v1825_v51, %v1823_v50  ;;  %v1822_v53 = vld [vmem:[%s4396_s2 + $0xa0] sm:$0xff]  ;;  %4453 = vst [vmem:[#allocation24_spill] sm:$0xff] %v3985_v48  ;;  %v1851_v51 = vld [vmem:[%s4396_s2 + $0x188] sm:$0xff]  ;;  %v4053_v41 = vpack.c.bf16 %v1860_v33, %v1858_v29 }
  0xac   :  { %1583 = vmatprep.subr.bf16.mxu0 %v3038_v54  ;;  %2561 = vmatprep.subr.bf16.mxu1 %v3773_v28  ;;  %v1824_v54 = vld [vmem:[%s4396_s2 + $0xb0] sm:$0xff]  ;;  %4450 = vst [vmem:[#allocation21_spill] sm:$0xff] %v3955_v32 }
  0xad   :  { %2563 = vmatpush1.bf16.msra.mxu1 %v3781_v31  ;;  %4440 = vst [vmem:[#allocation11_spill] sm:$0xff] %v3845_v52  ;;  %v3853_v55 = vpack.c.bf16 %v1824_v54, %v1822_v53  ;;  %v1853_v53 = vld [vmem:[%s4396_s2 + $0x198] sm:$0xff]  ;;  %4459 = vst [vmem:[#allocation30_spill] sm:$0xff] %v4053_v41 }
  0xae   :  { %2565 = vmatprep.subr.bf16.mxu1 %v3791_v34 }
  0xaf   :  { %1584 = vmatpush1.bf16.msra.mxu0 %v3036_v56  ;;  %4441 = vst [vmem:[#allocation12_spill] sm:$0xff] %v3853_v55 }
  0xb0   :  { %1585 = vmatprep.subr.bf16.mxu0 %v3050_v57  ;;  %1755 = vmatmul.mubr.bf16.gmra.mrb[52].mxu1 %v3095_v7  ;;  %v1827_v57 = vld [vmem:[%s4396_s2 + $0xc8] sm:$0xff] }
  0xb1   :  { %2567 = vmatpush1.bf16.msra.mxu1 %v3799_v37 }
  0xb2   :  { %1553 = vmatmul.mubr.bf16.gmra.mrb[24].mxu0 %v2381_v58  ;;  %2569 = vmatprep.subr.bf16.mxu1 %v3809_v40  ;;  %v1829_v58 = vld [vmem:[%s4396_s2 + $0xd8] sm:$0xff] }
  0xb3   :  { %1586 = vmatpush1.bf16.msra.mxu0 %v3048_v59  ;;  %1593 = vmatprep.mubr.bf16.mxu0 %v3072_v60  ;;  %v3867_v60 = vpack.c.bf16 %v1829_v58, %v1827_v57  ;;  %v3999_v57 = vpack.c.bf16 %v1853_v53, %v1851_v51  ;;  %v1850_v58 = vld [vmem:[%s4396_s2 + $0x180] sm:$0xff]  ;;  %v4068_v53 = vpack.c.bf16 %v1865_v47, %v1863_v45 }
  0xb4   :  { %1587 = vmatprep.subr.bf16.mxu0 %v3056_v61  ;;  %v1826_v61 = vld [vmem:[%s4396_s2 + $0xc0] sm:$0xff] }
  0xb5   :  { %2571 = vmatpush1.bf16.msra.mxu1 %v3817_v43  ;;  %4442 = vst [vmem:[#allocation13_spill] sm:$0xff] %v3867_v60  ;;  %4454 = vst [vmem:[#allocation25_spill] sm:$0xff] %v3999_v57  ;;  %v1862_v51 = vld [vmem:[%s4396_s2 + $0x1e0] sm:$0xff] }
  0xb6   :  { %2573 = vmatprep.subr.bf16.mxu1 %v3827_v46  ;;  %4460 = vst [vmem:[#allocation31_spill] sm:$0xff] %v4068_v53 }
  0xb7   :  { %1588 = vmatpush1.bf16.msra.mxu0 %v3054_v63 }
  0xb8   :  { %1589 = vmatprep.subr.bf16.mxu0 %v3063_v0  ;;  %v3877_v0 = vpack.c.bf16 %v1828_v62, %v1826_v61  ;;  %v1852_v61 = vld [vmem:[%s4396_s2 + $0x190] sm:$0xff] }
  0xb9   :  { %2575 = vmatpush1.bf16.msra.mxu1 %v3835_v49 }
  0xba   :  { %2577 = vmatprep.subr.bf16.mxu1 %v3845_v52  ;;  %4443 = vst [vmem:[#allocation14_spill] sm:$0xff] %v3877_v0 }
  0xbb   :  { %1590 = vmatpush1.bf16.msra.mxu0 %v3061_v1 }
  0xbc   :  { %1591 = vmatprep.subr.bf16.mxu0 %v3069_v2  ;;  %v1831_v2 = vld [vmem:[%s4396_s2 + $0xe8] sm:$0xff] }
  0xbd   :  { %2579 = vmatpush1.bf16.msra.mxu1 %v3853_v55 }
  0xbe   :  { %2581 = vmatprep.subr.bf16.mxu1 %v3867_v60 }
  0xbf   :  { %1592 = vmatpush1.bf16.msra.mxu0 %v3067_v4  ;;  %v3889_v4 = vpack.c.bf16 %v1833_v3, %v1831_v2  ;;  %v4009_v2 = vpack.c.bf16 %v1852_v61, %v1850_v58  ;;  %v1864_v58 = vld [vmem:[%s4396_s2 + $0x1f0] sm:$0xff] }
  0xc0   :  { %v4073_v61 = vpack.c.bf16 %v1864_v58, %v1862_v51 }
  0xc1   :  { %2583 = vmatpush1.bf16.msra.mxu1 %v3877_v0  ;;  %4444 = vst [vmem:[#allocation15_spill] sm:$0xff] %v3889_v4  ;;  %4455 = vst [vmem:[#allocation26_spill] sm:$0xff] %v4009_v2 }
  0xc2   :  { %1594 = vmatmul.mubr.bf16.vlgmr.msra.gmra.mrb[0].mxu0 %v3070_v5  ;;  %v1830_v5 = vld [vmem:[%s4396_s2 + $0xe0] sm:$0xff]  ;;  %2585 = vmatprep.subr.bf16.mxu1 %v3889_v4  ;;  %4461 = vst [vmem:[#allocation32_spill] sm:$0xff] %v4073_v61 }
  0xc3   :  { %1603 = vmatprep.mubr.bf16.mxu0 %v3074_v6  ;;  %v1832_v6 = vld [vmem:[%s4396_s2 + $0xf0] sm:$0xff] }
  0xc4   :  { %v3897_v7 = vpack.c.bf16 %v1832_v6, %v1830_v5  ;;  %v1855_v5 = vld [vmem:[%s4396_s2 + $0x1a8] sm:$0xff]  ;;  %v1857_v6 = vld [vmem:[%s4396_s2 + $0x1b8] sm:$0xff] }
  0xc6   :  { %4445 = vst [vmem:[#allocation16_spill] sm:$0xff] %v3897_v7  ;;  %2587 = vmatpush1.bf16.msra.mxu1 %v3897_v7 }
  0xca   :  { %1604 = vmatmul.mubr.bf16.gmra.mrb[4].mxu0 %v3077_v8 }
  0xcb   :  { %1613 = vmatprep.mubr.bf16.mxu0 %v3078_v9  ;;  %v1835_v9 = vld [vmem:[%s4396_s2 + $0x108] sm:$0xff] }
  0xd2   :  { %1614 = vmatmul.mubr.bf16.gmra.mrb[8].mxu0 %v3081_v10  ;;  %v1837_v10 = vld [vmem:[%s4396_s2 + $0x118] sm:$0xff] }
  0xd3   :  { %1623 = vmatprep.mubr.bf16.mxu0 %v3082_v11 }
  0xda   :  { %1624 = vmatmul.mubr.bf16.gmra.mrb[12].mxu0 %v3085_v12  ;;  %v3911_v12 = vpack.c.bf16 %v1837_v10, %v1835_v9  ;;  %v4021_v9 = vpack.c.bf16 %v1857_v6, %v1855_v5  ;;  %v1854_v10 = vld [vmem:[%s4396_s2 + $0x1a0] sm:$0xff] }
  0xdb   :  { %1633 = vmatprep.mubr.bf16.mxu0 %v3086_v13  ;;  %v1834_v13 = vld [vmem:[%s4396_s2 + $0x100] sm:$0xff] }
  0xdc   :  { %4446 = vst [vmem:[#allocation17_spill] sm:$0xff] %v3911_v12  ;;  %2589 = vmatprep.subr.bf16.mxu1 %v3911_v12  ;;  %4456 = vst [vmem:[#allocation27_spill] sm:$0xff] %v4021_v9 }
  0xe2   :  { %1634 = vmatmul.mubr.bf16.gmra.mrb[16].mxu0 %v3089_v14  ;;  %v1836_v14 = vld [vmem:[%s4396_s2 + $0x110] sm:$0xff] }
  0xe3   :  { %1643 = vmatprep.mubr.bf16.mxu0 %v3090_v15  ;;  %v3921_v16 = vpack.c.bf16 %v1836_v14, %v1834_v13  ;;  %v1856_v13 = vld [vmem:[%s4396_s2 + $0x1b0] sm:$0xff] }
  0xe4   :  { %v4029_v14 = vpack.c.bf16 %v1856_v13, %v1854_v10 }
  0xe5   :  { %4447 = vst [vmem:[#allocation18_spill] sm:$0xff] %v3921_v16  ;;  %2591 = vmatpush1.bf16.msra.mxu1 %v3921_v16 }
  0xe6   :  { %4457 = vst [vmem:[#allocation28_spill] sm:$0xff] %v4029_v14 }
  0xea   :  { %1644 = vmatmul.mubr.bf16.gmra.mrb[20].mxu0 %v3093_v17 }
  0xeb   :  { %1653 = vmatprep.mubr.bf16.mxu0 %v2384_v18  ;;  %v1839_v18 = vld [vmem:[%s4396_s2 + $0x128] sm:$0xff] }
  0xf2   :  { %1654 = vmatmul.mubr.bf16.gmra.mrb[24].mxu0 %v2383_v19  ;;  %v1841_v19 = vld [vmem:[%s4396_s2 + $0x138] sm:$0xff] }
  0xf3   :  { %v3933_v20 = vpack.c.bf16 %v1841_v19, %v1839_v18  ;;  %v1859_v19 = vld [vmem:[%s4396_s2 + $0x1c8] sm:$0xff] }
  0xf4   :  { %v4043_v27 = vpack.c.bf16 %v1861_v21, %v1859_v19 }
  0xf5   :  { %4448 = vst [vmem:[#allocation19_spill] sm:$0xff] %v3933_v20  ;;  %2593 = vmatprep.subr.bf16.mxu1 %v3933_v20 }
  0xf6   :  { %2595 = vmatpush1.bf16.msra.mxu1 %v3941_v24  ;;  %4458 = vst [vmem:[#allocation29_spill] sm:$0xff] %v4043_v27 }
  0xf7   :  { %2597 = vmatprep.subr.bf16.mxu1 %v3955_v32 }
  0xfa   :  { %2599 = vmatpush1.bf16.msra.mxu1 %v3965_v38 }
  0xfb   :  { %2601 = vmatprep.subr.bf16.mxu1 %v3977_v44 }
  0xfe   :  { %2603 = vmatpush1.bf16.msra.mxu1 %v3985_v48 }
  0xff   :  { %2605 = vmatprep.subr.bf16.mxu1 %v3999_v57 }
 0x102   :  { %2607 = vmatpush1.bf16.msra.mxu1 %v4009_v2 }
 0x103   :  { %2609 = vmatprep.subr.bf16.mxu1 %v4021_v9 }
 0x106   :  { %2611 = vmatpush1.bf16.msra.mxu1 %v4029_v14 }
 0x107   :  { %2613 = vmatprep.subr.bf16.mxu1 %v4043_v27 }
 0x10a   :  { %2615 = vmatpush1.bf16.msra.mxu1 %v4053_v41 }
 0x10b   :  { %2617 = vmatprep.subr.bf16.mxu1 %v4068_v53 }
 0x10e   :  { %2619 = vmatpush1.bf16.msra.mxu1 %v4073_v61 }
 0x10f   :  { %2621 = vmatprep.subr.bf16.mxu1 %v3755_v22 }
 0x11b   :  { %v3856_v56 = vpop.f32.mrb[0].mxu1 }
 0x11c   :  { %v3865_v59 = vpop.f32.mrb[1].mxu1 }
 0x11d   :  { %v3875_v63 = vpop.f32.mrb[2].mxu1 }
 0x11e   :  { %v3879_v1 = vpop.f32.mrb[3].mxu1 }
 0x123   :  { %v3900_v8 = vpop.f32.mrb[4].mxu1 }
 0x124   :  { %v3909_v11 = vpop.f32.mrb[5].mxu1 }
 0x125   :  { %v3919_v15 = vpop.f32.mrb[6].mxu1 }
 0x126   :  { %v3923_v17 = vpop.f32.mrb[7].mxu1 }
 0x12b   :  { %v3944_v26 = vpop.f32.mrb[8].mxu1 }
 0x12c   :  { %v3953_v30 = vpop.f32.mrb[9].mxu1 }
 0x12d   :  { %v3963_v36 = vpop.f32.mrb[10].mxu1 }
 0x12e   :  { %v3967_v39 = vpop.f32.mrb[11].mxu1 }
 0x133   :  { %v3988_v50 = vpop.f32.mrb[12].mxu1 }
 0x134   :  { %v3997_v54 = vpop.f32.mrb[13].mxu1 }
 0x135   :  { %v4007_v62 = vpop.f32.mrb[14].mxu1 }
 0x136   :  { %v4011_v3 = vpop.f32.mrb[15].mxu1 }
 0x13b   :  { %v4032_v18 = vpop.f32.mrb[16].mxu1 }
 0x13c   :  { %v4041_v23 = vpop.f32.mrb[17].mxu1 }
 0x13d   :  { %v4051_v35 = vpop.f32.mrb[18].mxu1 }
 0x13e   :  { %v4055_v42 = vpop.f32.mrb[19].mxu1 }
 0x143   :  { %v4076_v5 = vpop.f32.mrb[20].mxu1 }
 0x144   :  { %v4079_v6 = vpop.f32.mrb[21].mxu1 }
 0x145   :  { %v4082_v10 = vpop.f32.mrb[22].mxu1 }
 0x146   :  { %v4084_v13 = vpop.f32.mrb[23].mxu1 }
 0x14b   :  { %v4086_v19 = vpop.f32.mrb[24].mxu1 }
 0x14c   :  { %v4088_v21 = vpop.f32.mrb[25].mxu1 }
 0x14d   :  { %v1356_v29 = vpop.f32.mrb[26].mxu1 }
 0x14e   :  { %v1357_v33 = vpop.f32.mrb[27].mxu1 }
 0x153   :  { %v1696_v45 = vpop.f32.mrb[28].mxu1 }
 0x154   :  { %v1698_v47 = vpop.f32.mrb[29].mxu1 }
 0x155   :  { %v1700_v51 = vpop.f32.mrb[30].mxu1 }
 0x156   :  { %v1702_v58 = vpop.f32.mrb[31].mxu1 }
 0x15b   :  { %v1706_v53 = vpop.f32.mrb[32].mxu1 }
 0x15c   :  { %v1708_v61 = vpop.f32.mrb[33].mxu1 }
 0x15d   :  { %v1710_v41 = vpop.f32.mrb[34].mxu1 }
 0x15e   :  { %v1712_v27 = vpop.f32.mrb[35].mxu1 }
 0x163   :  { %v1716_v14 = vpop.f32.mrb[36].mxu1 }
 0x164   :  { %v1718_v22 = vpop.f32.mrb[37].mxu1 }
 0x165   :  { %v1720_v9 = vpop.f32.mrb[38].mxu1 }
 0x166   :  { %v1722_v2 = vpop.f32.mrb[39].mxu1 }
 0x16b   :  { %v4090_v57 = vpop.f32.mrb[40].mxu1 }
 0x16c   :  { %v4092_v48 = vpop.f32.mrb[41].mxu1 }
 0x16d   :  { %v4094_v44 = vpop.f32.mrb[42].mxu1 }
 0x16e   :  { %v4096_v29 = vpop.f32.mrb[43].mxu1 }
 0x173   :  { %v4098_v33 = vpop.f32.mrb[44].mxu1 }
 0x174   :  { %v4100_v38 = vpop.f32.mrb[45].mxu1 }
 0x175   :  { %v4102_v32 = vpop.f32.mrb[46].mxu1 }
 0x176   :  { %v4104_v24 = vpop.f32.mrb[47].mxu1 }
 0x17b   :  { %v4106_v20 = vpop.f32.mrb[48].mxu1 }
 0x17c   :  { %v4108_v16 = vpop.f32.mrb[49].mxu1 }
 0x17d   :  { %v4110_v12 = vpop.f32.mrb[50].mxu1 }
 0x17e   :  { %v4112_v7 = vpop.f32.mrb[51].mxu1 }
 0x183   :  { %v4116_v49 = vpop.f32.mrb[52].mxu1 }
 0x184   :  { %v4121_v37 = vpop.f32.mrb[53].mxu1 }
 0x185   :  { %4462 = vst [vmem:[#allocation33_spill] sm:$0xff] %v4121_v37  ;;  %v1760_v28 = vpop.f32.mrb[54].mxu1 }
 0x195   :  { %v1595_v4 = vpop.f32.mrb[0].mxu0 }
 0x196   :  { %v2684_v0 = vadd.f32 %v1595_v4, %v3856_v56  ;;  %v1597_v60 = vpop.f32.mrb[1].mxu0  ;;  %v1761_v56 = vpop.f32.mrb[55].mxu1 }
 0x197   :  { %v2686_v55 = vadd.f32 %v1597_v60, %v3865_v59  ;;  %v1599_v52 = vpop.f32.mrb[2].mxu0 }
 0x198   :  { %v4118_v46 = vadd.f32 %v2684_v0, %v1696_v45  ;;  %v2688_v43 = vadd.f32 %v1599_v52, %v3875_v63  ;;  %v1601_v40 = vpop.f32.mrb[3].mxu0 }
 0x199   :  { %v4123_v34 = vadd.f32 %v2686_v55, %v1698_v47  ;;  %v2690_v31 = vadd.f32 %v1601_v40, %v3879_v1 }
 0x19a   :  { %v4126_v25 = vadd.f32 %v2688_v43, %v1700_v51 }
 0x19b   :  { %v4128_v4 = vadd.f32 %v2690_v31, %v1702_v58 }
 0x19d   :  { %v1605_v59 = vpop.f32.mrb[4].mxu0 }
 0x19e   :  { %v2692_v60 = vadd.f32 %v1605_v59, %v3900_v8  ;;  %v1607_v0 = vpop.f32.mrb[5].mxu0 }
 0x19f   :  { %v2694_v45 = vadd.f32 %v1607_v0, %v3909_v11  ;;  %v1609_v52 = vpop.f32.mrb[6].mxu0 }
 0x1a0   :  { %v4132_v63 = vadd.f32 %v2692_v60, %v1706_v53  ;;  %v2696_v55 = vadd.f32 %v1609_v52, %v3919_v15  ;;  %v1611_v47 = vpop.f32.mrb[7].mxu0 }
 0x1a1   :  { %v4135_v37 = vadd.f32 %v2694_v45, %v1708_v61  ;;  %v2698_v28 = vadd.f32 %v1611_v47, %v3923_v17 }
 0x1a2   :  { %v4138_v40 = vadd.f32 %v2696_v55, %v1710_v41 }
 0x1a3   :  { %v4140_v31 = vadd.f32 %v2698_v28, %v1712_v27  ;;  %v1940_v27 = vmul.f32 %v4128_v4, %v4128_v4 }
 0x1a5   :  { %v1615_v43 = vpop.f32.mrb[8].mxu0  ;;  %v1944_v55 = vmul.f32 %v4140_v31, %v4140_v31 }
 0x1a6   :  { %v2700_v1 = vadd.f32 %v1615_v43, %v3944_v26  ;;  %v1617_v8 = vpop.f32.mrb[9].mxu0  ;;  %v1763_v26 = vadd.f32 %v4126_v25, %v4118_v46 }
 0x1a7   :  { %v2702_v11 = vadd.f32 %v1617_v8, %v3953_v30  ;;  %v1619_v51 = vpop.f32.mrb[10].mxu0  ;;  %v1938_v30 = vmul.f32 %v4123_v34, %v4123_v34 }
 0x1a8   :  { %v4144_v53 = vadd.f32 %v2700_v1, %v1716_v14  ;;  %v2704_v15 = vadd.f32 %v1619_v51, %v3963_v36  ;;  %v1621_v58 = vpop.f32.mrb[11].mxu0  ;;  %v1783_v36 = vadd.f32 %v4128_v4, %v4123_v34  ;;  %v1942_v14 = vmul.f32 %v4135_v37, %v4135_v37 }
 0x1a9   :  { %v4147_v61 = vadd.f32 %v2702_v11, %v1718_v22  ;;  %v2706_v17 = vadd.f32 %v1621_v58, %v3967_v39  ;;  %v1764_v39 = vadd.f32 %v4132_v63, %v1763_v26  ;;  %v1982_v59 = vadd.f32 %v1940_v27, %v1938_v30 }
 0x1aa   :  { %v4152_v41 = vadd.f32 %v2704_v15, %v1720_v9  ;;  %v1784_v9 = vadd.f32 %v4135_v37, %v1783_v36 }
 0x1ab   :  { %v4156_v56 = vadd.f32 %v2706_v17, %v1722_v2  ;;  %v1983_v52 = vadd.f32 %v1982_v59, %v1942_v14  ;;  %v1765_v1 = vadd.f32 %v4138_v40, %v1764_v39  ;;  %v1946_v11 = vmul.f32 %v4147_v61, %v4147_v61 }
 0x1ad   :  { %v1625_v22 = vpop.f32.mrb[12].mxu0  ;;  %v1984_v15 = vadd.f32 %v1983_v52, %v1944_v55 }
 0x1ae   :  { %v2708_v60 = vadd.f32 %v1625_v22, %v3988_v50  ;;  %v1627_v0 = vpop.f32.mrb[13].mxu0 }
 0x1af   :  { %v2710_v2 = vadd.f32 %v1627_v0, %v3997_v54  ;;  %v1629_v45 = vpop.f32.mrb[14].mxu0  ;;  %v1785_v54 = vadd.f32 %v4140_v31, %v1784_v9  ;;  %v1985_v17 = vadd.f32 %v1984_v15, %v1946_v11 }
 0x1b0   :  { %v4171_v47 = vadd.f32 %v2708_v60, %v4090_v57  ;;  %v2712_v28 = vadd.f32 %v1629_v45, %v4007_v62  ;;  %v1631_v43 = vpop.f32.mrb[15].mxu0  ;;  %v1766_v57 = vadd.f32 %v4144_v53, %v1765_v1 }
 0x1b1   :  { %v4176_v8 = vadd.f32 %v2710_v2, %v4092_v48  ;;  %v2714_v50 = vadd.f32 %v1631_v43, %v4011_v3  ;;  %v1786_v58 = vadd.f32 %v4147_v61, %v1785_v54  ;;  %v1948_v3 = vmul.f32 %v4156_v56, %v4156_v56 }
 0x1b2   :  { %v4183_v51 = vadd.f32 %v2712_v28, %v4094_v44  ;;  %v1767_v30 = vadd.f32 %v4152_v41, %v1766_v57 }
 0x1b3   :  { %v4187_v62 = vadd.f32 %v2714_v50, %v4096_v29  ;;  %v1787_v14 = vadd.f32 %v4156_v56, %v1786_v58  ;;  %v1950_v29 = vmul.f32 %v4176_v8, %v4176_v8 }
 0x1b4   :  { %v1768_v9 = vadd.f32 %v4171_v47, %v1767_v30 }
 0x1b5   :  { %v1635_v48 = vpop.f32.mrb[16].mxu0  ;;  %v1788_v0 = vadd.f32 %v4176_v8, %v1787_v14 }
 0x1b6   :  { %v2716_v27 = vadd.f32 %v1635_v48, %v4032_v18  ;;  %v1637_v26 = vpop.f32.mrb[17].mxu0  ;;  %v1769_v52 = vadd.f32 %v4183_v51, %v1768_v9 }
 0x1b7   :  { %v2718_v44 = vadd.f32 %v1637_v26, %v4041_v23  ;;  %v1639_v36 = vpop.f32.mrb[18].mxu0  ;;  %v1986_v23 = vadd.f32 %v1985_v17, %v1948_v3 }
 0x1b8   :  { %v4199_v39 = vadd.f32 %v2716_v27, %v4098_v33  ;;  %v2720_v22 = vadd.f32 %v1639_v36, %v4051_v35  ;;  %v1641_v59 = vpop.f32.mrb[19].mxu0  ;;  %v1952_v35 = vmul.f32 %v4187_v62, %v4187_v62 }
 0x1b9   :  { %v4204_v18 = vadd.f32 %v2718_v44, %v4100_v38  ;;  %v2722_v60 = vadd.f32 %v1641_v59, %v4055_v42  ;;  %v1987_v33 = vadd.f32 %v1986_v23, %v1950_v29  ;;  %v1789_v38 = vadd.f32 %v4187_v62, %v1788_v0 }
 0x1ba   :  { %v4209_v2 = vadd.f32 %v2720_v22, %v4102_v32  ;;  %v1770_v32 = vadd.f32 %v4199_v39, %v1769_v52 }
 0x1bb   :  { %v4212_v45 = vadd.f32 %v2722_v60, %v4104_v24  ;;  %v1954_v42 = vmul.f32 %v4204_v18, %v4204_v18  ;;  %v1988_v50 = vadd.f32 %v1987_v33, %v1952_v35  ;;  %v1790_v54 = vadd.f32 %v4204_v18, %v1789_v38  ;;  %v4463_v60 = vld [vmem:[#allocation33_spill] sm:$0xff] }
 0x1bc   :  { %v1771_v3 = vadd.f32 %v4209_v2, %v1770_v32 }
 0x1bd   :  { %v1645_v55 = vpop.f32.mrb[20].mxu0  ;;  %v1989_v48 = vadd.f32 %v1988_v50, %v1954_v42  ;;  %v1956_v17 = vmul.f32 %v4212_v45, %v4212_v45 }
 0x1be   :  { %v2724_v28 = vadd.f32 %v1645_v55, %v4076_v5  ;;  %v1647_v43 = vpop.f32.mrb[21].mxu0 }
 0x1bf   :  { %v2726_v24 = vadd.f32 %v1647_v43, %v4079_v6  ;;  %v1649_v1 = vpop.f32.mrb[22].mxu0  ;;  %v1990_v26 = vadd.f32 %v1989_v48, %v1956_v17 }
 0x1c0   :  { %v4225_v11 = vadd.f32 %v2724_v28, %v4106_v20  ;;  %v2728_v57 = vadd.f32 %v1649_v1, %v4082_v10  ;;  %v1651_v15 = vpop.f32.mrb[23].mxu0  ;;  %v1791_v10 = vadd.f32 %v4212_v45, %v1790_v54 }
 0x1c1   :  { %v4229_v58 = vadd.f32 %v2726_v24, %v4108_v16  ;;  %v2730_v5 = vadd.f32 %v1651_v15, %v4084_v13 }
 0x1c2   :  { %v4235_v6 = vadd.f32 %v2728_v57, %v4110_v12  ;;  %v1772_v27 = vadd.f32 %v4225_v11, %v1771_v3 }
 0x1c3   :  { %v4239_v20 = vadd.f32 %v2730_v5, %v4112_v7  ;;  %v1958_v16 = vmul.f32 %v4229_v58, %v4229_v58  ;;  %v1792_v30 = vadd.f32 %v4229_v58, %v1791_v10 }
 0x1c4   :  { %v1773_v9 = vadd.f32 %v4235_v6, %v1772_v27 }
 0x1c5   :  { %v1655_v13 = vpop.f32.mrb[24].mxu0  ;;  %v1991_v7 = vadd.f32 %v1990_v26, %v1958_v16  ;;  %v1960_v29 = vmul.f32 %v4239_v20, %v4239_v20  ;;  %v4464_v26 = vld [vmem:[#allocation2_spill] sm:$0xff] }
 0x1c6   :  { %v2732_v44 = vadd.f32 %v1655_v13, %v4086_v19  ;;  %v1657_v12 = vpop.f32.mrb[25].mxu0  ;;  %v1793_v19 = vadd.f32 %v4239_v20, %v1792_v30  ;;  %v1939_v30 = vmul.f32 %v4126_v25, %v4126_v25 }
 0x1c7   :  { %v2734_v36 = vadd.f32 %v1657_v12, %v4088_v21  ;;  %v1659_v14 = vpop.f32.mrb[26].mxu0  ;;  %v1937_v12 = vmul.f32 %v4118_v46, %v4118_v46 }
 0x1c8   :  { %v4251_v22 = vadd.f32 %v2732_v44, %v4116_v49  ;;  %v1660_v59 = vpop.f32.mrb[27].mxu0  ;;  %v1992_v49 = vadd.f32 %v1991_v7, %v1960_v29  ;;  %v4465_v44 = vld [vmem:[#allocation3_spill] sm:$0xff]  ;;  %v4466_v14 = vld [vmem:[#allocation4_spill] sm:$0xff]  ;;  %v4467_v29 = vld [vmem:[#allocation5_spill] sm:$0xff] }
 0x1c9   :  { %v4255_v23 = vadd.f32 %v2734_v36, %v4463_v60  ;;  %v1941_v36 = vmul.f32 %v4132_v63, %v4132_v63  ;;  %v1963_v7 = vadd.f32 %v1939_v30, %v1937_v12  ;;  %v4468_v60 = vld [vmem:[#allocation6_spill] sm:$0xff] }
 0x1ca   :  { %v1775_v0 = vsel %vm1774_vm0, %v4251_v22, 0.0  ;;  %v4480_v30 = vld [vmem:[#allocation18_spill] sm:$0xff] }
 0x1cb   :  { %v1776_v21 = vadd.f32 %v1775_v0, %v1773_v9  ;;  %v1794_v33 = vsel %vm1774_vm0, %v4255_v23, 0.0  ;;  %v1962_v35 = vmul.f32 %v4255_v23, %v4255_v23  ;;  %v1964_v59 = vadd.f32 %v1963_v7, %v1941_v36  ;;  %v4469_v0 = vld [vmem:[#allocation7_spill] sm:$0xff] }
 0x1cc   :  { %v1795_v52 = vadd.f32 %v1794_v33, %v1793_v19  ;;  %v1943_v9 = vmul.f32 %v4138_v40, %v4138_v40  ;;  %v1945_v19 = vmul.f32 %v4144_v53, %v4144_v53  ;;  %v4470_v33 = vld [vmem:[#allocation8_spill] sm:$0xff] }
 0x1cd   :  { %v1777_v55 = vrot.slane %v1776_v21, 4  ;;  %v1993_v38 = vsel %vm1774_vm0, %v1962_v35, 0.0 }
 0x1ce   :  { %v1796_v42 = vrot.slane %v1795_v52, 4  ;;  %v1994_v28 = vadd.f32 %v1993_v38, %v1992_v49  ;;  %v1947_v49 = vmul.f32 %v4152_v41, %v4152_v41  ;;  %v4472_v38 = vld [vmem:[#allocation10_spill] sm:$0xff] }
 0x1cf   :  { %v1778_v43 = vadd.f32 %v1777_v55, %v1776_v21  ;;  %v1965_v21 = vadd.f32 %v1964_v59, %v1943_v9  ;;  %v1949_v55 = vmul.f32 %v4171_v47, %v4171_v47  ;;  %v4484_v59 = vld [vmem:[#allocation22_spill] sm:$0xff] }
 0x1d0   :  { %v1797_v32 = vadd.f32 %v1796_v42, %v1795_v52  ;;  %v1995_v24 = vrot.slane %v1994_v28, 4  ;;  %v4471_v52 = vld [vmem:[#allocation9_spill] sm:$0xff] }
 0x1d1   :  { %v1779_v1 = vrot.slane %v1778_v43, 2  ;;  %v1966_v35 = vadd.f32 %v1965_v21, %v1945_v19  ;;  %v4486_v19 = vld [vmem:[#allocation24_spill] sm:$0xff] }
 0x1d2   :  { %v1798_v50 = vrot.slane %v1797_v32, 2  ;;  %v1996_v54 = vadd.f32 %v1995_v24, %v1994_v28  ;;  %v4473_v28 = vld [vmem:[#allocation11_spill] sm:$0xff]  ;;  %v4474_v24 = vld [vmem:[#allocation12_spill] sm:$0xff] }
 0x1d3   :  { %v1780_v57 = vadd.f32 %v1779_v1, %v1778_v43  ;;  %v1967_v42 = vadd.f32 %v1966_v35, %v1947_v49  ;;  %v1953_v1 = vmul.f32 %v4199_v39, %v4199_v39  ;;  %v4489_v35 = vld [vmem:[#allocation27_spill] sm:$0xff] }
 0x1d4   :  { %v1799_v15 = vadd.f32 %v1798_v50, %v1797_v32  ;;  %v1997_v5 = vrot.slane %v1996_v54, 2  ;;  %v1951_v32 = vmul.f32 %v4183_v51, %v4183_v51  ;;  %v4475_v50 = vld [vmem:[#allocation13_spill] sm:$0xff] }
 0x1d5   :  { %v1781_v48 = vrot.slane %v1780_v57, 1  ;;  %v1968_v43 = vadd.f32 %v1967_v42, %v1949_v55  ;;  %v4491_v55 = vld [vmem:[#allocation29_spill] sm:$0xff]  ;;  %v4492_v42 = vld [vmem:[#allocation30_spill] sm:$0xff] }
 0x1d6   :  { %v1800_v17 = vrot.slane %v1799_v15, 1  ;;  %v1998_v3 = vadd.f32 %v1997_v5, %v1996_v54  ;;  %v1955_v5 = vmul.f32 %v4209_v2, %v4209_v2 }
 0x1d7   :  { %v1782_v27 = vadd.f32 %v1781_v48, %v1780_v57  ;;  %v1969_v54 = vadd.f32 %v1968_v43, %v1951_v32  ;;  %v4476_v57 = vld [vmem:[#allocation14_spill] sm:$0xff]  ;;  %v4477_v48 = vld [vmem:[#allocation15_spill] sm:$0xff]  ;;  %v4494_v32 = vld [vmem:[#allocation32_spill] sm:$0xff] }
 0x1d8   :  { %v1801_v10 = vadd.f32 %v1800_v17, %v1799_v15  ;;  %v1999_v16 = vrot.slane %v1998_v3, 1  ;;  %v1957_v17 = vmul.f32 %v4225_v11, %v4225_v11 }
 0x1d9   :  { %v1970_v15 = vadd.f32 %v1969_v54, %v1953_v1 }
 0x1da   :  { %1930 = vmatprep.mubr.f32.mxu1 %v1801_v10  ;;  %v2000_v13 = vadd.f32 %v1999_v16, %v1998_v3  ;;  %v4478_v3 = vld [vmem:[#allocation16_spill] sm:$0xff]  ;;  %v4479_v16 = vld [vmem:[#allocation17_spill] sm:$0xff] }
 0x1db   :  { %1931 = vmatmul.mubr.f32.vlgmr.msra.gmra.mrb[56].mxu1 %v1782_v27  ;;  %v1971_v10 = vadd.f32 %v1970_v15, %v1955_v5  ;;  %v1961_v27 = vmul.f32 %v4251_v22, %v4251_v22 }
 0x1dc   :  { %2623 = vmatpush1.bf16.msra.mxu1 %v4464_v26  ;;  %2065 = vmatprep.mubr.f32.mxu1 %v2000_v13  ;;  %v1959_v26 = vmul.f32 %v4235_v6, %v4235_v6 }
 0x1dd   :  { %2625 = vmatprep.subr.bf16.mxu1 %v4465_v44  ;;  %v1972_v13 = vadd.f32 %v1971_v10, %v1957_v17  ;;  %v4481_v44 = vld [vmem:[#allocation19_spill] sm:$0xff]  ;;  %v1974_v12 = vsel %vm1774_vm0, %v1961_v27, 0.0 }
 0x1df   :  { %v1973_v36 = vadd.f32 %v1972_v13, %v1959_v26 }
 0x1e0   :  { %2627 = vmatpush1.bf16.msra.mxu1 %v4466_v14  ;;  %v4482_v14 = vld [vmem:[#allocation20_spill] sm:$0xff] }
 0x1e1   :  { %2629 = vmatprep.subr.bf16.mxu1 %v4467_v29  ;;  %v1975_v7 = vadd.f32 %v1974_v12, %v1973_v36  ;;  %v4483_v29 = vld [vmem:[#allocation21_spill] sm:$0xff]  ;;  %v2091_v12 = vlaneseq }
 0x1e3   :  { %v1976_v9 = vrot.slane %v1975_v7, 4 }
 0x1e4   :  { %2631 = vmatpush1.bf16.msra.mxu1 %v4468_v60  ;;  %v4485_v60 = vld [vmem:[#allocation23_spill] sm:$0xff] }
 0x1e5   :  { %2633 = vmatprep.subr.bf16.mxu1 %v4469_v0  ;;  %v4487_v0 = vld [vmem:[#allocation25_spill] sm:$0xff]  ;;  %v1977_v21 = vadd.f32 %v1976_v9, %v1975_v7 }
 0x1e7   :  { %v1978_v49 = vrot.slane %v1977_v21, 2 }
 0x1e8   :  { %2635 = vmatpush1.bf16.msra.mxu1 %v4470_v33  ;;  %v4488_v33 = vld [vmem:[#allocation26_spill] sm:$0xff] }
 0x1e9   :  { %2637 = vmatprep.subr.bf16.mxu1 %v4471_v52  ;;  %v4490_v52 = vld [vmem:[#allocation28_spill] sm:$0xff] }
 0x1ec   :  { %2639 = vmatpush1.bf16.msra.mxu1 %v4472_v38  ;;  %v1979_v38 = vadd.f32 %v1978_v49, %v1977_v21 }
 0x1ed   :  { %2641 = vmatprep.subr.bf16.mxu1 %v4473_v28  ;;  %v4493_v28 = vld [vmem:[#allocation31_spill] sm:$0xff] }
 0x1ee   :  { %v1980_v43 = vrot.slane %v1979_v38, 1 }
 0x1f0   :  { %2643 = vmatpush1.bf16.msra.mxu1 %v4474_v24  ;;  %v1981_v24 = vadd.f32 %v1980_v43, %v1979_v38 }
 0x1f1   :  { %2645 = vmatprep.subr.bf16.mxu1 %v4475_v50 }
 0x1f4   :  { %2647 = vmatpush1.bf16.msra.mxu1 %v4476_v57 }
 0x1f5   :  { %2649 = vmatprep.subr.bf16.mxu1 %v4477_v48 }
 0x1f8   :  { %2651 = vmatpush1.bf16.msra.mxu1 %v4478_v3 }
 0x1f9   :  { %2653 = vmatprep.subr.bf16.mxu1 %v4479_v16 }
 0x1fc   :  { %2655 = vmatpush1.bf16.msra.mxu1 %v4480_v30  ;;  %v3102_v30 = vmov 1966171168  }
 0x1fd   :  { %2657 = vmatprep.subr.bf16.mxu1 %v4481_v44  ;;  %v2089_v44 = vunpack.c.l.s4 %v3102_v30 }
 0x1ff   :  { %v2090_v36 = vunpack.c.0.s8 %v2089_v44 }
 0x200   :  { %2659 = vmatpush1.bf16.msra.mxu1 %v4482_v14  ;;  %v2092_v14 = vshrl.u32 %v2091_v12, 7 }
 0x201   :  { %2661 = vmatprep.subr.bf16.mxu1 %v4483_v29 }
 0x202   :  { %v2093_v29 = vsub.s32 %v2090_v36, %v2092_v14  ;;  %v2108_v21 = vsub.s32 0, %v2092_v14 }
 0x204   :  { %2663 = vmatpush1.bf16.msra.mxu1 %v4484_v59 }
 0x205   :  { %2665 = vmatprep.subr.bf16.mxu1 %v4485_v60 }
 0x208   :  { %2667 = vmatpush1.bf16.msra.mxu1 %v4486_v19  ;;  %v2080_v19 = vld [vmem:[%s4397_s3] sm:$0x3] }
 0x209   :  { %2669 = vmatprep.subr.bf16.mxu1 %v4487_v0 }
 0x20c   :  { %2671 = vmatpush1.bf16.msra.mxu1 %v4488_v33  ;;  %v2112_v33 = vsub.s32 1, %v2092_v14 }
 0x20d   :  { %2673 = vmatprep.subr.bf16.mxu1 %v4489_v35 }
 0x210   :  { %2675 = vmatpush1.bf16.msra.mxu1 %v4490_v52 }
 0x211   :  { %2677 = vmatprep.subr.bf16.mxu1 %v4491_v55 }
 0x214   :  { %2679 = vmatpush1.bf16.msra.mxu1 %v4492_v42 }
 0x215   :  { %2681 = vmatprep.subr.bf16.mxu1 %v4493_v28 }
 0x218   :  { %2683 = vmatpush1.bf16.msra.mxu1 %v4494_v32 }
 0x21b   :  { %2066 = vmatmul.mubr.f32.vlgmr.msra.gmra.mrb[58].mxu1 %v1981_v24  ;;  %v2104_v24 = vld [vmem:[%s4398_s4] sm:$0x3] }
 0x2ae   :  { %v1932_v1 = vpop.f32.mrb[56].mxu1 }
 0x2af   :  { %v1934_v50 = vpop.f32.mrb[57].mxu1  ;;  %v2072_v54 = vmul.f32 0.0025510204, %v1932_v1 }
 0x2b0   :  { %v2073_v57 = vmul.f32 0.0025510204, %v1934_v50 }
 0x2b1   :  { %v2076_v5 = vmul.f32 %v2072_v54, %v2072_v54 }
 0x2b2   :  { %v2077_v3 = vmul.f32 %v2073_v57, %v2073_v57 }
 0x2ee   :  { %v2067_v15 = vpop.f32.mrb[58].mxu1 }
 0x2ef   :  { %v2074_v48 = vmul.f32 0.0025510204, %v2067_v15  ;;  %v2069_v17 = vpop.f32.mrb[59].mxu1 }
 0x2f0   :  { %v2075_v10 = vmul.f32 0.0025510204, %v2069_v17 }
 0x2f1   :  { %v2078_v16 = vsub.f32 %v2074_v48, %v2076_v5 }
 0x2f2   :  { %v2079_v27 = vsub.f32 %v2075_v10, %v2077_v3 }
 0x2f3   :  { %v2081_v13 = vadd.f32 1e-05, %v2078_v16 }
 0x2f4   :  { %v2082_v26 = vadd.f32 1e-05, %v2079_v27 }
 0x2f5   :  { %3097 = vrsqrt.f32 %v2081_v13 }
 0x2f6   :  { %3099 = vrsqrt.f32 %v2082_v26 }
 0x2ff   :  { %v3098_v7 = vpop.eup %3097 }
 0x300   :  { %v3100_v59 = vpop.eup %3099 }
 0x301   :  { %v2087_v9 = vcombine.low %v3098_v7, %v3100_v59 }
 0x303   :  { %v2094_v60 = vrot.slane %v2087_v9, %v2093_v29 }
 0x305   :  { %v2101_v0 = vrot.slane %v2094_v60, %v2093_v29 }
 0x307   :  { %v2103_v35 = vmul.f32 %v2101_v0, %v2080_v19 }
 0x309   :  { %v2109_v49 = vrot.slane %v2103_v35, %v2108_v21  ;;  %v2113_v52 = vrot.slane %v2103_v35, %v2112_v33 }
 0x30b   :  { %v2116_v55 = vmul.f32 %v2109_v49, %v2072_v54  ;;  %v2117_v38 = vmul.f32 %v2113_v52, %v2073_v57  ;;  %v2137_v43 = vmul.f32 %v4118_v46, %v2109_v49  ;;  %v2138_v32 = vmul.f32 %v4123_v34, %v2113_v52 }
 0x30c   :  { %v2139_v1 = vmul.f32 %v4126_v25, %v2109_v49  ;;  %v2140_v50 = vmul.f32 %v4128_v4, %v2113_v52  ;;  %v2141_v15 = vmul.f32 %v4132_v63, %v2109_v49  ;;  %v2142_v5 = vmul.f32 %v4135_v37, %v2113_v52 }
 0x30d   :  { %v2120_v42 = vcombine.low %v2116_v55, %v2117_v38  ;;  %v2143_v57 = vmul.f32 %v4138_v40, %v2109_v49  ;;  %v2144_v48 = vmul.f32 %v4140_v31, %v2113_v52  ;;  %v2145_v46 = vmul.f32 %v4144_v53, %v2109_v49 }
 0x30e   :  { %v2146_v34 = vmul.f32 %v4147_v61, %v2113_v52  ;;  %v2147_v17 = vmul.f32 %v4152_v41, %v2109_v49  ;;  %v2148_v3 = vmul.f32 %v4156_v56, %v2113_v52  ;;  %v2149_v25 = vmul.f32 %v4171_v47, %v2109_v49 }
 0x30f   :  { %v2127_v28 = vrot.slane %v2120_v42, %v2093_v29  ;;  %v2150_v63 = vmul.f32 %v4176_v8, %v2113_v52  ;;  %v2151_v37 = vmul.f32 %v4183_v51, %v2109_v49  ;;  %v2152_v10 = vmul.f32 %v4187_v62, %v2113_v52 }
 0x310   :  { %v2153_v40 = vmul.f32 %v4199_v39, %v2109_v49  ;;  %v2154_v31 = vmul.f32 %v4204_v18, %v2113_v52  ;;  %v2155_v53 = vmul.f32 %v4209_v2, %v2109_v49  ;;  %v2156_v61 = vmul.f32 %v4212_v45, %v2113_v52 }
 0x311   :  { %v2134_v54 = vrot.slane %v2127_v28, %v2093_v29  ;;  %v2157_v41 = vmul.f32 %v4225_v11, %v2109_v49  ;;  %v2158_v56 = vmul.f32 %v4229_v58, %v2113_v52  ;;  %v2159_v8 = vmul.f32 %v4235_v6, %v2109_v49 }
 0x312   :  { %v2160_v51 = vmul.f32 %v4239_v20, %v2113_v52  ;;  %v2161_v62 = vmul.f32 %v4251_v22, %v2109_v49  ;;  %v2162_v39 = vmul.f32 %v4255_v23, %v2113_v52 }
 0x313   :  { %v2136_v4 = vsub.f32 %v2104_v24, %v2134_v54 }
 0x315   :  { %v2167_v47 = vrot.slane %v2136_v4, %v2108_v21  ;;  %v2171_v16 = vrot.slane %v2136_v4, %v2112_v33 }
 0x317   :  { %v2174_v27 = vadd.f32 %v2167_v47, %v2137_v43  ;;  %v2175_v18 = vadd.f32 %v2171_v16, %v2138_v32  ;;  %v2176_v13 = vadd.f32 %v2167_v47, %v2139_v1  ;;  %v2177_v2 = vadd.f32 %v2171_v16, %v2140_v50 }
 0x318   :  { %v2178_v26 = vadd.f32 %v2167_v47, %v2141_v15  ;;  %v2179_v45 = vadd.f32 %v2171_v16, %v2142_v5  ;;  %v2180_v30 = vadd.f32 %v2167_v47, %v2143_v57  ;;  %v2181_v11 = vadd.f32 %v2171_v16, %v2144_v48 }
 0x319   :  { %v2182_v44 = vadd.f32 %v2167_v47, %v2145_v46  ;;  %v2183_v58 = vadd.f32 %v2171_v16, %v2146_v34  ;;  %v2184_v12 = vadd.f32 %v2167_v47, %v2147_v17  ;;  %v2185_v36 = vadd.f32 %v2171_v16, %v2148_v3 }
 0x31a   :  { %v2186_v14 = vadd.f32 %v2167_v47, %v2149_v25  ;;  %v2187_v6 = vadd.f32 %v2171_v16, %v2150_v63  ;;  %v2188_v7 = vadd.f32 %v2167_v47, %v2151_v37  ;;  %v2189_v20 = vadd.f32 %v2171_v16, %v2152_v10 }
 0x31b   :  { %v2190_v29 = vadd.f32 %v2167_v47, %v2153_v40  ;;  %v2191_v22 = vadd.f32 %v2171_v16, %v2154_v31  ;;  %v2192_v59 = vadd.f32 %v2167_v47, %v2155_v53  ;;  %v2193_v23 = vadd.f32 %v2171_v16, %v2156_v61 }
 0x31c   :  { %v2194_v9 = vadd.f32 %v2167_v47, %v2157_v41  ;;  %v2195_v60 = vadd.f32 %v2171_v16, %v2158_v56  ;;  %v2196_v19 = vadd.f32 %v2167_v47, %v2159_v8  ;;  %v2197_v0 = vadd.f32 %v2171_v16, %v2160_v51 }
 0x31d   :  { %v2198_v21 = vadd.f32 %v2167_v47, %v2161_v62  ;;  %v2199_v33 = vadd.f32 %v2171_v16, %v2162_v39  ;;  %v2200_v35 = vmax.f32 %v2174_v27, 0.0  ;;  %v2201_v49 = vmax.f32 %v2175_v18, 0.0 }
 0x31e   :  { %v2202_v52 = vmax.f32 %v2176_v13, 0.0  ;;  %v2203_v55 = vmax.f32 %v2177_v2, 0.0  ;;  %v2204_v38 = vmax.f32 %v2178_v26, 0.0  ;;  %v2205_v42 = vmax.f32 %v2179_v45, 0.0 }
 0x31f   :  { %v2206_v28 = vmax.f32 %v2180_v30, 0.0  ;;  %v2207_v43 = vmax.f32 %v2181_v11, 0.0  ;;  %v2208_v32 = vmax.f32 %v2182_v44, 0.0  ;;  %v2209_v24 = vmax.f32 %v2183_v58, 0.0 }
 0x320   :  { %v2210_v1 = vmax.f32 %v2184_v12, 0.0  ;;  %v2211_v50 = vmax.f32 %v2185_v36, 0.0  ;;  %v2212_v15 = vmax.f32 %v2186_v14, 0.0  ;;  %v2213_v5 = vmax.f32 %v2187_v6, 0.0 }
 0x321   :  { %v2214_v54 = vmax.f32 %v2188_v7, 0.0  ;;  %v2215_v57 = vmax.f32 %v2189_v20, 0.0  ;;  %v2216_v48 = vmax.f32 %v2190_v29, 0.0  ;;  %v2217_v46 = vmax.f32 %v2191_v22, 0.0 }
 0x322   :  { %v2218_v34 = vmax.f32 %v2192_v59, 0.0  ;;  %v2219_v17 = vmax.f32 %v2193_v23, 0.0  ;;  %v2220_v3 = vmax.f32 %v2194_v9, 0.0  ;;  %v2221_v25 = vmax.f32 %v2195_v60, 0.0 }
 0x323   :  { %v2222_v4 = vmax.f32 %v2196_v19, 0.0  ;;  %v2223_v63 = vmax.f32 %v2197_v0, 0.0  ;;  %v2224_v37 = vmax.f32 %v2198_v21, 0.0  ;;  %v2225_v10 = vmax.f32 %v2199_v33, 0.0 }
 0x324   :  { %v2543_v40 = vpack.c.bf16 %v2201_v49, %v2200_v35  ;;  %v2544_v31 = vpack.c.bf16 %v2203_v55, %v2202_v52  ;;  %v2545_v53 = vpack.c.bf16 %v2205_v42, %v2204_v38  ;;  %v2546_v61 = vpack.c.bf16 %v2207_v43, %v2206_v28 }
 0x325   :  { %v2547_v41 = vpack.c.bf16 %v2209_v24, %v2208_v32  ;;  %v2548_v56 = vpack.c.bf16 %v2211_v50, %v2210_v1  ;;  %v2549_v47 = vpack.c.bf16 %v2213_v5, %v2212_v15  ;;  %v2550_v16 = vpack.c.bf16 %v2215_v57, %v2214_v54 }
 0x326   :  { %v2551_v8 = vpack.c.bf16 %v2217_v46, %v2216_v48  ;;  %v2552_v51 = vpack.c.bf16 %v2219_v17, %v2218_v34  ;;  %v2553_v62 = vpack.c.bf16 %v2221_v25, %v2220_v3  ;;  %v2554_v39 = vpack.c.bf16 %v2223_v63, %v2222_v4  ;;  %2306 = vst [vmem:[%s4399_s5] sm:$0xff] %v2543_v40 }
 0x327   :  { %2307 = vst [vmem:[%s4399_s5 + $0x8] sm:$0xff] %v2544_v31  ;;  %2308 = vst [vmem:[%s4399_s5 + $0x10] sm:$0xff] %v2545_v53  ;;  %v2555_v27 = vpack.c.bf16 %v2225_v10, %v2224_v37 }
 0x328   :  { %2309 = vst [vmem:[%s4399_s5 + $0x18] sm:$0xff] %v2546_v61  ;;  %2310 = vst [vmem:[%s4399_s5 + $0x20] sm:$0xff] %v2547_v41 }
 0x329   :  { %2311 = vst [vmem:[%s4399_s5 + $0x28] sm:$0xff] %v2548_v56  ;;  %2312 = vst [vmem:[%s4399_s5 + $0x30] sm:$0xff] %v2549_v47 }
 0x32a   :  { %2313 = vst [vmem:[%s4399_s5 + $0x38] sm:$0xff] %v2550_v16  ;;  %2314 = vst [vmem:[%s4399_s5 + $0x40] sm:$0xff] %v2551_v8 }
 0x32b   :  { %2315 = vst [vmem:[%s4399_s5 + $0x48] sm:$0xff] %v2552_v51  ;;  %2316 = vst [vmem:[%s4399_s5 + $0x50] sm:$0xff] %v2553_v62 }
 0x32c   :  { %2317 = vst [vmem:[%s4399_s5 + $0x58] sm:$0xff] %v2554_v39  ;;  %2318 = vst [vmem:[%s4399_s5 + $0x60] sm:$0x11] %v2555_v27 }

// kernel: cgan_generator_forward.4
= control target key start
LH: loop header
LB: loop body
LE: loop exit
PB: predicated region body
PF: predicated region fallthrough
CT: control target
= control target key end

     0   :  { %8 = vsyncpa [#allocation3], 0  ;;  %s16378_s0 = inlined_call_operand.vmem [shape: bf16[2,208], index: 0, kind: input, shape index: {}]   ;;  %s16379_s1 = inlined_call_operand.hbm [shape: bf16[208,12936], index: 1, kind: input, shape index: {}]   ;;  %s16380_s2 = inlined_call_operand.hbm [shape: f32[1,12936], index: 2, kind: input, shape index: {}]   ;;  %s16381_s3 = inlined_call_operand.vmem [shape: bf16[2,12936], index: 3, kind: output, shape index: {}]  }
   0x1   :  { %9 = vsyncpa [#allocation5], 0  ;;  %s15217_s12 = smov [#allocation2]   ;;  %s15169_s16 = scalar_lea.hbm %s16379_s1, 169728 }
   0x2   :  { %s17_s13 = sshll.u32 %s15217_s12, 4  ;;  %p15170_p0 = scmp.ne.s32.totalorder %s16379_s1, %s15169_s16  ;;  %s18_s13 = int_to_ptr.vmem [resolvable:$true] %s17_s13 }
   0x3   :  { %p15173_p1 = scmp.lt.u32.totalorder %s15169_s16, %s16379_s1 }
   0x5   :  { %p15175_p2 = pnand %p15173_p1, %p15170_p0 }
   0x7   :  { %15178 = shalt.err (!%p15175_p2)
}
   0x8   :  { %s15179_s21 = scalar_lea.vmem %s18_s13, 169728  ;;  %p15184_p4 = scmp.lt.s32.totalorder %s18_s13, %s18_s13 }
   0x9   :  { %p15180_p3 = scmp.ne.s32.totalorder %s18_s13, %s15179_s21  ;;  %p15185_p5 = scmp.lt.s32.totalorder %s15179_s21, %s15179_s21 }
   0xb   :  { %p15186_p6 = por %p15185_p5, %p15184_p4 }
   0xd   :  { %p15187_p7 = pnand %p15186_p6, %p15180_p3 }
   0xf   :  { %15190 = shalt.err (!%p15187_p7)
}
  0x10   :  { %s15218_s22 = smov 6528   ;;  %s15219_s23 = smov 408  }
  0x11   :  { %23 = dma.hbm_to_vmem [thread:$0]  %s16379_s1, 169728, %s18_s13, [#allocation3], %s15218_s22, %s15218_s22, %s15219_s23  }
  0x12   :  { %s15220_s26 = smov [#allocation4]   ;;  %s15191_s30 = scalar_lea.hbm %s16380_s2, 1632 }
  0x13   :  { %s30_s27 = sshll.u32 %s15220_s26, 4  ;;  %p15192_p8 = scmp.ne.s32.totalorder %s16380_s2, %s15191_s30  ;;  %s31_s27 = int_to_ptr.vmem [resolvable:$true] %s30_s27 }
  0x14   :  { %p15195_p9 = scmp.lt.u32.totalorder %s15191_s30, %s16380_s2 }
  0x16   :  { %p15197_p10 = pnand %p15195_p9, %p15192_p8 }
  0x18   :  { %15200 = shalt.err (!%p15197_p10)
}
  0x19   :  { %s15201_s8 = scalar_lea.vmem %s31_s27, 1632  ;;  %p15206_p12 = scmp.lt.s32.totalorder %s31_s27, %s31_s27 }
  0x1a   :  { %p15202_p11 = scmp.ne.s32.totalorder %s31_s27, %s15201_s8  ;;  %p15207_p13 = scmp.lt.s32.totalorder %s15201_s8, %s15201_s8 }
  0x1c   :  { %p15208_p0 = por %p15207_p13, %p15206_p12 }
  0x1e   :  { %p15209_p1 = pnand %p15208_p0, %p15202_p11 }
  0x20   :  { %15212 = shalt.err (!%p15209_p1)
}
  0x21   :  { %33 = dma.hbm_to_vmem [thread:$0]  %s16380_s2, 1632, %s31_s27, [#allocation5]  }
  0x22   :  { %15213 = dma.done.wait [#allocation3], 169728  }
  0x23   :  { %15214 = vsyncadd [#allocation3], 4294797568 }
  0x24   :  { %15215 = dma.done.wait [#allocation5], 1632  }
  0x25   :  { %15216 = vsyncadd [#allocation5], 4294965664  ;;  %v13180_v0 = vld [vmem:[#allocation2 + $0x4] ss:$408 sps:$4 sm:$0xff]   ;;  %v13184_v2 = vld [vmem:[#allocation2] ss:$408 sps:$4 sm:$0xff]   ;;  %v1380_v32 = vlaneseq }
  0x26   :  { %v13182_v1 = vld [vmem:[#allocation2 + $0xc] ss:$408 sps:$4 sm:$0xff]   ;;  %8026 = vmatprep.subr.bf16.mxu0 %v13180_v0  ;;  %v13185_v3 = vld [vmem:[#allocation2 + $0x8] ss:$408 sps:$4 sm:$0xff]   ;;  %v13188_v5 = vld [vmem:[#allocation2 + $0x33c] ss:$408 sps:$4 sm:$0xff]  }
  0x27   :  { %8067 = vmatprep.subr.bf16.mxu1 %v13182_v1  ;;  %v13186_v4 = vld [vmem:[#allocation2 + $0x334] ss:$408 sps:$4 sm:$0xff]   ;;  %8027 = vmatpush1.bf16.msra.mxu0 %v13184_v2  ;;  %v13190_v6 = vld [vmem:[#allocation2 + $0x330] ss:$408 sps:$4 sm:$0xff]   ;;  %v13192_v8 = vld [vmem:[#allocation2 + $0x664] ss:$408 sps:$4 sm:$0xff]  }
  0x28   :  { %8068 = vmatpush1.bf16.msra.mxu1 %v13185_v3  ;;  %8028 = vmatprep.subr.bf16.mxu0 %v13186_v4  ;;  %v13191_v7 = vld [vmem:[#allocation2 + $0x338] ss:$408 sps:$4 sm:$0xff]   ;;  %v13194_v9 = vld [vmem:[#allocation2 + $0x66c] ss:$408 sps:$4 sm:$0xff]   ;;  %v13197_v11 = vld [vmem:[#allocation2 + $0x668] ss:$408 sps:$4 sm:$0xff]  }
  0x29   :  { %8069 = vmatprep.subr.bf16.mxu1 %v13188_v5  ;;  %v13196_v10 = vld [vmem:[#allocation2 + $0x660] ss:$408 sps:$4 sm:$0xff]   ;;  %v13198_v12 = vld [vmem:[#allocation2 + $0x994] ss:$408 sps:$4 sm:$0xff]   ;;  %v13202_v14 = vld [vmem:[#allocation2 + $0x990] ss:$408 sps:$4 sm:$0xff]  }
  0x2a   :  { %v13200_v13 = vld [vmem:[#allocation2 + $0x99c] ss:$408 sps:$4 sm:$0xff]   ;;  %v13203_v15 = vld [vmem:[#allocation2 + $0x998] ss:$408 sps:$4 sm:$0xff]   ;;  %v13206_v17 = vld [vmem:[#allocation2 + $0xccc] ss:$408 sps:$4 sm:$0xff]  }
  0x2b   :  { %8029 = vmatpush1.bf16.msra.mxu0 %v13190_v6  ;;  %v13204_v16 = vld [vmem:[#allocation2 + $0xcc4] ss:$408 sps:$4 sm:$0xff]   ;;  %v13208_v18 = vld [vmem:[#allocation2 + $0xcc0] ss:$408 sps:$4 sm:$0xff]   ;;  %v13210_v20 = vld [vmem:[#allocation2 + $0xff4] ss:$408 sps:$4 sm:$0xff]  }
  0x2c   :  { %8070 = vmatpush1.bf16.msra.mxu1 %v13191_v7  ;;  %8030 = vmatprep.subr.bf16.mxu0 %v13192_v8  ;;  %v13209_v19 = vld [vmem:[#allocation2 + $0xcc8] ss:$408 sps:$4 sm:$0xff]   ;;  %v13212_v21 = vld [vmem:[#allocation2 + $0xffc] ss:$408 sps:$4 sm:$0xff]   ;;  %v13215_v23 = vld [vmem:[#allocation2 + $0xff8] ss:$408 sps:$4 sm:$0xff]  }
  0x2d   :  { %8071 = vmatprep.subr.bf16.mxu1 %v13194_v9  ;;  %v13214_v22 = vld [vmem:[#allocation2 + $0xff0] ss:$408 sps:$4 sm:$0xff]   ;;  %v13216_v24 = vld [vmem:[#allocation2 + $0x1324] ss:$408 sps:$4 sm:$0xff]   ;;  %v13220_v26 = vld [vmem:[#allocation2 + $0x1320] ss:$408 sps:$4 sm:$0xff]  }
  0x2e   :  { %v13218_v25 = vld [vmem:[#allocation2 + $0x132c] ss:$408 sps:$4 sm:$0xff]   ;;  %v13221_v27 = vld [vmem:[#allocation2 + $0x1328] ss:$408 sps:$4 sm:$0xff]   ;;  %v13224_v29 = vld [vmem:[#allocation2 + $0x165c] ss:$408 sps:$4 sm:$0xff]  }
  0x2f   :  { %8031 = vmatpush1.bf16.msra.mxu0 %v13196_v10  ;;  %v13222_v28 = vld [vmem:[#allocation2 + $0x1654] ss:$408 sps:$4 sm:$0xff]   ;;  %v15221_v30 = vmov 1966171168   ;;  %v13226_v33 = vld [vmem:[#allocation2 + $0x1650] ss:$408 sps:$4 sm:$0xff]  }
  0x30   :  { %8072 = vmatpush1.bf16.msra.mxu1 %v13197_v11  ;;  %8032 = vmatprep.subr.bf16.mxu0 %v13198_v12  ;;  %v1378_v31 = vunpack.c.l.s4 %v15221_v30  ;;  %v13227_v34 = vld [vmem:[#allocation2 + $0x1658] ss:$408 sps:$4 sm:$0xff]   ;;  %v13228_v35 = vld [vmem:[#allocation2 + $0x1984] ss:$408 sps:$4 sm:$0xff]   ;;  %v15267_v38 = vshrl.u32 %v1380_v32, 7  ;;  %vm8022_vm0 = vcmask 654336  }
  0x31   :  { %8073 = vmatprep.subr.bf16.mxu1 %v13200_v13  ;;  %v13230_v36 = vld [vmem:[#allocation2 + $0x198c] ss:$408 sps:$4 sm:$0xff]   ;;  %v13232_v39 = vld [vmem:[#allocation2 + $0x1980] ss:$408 sps:$4 sm:$0xff]   ;;  %v13236_v42 = vld [vmem:[#allocation2 + $0x1cbc] ss:$408 sps:$4 sm:$0xff]  }
  0x32   :  { %v1379_v37 = vunpack.c.0.s8 %v1378_v31  ;;  %v13233_v40 = vld [vmem:[#allocation2 + $0x1988] ss:$408 sps:$4 sm:$0xff]   ;;  %v13234_v41 = vld [vmem:[#allocation2 + $0x1cb4] ss:$408 sps:$4 sm:$0xff]   ;;  %v13239_v46 = vld [vmem:[#allocation2 + $0x1cb8] ss:$408 sps:$4 sm:$0xff]  }
  0x33   :  { %8033 = vmatpush1.bf16.msra.mxu0 %v13202_v14  ;;  %v11745_v44 = vld.sshfl [vmem:[%s16378_s0] sm:$0x11 pattern:$0x75316420]  ;;  %v13238_v45 = vld [vmem:[#allocation2 + $0x1cb0] ss:$408 sps:$4 sm:$0xff]  }
  0x34   :  { %8074 = vmatpush1.bf16.msra.mxu1 %v13203_v15  ;;  %8034 = vmatprep.subr.bf16.mxu0 %v13204_v16  ;;  %v15270_v43 = vsub.s32 %v1379_v37, %v15267_v38  ;;  %v1376_v47 = vcombine.high %v11745_v44, %v11745_v44  ;;  %v13240_v48 = vld [vmem:[#allocation2 + $0x1fe4] ss:$408 sps:$4 sm:$0xff]   ;;  %v13244_v51 = vld [vmem:[#allocation2 + $0x1fe0] ss:$408 sps:$4 sm:$0xff]   ;;  %v13246_v53 = vld [vmem:[#allocation2 + $0x2314] ss:$408 sps:$4 sm:$0xff]  }
  0x35   :  { %8075 = vmatprep.subr.bf16.mxu1 %v13206_v17  ;;  %v13242_v49 = vld [vmem:[#allocation2 + $0x1fec] ss:$408 sps:$4 sm:$0xff]   ;;  %v13245_v52 = vld [vmem:[#allocation2 + $0x1fe8] ss:$408 sps:$4 sm:$0xff]   ;;  %v13248_v54 = vld [vmem:[#allocation2 + $0x231c] ss:$408 sps:$4 sm:$0xff]  }
  0x36   :  { %v15276_v50 = vrot.slane %v1376_v47, %v15270_v43  ;;  %v13250_v55 = vld [vmem:[#allocation2 + $0x2310] ss:$408 sps:$4 sm:$0xff]   ;;  %v13252_v57 = vld [vmem:[#allocation2 + $0x2644] ss:$408 sps:$4 sm:$0xff]   ;;  %v13256_v59 = vld [vmem:[#allocation2 + $0x2640] ss:$408 sps:$4 sm:$0xff]   ;;  %v15283_v63 = vrot.slane %v11745_v44, %v15270_v43 }
  0x37   :  { %8035 = vmatpush1.bf16.msra.mxu0 %v13208_v18  ;;  %v13251_v56 = vld [vmem:[#allocation2 + $0x2318] ss:$408 sps:$4 sm:$0xff]   ;;  %v13254_v58 = vld [vmem:[#allocation2 + $0x264c] ss:$408 sps:$4 sm:$0xff]   ;;  %v13257_v60 = vld [vmem:[#allocation2 + $0x2648] ss:$408 sps:$4 sm:$0xff]  }
  0x38   :  { %8076 = vmatpush1.bf16.msra.mxu1 %v13209_v19  ;;  %8036 = vmatprep.subr.bf16.mxu0 %v13210_v20  ;;  %v13260_v61 = vld [vmem:[#allocation2 + $0x14] ss:$408 sps:$4 sm:$0xff]   ;;  %v13258_v0 = vld [vmem:[#allocation2 + $0x10] ss:$408 sps:$4 sm:$0xff]   ;;  %v13266_v2 = vld [vmem:[#allocation2 + $0x344] ss:$408 sps:$4 sm:$0xff]  }
  0x39   :  { %8077 = vmatprep.subr.bf16.mxu1 %v13212_v21  ;;  %13072 = vmatprep.mubr.msk.bf16.mxu0 %vm8022_vm0, %v15276_v50  ;;  %v13263_v62 = vld [vmem:[#allocation2 + $0x1c] ss:$408 sps:$4 sm:$0xff]   ;;  %v13261_v1 = vld [vmem:[#allocation2 + $0x18] ss:$408 sps:$4 sm:$0xff]   ;;  %v13269_v3 = vld [vmem:[#allocation2 + $0x34c] ss:$408 sps:$4 sm:$0xff]  }
  0x3a   :  { %13073 = vmatprep.mubr.msk.bf16.mxu1 %vm8022_vm0, %v15276_v50  ;;  %v13264_v4 = vld [vmem:[#allocation2 + $0x340] ss:$408 sps:$4 sm:$0xff]   ;;  %v13272_v6 = vld [vmem:[#allocation2 + $0x674] ss:$408 sps:$4 sm:$0xff]   ;;  %v13270_v8 = vld [vmem:[#allocation2 + $0x670] ss:$408 sps:$4 sm:$0xff]  }
  0x3b   :  { %8037 = vmatpush1.bf16.msra.mxu0 %v13214_v22  ;;  %v13267_v5 = vld [vmem:[#allocation2 + $0x348] ss:$408 sps:$4 sm:$0xff]   ;;  %v13275_v7 = vld [vmem:[#allocation2 + $0x67c] ss:$408 sps:$4 sm:$0xff]   ;;  %v13273_v9 = vld [vmem:[#allocation2 + $0x678] ss:$408 sps:$4 sm:$0xff]  }
  0x3c   :  { %8078 = vmatpush1.bf16.msra.mxu1 %v13215_v23  ;;  %8038 = vmatprep.subr.bf16.mxu0 %v13216_v24  ;;  %v13278_v10 = vld [vmem:[#allocation2 + $0x9a4] ss:$408 sps:$4 sm:$0xff]   ;;  %v13276_v12 = vld [vmem:[#allocation2 + $0x9a0] ss:$408 sps:$4 sm:$0xff]   ;;  %v13284_v14 = vld [vmem:[#allocation2 + $0xcd4] ss:$408 sps:$4 sm:$0xff]  }
  0x3d   :  { %8079 = vmatprep.subr.bf16.mxu1 %v13218_v25  ;;  %v13281_v11 = vld [vmem:[#allocation2 + $0x9ac] ss:$408 sps:$4 sm:$0xff]   ;;  %v13279_v13 = vld [vmem:[#allocation2 + $0x9a8] ss:$408 sps:$4 sm:$0xff]   ;;  %v13287_v15 = vld [vmem:[#allocation2 + $0xcdc] ss:$408 sps:$4 sm:$0xff]  }
  0x3e   :  { %v13282_v16 = vld [vmem:[#allocation2 + $0xcd0] ss:$408 sps:$4 sm:$0xff]   ;;  %v13290_v18 = vld [vmem:[#allocation2 + $0x1004] ss:$408 sps:$4 sm:$0xff]   ;;  %v13288_v20 = vld [vmem:[#allocation2 + $0x1000] ss:$408 sps:$4 sm:$0xff]  }
  0x3f   :  { %8039 = vmatpush1.bf16.msra.mxu0 %v13220_v26  ;;  %v13285_v17 = vld [vmem:[#allocation2 + $0xcd8] ss:$408 sps:$4 sm:$0xff]   ;;  %v13293_v19 = vld [vmem:[#allocation2 + $0x100c] ss:$408 sps:$4 sm:$0xff]   ;;  %v13291_v21 = vld [vmem:[#allocation2 + $0x1008] ss:$408 sps:$4 sm:$0xff]  }
  0x40   :  { %8080 = vmatpush1.bf16.msra.mxu1 %v13221_v27  ;;  %8040 = vmatprep.subr.bf16.mxu0 %v13222_v28  ;;  %v13296_v22 = vld [vmem:[#allocation2 + $0x1334] ss:$408 sps:$4 sm:$0xff]   ;;  %v13294_v24 = vld [vmem:[#allocation2 + $0x1330] ss:$408 sps:$4 sm:$0xff]   ;;  %v13302_v26 = vld [vmem:[#allocation2 + $0x1664] ss:$408 sps:$4 sm:$0xff]  }
  0x41   :  { %8081 = vmatprep.subr.bf16.mxu1 %v13224_v29  ;;  %v13299_v23 = vld [vmem:[#allocation2 + $0x133c] ss:$408 sps:$4 sm:$0xff]   ;;  %v13297_v25 = vld [vmem:[#allocation2 + $0x1338] ss:$408 sps:$4 sm:$0xff]   ;;  %v13305_v27 = vld [vmem:[#allocation2 + $0x166c] ss:$408 sps:$4 sm:$0xff]  }
  0x42   :  { %v13300_v28 = vld [vmem:[#allocation2 + $0x1660] ss:$408 sps:$4 sm:$0xff]   ;;  %v13308_v30 = vld [vmem:[#allocation2 + $0x1994] ss:$408 sps:$4 sm:$0xff]   ;;  %v13306_v32 = vld [vmem:[#allocation2 + $0x1990] ss:$408 sps:$4 sm:$0xff]  }
  0x43   :  { %8041 = vmatpush1.bf16.msra.mxu0 %v13226_v33  ;;  %v13303_v29 = vld [vmem:[#allocation2 + $0x1668] ss:$408 sps:$4 sm:$0xff]   ;;  %v13311_v31 = vld [vmem:[#allocation2 + $0x199c] ss:$408 sps:$4 sm:$0xff]   ;;  %v13309_v33 = vld [vmem:[#allocation2 + $0x1998] ss:$408 sps:$4 sm:$0xff]  }
  0x44   :  { %8082 = vmatpush1.bf16.msra.mxu1 %v13227_v34  ;;  %8042 = vmatprep.subr.bf16.mxu0 %v13228_v35  ;;  %v13314_v34 = vld [vmem:[#allocation2 + $0x1cc4] ss:$408 sps:$4 sm:$0xff]   ;;  %v13315_v37 = vld [vmem:[#allocation2 + $0x1cc8] ss:$408 sps:$4 sm:$0xff]  }
  0x45   :  { %8083 = vmatprep.subr.bf16.mxu1 %v13230_v36  ;;  %v13317_v35 = vld [vmem:[#allocation2 + $0x1ccc] ss:$408 sps:$4 sm:$0xff]   ;;  %v13312_v36 = vld [vmem:[#allocation2 + $0x1cc0] ss:$408 sps:$4 sm:$0xff]  }
  0x46   :  { %v13326_v44 = vld [vmem:[#allocation2 + $0x2324] ss:$408 sps:$4 sm:$0xff]   ;;  %v13327_v47 = vld [vmem:[#allocation2 + $0x2328] ss:$408 sps:$4 sm:$0xff]  }
  0x47   :  { %8043 = vmatpush1.bf16.msra.mxu0 %v13232_v39  ;;  %v13320_v39 = vld [vmem:[#allocation2 + $0x1ff4] ss:$408 sps:$4 sm:$0xff]  }
  0x48   :  { %8084 = vmatpush1.bf16.msra.mxu1 %v13233_v40  ;;  %8044 = vmatprep.subr.bf16.mxu0 %v13234_v41  ;;  %v13323_v40 = vld [vmem:[#allocation2 + $0x1ffc] ss:$408 sps:$4 sm:$0xff]   ;;  %v13318_v41 = vld [vmem:[#allocation2 + $0x1ff0] ss:$408 sps:$4 sm:$0xff]  }
  0x49   :  { %8085 = vmatprep.subr.bf16.mxu1 %v13236_v42  ;;  %v13321_v42 = vld [vmem:[#allocation2 + $0x1ff8] ss:$408 sps:$4 sm:$0xff]  }
  0x4b   :  { %8045 = vmatpush1.bf16.msra.mxu0 %v13238_v45  ;;  %v13329_v45 = vld [vmem:[#allocation2 + $0x232c] ss:$408 sps:$4 sm:$0xff]  }
  0x4c   :  { %8086 = vmatpush1.bf16.msra.mxu1 %v13239_v46  ;;  %8046 = vmatprep.subr.bf16.mxu0 %v13240_v48  ;;  %v13324_v46 = vld [vmem:[#allocation2 + $0x2320] ss:$408 sps:$4 sm:$0xff]   ;;  %v13332_v48 = vld [vmem:[#allocation2 + $0x2654] ss:$408 sps:$4 sm:$0xff]  }
  0x4d   :  { %8087 = vmatprep.subr.bf16.mxu1 %v13242_v49  ;;  %v13335_v49 = vld [vmem:[#allocation2 + $0x265c] ss:$408 sps:$4 sm:$0xff]  }
  0x4f   :  { %8047 = vmatpush1.bf16.msra.mxu0 %v13244_v51  ;;  %v13330_v51 = vld [vmem:[#allocation2 + $0x2650] ss:$408 sps:$4 sm:$0xff]  }
  0x50   :  { %8088 = vmatpush1.bf16.msra.mxu1 %v13245_v52  ;;  %8048 = vmatprep.subr.bf16.mxu0 %v13246_v53  ;;  %v13333_v52 = vld [vmem:[#allocation2 + $0x2658] ss:$408 sps:$4 sm:$0xff]   ;;  %v13338_v53 = vld [vmem:[#allocation2 + $0x24] ss:$408 sps:$4 sm:$0xff]  }
  0x51   :  { %8089 = vmatprep.subr.bf16.mxu1 %v13248_v54  ;;  %v13341_v54 = vld [vmem:[#allocation2 + $0x2c] ss:$408 sps:$4 sm:$0xff]  }
  0x53   :  { %8049 = vmatpush1.bf16.msra.mxu0 %v13250_v55  ;;  %v13336_v55 = vld [vmem:[#allocation2 + $0x20] ss:$408 sps:$4 sm:$0xff]  }
  0x54   :  { %8090 = vmatpush1.bf16.msra.mxu1 %v13251_v56  ;;  %8050 = vmatprep.subr.bf16.mxu0 %v13252_v57  ;;  %v13339_v56 = vld [vmem:[#allocation2 + $0x28] ss:$408 sps:$4 sm:$0xff]   ;;  %v13344_v57 = vld [vmem:[#allocation2 + $0x354] ss:$408 sps:$4 sm:$0xff]  }
  0x55   :  { %8091 = vmatprep.subr.bf16.mxu1 %v13254_v58  ;;  %v13347_v58 = vld [vmem:[#allocation2 + $0x35c] ss:$408 sps:$4 sm:$0xff]  }
  0x57   :  { %8051 = vmatpush1.bf16.msra.mxu0 %v13256_v59  ;;  %v13342_v59 = vld [vmem:[#allocation2 + $0x350] ss:$408 sps:$4 sm:$0xff]  }
  0x58   :  { %8092 = vmatpush1.bf16.msra.mxu1 %v13257_v60  ;;  %8108 = vmatprep.subr.bf16.mxu0 %v13260_v61  ;;  %v13345_v60 = vld [vmem:[#allocation2 + $0x358] ss:$408 sps:$4 sm:$0xff]   ;;  %v13350_v61 = vld [vmem:[#allocation2 + $0x684] ss:$408 sps:$4 sm:$0xff]  }
  0x59   :  { %8149 = vmatprep.subr.bf16.mxu1 %v13263_v62  ;;  %v13353_v62 = vld [vmem:[#allocation2 + $0x68c] ss:$408 sps:$4 sm:$0xff]  }
  0x5a   :  { %8059 = vmatmul.mubr.bf16.vlgmr.msra.gmra.mrb[0].mxu0 %v15283_v63 }
  0x5b   :  { %8100 = vmatmul.mubr.bf16.vlgmr.msra.gmra.mrb[0].mxu1 %v15283_v63  ;;  %8109 = vmatpush1.bf16.msra.mxu0 %v13258_v0  ;;  %v13348_v0 = vld [vmem:[#allocation2 + $0x680] ss:$408 sps:$4 sm:$0xff]  }
  0x5c   :  { %8150 = vmatpush1.bf16.msra.mxu1 %v13261_v1  ;;  %8110 = vmatprep.subr.bf16.mxu0 %v13266_v2  ;;  %v13351_v1 = vld [vmem:[#allocation2 + $0x688] ss:$408 sps:$4 sm:$0xff]   ;;  %v13356_v2 = vld [vmem:[#allocation2 + $0x9b4] ss:$408 sps:$4 sm:$0xff]  }
  0x5d   :  { %8151 = vmatprep.subr.bf16.mxu1 %v13269_v3  ;;  %13074 = vmatprep.mubr.msk.bf16.mxu0 %vm8022_vm0, %v15276_v50  ;;  %v13359_v3 = vld [vmem:[#allocation2 + $0x9bc] ss:$408 sps:$4 sm:$0xff]  }
  0x5e   :  { %13075 = vmatprep.mubr.msk.bf16.mxu1 %vm8022_vm0, %v15276_v50 }
  0x5f   :  { %8111 = vmatpush1.bf16.msra.mxu0 %v13264_v4  ;;  %v13354_v4 = vld [vmem:[#allocation2 + $0x9b0] ss:$408 sps:$4 sm:$0xff]  }
  0x60   :  { %8152 = vmatpush1.bf16.msra.mxu1 %v13267_v5  ;;  %8112 = vmatprep.subr.bf16.mxu0 %v13272_v6  ;;  %v13357_v5 = vld [vmem:[#allocation2 + $0x9b8] ss:$408 sps:$4 sm:$0xff]   ;;  %v13362_v6 = vld [vmem:[#allocation2 + $0xce4] ss:$408 sps:$4 sm:$0xff]  }
  0x61   :  { %8153 = vmatprep.subr.bf16.mxu1 %v13275_v7  ;;  %v13365_v7 = vld [vmem:[#allocation2 + $0xcec] ss:$408 sps:$4 sm:$0xff]  }
  0x63   :  { %8113 = vmatpush1.bf16.msra.mxu0 %v13270_v8  ;;  %v13360_v8 = vld [vmem:[#allocation2 + $0xce0] ss:$408 sps:$4 sm:$0xff]  }
  0x64   :  { %8154 = vmatpush1.bf16.msra.mxu1 %v13273_v9  ;;  %8114 = vmatprep.subr.bf16.mxu0 %v13278_v10  ;;  %v13363_v9 = vld [vmem:[#allocation2 + $0xce8] ss:$408 sps:$4 sm:$0xff]   ;;  %v13368_v10 = vld [vmem:[#allocation2 + $0x1014] ss:$408 sps:$4 sm:$0xff]  }
  0x65   :  { %8155 = vmatprep.subr.bf16.mxu1 %v13281_v11  ;;  %v13371_v11 = vld [vmem:[#allocation2 + $0x101c] ss:$408 sps:$4 sm:$0xff]  }
  0x67   :  { %8115 = vmatpush1.bf16.msra.mxu0 %v13276_v12  ;;  %v13366_v12 = vld [vmem:[#allocation2 + $0x1010] ss:$408 sps:$4 sm:$0xff]  }
  0x68   :  { %8156 = vmatpush1.bf16.msra.mxu1 %v13279_v13  ;;  %8116 = vmatprep.subr.bf16.mxu0 %v13284_v14  ;;  %v13369_v13 = vld [vmem:[#allocation2 + $0x1018] ss:$408 sps:$4 sm:$0xff]   ;;  %v13374_v14 = vld [vmem:[#allocation2 + $0x1344] ss:$408 sps:$4 sm:$0xff]  }
  0x69   :  { %8157 = vmatprep.subr.bf16.mxu1 %v13287_v15  ;;  %v13377_v15 = vld [vmem:[#allocation2 + $0x134c] ss:$408 sps:$4 sm:$0xff]  }
  0x6b   :  { %8117 = vmatpush1.bf16.msra.mxu0 %v13282_v16  ;;  %v13372_v16 = vld [vmem:[#allocation2 + $0x1340] ss:$408 sps:$4 sm:$0xff]  }
  0x6c   :  { %8158 = vmatpush1.bf16.msra.mxu1 %v13285_v17  ;;  %8118 = vmatprep.subr.bf16.mxu0 %v13290_v18  ;;  %v13375_v17 = vld [vmem:[#allocation2 + $0x1348] ss:$408 sps:$4 sm:$0xff]   ;;  %v13380_v18 = vld [vmem:[#allocation2 + $0x1674] ss:$408 sps:$4 sm:$0xff]  }
  0x6d   :  { %8159 = vmatprep.subr.bf16.mxu1 %v13293_v19  ;;  %v13383_v19 = vld [vmem:[#allocation2 + $0x167c] ss:$408 sps:$4 sm:$0xff]  }
  0x6f   :  { %8119 = vmatpush1.bf16.msra.mxu0 %v13288_v20  ;;  %v13378_v20 = vld [vmem:[#allocation2 + $0x1670] ss:$408 sps:$4 sm:$0xff]  }
  0x70   :  { %8160 = vmatpush1.bf16.msra.mxu1 %v13291_v21  ;;  %8120 = vmatprep.subr.bf16.mxu0 %v13296_v22  ;;  %v13381_v21 = vld [vmem:[#allocation2 + $0x1678] ss:$408 sps:$4 sm:$0xff]   ;;  %v13386_v22 = vld [vmem:[#allocation2 + $0x19a4] ss:$408 sps:$4 sm:$0xff]  }
  0x71   :  { %8161 = vmatprep.subr.bf16.mxu1 %v13299_v23  ;;  %v13389_v23 = vld [vmem:[#allocation2 + $0x19ac] ss:$408 sps:$4 sm:$0xff]  }
  0x73   :  { %8121 = vmatpush1.bf16.msra.mxu0 %v13294_v24  ;;  %v13384_v24 = vld [vmem:[#allocation2 + $0x19a0] ss:$408 sps:$4 sm:$0xff]  }
  0x74   :  { %8162 = vmatpush1.bf16.msra.mxu1 %v13297_v25  ;;  %8122 = vmatprep.subr.bf16.mxu0 %v13302_v26  ;;  %v13387_v25 = vld [vmem:[#allocation2 + $0x19a8] ss:$408 sps:$4 sm:$0xff]   ;;  %v13392_v26 = vld [vmem:[#allocation2 + $0x1cd4] ss:$408 sps:$4 sm:$0xff]  }
  0x75   :  { %8163 = vmatprep.subr.bf16.mxu1 %v13305_v27  ;;  %v13395_v27 = vld [vmem:[#allocation2 + $0x1cdc] ss:$408 sps:$4 sm:$0xff]  }
  0x77   :  { %8123 = vmatpush1.bf16.msra.mxu0 %v13300_v28  ;;  %v13390_v28 = vld [vmem:[#allocation2 + $0x1cd0] ss:$408 sps:$4 sm:$0xff]  }
  0x78   :  { %8164 = vmatpush1.bf16.msra.mxu1 %v13303_v29  ;;  %8124 = vmatprep.subr.bf16.mxu0 %v13308_v30  ;;  %v13393_v29 = vld [vmem:[#allocation2 + $0x1cd8] ss:$408 sps:$4 sm:$0xff]   ;;  %v13398_v30 = vld [vmem:[#allocation2 + $0x2004] ss:$408 sps:$4 sm:$0xff]  }
  0x79   :  { %8165 = vmatprep.subr.bf16.mxu1 %v13311_v31  ;;  %v13401_v31 = vld [vmem:[#allocation2 + $0x200c] ss:$408 sps:$4 sm:$0xff]  }
  0x7b   :  { %8125 = vmatpush1.bf16.msra.mxu0 %v13306_v32  ;;  %v13396_v32 = vld [vmem:[#allocation2 + $0x2000] ss:$408 sps:$4 sm:$0xff]  }
  0x7c   :  { %8166 = vmatpush1.bf16.msra.mxu1 %v13309_v33  ;;  %8126 = vmatprep.subr.bf16.mxu0 %v13314_v34  ;;  %v13399_v33 = vld [vmem:[#allocation2 + $0x2008] ss:$408 sps:$4 sm:$0xff]   ;;  %v13404_v34 = vld [vmem:[#allocation2 + $0x2334] ss:$408 sps:$4 sm:$0xff]  }
  0x7d   :  { %8167 = vmatprep.subr.bf16.mxu1 %v13317_v35  ;;  %v13407_v35 = vld [vmem:[#allocation2 + $0x233c] ss:$408 sps:$4 sm:$0xff]  }
  0x7f   :  { %8127 = vmatpush1.bf16.msra.mxu0 %v13312_v36  ;;  %v13402_v36 = vld [vmem:[#allocation2 + $0x2330] ss:$408 sps:$4 sm:$0xff]  }
  0x80   :  { %8168 = vmatpush1.bf16.msra.mxu1 %v13315_v37  ;;  %8128 = vmatprep.subr.bf16.mxu0 %v13320_v39  ;;  %v13405_v37 = vld [vmem:[#allocation2 + $0x2338] ss:$408 sps:$4 sm:$0xff]   ;;  %v13410_v39 = vld [vmem:[#allocation2 + $0x2664] ss:$408 sps:$4 sm:$0xff]  }
  0x81   :  { %8169 = vmatprep.subr.bf16.mxu1 %v13323_v40  ;;  %v13413_v40 = vld [vmem:[#allocation2 + $0x266c] ss:$408 sps:$4 sm:$0xff]  }
  0x83   :  { %8129 = vmatpush1.bf16.msra.mxu0 %v13318_v41  ;;  %v13408_v41 = vld [vmem:[#allocation2 + $0x2660] ss:$408 sps:$4 sm:$0xff]  }
  0x84   :  { %8170 = vmatpush1.bf16.msra.mxu1 %v13321_v42  ;;  %8130 = vmatprep.subr.bf16.mxu0 %v13326_v44  ;;  %v13411_v42 = vld [vmem:[#allocation2 + $0x2668] ss:$408 sps:$4 sm:$0xff]   ;;  %v13416_v44 = vld [vmem:[#allocation2 + $0x34] ss:$408 sps:$4 sm:$0xff]  }
  0x85   :  { %8171 = vmatprep.subr.bf16.mxu1 %v13329_v45  ;;  %v13419_v45 = vld [vmem:[#allocation2 + $0x3c] ss:$408 sps:$4 sm:$0xff]  }
  0x87   :  { %8131 = vmatpush1.bf16.msra.mxu0 %v13324_v46  ;;  %v13414_v46 = vld [vmem:[#allocation2 + $0x30] ss:$408 sps:$4 sm:$0xff]  }
  0x88   :  { %8172 = vmatpush1.bf16.msra.mxu1 %v13327_v47  ;;  %8132 = vmatprep.subr.bf16.mxu0 %v13332_v48  ;;  %v13417_v47 = vld [vmem:[#allocation2 + $0x38] ss:$408 sps:$4 sm:$0xff]   ;;  %v13422_v48 = vld [vmem:[#allocation2 + $0x364] ss:$408 sps:$4 sm:$0xff]  }
  0x89   :  { %8173 = vmatprep.subr.bf16.mxu1 %v13335_v49  ;;  %v13425_v49 = vld [vmem:[#allocation2 + $0x36c] ss:$408 sps:$4 sm:$0xff]  }
  0x8b   :  { %8133 = vmatpush1.bf16.msra.mxu0 %v13330_v51  ;;  %v13420_v51 = vld [vmem:[#allocation2 + $0x360] ss:$408 sps:$4 sm:$0xff]  }
  0x8c   :  { %8174 = vmatpush1.bf16.msra.mxu1 %v13333_v52  ;;  %8190 = vmatprep.subr.bf16.mxu0 %v13338_v53  ;;  %v13423_v52 = vld [vmem:[#allocation2 + $0x368] ss:$408 sps:$4 sm:$0xff]   ;;  %v13428_v53 = vld [vmem:[#allocation2 + $0x694] ss:$408 sps:$4 sm:$0xff]  }
  0x8d   :  { %8231 = vmatprep.subr.bf16.mxu1 %v13341_v54  ;;  %v13431_v54 = vld [vmem:[#allocation2 + $0x69c] ss:$408 sps:$4 sm:$0xff]  }
  0x8e   :  { %8141 = vmatmul.mubr.bf16.vlgmr.msra.gmra.mrb[4].mxu0 %v15283_v63 }
  0x8f   :  { %8182 = vmatmul.mubr.bf16.vlgmr.msra.gmra.mrb[4].mxu1 %v15283_v63  ;;  %8191 = vmatpush1.bf16.msra.mxu0 %v13336_v55  ;;  %v13426_v55 = vld [vmem:[#allocation2 + $0x690] ss:$408 sps:$4 sm:$0xff]  }
  0x90   :  { %8232 = vmatpush1.bf16.msra.mxu1 %v13339_v56  ;;  %8192 = vmatprep.subr.bf16.mxu0 %v13344_v57  ;;  %v13429_v56 = vld [vmem:[#allocation2 + $0x698] ss:$408 sps:$4 sm:$0xff]   ;;  %v13434_v57 = vld [vmem:[#allocation2 + $0x9c4] ss:$408 sps:$4 sm:$0xff]  }
  0x91   :  { %8233 = vmatprep.subr.bf16.mxu1 %v13347_v58  ;;  %13076 = vmatprep.mubr.msk.bf16.mxu0 %vm8022_vm0, %v15276_v50  ;;  %v13437_v58 = vld [vmem:[#allocation2 + $0x9cc] ss:$408 sps:$4 sm:$0xff]  }
  0x92   :  { %13077 = vmatprep.mubr.msk.bf16.mxu1 %vm8022_vm0, %v15276_v50 }
  0x93   :  { %8193 = vmatpush1.bf16.msra.mxu0 %v13342_v59  ;;  %v13432_v59 = vld [vmem:[#allocation2 + $0x9c0] ss:$408 sps:$4 sm:$0xff]  }
  0x94   :  { %8234 = vmatpush1.bf16.msra.mxu1 %v13345_v60  ;;  %8194 = vmatprep.subr.bf16.mxu0 %v13350_v61  ;;  %v13435_v60 = vld [vmem:[#allocation2 + $0x9c8] ss:$408 sps:$4 sm:$0xff]   ;;  %v13440_v61 = vld [vmem:[#allocation2 + $0xcf4] ss:$408 sps:$4 sm:$0xff]  }
  0x95   :  { %8235 = vmatprep.subr.bf16.mxu1 %v13353_v62  ;;  %v13443_v62 = vld [vmem:[#allocation2 + $0xcfc] ss:$408 sps:$4 sm:$0xff]  }
  0x97   :  { %8195 = vmatpush1.bf16.msra.mxu0 %v13348_v0  ;;  %v13438_v0 = vld [vmem:[#allocation2 + $0xcf0] ss:$408 sps:$4 sm:$0xff]  }
  0x98   :  { %8236 = vmatpush1.bf16.msra.mxu1 %v13351_v1  ;;  %8196 = vmatprep.subr.bf16.mxu0 %v13356_v2  ;;  %v13441_v1 = vld [vmem:[#allocation2 + $0xcf8] ss:$408 sps:$4 sm:$0xff]   ;;  %v13446_v2 = vld [vmem:[#allocation2 + $0x1024] ss:$408 sps:$4 sm:$0xff]  }
  0x99   :  { %8237 = vmatprep.subr.bf16.mxu1 %v13359_v3  ;;  %v13449_v3 = vld [vmem:[#allocation2 + $0x102c] ss:$408 sps:$4 sm:$0xff]  }
  0x9b   :  { %8197 = vmatpush1.bf16.msra.mxu0 %v13354_v4  ;;  %v13444_v4 = vld [vmem:[#allocation2 + $0x1020] ss:$408 sps:$4 sm:$0xff]  }
  0x9c   :  { %8238 = vmatpush1.bf16.msra.mxu1 %v13357_v5  ;;  %8198 = vmatprep.subr.bf16.mxu0 %v13362_v6  ;;  %v13447_v5 = vld [vmem:[#allocation2 + $0x1028] ss:$408 sps:$4 sm:$0xff]   ;;  %v13452_v6 = vld [vmem:[#allocation2 + $0x1354] ss:$408 sps:$4 sm:$0xff]  }
  0x9d   :  { %8239 = vmatprep.subr.bf16.mxu1 %v13365_v7  ;;  %v13455_v7 = vld [vmem:[#allocation2 + $0x135c] ss:$408 sps:$4 sm:$0xff]  }
  0x9f   :  { %8199 = vmatpush1.bf16.msra.mxu0 %v13360_v8  ;;  %v13450_v8 = vld [vmem:[#allocation2 + $0x1350] ss:$408 sps:$4 sm:$0xff]  }
  0xa0   :  { %8240 = vmatpush1.bf16.msra.mxu1 %v13363_v9  ;;  %8200 = vmatprep.subr.bf16.mxu0 %v13368_v10  ;;  %v13453_v9 = vld [vmem:[#allocation2 + $0x1358] ss:$408 sps:$4 sm:$0xff]   ;;  %v13458_v10 = vld [vmem:[#allocation2 + $0x1684] ss:$408 sps:$4 sm:$0xff]  }
  0xa1   :  { %8241 = vmatprep.subr.bf16.mxu1 %v13371_v11  ;;  %v13461_v11 = vld [vmem:[#allocation2 + $0x168c] ss:$408 sps:$4 sm:$0xff]  }
  0xa3   :  { %8201 = vmatpush1.bf16.msra.mxu0 %v13366_v12  ;;  %v13456_v12 = vld [vmem:[#allocation2 + $0x1680] ss:$408 sps:$4 sm:$0xff]  }
  0xa4   :  { %8242 = vmatpush1.bf16.msra.mxu1 %v13369_v13  ;;  %8202 = vmatprep.subr.bf16.mxu0 %v13374_v14  ;;  %v13459_v13 = vld [vmem:[#allocation2 + $0x1688] ss:$408 sps:$4 sm:$0xff]   ;;  %v13464_v14 = vld [vmem:[#allocation2 + $0x19b4] ss:$408 sps:$4 sm:$0xff]  }
  0xa5   :  { %8243 = vmatprep.subr.bf16.mxu1 %v13377_v15  ;;  %v13467_v15 = vld [vmem:[#allocation2 + $0x19bc] ss:$408 sps:$4 sm:$0xff]  }
  0xa7   :  { %8203 = vmatpush1.bf16.msra.mxu0 %v13372_v16  ;;  %v13462_v16 = vld [vmem:[#allocation2 + $0x19b0] ss:$408 sps:$4 sm:$0xff]  }
  0xa8   :  { %8244 = vmatpush1.bf16.msra.mxu1 %v13375_v17  ;;  %8204 = vmatprep.subr.bf16.mxu0 %v13380_v18  ;;  %v13465_v17 = vld [vmem:[#allocation2 + $0x19b8] ss:$408 sps:$4 sm:$0xff]   ;;  %v13470_v18 = vld [vmem:[#allocation2 + $0x1ce4] ss:$408 sps:$4 sm:$0xff]  }
  0xa9   :  { %8245 = vmatprep.subr.bf16.mxu1 %v13383_v19  ;;  %v13473_v19 = vld [vmem:[#allocation2 + $0x1cec] ss:$408 sps:$4 sm:$0xff]  }
  0xab   :  { %8205 = vmatpush1.bf16.msra.mxu0 %v13378_v20  ;;  %v13468_v20 = vld [vmem:[#allocation2 + $0x1ce0] ss:$408 sps:$4 sm:$0xff]  }
  0xac   :  { %8246 = vmatpush1.bf16.msra.mxu1 %v13381_v21  ;;  %8206 = vmatprep.subr.bf16.mxu0 %v13386_v22  ;;  %v13471_v21 = vld [vmem:[#allocation2 + $0x1ce8] ss:$408 sps:$4 sm:$0xff]   ;;  %v13476_v22 = vld [vmem:[#allocation2 + $0x2014] ss:$408 sps:$4 sm:$0xff]  }
  0xad   :  { %8247 = vmatprep.subr.bf16.mxu1 %v13389_v23  ;;  %v13479_v23 = vld [vmem:[#allocation2 + $0x201c] ss:$408 sps:$4 sm:$0xff]  }
  0xaf   :  { %8207 = vmatpush1.bf16.msra.mxu0 %v13384_v24  ;;  %v13474_v24 = vld [vmem:[#allocation2 + $0x2010] ss:$408 sps:$4 sm:$0xff]  }
  0xb0   :  { %8248 = vmatpush1.bf16.msra.mxu1 %v13387_v25  ;;  %8208 = vmatprep.subr.bf16.mxu0 %v13392_v26  ;;  %v13477_v25 = vld [vmem:[#allocation2 + $0x2018] ss:$408 sps:$4 sm:$0xff]   ;;  %v13482_v26 = vld [vmem:[#allocation2 + $0x2344] ss:$408 sps:$4 sm:$0xff]  }
  0xb1   :  { %8249 = vmatprep.subr.bf16.mxu1 %v13395_v27  ;;  %v13485_v27 = vld [vmem:[#allocation2 + $0x234c] ss:$408 sps:$4 sm:$0xff]  }
  0xb3   :  { %8209 = vmatpush1.bf16.msra.mxu0 %v13390_v28  ;;  %v13480_v28 = vld [vmem:[#allocation2 + $0x2340] ss:$408 sps:$4 sm:$0xff]  }
  0xb4   :  { %8250 = vmatpush1.bf16.msra.mxu1 %v13393_v29  ;;  %8210 = vmatprep.subr.bf16.mxu0 %v13398_v30  ;;  %v13483_v29 = vld [vmem:[#allocation2 + $0x2348] ss:$408 sps:$4 sm:$0xff]   ;;  %v13488_v30 = vld [vmem:[#allocation2 + $0x2674] ss:$408 sps:$4 sm:$0xff]  }
  0xb5   :  { %8251 = vmatprep.subr.bf16.mxu1 %v13401_v31  ;;  %v13491_v31 = vld [vmem:[#allocation2 + $0x267c] ss:$408 sps:$4 sm:$0xff]  }
  0xb7   :  { %8211 = vmatpush1.bf16.msra.mxu0 %v13396_v32  ;;  %v13486_v32 = vld [vmem:[#allocation2 + $0x2670] ss:$408 sps:$4 sm:$0xff]  }
  0xb8   :  { %8252 = vmatpush1.bf16.msra.mxu1 %v13399_v33  ;;  %8212 = vmatprep.subr.bf16.mxu0 %v13404_v34  ;;  %v13489_v33 = vld [vmem:[#allocation2 + $0x2678] ss:$408 sps:$4 sm:$0xff]   ;;  %v13494_v34 = vld [vmem:[#allocation2 + $0x44] ss:$408 sps:$4 sm:$0xff]  }
  0xb9   :  { %8253 = vmatprep.subr.bf16.mxu1 %v13407_v35  ;;  %v13497_v35 = vld [vmem:[#allocation2 + $0x4c] ss:$408 sps:$4 sm:$0xff]  }
  0xbb   :  { %8213 = vmatpush1.bf16.msra.mxu0 %v13402_v36  ;;  %v13492_v36 = vld [vmem:[#allocation2 + $0x40] ss:$408 sps:$4 sm:$0xff]  }
  0xbc   :  { %8254 = vmatpush1.bf16.msra.mxu1 %v13405_v37  ;;  %8214 = vmatprep.subr.bf16.mxu0 %v13410_v39  ;;  %v13495_v37 = vld [vmem:[#allocation2 + $0x48] ss:$408 sps:$4 sm:$0xff]   ;;  %v13500_v39 = vld [vmem:[#allocation2 + $0x374] ss:$408 sps:$4 sm:$0xff]  }
  0xbd   :  { %8255 = vmatprep.subr.bf16.mxu1 %v13413_v40  ;;  %v13503_v40 = vld [vmem:[#allocation2 + $0x37c] ss:$408 sps:$4 sm:$0xff]  }
  0xbf   :  { %8215 = vmatpush1.bf16.msra.mxu0 %v13408_v41  ;;  %v13498_v41 = vld [vmem:[#allocation2 + $0x370] ss:$408 sps:$4 sm:$0xff]  }
  0xc0   :  { %8256 = vmatpush1.bf16.msra.mxu1 %v13411_v42  ;;  %8272 = vmatprep.subr.bf16.mxu0 %v13416_v44  ;;  %v13501_v42 = vld [vmem:[#allocation2 + $0x378] ss:$408 sps:$4 sm:$0xff]   ;;  %v13506_v44 = vld [vmem:[#allocation2 + $0x6a4] ss:$408 sps:$4 sm:$0xff]  }
  0xc1   :  { %8313 = vmatprep.subr.bf16.mxu1 %v13419_v45  ;;  %v13509_v45 = vld [vmem:[#allocation2 + $0x6ac] ss:$408 sps:$4 sm:$0xff]  }
  0xc2   :  { %8223 = vmatmul.mubr.bf16.vlgmr.msra.gmra.mrb[8].mxu0 %v15283_v63 }
  0xc3   :  { %8264 = vmatmul.mubr.bf16.vlgmr.msra.gmra.mrb[8].mxu1 %v15283_v63  ;;  %8273 = vmatpush1.bf16.msra.mxu0 %v13414_v46  ;;  %v13504_v46 = vld [vmem:[#allocation2 + $0x6a0] ss:$408 sps:$4 sm:$0xff]  }
  0xc4   :  { %8314 = vmatpush1.bf16.msra.mxu1 %v13417_v47  ;;  %8274 = vmatprep.subr.bf16.mxu0 %v13422_v48  ;;  %v13507_v47 = vld [vmem:[#allocation2 + $0x6a8] ss:$408 sps:$4 sm:$0xff]   ;;  %v13512_v48 = vld [vmem:[#allocation2 + $0x9d4] ss:$408 sps:$4 sm:$0xff]  }
  0xc5   :  { %8315 = vmatprep.subr.bf16.mxu1 %v13425_v49  ;;  %13078 = vmatprep.mubr.msk.bf16.mxu0 %vm8022_vm0, %v15276_v50  ;;  %v13515_v49 = vld [vmem:[#allocation2 + $0x9dc] ss:$408 sps:$4 sm:$0xff]  }
  0xc6   :  { %13079 = vmatprep.mubr.msk.bf16.mxu1 %vm8022_vm0, %v15276_v50 }
  0xc7   :  { %8275 = vmatpush1.bf16.msra.mxu0 %v13420_v51  ;;  %v13510_v51 = vld [vmem:[#allocation2 + $0x9d0] ss:$408 sps:$4 sm:$0xff]  }
  0xc8   :  { %8316 = vmatpush1.bf16.msra.mxu1 %v13423_v52  ;;  %8276 = vmatprep.subr.bf16.mxu0 %v13428_v53  ;;  %v13513_v52 = vld [vmem:[#allocation2 + $0x9d8] ss:$408 sps:$4 sm:$0xff]   ;;  %v13518_v53 = vld [vmem:[#allocation2 + $0xd04] ss:$408 sps:$4 sm:$0xff]  }
  0xc9   :  { %8317 = vmatprep.subr.bf16.mxu1 %v13431_v54  ;;  %v13521_v54 = vld [vmem:[#allocation2 + $0xd0c] ss:$408 sps:$4 sm:$0xff]  }
  0xcb   :  { %8277 = vmatpush1.bf16.msra.mxu0 %v13426_v55  ;;  %v13516_v55 = vld [vmem:[#allocation2 + $0xd00] ss:$408 sps:$4 sm:$0xff]  }
  0xcc   :  { %8318 = vmatpush1.bf16.msra.mxu1 %v13429_v56  ;;  %8278 = vmatprep.subr.bf16.mxu0 %v13434_v57  ;;  %v13519_v56 = vld [vmem:[#allocation2 + $0xd08] ss:$408 sps:$4 sm:$0xff]   ;;  %v13524_v57 = vld [vmem:[#allocation2 + $0x1034] ss:$408 sps:$4 sm:$0xff]  }
  0xcd   :  { %8319 = vmatprep.subr.bf16.mxu1 %v13437_v58  ;;  %v13527_v58 = vld [vmem:[#allocation2 + $0x103c] ss:$408 sps:$4 sm:$0xff]  }
  0xcf   :  { %8279 = vmatpush1.bf16.msra.mxu0 %v13432_v59  ;;  %v13522_v59 = vld [vmem:[#allocation2 + $0x1030] ss:$408 sps:$4 sm:$0xff]  }
  0xd0   :  { %8320 = vmatpush1.bf16.msra.mxu1 %v13435_v60  ;;  %8280 = vmatprep.subr.bf16.mxu0 %v13440_v61  ;;  %v13525_v60 = vld [vmem:[#allocation2 + $0x1038] ss:$408 sps:$4 sm:$0xff]   ;;  %v13530_v61 = vld [vmem:[#allocation2 + $0x1364] ss:$408 sps:$4 sm:$0xff]  }
  0xd1   :  { %8321 = vmatprep.subr.bf16.mxu1 %v13443_v62  ;;  %v13533_v62 = vld [vmem:[#allocation2 + $0x136c] ss:$408 sps:$4 sm:$0xff]  }
  0xd3   :  { %8281 = vmatpush1.bf16.msra.mxu0 %v13438_v0  ;;  %v13528_v0 = vld [vmem:[#allocation2 + $0x1360] ss:$408 sps:$4 sm:$0xff]  }
  0xd4   :  { %8322 = vmatpush1.bf16.msra.mxu1 %v13441_v1  ;;  %8282 = vmatprep.subr.bf16.mxu0 %v13446_v2  ;;  %v13531_v1 = vld [vmem:[#allocation2 + $0x1368] ss:$408 sps:$4 sm:$0xff]   ;;  %v13536_v2 = vld [vmem:[#allocation2 + $0x1694] ss:$408 sps:$4 sm:$0xff]  }
  0xd5   :  { %8323 = vmatprep.subr.bf16.mxu1 %v13449_v3  ;;  %v13539_v3 = vld [vmem:[#allocation2 + $0x169c] ss:$408 sps:$4 sm:$0xff]  }
  0xd7   :  { %8283 = vmatpush1.bf16.msra.mxu0 %v13444_v4  ;;  %v13534_v4 = vld [vmem:[#allocation2 + $0x1690] ss:$408 sps:$4 sm:$0xff]  }
  0xd8   :  { %8324 = vmatpush1.bf16.msra.mxu1 %v13447_v5  ;;  %8284 = vmatprep.subr.bf16.mxu0 %v13452_v6  ;;  %v13537_v5 = vld [vmem:[#allocation2 + $0x1698] ss:$408 sps:$4 sm:$0xff]   ;;  %v13542_v6 = vld [vmem:[#allocation2 + $0x19c4] ss:$408 sps:$4 sm:$0xff]  }
  0xd9   :  { %8325 = vmatprep.subr.bf16.mxu1 %v13455_v7  ;;  %v13545_v7 = vld [vmem:[#allocation2 + $0x19cc] ss:$408 sps:$4 sm:$0xff]  }
  0xdb   :  { %8285 = vmatpush1.bf16.msra.mxu0 %v13450_v8  ;;  %v13540_v8 = vld [vmem:[#allocation2 + $0x19c0] ss:$408 sps:$4 sm:$0xff]  }
  0xdc   :  { %8326 = vmatpush1.bf16.msra.mxu1 %v13453_v9  ;;  %8286 = vmatprep.subr.bf16.mxu0 %v13458_v10  ;;  %v13543_v9 = vld [vmem:[#allocation2 + $0x19c8] ss:$408 sps:$4 sm:$0xff]   ;;  %v13548_v10 = vld [vmem:[#allocation2 + $0x1cf4] ss:$408 sps:$4 sm:$0xff]  }
  0xdd   :  { %8327 = vmatprep.subr.bf16.mxu1 %v13461_v11  ;;  %v13551_v11 = vld [vmem:[#allocation2 + $0x1cfc] ss:$408 sps:$4 sm:$0xff]  }
  0xdf   :  { %8287 = vmatpush1.bf16.msra.mxu0 %v13456_v12  ;;  %v13546_v12 = vld [vmem:[#allocation2 + $0x1cf0] ss:$408 sps:$4 sm:$0xff]  }
  0xe0   :  { %8328 = vmatpush1.bf16.msra.mxu1 %v13459_v13  ;;  %8288 = vmatprep.subr.bf16.mxu0 %v13464_v14  ;;  %v13549_v13 = vld [vmem:[#allocation2 + $0x1cf8] ss:$408 sps:$4 sm:$0xff]   ;;  %v13554_v14 = vld [vmem:[#allocation2 + $0x2024] ss:$408 sps:$4 sm:$0xff]  }
  0xe1   :  { %8329 = vmatprep.subr.bf16.mxu1 %v13467_v15  ;;  %v13557_v15 = vld [vmem:[#allocation2 + $0x202c] ss:$408 sps:$4 sm:$0xff]  }
  0xe3   :  { %8289 = vmatpush1.bf16.msra.mxu0 %v13462_v16  ;;  %v13552_v16 = vld [vmem:[#allocation2 + $0x2020] ss:$408 sps:$4 sm:$0xff]  }
  0xe4   :  { %8330 = vmatpush1.bf16.msra.mxu1 %v13465_v17  ;;  %8290 = vmatprep.subr.bf16.mxu0 %v13470_v18  ;;  %v13555_v17 = vld [vmem:[#allocation2 + $0x2028] ss:$408 sps:$4 sm:$0xff]   ;;  %v13560_v18 = vld [vmem:[#allocation2 + $0x2354] ss:$408 sps:$4 sm:$0xff]  }
  0xe5   :  { %8331 = vmatprep.subr.bf16.mxu1 %v13473_v19  ;;  %v13563_v19 = vld [vmem:[#allocation2 + $0x235c] ss:$408 sps:$4 sm:$0xff]  }
  0xe7   :  { %8291 = vmatpush1.bf16.msra.mxu0 %v13468_v20  ;;  %v13558_v20 = vld [vmem:[#allocation2 + $0x2350] ss:$408 sps:$4 sm:$0xff]  }
  0xe8   :  { %8332 = vmatpush1.bf16.msra.mxu1 %v13471_v21  ;;  %8292 = vmatprep.subr.bf16.mxu0 %v13476_v22  ;;  %v13561_v21 = vld [vmem:[#allocation2 + $0x2358] ss:$408 sps:$4 sm:$0xff]  }
  0xe9   :  { %8333 = vmatprep.subr.bf16.mxu1 %v13479_v23  ;;  %v10117_v22 = vld [vmem:[#allocation4] sm:$0xff]  ;;  %v13566_v23 = vld [vmem:[#allocation2 + $0x2684] ss:$408 sps:$4 sm:$0xff]  }
  0xea   :  { %vm10130_vm1 = vcmp.ne.f32.partialorder %v10117_v22, 0.0  ;;  %v13602_v22 = vld [vmem:[#allocation2 + $0x1044] ss:$408 sps:$4 sm:$0xff]  }
  0xeb   :  { %8293 = vmatpush1.bf16.msra.mxu0 %v13474_v24  ;;  %v13569_v24 = vld [vmem:[#allocation2 + $0x268c] ss:$408 sps:$4 sm:$0xff]  }
  0xec   :  { %8334 = vmatpush1.bf16.msra.mxu1 %v13477_v25  ;;  %8294 = vmatprep.subr.bf16.mxu0 %v13482_v26  ;;  %v13564_v25 = vld [vmem:[#allocation2 + $0x2680] ss:$408 sps:$4 sm:$0xff]  }
  0xed   :  { %8335 = vmatprep.subr.bf16.mxu1 %v13485_v27  ;;  %v13567_v26 = vld [vmem:[#allocation2 + $0x2688] ss:$408 sps:$4 sm:$0xff]   ;;  %v15310_v27 = vsub.s32 0, %v15267_v38 }
  0xef   :  { %8295 = vmatpush1.bf16.msra.mxu0 %v13480_v28  ;;  %v15313_v28 = vsub.s32 2, %v15267_v38 }
  0xf0   :  { %8336 = vmatpush1.bf16.msra.mxu1 %v13483_v29  ;;  %8296 = vmatprep.subr.bf16.mxu0 %v13488_v30  ;;  %v13572_v29 = vld [vmem:[#allocation2 + $0x54] ss:$408 sps:$4 sm:$0xff]  }
  0xf1   :  { %8337 = vmatprep.subr.bf16.mxu1 %v13491_v31  ;;  %v13575_v30 = vld [vmem:[#allocation2 + $0x5c] ss:$408 sps:$4 sm:$0xff]   ;;  %v15316_v31 = vsub.s32 1, %v15267_v38 }
  0xf3   :  { %8297 = vmatpush1.bf16.msra.mxu0 %v13486_v32  ;;  %v15222_v32 = vmov 0  }
  0xf4   :  { %8338 = vmatpush1.bf16.msra.mxu1 %v13489_v33  ;;  %8354 = vmatprep.subr.bf16.mxu0 %v13494_v34  ;;  %v15319_v33 = vsel %vm10130_vm1, 1, %v15222_v32  ;;  %v15322_v34 = vsub.s32 3, %v15267_v38 }
  0xf5   :  { %8395 = vmatprep.subr.bf16.mxu1 %v13497_v35  ;;  %v13570_v35 = vld [vmem:[#allocation2 + $0x50] ss:$408 sps:$4 sm:$0xff]  }
  0xf6   :  { %8305 = vmatmul.mubr.bf16.vlgmr.msra.gmra.mrb[12].mxu0 %v15283_v63 }
  0xf7   :  { %8346 = vmatmul.mubr.bf16.vlgmr.msra.gmra.mrb[12].mxu1 %v15283_v63  ;;  %8355 = vmatpush1.bf16.msra.mxu0 %v13492_v36  ;;  %v13573_v36 = vld [vmem:[#allocation2 + $0x58] ss:$408 sps:$4 sm:$0xff]  }
  0xf8   :  { %8396 = vmatpush1.bf16.msra.mxu1 %v13495_v37  ;;  %8356 = vmatprep.subr.bf16.mxu0 %v13500_v39  ;;  %v10261_v37 = vrot.slane %v15319_v33, %v15310_v27  ;;  %v10269_v39 = vrot.slane %v15319_v33, %v15313_v28 }
  0xf9   :  { %8397 = vmatprep.subr.bf16.mxu1 %v13503_v40  ;;  %13080 = vmatprep.mubr.msk.bf16.mxu0 %vm8022_vm0, %v15276_v50  ;;  %v10265_v40 = vrot.slane %v15319_v33, %v15316_v31 }
  0xfa   :  { %13081 = vmatprep.mubr.msk.bf16.mxu1 %vm8022_vm0, %v15276_v50  ;;  %vm15334_vm2 = vcmp.eq.s32.totalorder %v10261_v37, 1  ;;  %vm15338_vm3 = vcmp.eq.s32.totalorder %v10269_v39, 1  ;;  %v13617_v37 = vld [vmem:[#allocation2 + $0x16ac] ss:$408 sps:$4 sm:$0xff]   ;;  %v13612_v39 = vld [vmem:[#allocation2 + $0x16a0] ss:$408 sps:$4 sm:$0xff]  }
  0xfb   :  { %8357 = vmatpush1.bf16.msra.mxu0 %v13498_v41  ;;  %v13578_v41 = vld [vmem:[#allocation2 + $0x384] ss:$408 sps:$4 sm:$0xff]   ;;  %vm15342_vm4 = vcmp.eq.s32.totalorder %v10265_v40, 1  ;;  %v13615_v40 = vld [vmem:[#allocation2 + $0x16a8] ss:$408 sps:$4 sm:$0xff]  }
  0xfc   :  { %8398 = vmatpush1.bf16.msra.mxu1 %v13501_v42  ;;  %8358 = vmatprep.subr.bf16.mxu0 %v13506_v44  ;;  %v13581_v42 = vld [vmem:[#allocation2 + $0x38c] ss:$408 sps:$4 sm:$0xff]   ;;  %v10273_v44 = vrot.slane %v15319_v33, %v15322_v34 }
  0xfd   :  { %8399 = vmatprep.subr.bf16.mxu1 %v13509_v45  ;;  %v13576_v45 = vld [vmem:[#allocation2 + $0x380] ss:$408 sps:$4 sm:$0xff]  }
  0xfe   :  { %vm15346_vm5 = vcmp.eq.s32.totalorder %v10273_v44, 1  ;;  %v13618_v44 = vld [vmem:[#allocation2 + $0x19d0] ss:$408 sps:$4 sm:$0xff]  }
  0xff   :  { %8359 = vmatpush1.bf16.msra.mxu0 %v13504_v46  ;;  %v13579_v46 = vld [vmem:[#allocation2 + $0x388] ss:$408 sps:$4 sm:$0xff]  }
 0x100   :  { %8400 = vmatpush1.bf16.msra.mxu1 %v13507_v47  ;;  %8360 = vmatprep.subr.bf16.mxu0 %v13512_v48  ;;  %v13584_v47 = vld [vmem:[#allocation2 + $0x6b4] ss:$408 sps:$4 sm:$0xff]   ;;  %v13624_v48 = vld [vmem:[#allocation2 + $0x1d00] ss:$408 sps:$4 sm:$0xff]  }
 0x101   :  { %8401 = vmatprep.subr.bf16.mxu1 %v13515_v49  ;;  %v13627_v49 = vld [vmem:[#allocation2 + $0x1d08] ss:$408 sps:$4 sm:$0xff]  }
 0x103   :  { %8361 = vmatpush1.bf16.msra.mxu0 %v13510_v51  ;;  %v13632_v51 = vld [vmem:[#allocation2 + $0x2034] ss:$408 sps:$4 sm:$0xff]  }
 0x104   :  { %8402 = vmatpush1.bf16.msra.mxu1 %v13513_v52  ;;  %8362 = vmatprep.subr.bf16.mxu0 %v13518_v53  ;;  %v13587_v52 = vld [vmem:[#allocation2 + $0x6bc] ss:$408 sps:$4 sm:$0xff]  }
 0x105   :  { %8403 = vmatprep.subr.bf16.mxu1 %v13521_v54 }
 0x107   :  { %8363 = vmatpush1.bf16.msra.mxu0 %v13516_v55  ;;  %v13638_v55 = vld [vmem:[#allocation2 + $0x2364] ss:$408 sps:$4 sm:$0xff]  }
 0x108   :  { %8404 = vmatpush1.bf16.msra.mxu1 %v13519_v56  ;;  %8364 = vmatprep.subr.bf16.mxu0 %v13524_v57  ;;  %v13582_v56 = vld [vmem:[#allocation2 + $0x6b0] ss:$408 sps:$4 sm:$0xff]  }
 0x109   :  { %8405 = vmatprep.subr.bf16.mxu1 %v13527_v58 }
 0x10b   :  { %8365 = vmatpush1.bf16.msra.mxu0 %v13522_v59 }
 0x10c   :  { %8406 = vmatpush1.bf16.msra.mxu1 %v13525_v60  ;;  %8366 = vmatprep.subr.bf16.mxu0 %v13530_v61 }
 0x10d   :  { %8407 = vmatprep.subr.bf16.mxu1 %v13533_v62 }
 0x10f   :  { %8367 = vmatpush1.bf16.msra.mxu0 %v13528_v0 }
 0x110   :  { %8408 = vmatpush1.bf16.msra.mxu1 %v13531_v1  ;;  %8368 = vmatprep.subr.bf16.mxu0 %v13536_v2  ;;  %v13585_v1 = vld [vmem:[#allocation2 + $0x6b8] ss:$408 sps:$4 sm:$0xff]  }
 0x111   :  { %8409 = vmatprep.subr.bf16.mxu1 %v13539_v3 }
 0x113   :  { %8369 = vmatpush1.bf16.msra.mxu0 %v13534_v4 }
 0x114   :  { %8410 = vmatpush1.bf16.msra.mxu1 %v13537_v5  ;;  %8370 = vmatprep.subr.bf16.mxu0 %v13542_v6  ;;  %v13590_v6 = vld [vmem:[#allocation2 + $0x9e4] ss:$408 sps:$4 sm:$0xff]  }
 0x115   :  { %8411 = vmatprep.subr.bf16.mxu1 %v13545_v7  ;;  %v13593_v7 = vld [vmem:[#allocation2 + $0x9ec] ss:$408 sps:$4 sm:$0xff]  }
 0x117   :  { %8371 = vmatpush1.bf16.msra.mxu0 %v13540_v8 }
 0x118   :  { %8412 = vmatpush1.bf16.msra.mxu1 %v13543_v9  ;;  %8372 = vmatprep.subr.bf16.mxu0 %v13548_v10 }
 0x119   :  { %8413 = vmatprep.subr.bf16.mxu1 %v13551_v11 }
 0x11b   :  { %8373 = vmatpush1.bf16.msra.mxu0 %v13546_v12 }
 0x11c   :  { %8414 = vmatpush1.bf16.msra.mxu1 %v13549_v13  ;;  %8374 = vmatprep.subr.bf16.mxu0 %v13554_v14  ;;  %v13588_v13 = vld [vmem:[#allocation2 + $0x9e0] ss:$408 sps:$4 sm:$0xff]  }
 0x11d   :  { %8415 = vmatprep.subr.bf16.mxu1 %v13557_v15  ;;  %v13591_v14 = vld [vmem:[#allocation2 + $0x9e8] ss:$408 sps:$4 sm:$0xff]  }
 0x11f   :  { %8375 = vmatpush1.bf16.msra.mxu0 %v13552_v16 }
 0x120   :  { %8416 = vmatpush1.bf16.msra.mxu1 %v13555_v17  ;;  %8376 = vmatprep.subr.bf16.mxu0 %v13560_v18  ;;  %v13596_v17 = vld [vmem:[#allocation2 + $0xd14] ss:$408 sps:$4 sm:$0xff]  }
 0x121   :  { %8417 = vmatprep.subr.bf16.mxu1 %v13563_v19  ;;  %v13599_v18 = vld [vmem:[#allocation2 + $0xd1c] ss:$408 sps:$4 sm:$0xff]  }
 0x123   :  { %8377 = vmatpush1.bf16.msra.mxu0 %v13558_v20  ;;  %v13594_v20 = vld [vmem:[#allocation2 + $0xd10] ss:$408 sps:$4 sm:$0xff]  }
 0x124   :  { %8418 = vmatpush1.bf16.msra.mxu1 %v13561_v21  ;;  %8378 = vmatprep.subr.bf16.mxu0 %v13566_v23  ;;  %v13597_v21 = vld [vmem:[#allocation2 + $0xd18] ss:$408 sps:$4 sm:$0xff]   ;;  %v13605_v23 = vld [vmem:[#allocation2 + $0x104c] ss:$408 sps:$4 sm:$0xff]  }
 0x125   :  { %8419 = vmatprep.subr.bf16.mxu1 %v13569_v24  ;;  %v13600_v24 = vld [vmem:[#allocation2 + $0x1040] ss:$408 sps:$4 sm:$0xff]  }
 0x127   :  { %8379 = vmatpush1.bf16.msra.mxu0 %v13564_v25  ;;  %v13603_v25 = vld [vmem:[#allocation2 + $0x1048] ss:$408 sps:$4 sm:$0xff]  }
 0x128   :  { %8420 = vmatpush1.bf16.msra.mxu1 %v13567_v26  ;;  %8436 = vmatprep.subr.bf16.mxu0 %v13572_v29  ;;  %v13608_v26 = vld [vmem:[#allocation2 + $0x1374] ss:$408 sps:$4 sm:$0xff]  }
 0x129   :  { %8477 = vmatprep.subr.bf16.mxu1 %v13575_v30  ;;  %v13611_v29 = vld [vmem:[#allocation2 + $0x137c] ss:$408 sps:$4 sm:$0xff]   ;;  %v13606_v30 = vld [vmem:[#allocation2 + $0x1370] ss:$408 sps:$4 sm:$0xff]  }
 0x12a   :  { %8387 = vmatmul.mubr.bf16.vlgmr.msra.gmra.mrb[16].mxu0 %v15283_v63 }
 0x12b   :  { %8428 = vmatmul.mubr.bf16.vlgmr.msra.gmra.mrb[16].mxu1 %v15283_v63  ;;  %8437 = vmatpush1.bf16.msra.mxu0 %v13570_v35  ;;  %v13609_v35 = vld [vmem:[#allocation2 + $0x1378] ss:$408 sps:$4 sm:$0xff]  }
 0x12c   :  { %8478 = vmatpush1.bf16.msra.mxu1 %v13573_v36  ;;  %8438 = vmatprep.subr.bf16.mxu0 %v13578_v41  ;;  %v13614_v36 = vld [vmem:[#allocation2 + $0x16a4] ss:$408 sps:$4 sm:$0xff]   ;;  %v13620_v41 = vld [vmem:[#allocation2 + $0x19d4] ss:$408 sps:$4 sm:$0xff]  }
 0x12d   :  { %8479 = vmatprep.subr.bf16.mxu1 %v13581_v42  ;;  %v8060_v53 = vpop.f32.mrb[0].mxu0  ;;  %13082 = vmatprep.mubr.msk.bf16.mxu0 %vm8022_vm0, %v15276_v50  ;;  %v13623_v42 = vld [vmem:[#allocation2 + $0x19dc] ss:$408 sps:$4 sm:$0xff]  }
 0x12e   :  { %v8101_v54 = vpop.f32.mrb[0].mxu1  ;;  %13083 = vmatprep.mubr.msk.bf16.mxu1 %vm8022_vm0, %v15276_v50  ;;  %v10143_v57 = vmax.f32 %v8060_v53, 0.0  ;;  %v8062_v59 = vpop.f32.mrb[1].mxu0 }
 0x12f   :  { %v10145_v58 = vmax.f32 %v8101_v54, 0.0  ;;  %v8103_v60 = vpop.f32.mrb[1].mxu1  ;;  %v10144_v61 = vmax.f32 %v8062_v59, 0.0  ;;  %v8064_v0 = vpop.f32.mrb[2].mxu0  ;;  %8439 = vmatpush1.bf16.msra.mxu0 %v13576_v45  ;;  %v13621_v45 = vld [vmem:[#allocation2 + $0x19d8] ss:$408 sps:$4 sm:$0xff]  }
 0x130   :  { %v10146_v62 = vmax.f32 %v8103_v60, 0.0  ;;  %8480 = vmatpush1.bf16.msra.mxu1 %v13579_v46  ;;  %v8105_v2 = vpop.f32.mrb[2].mxu1  ;;  %v10768_v3 = vsel %vm15334_vm2, %v10143_v57, %v8060_v53  ;;  %v8065_v5 = vpop.f32.mrb[3].mxu0  ;;  %8440 = vmatprep.subr.bf16.mxu0 %v13584_v47  ;;  %v13626_v46 = vld [vmem:[#allocation2 + $0x1d04] ss:$408 sps:$4 sm:$0xff]   ;;  %v15371_v0 = vsub.s32 4, %v15267_v38 }
 0x131   :  { %v10770_v4 = vsel %vm15338_vm3, %v10145_v58, %v8101_v54  ;;  %8481 = vmatprep.subr.bf16.mxu1 %v13587_v52  ;;  %v8106_v8 = vpop.f32.mrb[3].mxu1  ;;  %v10769_v9 = vsel %vm15342_vm4, %v10144_v61, %v8062_v59  ;;  %v13629_v47 = vld [vmem:[#allocation2 + $0x1d0c] ss:$408 sps:$4 sm:$0xff]   ;;  %v13635_v52 = vld [vmem:[#allocation2 + $0x203c] ss:$408 sps:$4 sm:$0xff]   ;;  %v15380_v5 = vsub.s32 7, %v15267_v38 }
 0x132   :  { %v10771_v10 = vsel %vm15346_vm5, %v10146_v62, %v8103_v60  ;;  %v13123_v11 = vpack.c.bf16 %v10769_v9, %v10768_v3  ;;  %v13630_v53 = vld [vmem:[#allocation2 + $0x2030] ss:$408 sps:$4 sm:$0xff]   ;;  %v13636_v57 = vld [vmem:[#allocation2 + $0x2360] ss:$408 sps:$4 sm:$0xff]   ;;  %v13644_v59 = vld [vmem:[#allocation2 + $0x2694] ss:$408 sps:$4 sm:$0xff]  }
 0x133   :  { %v13124_v12 = vpack.c.bf16 %v10771_v10, %v10770_v4  ;;  %8441 = vmatpush1.bf16.msra.mxu0 %v13582_v56  ;;  %v13633_v54 = vld [vmem:[#allocation2 + $0x2038] ss:$408 sps:$4 sm:$0xff]   ;;  %v13641_v56 = vld [vmem:[#allocation2 + $0x236c] ss:$408 sps:$4 sm:$0xff]   ;;  %v13639_v58 = vld [vmem:[#allocation2 + $0x2368] ss:$408 sps:$4 sm:$0xff]  }
 0x134   :  { %8482 = vmatpush1.bf16.msra.mxu1 %v13585_v1  ;;  %v15363_v15 = vrot.slane %v13123_v11, %v15270_v43  ;;  %8442 = vmatprep.subr.bf16.mxu0 %v13590_v6  ;;  %v13647_v60 = vld [vmem:[#allocation2 + $0x269c] ss:$408 sps:$4 sm:$0xff]   ;;  %v13642_v61 = vld [vmem:[#allocation2 + $0x2690] ss:$408 sps:$4 sm:$0xff]   ;;  %v15374_v1 = vsub.s32 6, %v15267_v38  ;;  %v15377_v4 = vsub.s32 5, %v15267_v38  ;;  %v10277_v6 = vrot.slane %v15319_v33, %v15371_v0 }
 0x135   :  { %v15366_v16 = vrot.slane %v13124_v12, %v15270_v43  ;;  %8483 = vmatprep.subr.bf16.mxu1 %v13593_v7  ;;  %v13645_v62 = vld [vmem:[#allocation2 + $0x2698] ss:$408 sps:$4 sm:$0xff]   ;;  %v13650_v2 = vld [vmem:[#allocation2 + $0x64] ss:$408 sps:$4 sm:$0xff]   ;;  %v13651_v8 = vld [vmem:[#allocation2 + $0x68] ss:$408 sps:$4 sm:$0xff]   ;;  %v10289_v38 = vrot.slane %v15319_v33, %v15380_v5 }
 0x136   :  { %v13653_v3 = vld [vmem:[#allocation2 + $0x6c] ss:$408 sps:$4 sm:$0xff]   ;;  %v13648_v7 = vld [vmem:[#allocation2 + $0x60] ss:$408 sps:$4 sm:$0xff]   ;;  %v10285_v9 = vrot.slane %v15319_v33, %v15374_v1  ;;  %v10281_v10 = vrot.slane %v15319_v33, %v15377_v4  ;;  %v13659_v12 = vld [vmem:[#allocation2 + $0x39c] ss:$408 sps:$4 sm:$0xff]  }
 0x137   :  { %v11106_v19 = vcombine.low %v15363_v15, %v15366_v16  ;;  %8443 = vmatpush1.bf16.msra.mxu0 %v13588_v13  ;;  %v13656_v11 = vld [vmem:[#allocation2 + $0x394] ss:$408 sps:$4 sm:$0xff]   ;;  %vm15392_vm6 = vcmp.eq.s32.totalorder %v10277_v6, 1  ;;  %v13662_v33 = vld [vmem:[#allocation2 + $0x6c4] ss:$408 sps:$4 sm:$0xff]   ;;  %vm15404_vm9 = vcmp.eq.s32.totalorder %v10289_v38, 1 }
 0x138   :  { %8484 = vmatpush1.bf16.msra.mxu1 %v13591_v14  ;;  %8444 = vmatprep.subr.bf16.mxu0 %v13596_v17  ;;  %vm15396_vm7 = vcmp.eq.s32.totalorder %v10285_v9, 1  ;;  %v13654_v17 = vld [vmem:[#allocation2 + $0x390] ss:$408 sps:$4 sm:$0xff]   ;;  %vm15400_vm8 = vcmp.eq.s32.totalorder %v10281_v10, 1  ;;  %v13680_v6 = vld [vmem:[#allocation2 + $0x1054] ss:$408 sps:$4 sm:$0xff]  }
 0x139   :  { %8485 = vmatprep.subr.bf16.mxu1 %v13599_v18  ;;  %v13657_v18 = vld [vmem:[#allocation2 + $0x398] ss:$408 sps:$4 sm:$0xff]   ;;  %v13689_v15 = vld [vmem:[#allocation2 + $0x138c] ss:$408 sps:$4 sm:$0xff]   ;;  %v13695_v38 = vld [vmem:[#allocation2 + $0x16bc] ss:$408 sps:$4 sm:$0xff]  }
 0x13a   :  { %v13678_v9 = vld [vmem:[#allocation2 + $0x1050] ss:$408 sps:$4 sm:$0xff]   ;;  %v13684_v16 = vld [vmem:[#allocation2 + $0x1380] ss:$408 sps:$4 sm:$0xff]  }
 0x13b   :  { %8445 = vmatpush1.bf16.msra.mxu0 %v13594_v20  ;;  %v13681_v10 = vld [vmem:[#allocation2 + $0x1058] ss:$408 sps:$4 sm:$0xff]  }
 0x13c   :  { %8486 = vmatpush1.bf16.msra.mxu1 %v13597_v21  ;;  %8446 = vmatprep.subr.bf16.mxu0 %v13602_v22  ;;  %v13665_v21 = vld [vmem:[#allocation2 + $0x6cc] ss:$408 sps:$4 sm:$0xff]   ;;  %v13690_v13 = vld [vmem:[#allocation2 + $0x16b0] ss:$408 sps:$4 sm:$0xff]   ;;  %v13696_v20 = vld [vmem:[#allocation2 + $0x19e0] ss:$408 sps:$4 sm:$0xff]  }
 0x13d   :  { %8487 = vmatprep.subr.bf16.mxu1 %v13605_v23  ;;  %v13693_v14 = vld [vmem:[#allocation2 + $0x16b8] ss:$408 sps:$4 sm:$0xff]  }
 0x13f   :  { %8447 = vmatpush1.bf16.msra.mxu0 %v13600_v24  ;;  %v13705_v24 = vld [vmem:[#allocation2 + $0x1d18] ss:$408 sps:$4 sm:$0xff]  }
 0x140   :  { %8488 = vmatpush1.bf16.msra.mxu1 %v13603_v25  ;;  %8448 = vmatprep.subr.bf16.mxu0 %v13608_v26  ;;  %v13660_v25 = vld [vmem:[#allocation2 + $0x6c0] ss:$408 sps:$4 sm:$0xff]  }
 0x141   :  { %8489 = vmatprep.subr.bf16.mxu1 %v13611_v29 }
 0x143   :  { %8449 = vmatpush1.bf16.msra.mxu0 %v13606_v30 }
 0x144   :  { %8490 = vmatpush1.bf16.msra.mxu1 %v13609_v35  ;;  %8450 = vmatprep.subr.bf16.mxu0 %v13614_v36 }
 0x145   :  { %8491 = vmatprep.subr.bf16.mxu1 %v13617_v37 }
 0x147   :  { %8451 = vmatpush1.bf16.msra.mxu0 %v13612_v39 }
 0x148   :  { %8492 = vmatpush1.bf16.msra.mxu1 %v13615_v40  ;;  %8452 = vmatprep.subr.bf16.mxu0 %v13620_v41  ;;  %v13663_v40 = vld [vmem:[#allocation2 + $0x6c8] ss:$408 sps:$4 sm:$0xff]  }
 0x149   :  { %8493 = vmatprep.subr.bf16.mxu1 %v13623_v42 }
 0x14b   :  { %8453 = vmatpush1.bf16.msra.mxu0 %v13618_v44 }
 0x14c   :  { %8494 = vmatpush1.bf16.msra.mxu1 %v13621_v45  ;;  %8454 = vmatprep.subr.bf16.mxu0 %v13626_v46  ;;  %v13668_v46 = vld [vmem:[#allocation2 + $0x9f4] ss:$408 sps:$4 sm:$0xff]  }
 0x14d   :  { %8495 = vmatprep.subr.bf16.mxu1 %v13629_v47  ;;  %v13671_v47 = vld [vmem:[#allocation2 + $0x9fc] ss:$408 sps:$4 sm:$0xff]  }
 0x14f   :  { %8455 = vmatpush1.bf16.msra.mxu0 %v13624_v48 }
 0x150   :  { %8496 = vmatpush1.bf16.msra.mxu1 %v13627_v49  ;;  %8456 = vmatprep.subr.bf16.mxu0 %v13632_v51 }
 0x151   :  { %8497 = vmatprep.subr.bf16.mxu1 %v13635_v52 }
 0x153   :  { %8457 = vmatpush1.bf16.msra.mxu0 %v13630_v53 }
 0x154   :  { %8498 = vmatpush1.bf16.msra.mxu1 %v13633_v54  ;;  %8458 = vmatprep.subr.bf16.mxu0 %v13638_v55  ;;  %v13666_v54 = vld [vmem:[#allocation2 + $0x9f0] ss:$408 sps:$4 sm:$0xff]  }
 0x155   :  { %8499 = vmatprep.subr.bf16.mxu1 %v13641_v56  ;;  %v13669_v55 = vld [vmem:[#allocation2 + $0x9f8] ss:$408 sps:$4 sm:$0xff]  }
 0x157   :  { %8459 = vmatpush1.bf16.msra.mxu0 %v13636_v57 }
 0x158   :  { %8500 = vmatpush1.bf16.msra.mxu1 %v13639_v58  ;;  %8460 = vmatprep.subr.bf16.mxu0 %v13644_v59  ;;  %v13674_v58 = vld [vmem:[#allocation2 + $0xd24] ss:$408 sps:$4 sm:$0xff]  }
 0x159   :  { %8501 = vmatprep.subr.bf16.mxu1 %v13647_v60  ;;  %v13677_v59 = vld [vmem:[#allocation2 + $0xd2c] ss:$408 sps:$4 sm:$0xff]  }
 0x15b   :  { %8461 = vmatpush1.bf16.msra.mxu0 %v13642_v61  ;;  %v13672_v61 = vld [vmem:[#allocation2 + $0xd20] ss:$408 sps:$4 sm:$0xff]  }
 0x15c   :  { %8502 = vmatpush1.bf16.msra.mxu1 %v13645_v62  ;;  %8518 = vmatprep.subr.bf16.mxu0 %v13650_v2  ;;  %v13675_v62 = vld [vmem:[#allocation2 + $0xd28] ss:$408 sps:$4 sm:$0xff]   ;;  %v11114_v2 = vrot.slane %v11106_v19, %v15270_v43 }
 0x15d   :  { %8559 = vmatprep.subr.bf16.mxu1 %v13653_v3  ;;  %v13687_v19 = vld [vmem:[#allocation2 + $0x1388] ss:$408 sps:$4 sm:$0xff]  }
 0x15e   :  { %8469 = vmatmul.mubr.bf16.vlgmr.msra.gmra.mrb[20].mxu0 %v15283_v63 }
 0x15f   :  { %8510 = vmatmul.mubr.bf16.vlgmr.msra.gmra.mrb[20].mxu1 %v15283_v63  ;;  %8519 = vmatpush1.bf16.msra.mxu0 %v13648_v7  ;;  %v13683_v7 = vld [vmem:[#allocation2 + $0x105c] ss:$408 sps:$4 sm:$0xff]  }
 0x160   :  { %8560 = vmatpush1.bf16.msra.mxu1 %v13651_v8  ;;  %8520 = vmatprep.subr.bf16.mxu0 %v13656_v11  ;;  %v13686_v11 = vld [vmem:[#allocation2 + $0x1384] ss:$408 sps:$4 sm:$0xff]  }
 0x161   :  { %8561 = vmatprep.subr.bf16.mxu1 %v13659_v12  ;;  %v8142_v22 = vpop.f32.mrb[4].mxu0  ;;  %13084 = vmatprep.mubr.msk.bf16.mxu0 %vm8022_vm0, %v15276_v50  ;;  %v13692_v12 = vld [vmem:[#allocation2 + $0x16b4] ss:$408 sps:$4 sm:$0xff]  }
 0x162   :  { %v8183_v23 = vpop.f32.mrb[4].mxu1  ;;  %13085 = vmatprep.mubr.msk.bf16.mxu1 %vm8022_vm0, %v15276_v50  ;;  %v10147_v26 = vmax.f32 %v8142_v22, 0.0  ;;  %v8144_v30 = vpop.f32.mrb[5].mxu0 }
 0x163   :  { %v10149_v29 = vmax.f32 %v8183_v23, 0.0  ;;  %v8185_v35 = vpop.f32.mrb[5].mxu1  ;;  %v10148_v36 = vmax.f32 %v8144_v30, 0.0  ;;  %v8146_v39 = vpop.f32.mrb[6].mxu0  ;;  %8521 = vmatpush1.bf16.msra.mxu0 %v13654_v17  ;;  %v13698_v17 = vld [vmem:[#allocation2 + $0x19e4] ss:$408 sps:$4 sm:$0xff]  }
 0x164   :  { %v10150_v37 = vmax.f32 %v8185_v35, 0.0  ;;  %8562 = vmatpush1.bf16.msra.mxu1 %v13657_v18  ;;  %v8187_v41 = vpop.f32.mrb[6].mxu1  ;;  %v10772_v42 = vsel %vm15392_vm6, %v10147_v26, %v8142_v22  ;;  %v8147_v45 = vpop.f32.mrb[7].mxu0  ;;  %8522 = vmatprep.subr.bf16.mxu0 %v13662_v33  ;;  %v13701_v18 = vld [vmem:[#allocation2 + $0x19ec] ss:$408 sps:$4 sm:$0xff]  }
 0x165   :  { %v10774_v44 = vsel %vm15396_vm7, %v10149_v29, %v8183_v23  ;;  %8563 = vmatprep.subr.bf16.mxu1 %v13665_v21  ;;  %v8188_v48 = vpop.f32.mrb[7].mxu1  ;;  %v10773_v49 = vsel %vm15400_vm8, %v10148_v36, %v8144_v30  ;;  %v13699_v33 = vld [vmem:[#allocation2 + $0x19e8] ss:$408 sps:$4 sm:$0xff]   ;;  %v13704_v21 = vld [vmem:[#allocation2 + $0x1d14] ss:$408 sps:$4 sm:$0xff]  }
 0x166   :  { %v10775_v51 = vsel %vm15404_vm9, %v10150_v37, %v8185_v35  ;;  %v13125_v52 = vpack.c.bf16 %v10773_v49, %v10772_v42  ;;  %v13707_v22 = vld [vmem:[#allocation2 + $0x1d1c] ss:$408 sps:$4 sm:$0xff]   ;;  %v13702_v23 = vld [vmem:[#allocation2 + $0x1d10] ss:$408 sps:$4 sm:$0xff]   ;;  %v13713_v26 = vld [vmem:[#allocation2 + $0x204c] ss:$408 sps:$4 sm:$0xff]  }
 0x167   :  { %v13126_v53 = vpack.c.bf16 %v10775_v51, %v10774_v44  ;;  %8523 = vmatpush1.bf16.msra.mxu0 %v13660_v25  ;;  %v13710_v25 = vld [vmem:[#allocation2 + $0x2044] ss:$408 sps:$4 sm:$0xff]   ;;  %v13708_v29 = vld [vmem:[#allocation2 + $0x2040] ss:$408 sps:$4 sm:$0xff]   ;;  %v13716_v35 = vld [vmem:[#allocation2 + $0x2374] ss:$408 sps:$4 sm:$0xff]  }
 0x168   :  { %8564 = vmatpush1.bf16.msra.mxu1 %v13663_v40  ;;  %v11098_v56 = vrot.slane %v13125_v52, %v15270_v43  ;;  %8524 = vmatprep.subr.bf16.mxu0 %v13668_v46  ;;  %v13711_v30 = vld [vmem:[#allocation2 + $0x2048] ss:$408 sps:$4 sm:$0xff]   ;;  %v13719_v36 = vld [vmem:[#allocation2 + $0x237c] ss:$408 sps:$4 sm:$0xff]   ;;  %v13717_v39 = vld [vmem:[#allocation2 + $0x2378] ss:$408 sps:$4 sm:$0xff]  }
 0x169   :  { %v11105_v57 = vrot.slane %v13126_v53, %v15270_v43  ;;  %8565 = vmatprep.subr.bf16.mxu1 %v13671_v47  ;;  %v13714_v37 = vld [vmem:[#allocation2 + $0x2370] ss:$408 sps:$4 sm:$0xff]   ;;  %v10118_v40 = vld [vmem:[#allocation4 + $0x8] sm:$0xff]  ;;  %v13725_v42 = vld [vmem:[#allocation2 + $0x26ac] ss:$408 sps:$4 sm:$0xff]  }
 0x16a   :  { %v13722_v41 = vld [vmem:[#allocation2 + $0x26a4] ss:$408 sps:$4 sm:$0xff]   ;;  %vm10131_vm10 = vcmp.ne.f32.partialorder %v10118_v40, 0.0  ;;  %v13720_v44 = vld [vmem:[#allocation2 + $0x26a0] ss:$408 sps:$4 sm:$0xff]  }
 0x16b   :  { %v11107_v60 = vcombine.low %v11098_v56, %v11105_v57  ;;  %8525 = vmatpush1.bf16.msra.mxu0 %v13666_v54  ;;  %v13723_v45 = vld [vmem:[#allocation2 + $0x26a8] ss:$408 sps:$4 sm:$0xff]   ;;  %v13728_v46 = vld [vmem:[#allocation2 + $0x74] ss:$408 sps:$4 sm:$0xff]   ;;  %v15431_v48 = vsel %vm10131_vm10, 1, %v15222_v32 }
 0x16c   :  { %8566 = vmatpush1.bf16.msra.mxu1 %v13669_v55  ;;  %8526 = vmatprep.subr.bf16.mxu0 %v13674_v58  ;;  %v13731_v47 = vld [vmem:[#allocation2 + $0x7c] ss:$408 sps:$4 sm:$0xff]   ;;  %v13726_v49 = vld [vmem:[#allocation2 + $0x70] ss:$408 sps:$4 sm:$0xff]   ;;  %v10293_v52 = vrot.slane %v15431_v48, %v15310_v27  ;;  %v10301_v53 = vrot.slane %v15431_v48, %v15313_v28  ;;  %v10297_v54 = vrot.slane %v15431_v48, %v15316_v31  ;;  %v13737_v56 = vld [vmem:[#allocation2 + $0x3ac] ss:$408 sps:$4 sm:$0xff]  }
 0x16d   :  { %v11121_v3 = vrot.slane %v11107_v60, %v15270_v43  ;;  %8567 = vmatprep.subr.bf16.mxu1 %v13677_v59  ;;  %v13729_v51 = vld [vmem:[#allocation2 + $0x78] ss:$408 sps:$4 sm:$0xff]   ;;  %v13734_v55 = vld [vmem:[#allocation2 + $0x3a4] ss:$408 sps:$4 sm:$0xff]   ;;  %v10305_v57 = vrot.slane %v15431_v48, %v15322_v34  ;;  %v13735_v59 = vld [vmem:[#allocation2 + $0x3a8] ss:$408 sps:$4 sm:$0xff]  }
 0x16e   :  { %v13732_v58 = vld [vmem:[#allocation2 + $0x3a0] ss:$408 sps:$4 sm:$0xff]   ;;  %v13740_v60 = vld [vmem:[#allocation2 + $0x6d4] ss:$408 sps:$4 sm:$0xff]   ;;  %vm15443_vm11 = vcmp.eq.s32.totalorder %v10293_v52, 1  ;;  %vm15447_vm12 = vcmp.eq.s32.totalorder %v10301_v53, 1 }
 0x16f   :  { %v11122_v8 = vcombine.low %v11114_v2, %v11121_v3  ;;  %8527 = vmatpush1.bf16.msra.mxu0 %v13672_v61  ;;  %vm15451_vm13 = vcmp.eq.s32.totalorder %v10297_v54, 1  ;;  %v13743_v3 = vld [vmem:[#allocation2 + $0x6dc] ss:$408 sps:$4 sm:$0xff]   ;;  %vm15455_vm14 = vcmp.eq.s32.totalorder %v10305_v57, 1  ;;  %v13762_v52 = vld [vmem:[#allocation2 + $0x1390] ss:$408 sps:$4 sm:$0xff]  }
 0x170   :  { %8568 = vmatpush1.bf16.msra.mxu1 %v13675_v62  ;;  %8528 = vmatprep.subr.bf16.mxu0 %v13680_v6  ;;  %v13765_v53 = vld [vmem:[#allocation2 + $0x1398] ss:$408 sps:$4 sm:$0xff]   ;;  %v13770_v54 = vld [vmem:[#allocation2 + $0x16c4] ss:$408 sps:$4 sm:$0xff]   ;;  %v13771_v57 = vld [vmem:[#allocation2 + $0x16c8] ss:$408 sps:$4 sm:$0xff]  }
 0x171   :  { %11715 = vst [vmem:[%s16381_s3] sm:$0xff] %v11122_v8  ;;  %8569 = vmatprep.subr.bf16.mxu1 %v13683_v7  ;;  %v13777_v61 = vld [vmem:[#allocation2 + $0x19f8] ss:$408 sps:$4 sm:$0xff]   ;;  %v13782_v62 = vld [vmem:[#allocation2 + $0x1d24] ss:$408 sps:$4 sm:$0xff]  }
 0x172   :  { %v13785_v2 = vld [vmem:[#allocation2 + $0x1d2c] ss:$408 sps:$4 sm:$0xff]   ;;  %v13791_v8 = vld [vmem:[#allocation2 + $0x205c] ss:$408 sps:$4 sm:$0xff]  }
 0x173   :  { %8529 = vmatpush1.bf16.msra.mxu0 %v13678_v9  ;;  %v13738_v9 = vld [vmem:[#allocation2 + $0x6d0] ss:$408 sps:$4 sm:$0xff]  }
 0x174   :  { %8570 = vmatpush1.bf16.msra.mxu1 %v13681_v10  ;;  %8530 = vmatprep.subr.bf16.mxu0 %v13686_v11 }
 0x175   :  { %8571 = vmatprep.subr.bf16.mxu1 %v13689_v15 }
 0x177   :  { %8531 = vmatpush1.bf16.msra.mxu0 %v13684_v16 }
 0x178   :  { %8572 = vmatpush1.bf16.msra.mxu1 %v13687_v19  ;;  %8532 = vmatprep.subr.bf16.mxu0 %v13692_v12 }
 0x179   :  { %8573 = vmatprep.subr.bf16.mxu1 %v13695_v38 }
 0x17b   :  { %8533 = vmatpush1.bf16.msra.mxu0 %v13690_v13  ;;  %v13741_v13 = vld [vmem:[#allocation2 + $0x6d8] ss:$408 sps:$4 sm:$0xff]  }
 0x17c   :  { %8574 = vmatpush1.bf16.msra.mxu1 %v13693_v14  ;;  %8534 = vmatprep.subr.bf16.mxu0 %v13698_v17 }
 0x17d   :  { %8575 = vmatprep.subr.bf16.mxu1 %v13701_v18 }
 0x17f   :  { %8535 = vmatpush1.bf16.msra.mxu0 %v13696_v20 }
 0x180   :  { %8576 = vmatpush1.bf16.msra.mxu1 %v13699_v33  ;;  %8536 = vmatprep.subr.bf16.mxu0 %v13704_v21  ;;  %v13746_v33 = vld [vmem:[#allocation2 + $0xa04] ss:$408 sps:$4 sm:$0xff]  }
 0x181   :  { %8577 = vmatprep.subr.bf16.mxu1 %v13707_v22  ;;  %v13749_v21 = vld [vmem:[#allocation2 + $0xa0c] ss:$408 sps:$4 sm:$0xff]  }
 0x183   :  { %8537 = vmatpush1.bf16.msra.mxu0 %v13702_v23 }
 0x184   :  { %8578 = vmatpush1.bf16.msra.mxu1 %v13705_v24  ;;  %8538 = vmatprep.subr.bf16.mxu0 %v13710_v25 }
 0x185   :  { %8579 = vmatprep.subr.bf16.mxu1 %v13713_v26 }
 0x187   :  { %8539 = vmatpush1.bf16.msra.mxu0 %v13708_v29  ;;  %v13744_v29 = vld [vmem:[#allocation2 + $0xa00] ss:$408 sps:$4 sm:$0xff]  }
 0x188   :  { %8580 = vmatpush1.bf16.msra.mxu1 %v13711_v30  ;;  %8540 = vmatprep.subr.bf16.mxu0 %v13716_v35  ;;  %v13747_v30 = vld [vmem:[#allocation2 + $0xa08] ss:$408 sps:$4 sm:$0xff]  }
 0x189   :  { %8581 = vmatprep.subr.bf16.mxu1 %v13719_v36 }
 0x18b   :  { %8541 = vmatpush1.bf16.msra.mxu0 %v13714_v37  ;;  %v13752_v37 = vld [vmem:[#allocation2 + $0xd34] ss:$408 sps:$4 sm:$0xff]  }
 0x18c   :  { %8582 = vmatpush1.bf16.msra.mxu1 %v13717_v39  ;;  %8542 = vmatprep.subr.bf16.mxu0 %v13722_v41  ;;  %v13755_v39 = vld [vmem:[#allocation2 + $0xd3c] ss:$408 sps:$4 sm:$0xff]   ;;  %v13750_v41 = vld [vmem:[#allocation2 + $0xd30] ss:$408 sps:$4 sm:$0xff]  }
 0x18d   :  { %8583 = vmatprep.subr.bf16.mxu1 %v13725_v42  ;;  %v13753_v42 = vld [vmem:[#allocation2 + $0xd38] ss:$408 sps:$4 sm:$0xff]  }
 0x18f   :  { %8543 = vmatpush1.bf16.msra.mxu0 %v13720_v44  ;;  %v13758_v44 = vld [vmem:[#allocation2 + $0x1064] ss:$408 sps:$4 sm:$0xff]  }
 0x190   :  { %8584 = vmatpush1.bf16.msra.mxu1 %v13723_v45  ;;  %8600 = vmatprep.subr.bf16.mxu0 %v13728_v46  ;;  %v13761_v45 = vld [vmem:[#allocation2 + $0x106c] ss:$408 sps:$4 sm:$0xff]   ;;  %v13756_v46 = vld [vmem:[#allocation2 + $0x1060] ss:$408 sps:$4 sm:$0xff]  }
 0x191   :  { %8641 = vmatprep.subr.bf16.mxu1 %v13731_v47  ;;  %v13759_v47 = vld [vmem:[#allocation2 + $0x1068] ss:$408 sps:$4 sm:$0xff]  }
 0x192   :  { %8551 = vmatmul.mubr.bf16.vlgmr.msra.gmra.mrb[24].mxu0 %v15283_v63 }
 0x193   :  { %8592 = vmatmul.mubr.bf16.vlgmr.msra.gmra.mrb[24].mxu1 %v15283_v63  ;;  %8601 = vmatpush1.bf16.msra.mxu0 %v13726_v49  ;;  %v13764_v49 = vld [vmem:[#allocation2 + $0x1394] ss:$408 sps:$4 sm:$0xff]  }
 0x194   :  { %8642 = vmatpush1.bf16.msra.mxu1 %v13729_v51  ;;  %8602 = vmatprep.subr.bf16.mxu0 %v13734_v55  ;;  %v13767_v51 = vld [vmem:[#allocation2 + $0x139c] ss:$408 sps:$4 sm:$0xff]   ;;  %v13773_v55 = vld [vmem:[#allocation2 + $0x16cc] ss:$408 sps:$4 sm:$0xff]  }
 0x195   :  { %8643 = vmatprep.subr.bf16.mxu1 %v13737_v56  ;;  %v8224_v6 = vpop.f32.mrb[8].mxu0  ;;  %13086 = vmatprep.mubr.msk.bf16.mxu0 %vm8022_vm0, %v15276_v50  ;;  %v13768_v56 = vld [vmem:[#allocation2 + $0x16c0] ss:$408 sps:$4 sm:$0xff]  }
 0x196   :  { %v8265_v7 = vpop.f32.mrb[8].mxu1  ;;  %13087 = vmatprep.mubr.msk.bf16.mxu1 %vm8022_vm0, %v15276_v50  ;;  %v10151_v10 = vmax.f32 %v8224_v6, 0.0  ;;  %v8226_v15 = vpop.f32.mrb[9].mxu0 }
 0x197   :  { %v10153_v11 = vmax.f32 %v8265_v7, 0.0  ;;  %v8267_v16 = vpop.f32.mrb[9].mxu1  ;;  %v10152_v19 = vmax.f32 %v8226_v15, 0.0  ;;  %v8228_v38 = vpop.f32.mrb[10].mxu0  ;;  %8603 = vmatpush1.bf16.msra.mxu0 %v13732_v58  ;;  %v13776_v58 = vld [vmem:[#allocation2 + $0x19f4] ss:$408 sps:$4 sm:$0xff]  }
 0x198   :  { %v10154_v12 = vmax.f32 %v8267_v16, 0.0  ;;  %8644 = vmatpush1.bf16.msra.mxu1 %v13735_v59  ;;  %v8269_v14 = vpop.f32.mrb[10].mxu1  ;;  %v10776_v17 = vsel %vm15443_vm11, %v10151_v10, %v8224_v6  ;;  %v8229_v20 = vpop.f32.mrb[11].mxu0  ;;  %8604 = vmatprep.subr.bf16.mxu0 %v13740_v60  ;;  %v13779_v59 = vld [vmem:[#allocation2 + $0x19fc] ss:$408 sps:$4 sm:$0xff]  }
 0x199   :  { %v10778_v18 = vsel %vm15447_vm12, %v10153_v11, %v8265_v7  ;;  %8645 = vmatprep.subr.bf16.mxu1 %v13743_v3  ;;  %v8270_v22 = vpop.f32.mrb[11].mxu1  ;;  %v10777_v23 = vsel %vm15451_vm13, %v10152_v19, %v8226_v15  ;;  %v13774_v60 = vld [vmem:[#allocation2 + $0x19f0] ss:$408 sps:$4 sm:$0xff]   ;;  %v13780_v3 = vld [vmem:[#allocation2 + $0x1d20] ss:$408 sps:$4 sm:$0xff]  }
 0x19a   :  { %v10779_v24 = vsel %vm15455_vm14, %v10154_v12, %v8267_v16  ;;  %v13127_v25 = vpack.c.bf16 %v10777_v23, %v10776_v17  ;;  %v13783_v6 = vld [vmem:[#allocation2 + $0x1d28] ss:$408 sps:$4 sm:$0xff]   ;;  %v13788_v7 = vld [vmem:[#allocation2 + $0x2054] ss:$408 sps:$4 sm:$0xff]   ;;  %v13789_v10 = vld [vmem:[#allocation2 + $0x2058] ss:$408 sps:$4 sm:$0xff]   ;;  %v10317_v22 = vrot.slane %v15431_v48, %v15374_v1  ;;  %v10313_v23 = vrot.slane %v15431_v48, %v15377_v4 }
 0x19b   :  { %v13128_v26 = vpack.c.bf16 %v10779_v24, %v10778_v18  ;;  %8605 = vmatpush1.bf16.msra.mxu0 %v13738_v9  ;;  %v13786_v9 = vld [vmem:[#allocation2 + $0x2050] ss:$408 sps:$4 sm:$0xff]   ;;  %v13794_v11 = vld [vmem:[#allocation2 + $0x2384] ss:$408 sps:$4 sm:$0xff]   ;;  %v13792_v16 = vld [vmem:[#allocation2 + $0x2380] ss:$408 sps:$4 sm:$0xff]  }
 0x19c   :  { %8646 = vmatpush1.bf16.msra.mxu1 %v13741_v13  ;;  %v15472_v35 = vrot.slane %v13127_v25, %v15270_v43  ;;  %8606 = vmatprep.subr.bf16.mxu0 %v13746_v33  ;;  %v13797_v15 = vld [vmem:[#allocation2 + $0x238c] ss:$408 sps:$4 sm:$0xff]   ;;  %v13795_v19 = vld [vmem:[#allocation2 + $0x2388] ss:$408 sps:$4 sm:$0xff]   ;;  %v13803_v38 = vld [vmem:[#allocation2 + $0x26bc] ss:$408 sps:$4 sm:$0xff]  }
 0x19d   :  { %v15475_v36 = vrot.slane %v13128_v26, %v15270_v43  ;;  %8647 = vmatprep.subr.bf16.mxu1 %v13749_v21  ;;  %v13800_v12 = vld [vmem:[#allocation2 + $0x26b4] ss:$408 sps:$4 sm:$0xff]   ;;  %v13798_v13 = vld [vmem:[#allocation2 + $0x26b0] ss:$408 sps:$4 sm:$0xff]   ;;  %v13806_v17 = vld [vmem:[#allocation2 + $0x84] ss:$408 sps:$4 sm:$0xff]   ;;  %v10309_v21 = vrot.slane %v15431_v48, %v15371_v0  ;;  %v10321_v26 = vrot.slane %v15431_v48, %v15380_v5 }
 0x19e   :  { %v13801_v14 = vld [vmem:[#allocation2 + $0x26b8] ss:$408 sps:$4 sm:$0xff]   ;;  %v13809_v18 = vld [vmem:[#allocation2 + $0x8c] ss:$408 sps:$4 sm:$0xff]   ;;  %v13807_v33 = vld [vmem:[#allocation2 + $0x88] ss:$408 sps:$4 sm:$0xff]  }
 0x19f   :  { %v11155_v40 = vcombine.low %v15472_v35, %v15475_v36  ;;  %8607 = vmatpush1.bf16.msra.mxu0 %v13744_v29  ;;  %v13804_v20 = vld [vmem:[#allocation2 + $0x80] ss:$408 sps:$4 sm:$0xff]   ;;  %v13812_v24 = vld [vmem:[#allocation2 + $0x3b4] ss:$408 sps:$4 sm:$0xff]   ;;  %v13810_v29 = vld [vmem:[#allocation2 + $0x3b0] ss:$408 sps:$4 sm:$0xff]  }
 0x1a0   :  { %8648 = vmatpush1.bf16.msra.mxu1 %v13747_v30  ;;  %8608 = vmatprep.subr.bf16.mxu0 %v13752_v37  ;;  %v13815_v25 = vld [vmem:[#allocation2 + $0x3bc] ss:$408 sps:$4 sm:$0xff]   ;;  %vm15489_vm15 = vcmp.eq.s32.totalorder %v10309_v21, 1  ;;  %vm15493_vm1 = vcmp.eq.s32.totalorder %v10317_v22, 1  ;;  %vm15497_vm2 = vcmp.eq.s32.totalorder %v10313_v23, 1  ;;  %vm15501_vm3 = vcmp.eq.s32.totalorder %v10321_v26, 1 }
 0x1a1   :  { %8649 = vmatprep.subr.bf16.mxu1 %v13755_v39  ;;  %v13813_v39 = vld [vmem:[#allocation2 + $0x3b8] ss:$408 sps:$4 sm:$0xff]   ;;  %v13818_v48 = vld [vmem:[#allocation2 + $0x6e4] ss:$408 sps:$4 sm:$0xff]  }
 0x1a2   :  { %v13834_v22 = vld [vmem:[#allocation2 + $0x1070] ss:$408 sps:$4 sm:$0xff]   ;;  %v13845_v35 = vld [vmem:[#allocation2 + $0x13ac] ss:$408 sps:$4 sm:$0xff]   ;;  %v13840_v36 = vld [vmem:[#allocation2 + $0x13a0] ss:$408 sps:$4 sm:$0xff]  }
 0x1a3   :  { %8609 = vmatpush1.bf16.msra.mxu0 %v13750_v41  ;;  %v13837_v23 = vld [vmem:[#allocation2 + $0x1078] ss:$408 sps:$4 sm:$0xff]   ;;  %v13851_v26 = vld [vmem:[#allocation2 + $0x16dc] ss:$408 sps:$4 sm:$0xff]  }
 0x1a4   :  { %8650 = vmatpush1.bf16.msra.mxu1 %v13753_v42  ;;  %8610 = vmatprep.subr.bf16.mxu0 %v13758_v44  ;;  %v13821_v42 = vld [vmem:[#allocation2 + $0x6ec] ss:$408 sps:$4 sm:$0xff]   ;;  %v13849_v30 = vld [vmem:[#allocation2 + $0x16d8] ss:$408 sps:$4 sm:$0xff]  }
 0x1a5   :  { %8651 = vmatprep.subr.bf16.mxu1 %v13761_v45  ;;  %v13854_v37 = vld [vmem:[#allocation2 + $0x1a04] ss:$408 sps:$4 sm:$0xff]   ;;  %v13852_v41 = vld [vmem:[#allocation2 + $0x1a00] ss:$408 sps:$4 sm:$0xff]  }
 0x1a7   :  { %8611 = vmatpush1.bf16.msra.mxu0 %v13756_v46  ;;  %v13861_v46 = vld [vmem:[#allocation2 + $0x1d38] ss:$408 sps:$4 sm:$0xff]  }
 0x1a8   :  { %8652 = vmatpush1.bf16.msra.mxu1 %v13759_v47  ;;  %8612 = vmatprep.subr.bf16.mxu0 %v13764_v49  ;;  %v13816_v47 = vld [vmem:[#allocation2 + $0x6e0] ss:$408 sps:$4 sm:$0xff]  }
 0x1a9   :  { %8653 = vmatprep.subr.bf16.mxu1 %v13767_v51 }
 0x1ab   :  { %8613 = vmatpush1.bf16.msra.mxu0 %v13762_v52 }
 0x1ac   :  { %8654 = vmatpush1.bf16.msra.mxu1 %v13765_v53  ;;  %8614 = vmatprep.subr.bf16.mxu0 %v13770_v54 }
 0x1ad   :  { %8655 = vmatprep.subr.bf16.mxu1 %v13773_v55 }
 0x1af   :  { %8615 = vmatpush1.bf16.msra.mxu0 %v13768_v56 }
 0x1b0   :  { %8656 = vmatpush1.bf16.msra.mxu1 %v13771_v57  ;;  %8616 = vmatprep.subr.bf16.mxu0 %v13776_v58  ;;  %v13819_v57 = vld [vmem:[#allocation2 + $0x6e8] ss:$408 sps:$4 sm:$0xff]  }
 0x1b1   :  { %8657 = vmatprep.subr.bf16.mxu1 %v13779_v59 }
 0x1b3   :  { %8617 = vmatpush1.bf16.msra.mxu0 %v13774_v60 }
 0x1b4   :  { %8658 = vmatpush1.bf16.msra.mxu1 %v13777_v61  ;;  %8618 = vmatprep.subr.bf16.mxu0 %v13782_v62  ;;  %v13824_v62 = vld [vmem:[#allocation2 + $0xa14] ss:$408 sps:$4 sm:$0xff]  }
 0x1b5   :  { %8659 = vmatprep.subr.bf16.mxu1 %v13785_v2  ;;  %v13827_v2 = vld [vmem:[#allocation2 + $0xa1c] ss:$408 sps:$4 sm:$0xff]  }
 0x1b7   :  { %8619 = vmatpush1.bf16.msra.mxu0 %v13780_v3 }
 0x1b8   :  { %8660 = vmatpush1.bf16.msra.mxu1 %v13783_v6  ;;  %8620 = vmatprep.subr.bf16.mxu0 %v13788_v7 }
 0x1b9   :  { %8661 = vmatprep.subr.bf16.mxu1 %v13791_v8 }
 0x1bb   :  { %8621 = vmatpush1.bf16.msra.mxu0 %v13786_v9 }
 0x1bc   :  { %8662 = vmatpush1.bf16.msra.mxu1 %v13789_v10  ;;  %8622 = vmatprep.subr.bf16.mxu0 %v13794_v11  ;;  %v13822_v10 = vld [vmem:[#allocation2 + $0xa10] ss:$408 sps:$4 sm:$0xff]  }
 0x1bd   :  { %8663 = vmatprep.subr.bf16.mxu1 %v13797_v15  ;;  %v13825_v11 = vld [vmem:[#allocation2 + $0xa18] ss:$408 sps:$4 sm:$0xff]  }
 0x1bf   :  { %8623 = vmatpush1.bf16.msra.mxu0 %v13792_v16 }
 0x1c0   :  { %8664 = vmatpush1.bf16.msra.mxu1 %v13795_v19  ;;  %8624 = vmatprep.subr.bf16.mxu0 %v13800_v12  ;;  %v13830_v19 = vld [vmem:[#allocation2 + $0xd44] ss:$408 sps:$4 sm:$0xff]  }
 0x1c1   :  { %8665 = vmatprep.subr.bf16.mxu1 %v13803_v38  ;;  %v13833_v12 = vld [vmem:[#allocation2 + $0xd4c] ss:$408 sps:$4 sm:$0xff]  }
 0x1c3   :  { %8625 = vmatpush1.bf16.msra.mxu0 %v13798_v13  ;;  %v13828_v13 = vld [vmem:[#allocation2 + $0xd40] ss:$408 sps:$4 sm:$0xff]  }
 0x1c4   :  { %8666 = vmatpush1.bf16.msra.mxu1 %v13801_v14  ;;  %8682 = vmatprep.subr.bf16.mxu0 %v13806_v17  ;;  %v13831_v14 = vld [vmem:[#allocation2 + $0xd48] ss:$408 sps:$4 sm:$0xff]   ;;  %v11163_v17 = vrot.slane %v11155_v40, %v15270_v43 }
 0x1c5   :  { %8723 = vmatprep.subr.bf16.mxu1 %v13809_v18  ;;  %v13843_v40 = vld [vmem:[#allocation2 + $0x13a8] ss:$408 sps:$4 sm:$0xff]  }
 0x1c6   :  { %8633 = vmatmul.mubr.bf16.vlgmr.msra.gmra.mrb[28].mxu0 %v15283_v63 }
 0x1c7   :  { %8674 = vmatmul.mubr.bf16.vlgmr.msra.gmra.mrb[28].mxu1 %v15283_v63  ;;  %8683 = vmatpush1.bf16.msra.mxu0 %v13804_v20  ;;  %v13836_v20 = vld [vmem:[#allocation2 + $0x1074] ss:$408 sps:$4 sm:$0xff]  }
 0x1c8   :  { %8724 = vmatpush1.bf16.msra.mxu1 %v13807_v33  ;;  %8684 = vmatprep.subr.bf16.mxu0 %v13812_v24  ;;  %v13839_v33 = vld [vmem:[#allocation2 + $0x107c] ss:$408 sps:$4 sm:$0xff]  }
 0x1c9   :  { %8725 = vmatprep.subr.bf16.mxu1 %v13815_v25  ;;  %v8306_v44 = vpop.f32.mrb[12].mxu0  ;;  %13088 = vmatprep.mubr.msk.bf16.mxu0 %vm8022_vm0, %v15276_v50  ;;  %v13842_v24 = vld [vmem:[#allocation2 + $0x13a4] ss:$408 sps:$4 sm:$0xff]   ;;  %v13848_v25 = vld [vmem:[#allocation2 + $0x16d4] ss:$408 sps:$4 sm:$0xff]  }
 0x1ca   :  { %v8347_v45 = vpop.f32.mrb[12].mxu1  ;;  %13089 = vmatprep.mubr.msk.bf16.mxu1 %vm8022_vm0, %v15276_v50  ;;  %v10155_v49 = vmax.f32 %v8306_v44, 0.0  ;;  %v8308_v52 = vpop.f32.mrb[13].mxu0 }
 0x1cb   :  { %v10157_v51 = vmax.f32 %v8347_v45, 0.0  ;;  %v8349_v53 = vpop.f32.mrb[13].mxu1  ;;  %v10156_v54 = vmax.f32 %v8308_v52, 0.0  ;;  %v8310_v56 = vpop.f32.mrb[14].mxu0  ;;  %8685 = vmatpush1.bf16.msra.mxu0 %v13810_v29  ;;  %v13846_v29 = vld [vmem:[#allocation2 + $0x16d0] ss:$408 sps:$4 sm:$0xff]  }
 0x1cc   :  { %v10158_v55 = vmax.f32 %v8349_v53, 0.0  ;;  %8726 = vmatpush1.bf16.msra.mxu1 %v13813_v39  ;;  %v8351_v58 = vpop.f32.mrb[14].mxu1  ;;  %v10780_v59 = vsel %vm15489_vm15, %v10155_v49, %v8306_v44  ;;  %v8311_v61 = vpop.f32.mrb[15].mxu0  ;;  %8686 = vmatprep.subr.bf16.mxu0 %v13818_v48  ;;  %v13857_v39 = vld [vmem:[#allocation2 + $0x1a0c] ss:$408 sps:$4 sm:$0xff]  }
 0x1cd   :  { %v10782_v60 = vsel %vm15493_vm1, %v10157_v51, %v8347_v45  ;;  %8727 = vmatprep.subr.bf16.mxu1 %v13821_v42  ;;  %v8352_v3 = vpop.f32.mrb[15].mxu1  ;;  %v10781_v6 = vsel %vm15497_vm2, %v10156_v54, %v8308_v52  ;;  %v13855_v48 = vld [vmem:[#allocation2 + $0x1a08] ss:$408 sps:$4 sm:$0xff]   ;;  %v13860_v42 = vld [vmem:[#allocation2 + $0x1d34] ss:$408 sps:$4 sm:$0xff]  }
 0x1ce   :  { %v10783_v7 = vsel %vm15501_vm3, %v10158_v55, %v8349_v53  ;;  %v13129_v8 = vpack.c.bf16 %v10781_v6, %v10780_v59  ;;  %v13863_v44 = vld [vmem:[#allocation2 + $0x1d3c] ss:$408 sps:$4 sm:$0xff]   ;;  %v13858_v45 = vld [vmem:[#allocation2 + $0x1d30] ss:$408 sps:$4 sm:$0xff]   ;;  %v13869_v49 = vld [vmem:[#allocation2 + $0x206c] ss:$408 sps:$4 sm:$0xff]  }
 0x1cf   :  { %v13130_v9 = vpack.c.bf16 %v10783_v7, %v10782_v60  ;;  %8687 = vmatpush1.bf16.msra.mxu0 %v13816_v47  ;;  %v13866_v47 = vld [vmem:[#allocation2 + $0x2064] ss:$408 sps:$4 sm:$0xff]   ;;  %v13864_v51 = vld [vmem:[#allocation2 + $0x2060] ss:$408 sps:$4 sm:$0xff]   ;;  %v13872_v53 = vld [vmem:[#allocation2 + $0x2394] ss:$408 sps:$4 sm:$0xff]  }
 0x1d0   :  { %8728 = vmatpush1.bf16.msra.mxu1 %v13819_v57  ;;  %v11147_v15 = vrot.slane %v13129_v8, %v15270_v43  ;;  %8688 = vmatprep.subr.bf16.mxu0 %v13824_v62  ;;  %v13867_v52 = vld [vmem:[#allocation2 + $0x2068] ss:$408 sps:$4 sm:$0xff]   ;;  %v13875_v54 = vld [vmem:[#allocation2 + $0x239c] ss:$408 sps:$4 sm:$0xff]   ;;  %v13873_v56 = vld [vmem:[#allocation2 + $0x2398] ss:$408 sps:$4 sm:$0xff]  }
 0x1d1   :  { %v11154_v16 = vrot.slane %v13130_v9, %v15270_v43  ;;  %8729 = vmatprep.subr.bf16.mxu1 %v13827_v2  ;;  %v13870_v55 = vld [vmem:[#allocation2 + $0x2390] ss:$408 sps:$4 sm:$0xff]   ;;  %v10119_v57 = vld [vmem:[#allocation4 + $0x10] sm:$0xff]  ;;  %v13884_v62 = vld [vmem:[#allocation2 + $0x94] ss:$408 sps:$4 sm:$0xff]  }
 0x1d2   :  { %v13878_v58 = vld [vmem:[#allocation2 + $0x26c4] ss:$408 sps:$4 sm:$0xff]   ;;  %vm10132_vm4 = vcmp.ne.f32.partialorder %v10119_v57, 0.0  ;;  %v13876_v60 = vld [vmem:[#allocation2 + $0x26c0] ss:$408 sps:$4 sm:$0xff]  }
 0x1d3   :  { %v11156_v38 = vcombine.low %v11147_v15, %v11154_v16  ;;  %8689 = vmatpush1.bf16.msra.mxu0 %v13822_v10  ;;  %v13881_v59 = vld [vmem:[#allocation2 + $0x26cc] ss:$408 sps:$4 sm:$0xff]   ;;  %v13879_v61 = vld [vmem:[#allocation2 + $0x26c8] ss:$408 sps:$4 sm:$0xff]   ;;  %v13887_v2 = vld [vmem:[#allocation2 + $0x9c] ss:$408 sps:$4 sm:$0xff]  }
 0x1d4   :  { %8730 = vmatpush1.bf16.msra.mxu1 %v13825_v11  ;;  %8690 = vmatprep.subr.bf16.mxu0 %v13830_v19  ;;  %v15528_v3 = vsel %vm10132_vm4, 1, %v15222_v32  ;;  %v13882_v6 = vld [vmem:[#allocation2 + $0x90] ss:$408 sps:$4 sm:$0xff]   ;;  %v13890_v11 = vld [vmem:[#allocation2 + $0x3c4] ss:$408 sps:$4 sm:$0xff]  }
 0x1d5   :  { %v11170_v18 = vrot.slane %v11156_v38, %v15270_v43  ;;  %8731 = vmatprep.subr.bf16.mxu1 %v13833_v12  ;;  %v13885_v7 = vld [vmem:[#allocation2 + $0x98] ss:$408 sps:$4 sm:$0xff]   ;;  %v10325_v8 = vrot.slane %v15528_v3, %v15310_v27  ;;  %v10333_v9 = vrot.slane %v15528_v3, %v15313_v28  ;;  %v10329_v10 = vrot.slane %v15528_v3, %v15316_v31  ;;  %v13893_v15 = vld [vmem:[#allocation2 + $0x3cc] ss:$408 sps:$4 sm:$0xff]   ;;  %v13935_v12 = vld [vmem:[#allocation2 + $0x1a1c] ss:$408 sps:$4 sm:$0xff]  }
 0x1d6   :  { %v10337_v16 = vrot.slane %v15528_v3, %v15322_v34  ;;  %v13888_v19 = vld [vmem:[#allocation2 + $0x3c0] ss:$408 sps:$4 sm:$0xff]   ;;  %v13930_v38 = vld [vmem:[#allocation2 + $0x1a10] ss:$408 sps:$4 sm:$0xff]  }
 0x1d7   :  { %v11171_v21 = vcombine.low %v11163_v17, %v11170_v18  ;;  %8691 = vmatpush1.bf16.msra.mxu0 %v13828_v13  ;;  %vm15540_vm5 = vcmp.eq.s32.totalorder %v10325_v8, 1  ;;  %vm15544_vm6 = vcmp.eq.s32.totalorder %v10333_v9, 1  ;;  %v13891_v13 = vld [vmem:[#allocation2 + $0x3c8] ss:$408 sps:$4 sm:$0xff]   ;;  %vm15548_vm7 = vcmp.eq.s32.totalorder %v10329_v10, 1 }
 0x1d8   :  { %8732 = vmatpush1.bf16.msra.mxu1 %v13831_v14  ;;  %8692 = vmatprep.subr.bf16.mxu0 %v13836_v20  ;;  %v13896_v17 = vld [vmem:[#allocation2 + $0x6f4] ss:$408 sps:$4 sm:$0xff]   ;;  %vm15552_vm8 = vcmp.eq.s32.totalorder %v10337_v16, 1  ;;  %v13918_v8 = vld [vmem:[#allocation2 + $0x13b0] ss:$408 sps:$4 sm:$0xff]  }
 0x1d9   :  { %11716 = vst [vmem:[%s16381_s3 + $0x8] sm:$0xff] %v11171_v21  ;;  %8733 = vmatprep.subr.bf16.mxu1 %v13839_v33  ;;  %v13899_v18 = vld [vmem:[#allocation2 + $0x6fc] ss:$408 sps:$4 sm:$0xff]   ;;  %v13921_v9 = vld [vmem:[#allocation2 + $0x13b8] ss:$408 sps:$4 sm:$0xff]  }
 0x1da   :  { %v13926_v10 = vld [vmem:[#allocation2 + $0x16e4] ss:$408 sps:$4 sm:$0xff]   ;;  %v13927_v16 = vld [vmem:[#allocation2 + $0x16e8] ss:$408 sps:$4 sm:$0xff]  }
 0x1db   :  { %8693 = vmatpush1.bf16.msra.mxu0 %v13834_v22  ;;  %v13894_v22 = vld [vmem:[#allocation2 + $0x6f0] ss:$408 sps:$4 sm:$0xff]   ;;  %v13938_v14 = vld [vmem:[#allocation2 + $0x1d44] ss:$408 sps:$4 sm:$0xff]  }
 0x1dc   :  { %8734 = vmatpush1.bf16.msra.mxu1 %v13837_v23  ;;  %8694 = vmatprep.subr.bf16.mxu0 %v13842_v24  ;;  %v13947_v21 = vld [vmem:[#allocation2 + $0x207c] ss:$408 sps:$4 sm:$0xff]  }
 0x1dd   :  { %8735 = vmatprep.subr.bf16.mxu1 %v13845_v35 }
 0x1df   :  { %8695 = vmatpush1.bf16.msra.mxu0 %v13840_v36 }
 0x1e0   :  { %8736 = vmatpush1.bf16.msra.mxu1 %v13843_v40  ;;  %8696 = vmatprep.subr.bf16.mxu0 %v13848_v25 }
 0x1e1   :  { %8737 = vmatprep.subr.bf16.mxu1 %v13851_v26 }
 0x1e3   :  { %8697 = vmatpush1.bf16.msra.mxu0 %v13846_v29  ;;  %v13897_v29 = vld [vmem:[#allocation2 + $0x6f8] ss:$408 sps:$4 sm:$0xff]  }
 0x1e4   :  { %8738 = vmatpush1.bf16.msra.mxu1 %v13849_v30  ;;  %8698 = vmatprep.subr.bf16.mxu0 %v13854_v37 }
 0x1e5   :  { %8739 = vmatprep.subr.bf16.mxu1 %v13857_v39 }
 0x1e7   :  { %8699 = vmatpush1.bf16.msra.mxu0 %v13852_v41 }
 0x1e8   :  { %8740 = vmatpush1.bf16.msra.mxu1 %v13855_v48  ;;  %8700 = vmatprep.subr.bf16.mxu0 %v13860_v42  ;;  %v13902_v48 = vld [vmem:[#allocation2 + $0xa24] ss:$408 sps:$4 sm:$0xff]  }
 0x1e9   :  { %8741 = vmatprep.subr.bf16.mxu1 %v13863_v44  ;;  %v13905_v42 = vld [vmem:[#allocation2 + $0xa2c] ss:$408 sps:$4 sm:$0xff]  }
 0x1eb   :  { %8701 = vmatpush1.bf16.msra.mxu0 %v13858_v45 }
 0x1ec   :  { %8742 = vmatpush1.bf16.msra.mxu1 %v13861_v46  ;;  %8702 = vmatprep.subr.bf16.mxu0 %v13866_v47 }
 0x1ed   :  { %8743 = vmatprep.subr.bf16.mxu1 %v13869_v49 }
 0x1ef   :  { %8703 = vmatpush1.bf16.msra.mxu0 %v13864_v51  ;;  %v13900_v51 = vld [vmem:[#allocation2 + $0xa20] ss:$408 sps:$4 sm:$0xff]  }
 0x1f0   :  { %8744 = vmatpush1.bf16.msra.mxu1 %v13867_v52  ;;  %8704 = vmatprep.subr.bf16.mxu0 %v13872_v53  ;;  %v13903_v52 = vld [vmem:[#allocation2 + $0xa28] ss:$408 sps:$4 sm:$0xff]  }
 0x1f1   :  { %8745 = vmatprep.subr.bf16.mxu1 %v13875_v54 }
 0x1f3   :  { %8705 = vmatpush1.bf16.msra.mxu0 %v13870_v55  ;;  %v13908_v55 = vld [vmem:[#allocation2 + $0xd54] ss:$408 sps:$4 sm:$0xff]  }
 0x1f4   :  { %8746 = vmatpush1.bf16.msra.mxu1 %v13873_v56  ;;  %8706 = vmatprep.subr.bf16.mxu0 %v13878_v58  ;;  %v13911_v56 = vld [vmem:[#allocation2 + $0xd5c] ss:$408 sps:$4 sm:$0xff]   ;;  %v13906_v58 = vld [vmem:[#allocation2 + $0xd50] ss:$408 sps:$4 sm:$0xff]  }
 0x1f5   :  { %8747 = vmatprep.subr.bf16.mxu1 %v13881_v59  ;;  %v13909_v59 = vld [vmem:[#allocation2 + $0xd58] ss:$408 sps:$4 sm:$0xff]  }
 0x1f7   :  { %8707 = vmatpush1.bf16.msra.mxu0 %v13876_v60  ;;  %v13914_v60 = vld [vmem:[#allocation2 + $0x1084] ss:$408 sps:$4 sm:$0xff]  }
 0x1f8   :  { %8748 = vmatpush1.bf16.msra.mxu1 %v13879_v61  ;;  %8764 = vmatprep.subr.bf16.mxu0 %v13884_v62  ;;  %v13917_v61 = vld [vmem:[#allocation2 + $0x108c] ss:$408 sps:$4 sm:$0xff]   ;;  %v13912_v62 = vld [vmem:[#allocation2 + $0x1080] ss:$408 sps:$4 sm:$0xff]  }
 0x1f9   :  { %8805 = vmatprep.subr.bf16.mxu1 %v13887_v2  ;;  %v13915_v2 = vld [vmem:[#allocation2 + $0x1088] ss:$408 sps:$4 sm:$0xff]  }
 0x1fa   :  { %8715 = vmatmul.mubr.bf16.vlgmr.msra.gmra.mrb[32].mxu0 %v15283_v63 }
 0x1fb   :  { %8756 = vmatmul.mubr.bf16.vlgmr.msra.gmra.mrb[32].mxu1 %v15283_v63  ;;  %8765 = vmatpush1.bf16.msra.mxu0 %v13882_v6  ;;  %v13920_v6 = vld [vmem:[#allocation2 + $0x13b4] ss:$408 sps:$4 sm:$0xff]  }
 0x1fc   :  { %8806 = vmatpush1.bf16.msra.mxu1 %v13885_v7  ;;  %8766 = vmatprep.subr.bf16.mxu0 %v13890_v11  ;;  %v13923_v7 = vld [vmem:[#allocation2 + $0x13bc] ss:$408 sps:$4 sm:$0xff]   ;;  %v13929_v11 = vld [vmem:[#allocation2 + $0x16ec] ss:$408 sps:$4 sm:$0xff]  }
 0x1fd   :  { %8807 = vmatprep.subr.bf16.mxu1 %v13893_v15  ;;  %v8388_v20 = vpop.f32.mrb[16].mxu0  ;;  %13090 = vmatprep.mubr.msk.bf16.mxu0 %vm8022_vm0, %v15276_v50  ;;  %v13924_v15 = vld [vmem:[#allocation2 + $0x16e0] ss:$408 sps:$4 sm:$0xff]  }
 0x1fe   :  { %v8429_v33 = vpop.f32.mrb[16].mxu1  ;;  %13091 = vmatprep.mubr.msk.bf16.mxu1 %vm8022_vm0, %v15276_v50  ;;  %v10159_v23 = vmax.f32 %v8388_v20, 0.0  ;;  %v8390_v35 = vpop.f32.mrb[17].mxu0 }
 0x1ff   :  { %v10161_v24 = vmax.f32 %v8429_v33, 0.0  ;;  %v8431_v36 = vpop.f32.mrb[17].mxu1  ;;  %v10160_v40 = vmax.f32 %v8390_v35, 0.0  ;;  %v8392_v26 = vpop.f32.mrb[18].mxu0  ;;  %8767 = vmatpush1.bf16.msra.mxu0 %v13888_v19  ;;  %v13932_v19 = vld [vmem:[#allocation2 + $0x1a14] ss:$408 sps:$4 sm:$0xff]  }
 0x200   :  { %v10162_v25 = vmax.f32 %v8431_v36, 0.0  ;;  %8808 = vmatpush1.bf16.msra.mxu1 %v13891_v13  ;;  %v8433_v30 = vpop.f32.mrb[18].mxu1  ;;  %v10784_v37 = vsel %vm15540_vm5, %v10159_v23, %v8388_v20  ;;  %v8393_v41 = vpop.f32.mrb[19].mxu0  ;;  %8768 = vmatprep.subr.bf16.mxu0 %v13896_v17  ;;  %v13933_v13 = vld [vmem:[#allocation2 + $0x1a18] ss:$408 sps:$4 sm:$0xff]  }
 0x201   :  { %v10786_v39 = vsel %vm15544_vm6, %v10161_v24, %v8429_v33  ;;  %8809 = vmatprep.subr.bf16.mxu1 %v13899_v18  ;;  %v8434_v44 = vpop.f32.mrb[19].mxu1  ;;  %v10785_v45 = vsel %vm15548_vm7, %v10160_v40, %v8390_v35  ;;  %v13941_v17 = vld [vmem:[#allocation2 + $0x1d4c] ss:$408 sps:$4 sm:$0xff]   ;;  %v13936_v18 = vld [vmem:[#allocation2 + $0x1d40] ss:$408 sps:$4 sm:$0xff]  }
 0x202   :  { %v10787_v46 = vsel %vm15552_vm8, %v10162_v25, %v8431_v36  ;;  %v13131_v47 = vpack.c.bf16 %v10785_v45, %v10784_v37  ;;  %v13939_v20 = vld [vmem:[#allocation2 + $0x1d48] ss:$408 sps:$4 sm:$0xff]   ;;  %v13944_v33 = vld [vmem:[#allocation2 + $0x2074] ss:$408 sps:$4 sm:$0xff]   ;;  %v13945_v23 = vld [vmem:[#allocation2 + $0x2078] ss:$408 sps:$4 sm:$0xff]   ;;  %v10349_v44 = vrot.slane %v15528_v3, %v15374_v1  ;;  %v10345_v45 = vrot.slane %v15528_v3, %v15377_v4 }
 0x203   :  { %v13132_v49 = vpack.c.bf16 %v10787_v46, %v10786_v39  ;;  %8769 = vmatpush1.bf16.msra.mxu0 %v13894_v22  ;;  %v13942_v22 = vld [vmem:[#allocation2 + $0x2070] ss:$408 sps:$4 sm:$0xff]   ;;  %v13950_v24 = vld [vmem:[#allocation2 + $0x23a4] ss:$408 sps:$4 sm:$0xff]   ;;  %v13948_v36 = vld [vmem:[#allocation2 + $0x23a0] ss:$408 sps:$4 sm:$0xff]  }
 0x204   :  { %8810 = vmatpush1.bf16.msra.mxu1 %v13897_v29  ;;  %v15569_v53 = vrot.slane %v13131_v47, %v15270_v43  ;;  %8770 = vmatprep.subr.bf16.mxu0 %v13902_v48  ;;  %v13953_v35 = vld [vmem:[#allocation2 + $0x23ac] ss:$408 sps:$4 sm:$0xff]   ;;  %v13951_v40 = vld [vmem:[#allocation2 + $0x23a8] ss:$408 sps:$4 sm:$0xff]   ;;  %v13959_v26 = vld [vmem:[#allocation2 + $0x26dc] ss:$408 sps:$4 sm:$0xff]  }
 0x205   :  { %v15572_v54 = vrot.slane %v13132_v49, %v15270_v43  ;;  %8811 = vmatprep.subr.bf16.mxu1 %v13905_v42  ;;  %v13956_v25 = vld [vmem:[#allocation2 + $0x26d4] ss:$408 sps:$4 sm:$0xff]   ;;  %v13954_v29 = vld [vmem:[#allocation2 + $0x26d0] ss:$408 sps:$4 sm:$0xff]   ;;  %v13962_v37 = vld [vmem:[#allocation2 + $0xa4] ss:$408 sps:$4 sm:$0xff]   ;;  %v10341_v42 = vrot.slane %v15528_v3, %v15371_v0  ;;  %v10353_v49 = vrot.slane %v15528_v3, %v15380_v5 }
 0x206   :  { %v13957_v30 = vld [vmem:[#allocation2 + $0x26d8] ss:$408 sps:$4 sm:$0xff]   ;;  %v13965_v39 = vld [vmem:[#allocation2 + $0xac] ss:$408 sps:$4 sm:$0xff]   ;;  %v13963_v48 = vld [vmem:[#allocation2 + $0xa8] ss:$408 sps:$4 sm:$0xff]  }
 0x207   :  { %v11204_v57 = vcombine.low %v15569_v53, %v15572_v54  ;;  %8771 = vmatpush1.bf16.msra.mxu0 %v13900_v51  ;;  %v13960_v41 = vld [vmem:[#allocation2 + $0xa0] ss:$408 sps:$4 sm:$0xff]   ;;  %v13968_v46 = vld [vmem:[#allocation2 + $0x3d4] ss:$408 sps:$4 sm:$0xff]   ;;  %v13966_v51 = vld [vmem:[#allocation2 + $0x3d0] ss:$408 sps:$4 sm:$0xff]  }
 0x208   :  { %8812 = vmatpush1.bf16.msra.mxu1 %v13903_v52  ;;  %8772 = vmatprep.subr.bf16.mxu0 %v13908_v55  ;;  %v13971_v47 = vld [vmem:[#allocation2 + $0x3dc] ss:$408 sps:$4 sm:$0xff]   ;;  %vm15586_vm9 = vcmp.eq.s32.totalorder %v10341_v42, 1  ;;  %vm15590_vm10 = vcmp.eq.s32.totalorder %v10349_v44, 1  ;;  %vm15594_vm11 = vcmp.eq.s32.totalorder %v10345_v45, 1  ;;  %vm15598_vm12 = vcmp.eq.s32.totalorder %v10353_v49, 1 }
 0x209   :  { %8813 = vmatprep.subr.bf16.mxu1 %v13911_v56  ;;  %v13969_v56 = vld [vmem:[#allocation2 + $0x3d8] ss:$408 sps:$4 sm:$0xff]   ;;  %v13974_v3 = vld [vmem:[#allocation2 + $0x704] ss:$408 sps:$4 sm:$0xff]  }
 0x20a   :  { %v13990_v44 = vld [vmem:[#allocation2 + $0x1090] ss:$408 sps:$4 sm:$0xff]   ;;  %v14001_v53 = vld [vmem:[#allocation2 + $0x13cc] ss:$408 sps:$4 sm:$0xff]   ;;  %v13996_v54 = vld [vmem:[#allocation2 + $0x13c0] ss:$408 sps:$4 sm:$0xff]  }
 0x20b   :  { %8773 = vmatpush1.bf16.msra.mxu0 %v13906_v58  ;;  %v13993_v45 = vld [vmem:[#allocation2 + $0x1098] ss:$408 sps:$4 sm:$0xff]   ;;  %v14007_v49 = vld [vmem:[#allocation2 + $0x16fc] ss:$408 sps:$4 sm:$0xff]  }
 0x20c   :  { %8814 = vmatpush1.bf16.msra.mxu1 %v13909_v59  ;;  %8774 = vmatprep.subr.bf16.mxu0 %v13914_v60  ;;  %v13977_v59 = vld [vmem:[#allocation2 + $0x70c] ss:$408 sps:$4 sm:$0xff]   ;;  %v14005_v52 = vld [vmem:[#allocation2 + $0x16f8] ss:$408 sps:$4 sm:$0xff]  }
 0x20d   :  { %8815 = vmatprep.subr.bf16.mxu1 %v13917_v61  ;;  %v14010_v55 = vld [vmem:[#allocation2 + $0x1a24] ss:$408 sps:$4 sm:$0xff]   ;;  %v14008_v58 = vld [vmem:[#allocation2 + $0x1a20] ss:$408 sps:$4 sm:$0xff]  }
 0x20f   :  { %8775 = vmatpush1.bf16.msra.mxu0 %v13912_v62  ;;  %v14017_v62 = vld [vmem:[#allocation2 + $0x1d58] ss:$408 sps:$4 sm:$0xff]  }
 0x210   :  { %8816 = vmatpush1.bf16.msra.mxu1 %v13915_v2  ;;  %8776 = vmatprep.subr.bf16.mxu0 %v13920_v6  ;;  %v13972_v2 = vld [vmem:[#allocation2 + $0x700] ss:$408 sps:$4 sm:$0xff]  }
 0x211   :  { %8817 = vmatprep.subr.bf16.mxu1 %v13923_v7 }
 0x213   :  { %8777 = vmatpush1.bf16.msra.mxu0 %v13918_v8 }
 0x214   :  { %8818 = vmatpush1.bf16.msra.mxu1 %v13921_v9  ;;  %8778 = vmatprep.subr.bf16.mxu0 %v13926_v10 }
 0x215   :  { %8819 = vmatprep.subr.bf16.mxu1 %v13929_v11 }
 0x217   :  { %8779 = vmatpush1.bf16.msra.mxu0 %v13924_v15 }
 0x218   :  { %8820 = vmatpush1.bf16.msra.mxu1 %v13927_v16  ;;  %8780 = vmatprep.subr.bf16.mxu0 %v13932_v19  ;;  %v13975_v16 = vld [vmem:[#allocation2 + $0x708] ss:$408 sps:$4 sm:$0xff]  }
 0x219   :  { %8821 = vmatprep.subr.bf16.mxu1 %v13935_v12 }
 0x21b   :  { %8781 = vmatpush1.bf16.msra.mxu0 %v13930_v38 }
 0x21c   :  { %8822 = vmatpush1.bf16.msra.mxu1 %v13933_v13  ;;  %8782 = vmatprep.subr.bf16.mxu0 %v13938_v14  ;;  %v13980_v14 = vld [vmem:[#allocation2 + $0xa34] ss:$408 sps:$4 sm:$0xff]  }
 0x21d   :  { %8823 = vmatprep.subr.bf16.mxu1 %v13941_v17  ;;  %v13983_v17 = vld [vmem:[#allocation2 + $0xa3c] ss:$408 sps:$4 sm:$0xff]  }
 0x21f   :  { %8783 = vmatpush1.bf16.msra.mxu0 %v13936_v18 }
 0x220   :  { %8824 = vmatpush1.bf16.msra.mxu1 %v13939_v20  ;;  %8784 = vmatprep.subr.bf16.mxu0 %v13944_v33 }
 0x221   :  { %8825 = vmatprep.subr.bf16.mxu1 %v13947_v21 }
 0x223   :  { %8785 = vmatpush1.bf16.msra.mxu0 %v13942_v22 }
 0x224   :  { %8826 = vmatpush1.bf16.msra.mxu1 %v13945_v23  ;;  %8786 = vmatprep.subr.bf16.mxu0 %v13950_v24  ;;  %v13978_v23 = vld [vmem:[#allocation2 + $0xa30] ss:$408 sps:$4 sm:$0xff]  }
 0x225   :  { %8827 = vmatprep.subr.bf16.mxu1 %v13953_v35  ;;  %v13981_v24 = vld [vmem:[#allocation2 + $0xa38] ss:$408 sps:$4 sm:$0xff]  }
 0x227   :  { %8787 = vmatpush1.bf16.msra.mxu0 %v13948_v36 }
 0x228   :  { %8828 = vmatpush1.bf16.msra.mxu1 %v13951_v40  ;;  %8788 = vmatprep.subr.bf16.mxu0 %v13956_v25  ;;  %v13986_v40 = vld [vmem:[#allocation2 + $0xd64] ss:$408 sps:$4 sm:$0xff]  }
 0x229   :  { %8829 = vmatprep.subr.bf16.mxu1 %v13959_v26  ;;  %v13989_v25 = vld [vmem:[#allocation2 + $0xd6c] ss:$408 sps:$4 sm:$0xff]  }
 0x22b   :  { %8789 = vmatpush1.bf16.msra.mxu0 %v13954_v29  ;;  %v13984_v29 = vld [vmem:[#allocation2 + $0xd60] ss:$408 sps:$4 sm:$0xff]  }
 0x22c   :  { %8830 = vmatpush1.bf16.msra.mxu1 %v13957_v30  ;;  %8846 = vmatprep.subr.bf16.mxu0 %v13962_v37  ;;  %v13987_v30 = vld [vmem:[#allocation2 + $0xd68] ss:$408 sps:$4 sm:$0xff]   ;;  %v11212_v37 = vrot.slane %v11204_v57, %v15270_v43 }
 0x22d   :  { %8887 = vmatprep.subr.bf16.mxu1 %v13965_v39  ;;  %v13999_v57 = vld [vmem:[#allocation2 + $0x13c8] ss:$408 sps:$4 sm:$0xff]  }
 0x22e   :  { %8797 = vmatmul.mubr.bf16.vlgmr.msra.gmra.mrb[36].mxu0 %v15283_v63 }
 0x22f   :  { %8838 = vmatmul.mubr.bf16.vlgmr.msra.gmra.mrb[36].mxu1 %v15283_v63  ;;  %8847 = vmatpush1.bf16.msra.mxu0 %v13960_v41  ;;  %v13992_v41 = vld [vmem:[#allocation2 + $0x1094] ss:$408 sps:$4 sm:$0xff]  }
 0x230   :  { %8888 = vmatpush1.bf16.msra.mxu1 %v13963_v48  ;;  %8848 = vmatprep.subr.bf16.mxu0 %v13968_v46  ;;  %v13995_v48 = vld [vmem:[#allocation2 + $0x109c] ss:$408 sps:$4 sm:$0xff]  }
 0x231   :  { %8889 = vmatprep.subr.bf16.mxu1 %v13971_v47  ;;  %v8470_v60 = vpop.f32.mrb[20].mxu0  ;;  %13092 = vmatprep.mubr.msk.bf16.mxu0 %vm8022_vm0, %v15276_v50  ;;  %v13998_v46 = vld [vmem:[#allocation2 + $0x13c4] ss:$408 sps:$4 sm:$0xff]   ;;  %v14004_v47 = vld [vmem:[#allocation2 + $0x16f4] ss:$408 sps:$4 sm:$0xff]  }
 0x232   :  { %v8511_v61 = vpop.f32.mrb[20].mxu1  ;;  %13093 = vmatprep.mubr.msk.bf16.mxu1 %vm8022_vm0, %v15276_v50  ;;  %v10163_v6 = vmax.f32 %v8470_v60, 0.0  ;;  %v8472_v8 = vpop.f32.mrb[21].mxu0 }
 0x233   :  { %v10165_v7 = vmax.f32 %v8511_v61, 0.0  ;;  %v8513_v9 = vpop.f32.mrb[21].mxu1  ;;  %v10164_v10 = vmax.f32 %v8472_v8, 0.0  ;;  %v8474_v15 = vpop.f32.mrb[22].mxu0  ;;  %8849 = vmatpush1.bf16.msra.mxu0 %v13966_v51  ;;  %v14002_v51 = vld [vmem:[#allocation2 + $0x16f0] ss:$408 sps:$4 sm:$0xff]  }
 0x234   :  { %v10166_v11 = vmax.f32 %v8513_v9, 0.0  ;;  %8890 = vmatpush1.bf16.msra.mxu1 %v13969_v56  ;;  %v8515_v19 = vpop.f32.mrb[22].mxu1  ;;  %v10788_v12 = vsel %vm15586_vm9, %v10163_v6, %v8470_v60  ;;  %v8475_v13 = vpop.f32.mrb[23].mxu0  ;;  %8850 = vmatprep.subr.bf16.mxu0 %v13974_v3  ;;  %v14013_v56 = vld [vmem:[#allocation2 + $0x1a2c] ss:$408 sps:$4 sm:$0xff]  }
 0x235   :  { %v10790_v38 = vsel %vm15590_vm10, %v10165_v7, %v8511_v61  ;;  %8891 = vmatprep.subr.bf16.mxu1 %v13977_v59  ;;  %v8516_v18 = vpop.f32.mrb[23].mxu1  ;;  %v10789_v20 = vsel %vm15594_vm11, %v10164_v10, %v8472_v8  ;;  %v14011_v3 = vld [vmem:[#allocation2 + $0x1a28] ss:$408 sps:$4 sm:$0xff]   ;;  %v14016_v59 = vld [vmem:[#allocation2 + $0x1d54] ss:$408 sps:$4 sm:$0xff]  }
 0x236   :  { %v10791_v33 = vsel %vm15598_vm12, %v10166_v11, %v8513_v9  ;;  %v13133_v21 = vpack.c.bf16 %v10789_v20, %v10788_v12  ;;  %v14019_v60 = vld [vmem:[#allocation2 + $0x1d5c] ss:$408 sps:$4 sm:$0xff]   ;;  %v14014_v61 = vld [vmem:[#allocation2 + $0x1d50] ss:$408 sps:$4 sm:$0xff]   ;;  %v14025_v6 = vld [vmem:[#allocation2 + $0x208c] ss:$408 sps:$4 sm:$0xff]  }
 0x237   :  { %v13134_v22 = vpack.c.bf16 %v10791_v33, %v10790_v38  ;;  %8851 = vmatpush1.bf16.msra.mxu0 %v13972_v2  ;;  %v14022_v2 = vld [vmem:[#allocation2 + $0x2084] ss:$408 sps:$4 sm:$0xff]   ;;  %v14020_v7 = vld [vmem:[#allocation2 + $0x2080] ss:$408 sps:$4 sm:$0xff]   ;;  %v14028_v9 = vld [vmem:[#allocation2 + $0x23b4] ss:$408 sps:$4 sm:$0xff]  }
 0x238   :  { %8892 = vmatpush1.bf16.msra.mxu1 %v13975_v16  ;;  %v11196_v35 = vrot.slane %v13133_v21, %v15270_v43  ;;  %8852 = vmatprep.subr.bf16.mxu0 %v13980_v14  ;;  %v14023_v8 = vld [vmem:[#allocation2 + $0x2088] ss:$408 sps:$4 sm:$0xff]   ;;  %v14031_v10 = vld [vmem:[#allocation2 + $0x23bc] ss:$408 sps:$4 sm:$0xff]   ;;  %v14029_v15 = vld [vmem:[#allocation2 + $0x23b8] ss:$408 sps:$4 sm:$0xff]  }
 0x239   :  { %v11203_v36 = vrot.slane %v13134_v22, %v15270_v43  ;;  %8893 = vmatprep.subr.bf16.mxu1 %v13983_v17  ;;  %v14026_v11 = vld [vmem:[#allocation2 + $0x23b0] ss:$408 sps:$4 sm:$0xff]   ;;  %v14034_v19 = vld [vmem:[#allocation2 + $0x26e4] ss:$408 sps:$4 sm:$0xff]   ;;  %v14032_v38 = vld [vmem:[#allocation2 + $0x26e0] ss:$408 sps:$4 sm:$0xff]  }
 0x23a   :  { %v10120_v16 = vld [vmem:[#allocation4 + $0x18] sm:$0xff]  ;;  %v14043_v17 = vld [vmem:[#allocation2 + $0xbc] ss:$408 sps:$4 sm:$0xff]   ;;  %v14041_v33 = vld [vmem:[#allocation2 + $0xb8] ss:$408 sps:$4 sm:$0xff]  }
 0x23b   :  { %v11205_v26 = vcombine.low %v11196_v35, %v11203_v36  ;;  %8853 = vmatpush1.bf16.msra.mxu0 %v13978_v23  ;;  %v14037_v12 = vld [vmem:[#allocation2 + $0x26ec] ss:$408 sps:$4 sm:$0xff]   ;;  %vm10133_vm13 = vcmp.ne.f32.partialorder %v10120_v16, 0.0  ;;  %v14035_v13 = vld [vmem:[#allocation2 + $0x26e8] ss:$408 sps:$4 sm:$0xff]  }
 0x23c   :  { %8894 = vmatpush1.bf16.msra.mxu1 %v13981_v24  ;;  %8854 = vmatprep.subr.bf16.mxu0 %v13986_v40  ;;  %v14040_v14 = vld [vmem:[#allocation2 + $0xb4] ss:$408 sps:$4 sm:$0xff]   ;;  %v15625_v18 = vsel %vm10133_vm13, 1, %v15222_v32  ;;  %v14038_v20 = vld [vmem:[#allocation2 + $0xb0] ss:$408 sps:$4 sm:$0xff]  }
 0x23d   :  { %v11219_v39 = vrot.slane %v11205_v26, %v15270_v43  ;;  %8895 = vmatprep.subr.bf16.mxu1 %v13989_v25  ;;  %v10357_v21 = vrot.slane %v15625_v18, %v15310_v27  ;;  %v10365_v22 = vrot.slane %v15625_v18, %v15313_v28  ;;  %v10361_v23 = vrot.slane %v15625_v18, %v15316_v31  ;;  %v14046_v24 = vld [vmem:[#allocation2 + $0x3e4] ss:$408 sps:$4 sm:$0xff]   ;;  %v14044_v40 = vld [vmem:[#allocation2 + $0x3e0] ss:$408 sps:$4 sm:$0xff]   ;;  %v14086_v26 = vld [vmem:[#allocation2 + $0x1a30] ss:$408 sps:$4 sm:$0xff]  }
 0x23e   :  { %v14049_v35 = vld [vmem:[#allocation2 + $0x3ec] ss:$408 sps:$4 sm:$0xff]   ;;  %v10369_v36 = vrot.slane %v15625_v18, %v15322_v34  ;;  %v14091_v25 = vld [vmem:[#allocation2 + $0x1a3c] ss:$408 sps:$4 sm:$0xff]  }
 0x23f   :  { %v11220_v42 = vcombine.low %v11212_v37, %v11219_v39  ;;  %8855 = vmatpush1.bf16.msra.mxu0 %v13984_v29  ;;  %vm15637_vm14 = vcmp.eq.s32.totalorder %v10357_v21, 1  ;;  %vm15641_vm15 = vcmp.eq.s32.totalorder %v10365_v22, 1  ;;  %v14047_v29 = vld [vmem:[#allocation2 + $0x3e8] ss:$408 sps:$4 sm:$0xff]   ;;  %vm15645_vm1 = vcmp.eq.s32.totalorder %v10361_v23, 1 }
 0x240   :  { %8896 = vmatpush1.bf16.msra.mxu1 %v13987_v30  ;;  %8856 = vmatprep.subr.bf16.mxu0 %v13992_v41  ;;  %v14052_v37 = vld [vmem:[#allocation2 + $0x714] ss:$408 sps:$4 sm:$0xff]   ;;  %vm15649_vm2 = vcmp.eq.s32.totalorder %v10369_v36, 1  ;;  %v14074_v21 = vld [vmem:[#allocation2 + $0x13d0] ss:$408 sps:$4 sm:$0xff]  }
 0x241   :  { %11717 = vst [vmem:[%s16381_s3 + $0x10] sm:$0xff] %v11220_v42  ;;  %8897 = vmatprep.subr.bf16.mxu1 %v13995_v48  ;;  %v14055_v39 = vld [vmem:[#allocation2 + $0x71c] ss:$408 sps:$4 sm:$0xff]   ;;  %v14077_v22 = vld [vmem:[#allocation2 + $0x13d8] ss:$408 sps:$4 sm:$0xff]  }
 0x242   :  { %v14082_v23 = vld [vmem:[#allocation2 + $0x1704] ss:$408 sps:$4 sm:$0xff]   ;;  %v14083_v36 = vld [vmem:[#allocation2 + $0x1708] ss:$408 sps:$4 sm:$0xff]  }
 0x243   :  { %8857 = vmatpush1.bf16.msra.mxu0 %v13990_v44  ;;  %v14050_v44 = vld [vmem:[#allocation2 + $0x710] ss:$408 sps:$4 sm:$0xff]   ;;  %v14094_v30 = vld [vmem:[#allocation2 + $0x1d64] ss:$408 sps:$4 sm:$0xff]  }
 0x244   :  { %8898 = vmatpush1.bf16.msra.mxu1 %v13993_v45  ;;  %8858 = vmatprep.subr.bf16.mxu0 %v13998_v46  ;;  %v14103_v42 = vld [vmem:[#allocation2 + $0x209c] ss:$408 sps:$4 sm:$0xff]  }
 0x245   :  { %8899 = vmatprep.subr.bf16.mxu1 %v14001_v53 }
 0x247   :  { %8859 = vmatpush1.bf16.msra.mxu0 %v13996_v54 }
 0x248   :  { %8900 = vmatpush1.bf16.msra.mxu1 %v13999_v57  ;;  %8860 = vmatprep.subr.bf16.mxu0 %v14004_v47 }
 0x249   :  { %8901 = vmatprep.subr.bf16.mxu1 %v14007_v49 }
 0x24b   :  { %8861 = vmatpush1.bf16.msra.mxu0 %v14002_v51  ;;  %v14053_v51 = vld [vmem:[#allocation2 + $0x718] ss:$408 sps:$4 sm:$0xff]  }
 0x24c   :  { %8902 = vmatpush1.bf16.msra.mxu1 %v14005_v52  ;;  %8862 = vmatprep.subr.bf16.mxu0 %v14010_v55 }
 0x24d   :  { %8903 = vmatprep.subr.bf16.mxu1 %v14013_v56 }
 0x24f   :  { %8863 = vmatpush1.bf16.msra.mxu0 %v14008_v58 }
 0x250   :  { %8904 = vmatpush1.bf16.msra.mxu1 %v14011_v3  ;;  %8864 = vmatprep.subr.bf16.mxu0 %v14016_v59  ;;  %v14058_v3 = vld [vmem:[#allocation2 + $0xa44] ss:$408 sps:$4 sm:$0xff]  }
 0x251   :  { %8905 = vmatprep.subr.bf16.mxu1 %v14019_v60  ;;  %v14061_v59 = vld [vmem:[#allocation2 + $0xa4c] ss:$408 sps:$4 sm:$0xff]  }
 0x253   :  { %8865 = vmatpush1.bf16.msra.mxu0 %v14014_v61 }
 0x254   :  { %8906 = vmatpush1.bf16.msra.mxu1 %v14017_v62  ;;  %8866 = vmatprep.subr.bf16.mxu0 %v14022_v2 }
 0x255   :  { %8907 = vmatprep.subr.bf16.mxu1 %v14025_v6 }
 0x257   :  { %8867 = vmatpush1.bf16.msra.mxu0 %v14020_v7  ;;  %v14056_v7 = vld [vmem:[#allocation2 + $0xa40] ss:$408 sps:$4 sm:$0xff]  }
 0x258   :  { %8908 = vmatpush1.bf16.msra.mxu1 %v14023_v8  ;;  %8868 = vmatprep.subr.bf16.mxu0 %v14028_v9  ;;  %v14059_v8 = vld [vmem:[#allocation2 + $0xa48] ss:$408 sps:$4 sm:$0xff]  }
 0x259   :  { %8909 = vmatprep.subr.bf16.mxu1 %v14031_v10 }
 0x25b   :  { %8869 = vmatpush1.bf16.msra.mxu0 %v14026_v11  ;;  %v14064_v11 = vld [vmem:[#allocation2 + $0xd74] ss:$408 sps:$4 sm:$0xff]  }
 0x25c   :  { %8910 = vmatpush1.bf16.msra.mxu1 %v14029_v15  ;;  %8870 = vmatprep.subr.bf16.mxu0 %v14034_v19  ;;  %v14067_v15 = vld [vmem:[#allocation2 + $0xd7c] ss:$408 sps:$4 sm:$0xff]   ;;  %v14062_v19 = vld [vmem:[#allocation2 + $0xd70] ss:$408 sps:$4 sm:$0xff]  }
 0x25d   :  { %8911 = vmatprep.subr.bf16.mxu1 %v14037_v12  ;;  %v14065_v12 = vld [vmem:[#allocation2 + $0xd78] ss:$408 sps:$4 sm:$0xff]  }
 0x25f   :  { %8871 = vmatpush1.bf16.msra.mxu0 %v14032_v38  ;;  %v14070_v38 = vld [vmem:[#allocation2 + $0x10a4] ss:$408 sps:$4 sm:$0xff]  }
 0x260   :  { %8912 = vmatpush1.bf16.msra.mxu1 %v14035_v13  ;;  %8928 = vmatprep.subr.bf16.mxu0 %v14040_v14  ;;  %v14073_v13 = vld [vmem:[#allocation2 + $0x10ac] ss:$408 sps:$4 sm:$0xff]   ;;  %v14068_v14 = vld [vmem:[#allocation2 + $0x10a0] ss:$408 sps:$4 sm:$0xff]  }
 0x261   :  { %8969 = vmatprep.subr.bf16.mxu1 %v14043_v17  ;;  %v14071_v17 = vld [vmem:[#allocation2 + $0x10a8] ss:$408 sps:$4 sm:$0xff]  }
 0x262   :  { %8879 = vmatmul.mubr.bf16.vlgmr.msra.gmra.mrb[40].mxu0 %v15283_v63 }
 0x263   :  { %8920 = vmatmul.mubr.bf16.vlgmr.msra.gmra.mrb[40].mxu1 %v15283_v63  ;;  %8929 = vmatpush1.bf16.msra.mxu0 %v14038_v20  ;;  %v14076_v20 = vld [vmem:[#allocation2 + $0x13d4] ss:$408 sps:$4 sm:$0xff]  }
 0x264   :  { %8970 = vmatpush1.bf16.msra.mxu1 %v14041_v33  ;;  %8930 = vmatprep.subr.bf16.mxu0 %v14046_v24  ;;  %v14079_v33 = vld [vmem:[#allocation2 + $0x13dc] ss:$408 sps:$4 sm:$0xff]   ;;  %v14085_v24 = vld [vmem:[#allocation2 + $0x170c] ss:$408 sps:$4 sm:$0xff]  }
 0x265   :  { %8971 = vmatprep.subr.bf16.mxu1 %v14049_v35  ;;  %v8552_v41 = vpop.f32.mrb[24].mxu0  ;;  %13094 = vmatprep.mubr.msk.bf16.mxu0 %vm8022_vm0, %v15276_v50  ;;  %v14080_v35 = vld [vmem:[#allocation2 + $0x1700] ss:$408 sps:$4 sm:$0xff]  }
 0x266   :  { %v8593_v48 = vpop.f32.mrb[24].mxu1  ;;  %13095 = vmatprep.mubr.msk.bf16.mxu1 %vm8022_vm0, %v15276_v50  ;;  %v10167_v45 = vmax.f32 %v8552_v41, 0.0  ;;  %v8554_v53 = vpop.f32.mrb[25].mxu0 }
 0x267   :  { %v10169_v46 = vmax.f32 %v8593_v48, 0.0  ;;  %v8595_v54 = vpop.f32.mrb[25].mxu1  ;;  %v10168_v57 = vmax.f32 %v8554_v53, 0.0  ;;  %v8556_v49 = vpop.f32.mrb[26].mxu0  ;;  %8931 = vmatpush1.bf16.msra.mxu0 %v14044_v40  ;;  %v14088_v40 = vld [vmem:[#allocation2 + $0x1a34] ss:$408 sps:$4 sm:$0xff]  }
 0x268   :  { %v10170_v47 = vmax.f32 %v8595_v54, 0.0  ;;  %8972 = vmatpush1.bf16.msra.mxu1 %v14047_v29  ;;  %v8597_v52 = vpop.f32.mrb[26].mxu1  ;;  %v10792_v55 = vsel %vm15637_vm14, %v10167_v45, %v8552_v41  ;;  %v8557_v58 = vpop.f32.mrb[27].mxu0  ;;  %8932 = vmatprep.subr.bf16.mxu0 %v14052_v37  ;;  %v14089_v29 = vld [vmem:[#allocation2 + $0x1a38] ss:$408 sps:$4 sm:$0xff]  }
 0x269   :  { %v10794_v56 = vsel %vm15641_vm15, %v10169_v46, %v8593_v48  ;;  %8973 = vmatprep.subr.bf16.mxu1 %v14055_v39  ;;  %v8598_v60 = vpop.f32.mrb[27].mxu1  ;;  %v10793_v61 = vsel %vm15645_vm1, %v10168_v57, %v8554_v53  ;;  %v14097_v37 = vld [vmem:[#allocation2 + $0x1d6c] ss:$408 sps:$4 sm:$0xff]   ;;  %v14092_v39 = vld [vmem:[#allocation2 + $0x1d60] ss:$408 sps:$4 sm:$0xff]  }
 0x26a   :  { %v10795_v62 = vsel %vm15649_vm2, %v10170_v47, %v8595_v54  ;;  %v13135_v2 = vpack.c.bf16 %v10793_v61, %v10792_v55  ;;  %v14095_v41 = vld [vmem:[#allocation2 + $0x1d68] ss:$408 sps:$4 sm:$0xff]   ;;  %v14100_v48 = vld [vmem:[#allocation2 + $0x2094] ss:$408 sps:$4 sm:$0xff]   ;;  %v14101_v45 = vld [vmem:[#allocation2 + $0x2098] ss:$408 sps:$4 sm:$0xff]   ;;  %v10381_v60 = vrot.slane %v15625_v18, %v15374_v1  ;;  %v10377_v61 = vrot.slane %v15625_v18, %v15377_v4 }
 0x26b   :  { %v13136_v6 = vpack.c.bf16 %v10795_v62, %v10794_v56  ;;  %8933 = vmatpush1.bf16.msra.mxu0 %v14050_v44  ;;  %v14098_v44 = vld [vmem:[#allocation2 + $0x2090] ss:$408 sps:$4 sm:$0xff]   ;;  %v14106_v46 = vld [vmem:[#allocation2 + $0x23c4] ss:$408 sps:$4 sm:$0xff]   ;;  %v14104_v54 = vld [vmem:[#allocation2 + $0x23c0] ss:$408 sps:$4 sm:$0xff]  }
 0x26c   :  { %8974 = vmatpush1.bf16.msra.mxu1 %v14053_v51  ;;  %v15666_v9 = vrot.slane %v13135_v2, %v15270_v43  ;;  %8934 = vmatprep.subr.bf16.mxu0 %v14058_v3  ;;  %v14109_v53 = vld [vmem:[#allocation2 + $0x23cc] ss:$408 sps:$4 sm:$0xff]   ;;  %v14107_v57 = vld [vmem:[#allocation2 + $0x23c8] ss:$408 sps:$4 sm:$0xff]   ;;  %v14115_v49 = vld [vmem:[#allocation2 + $0x26fc] ss:$408 sps:$4 sm:$0xff]  }
 0x26d   :  { %v15669_v10 = vrot.slane %v13136_v6, %v15270_v43  ;;  %8975 = vmatprep.subr.bf16.mxu1 %v14061_v59  ;;  %v14112_v47 = vld [vmem:[#allocation2 + $0x26f4] ss:$408 sps:$4 sm:$0xff]   ;;  %v14110_v51 = vld [vmem:[#allocation2 + $0x26f0] ss:$408 sps:$4 sm:$0xff]   ;;  %v14118_v55 = vld [vmem:[#allocation2 + $0xc4] ss:$408 sps:$4 sm:$0xff]   ;;  %v10373_v59 = vrot.slane %v15625_v18, %v15371_v0  ;;  %v10385_v6 = vrot.slane %v15625_v18, %v15380_v5 }
 0x26e   :  { %v14113_v52 = vld [vmem:[#allocation2 + $0x26f8] ss:$408 sps:$4 sm:$0xff]   ;;  %v14121_v56 = vld [vmem:[#allocation2 + $0xcc] ss:$408 sps:$4 sm:$0xff]   ;;  %v14119_v3 = vld [vmem:[#allocation2 + $0xc8] ss:$408 sps:$4 sm:$0xff]  }
 0x26f   :  { %v11253_v16 = vcombine.low %v15666_v9, %v15669_v10  ;;  %8935 = vmatpush1.bf16.msra.mxu0 %v14056_v7  ;;  %v14116_v58 = vld [vmem:[#allocation2 + $0xc0] ss:$408 sps:$4 sm:$0xff]   ;;  %v14124_v62 = vld [vmem:[#allocation2 + $0x3f4] ss:$408 sps:$4 sm:$0xff]   ;;  %v14122_v7 = vld [vmem:[#allocation2 + $0x3f0] ss:$408 sps:$4 sm:$0xff]  }
 0x270   :  { %8976 = vmatpush1.bf16.msra.mxu1 %v14059_v8  ;;  %8936 = vmatprep.subr.bf16.mxu0 %v14064_v11  ;;  %v14127_v2 = vld [vmem:[#allocation2 + $0x3fc] ss:$408 sps:$4 sm:$0xff]   ;;  %vm15683_vm3 = vcmp.eq.s32.totalorder %v10373_v59, 1  ;;  %vm15687_vm4 = vcmp.eq.s32.totalorder %v10381_v60, 1  ;;  %vm15691_vm5 = vcmp.eq.s32.totalorder %v10377_v61, 1  ;;  %vm15695_vm6 = vcmp.eq.s32.totalorder %v10385_v6, 1 }
 0x271   :  { %8977 = vmatprep.subr.bf16.mxu1 %v14067_v15  ;;  %v14125_v15 = vld [vmem:[#allocation2 + $0x3f8] ss:$408 sps:$4 sm:$0xff]   ;;  %v14130_v18 = vld [vmem:[#allocation2 + $0x724] ss:$408 sps:$4 sm:$0xff]  }
 0x272   :  { %v14146_v60 = vld [vmem:[#allocation2 + $0x10b0] ss:$408 sps:$4 sm:$0xff]   ;;  %v14157_v9 = vld [vmem:[#allocation2 + $0x13ec] ss:$408 sps:$4 sm:$0xff]   ;;  %v14152_v10 = vld [vmem:[#allocation2 + $0x13e0] ss:$408 sps:$4 sm:$0xff]  }
 0x273   :  { %8937 = vmatpush1.bf16.msra.mxu0 %v14062_v19  ;;  %v14149_v61 = vld [vmem:[#allocation2 + $0x10b8] ss:$408 sps:$4 sm:$0xff]   ;;  %v14163_v6 = vld [vmem:[#allocation2 + $0x171c] ss:$408 sps:$4 sm:$0xff]  }
 0x274   :  { %8978 = vmatpush1.bf16.msra.mxu1 %v14065_v12  ;;  %8938 = vmatprep.subr.bf16.mxu0 %v14070_v38  ;;  %v14133_v12 = vld [vmem:[#allocation2 + $0x72c] ss:$408 sps:$4 sm:$0xff]   ;;  %v14161_v8 = vld [vmem:[#allocation2 + $0x1718] ss:$408 sps:$4 sm:$0xff]  }
 0x275   :  { %8979 = vmatprep.subr.bf16.mxu1 %v14073_v13  ;;  %v14166_v11 = vld [vmem:[#allocation2 + $0x1a44] ss:$408 sps:$4 sm:$0xff]   ;;  %v14164_v19 = vld [vmem:[#allocation2 + $0x1a40] ss:$408 sps:$4 sm:$0xff]  }
 0x277   :  { %8939 = vmatpush1.bf16.msra.mxu0 %v14068_v14  ;;  %v14173_v14 = vld [vmem:[#allocation2 + $0x1d78] ss:$408 sps:$4 sm:$0xff]  }
 0x278   :  { %8980 = vmatpush1.bf16.msra.mxu1 %v14071_v17  ;;  %8940 = vmatprep.subr.bf16.mxu0 %v14076_v20  ;;  %v14128_v17 = vld [vmem:[#allocation2 + $0x720] ss:$408 sps:$4 sm:$0xff]  }
 0x279   :  { %8981 = vmatprep.subr.bf16.mxu1 %v14079_v33 }
 0x27b   :  { %8941 = vmatpush1.bf16.msra.mxu0 %v14074_v21 }
 0x27c   :  { %8982 = vmatpush1.bf16.msra.mxu1 %v14077_v22  ;;  %8942 = vmatprep.subr.bf16.mxu0 %v14082_v23 }
 0x27d   :  { %8983 = vmatprep.subr.bf16.mxu1 %v14085_v24 }
 0x27f   :  { %8943 = vmatpush1.bf16.msra.mxu0 %v14080_v35 }
 0x280   :  { %8984 = vmatpush1.bf16.msra.mxu1 %v14083_v36  ;;  %8944 = vmatprep.subr.bf16.mxu0 %v14088_v40  ;;  %v14131_v36 = vld [vmem:[#allocation2 + $0x728] ss:$408 sps:$4 sm:$0xff]  }
 0x281   :  { %8985 = vmatprep.subr.bf16.mxu1 %v14091_v25 }
 0x283   :  { %8945 = vmatpush1.bf16.msra.mxu0 %v14086_v26 }
 0x284   :  { %8986 = vmatpush1.bf16.msra.mxu1 %v14089_v29  ;;  %8946 = vmatprep.subr.bf16.mxu0 %v14094_v30  ;;  %v14136_v30 = vld [vmem:[#allocation2 + $0xa54] ss:$408 sps:$4 sm:$0xff]  }
 0x285   :  { %8987 = vmatprep.subr.bf16.mxu1 %v14097_v37  ;;  %v14139_v37 = vld [vmem:[#allocation2 + $0xa5c] ss:$408 sps:$4 sm:$0xff]  }
 0x287   :  { %8947 = vmatpush1.bf16.msra.mxu0 %v14092_v39 }
 0x288   :  { %8988 = vmatpush1.bf16.msra.mxu1 %v14095_v41  ;;  %8948 = vmatprep.subr.bf16.mxu0 %v14100_v48 }
 0x289   :  { %8989 = vmatprep.subr.bf16.mxu1 %v14103_v42 }
 0x28b   :  { %8949 = vmatpush1.bf16.msra.mxu0 %v14098_v44 }
 0x28c   :  { %8990 = vmatpush1.bf16.msra.mxu1 %v14101_v45  ;;  %8950 = vmatprep.subr.bf16.mxu0 %v14106_v46  ;;  %v14134_v45 = vld [vmem:[#allocation2 + $0xa50] ss:$408 sps:$4 sm:$0xff]  }
 0x28d   :  { %8991 = vmatprep.subr.bf16.mxu1 %v14109_v53  ;;  %v14137_v46 = vld [vmem:[#allocation2 + $0xa58] ss:$408 sps:$4 sm:$0xff]  }
 0x28f   :  { %8951 = vmatpush1.bf16.msra.mxu0 %v14104_v54 }
 0x290   :  { %8992 = vmatpush1.bf16.msra.mxu1 %v14107_v57  ;;  %8952 = vmatprep.subr.bf16.mxu0 %v14112_v47  ;;  %v14142_v57 = vld [vmem:[#allocation2 + $0xd84] ss:$408 sps:$4 sm:$0xff]  }
 0x291   :  { %8993 = vmatprep.subr.bf16.mxu1 %v14115_v49  ;;  %v14145_v47 = vld [vmem:[#allocation2 + $0xd8c] ss:$408 sps:$4 sm:$0xff]  }
 0x293   :  { %8953 = vmatpush1.bf16.msra.mxu0 %v14110_v51  ;;  %v14140_v51 = vld [vmem:[#allocation2 + $0xd80] ss:$408 sps:$4 sm:$0xff]  }
 0x294   :  { %8994 = vmatpush1.bf16.msra.mxu1 %v14113_v52  ;;  %9010 = vmatprep.subr.bf16.mxu0 %v14118_v55  ;;  %v14143_v52 = vld [vmem:[#allocation2 + $0xd88] ss:$408 sps:$4 sm:$0xff]   ;;  %v11261_v55 = vrot.slane %v11253_v16, %v15270_v43 }
 0x295   :  { %9051 = vmatprep.subr.bf16.mxu1 %v14121_v56  ;;  %v14155_v16 = vld [vmem:[#allocation2 + $0x13e8] ss:$408 sps:$4 sm:$0xff]  }
 0x296   :  { %8961 = vmatmul.mubr.bf16.vlgmr.msra.gmra.mrb[44].mxu0 %v15283_v63 }
 0x297   :  { %9002 = vmatmul.mubr.bf16.vlgmr.msra.gmra.mrb[44].mxu1 %v15283_v63  ;;  %9011 = vmatpush1.bf16.msra.mxu0 %v14116_v58  ;;  %v14148_v58 = vld [vmem:[#allocation2 + $0x10b4] ss:$408 sps:$4 sm:$0xff]  }
 0x298   :  { %9052 = vmatpush1.bf16.msra.mxu1 %v14119_v3  ;;  %9012 = vmatprep.subr.bf16.mxu0 %v14124_v62  ;;  %v14151_v3 = vld [vmem:[#allocation2 + $0x10bc] ss:$408 sps:$4 sm:$0xff]  }
 0x299   :  { %9053 = vmatprep.subr.bf16.mxu1 %v14127_v2  ;;  %v8634_v38 = vpop.f32.mrb[28].mxu0  ;;  %13096 = vmatprep.mubr.msk.bf16.mxu0 %vm8022_vm0, %v15276_v50  ;;  %v14154_v62 = vld [vmem:[#allocation2 + $0x13e4] ss:$408 sps:$4 sm:$0xff]   ;;  %v14160_v2 = vld [vmem:[#allocation2 + $0x1714] ss:$408 sps:$4 sm:$0xff]  }
 0x29a   :  { %v8675_v13 = vpop.f32.mrb[28].mxu1  ;;  %13097 = vmatprep.mubr.msk.bf16.mxu1 %vm8022_vm0, %v15276_v50  ;;  %v10171_v20 = vmax.f32 %v8634_v38, 0.0  ;;  %v8636_v21 = vpop.f32.mrb[29].mxu0 }
 0x29b   :  { %v10173_v33 = vmax.f32 %v8675_v13, 0.0  ;;  %v8677_v22 = vpop.f32.mrb[29].mxu1  ;;  %v10172_v23 = vmax.f32 %v8636_v21, 0.0  ;;  %v8638_v35 = vpop.f32.mrb[30].mxu0  ;;  %9013 = vmatpush1.bf16.msra.mxu0 %v14122_v7  ;;  %v14158_v7 = vld [vmem:[#allocation2 + $0x1710] ss:$408 sps:$4 sm:$0xff]  }
 0x29c   :  { %v10174_v24 = vmax.f32 %v8677_v22, 0.0  ;;  %9054 = vmatpush1.bf16.msra.mxu1 %v14125_v15  ;;  %v8679_v40 = vpop.f32.mrb[30].mxu1  ;;  %v10796_v25 = vsel %vm15683_vm3, %v10171_v20, %v8634_v38  ;;  %v8639_v29 = vpop.f32.mrb[31].mxu0  ;;  %9014 = vmatprep.subr.bf16.mxu0 %v14130_v18  ;;  %v14169_v15 = vld [vmem:[#allocation2 + $0x1a4c] ss:$408 sps:$4 sm:$0xff]  }
 0x29d   :  { %v10798_v26 = vsel %vm15687_vm4, %v10173_v33, %v8675_v13  ;;  %9055 = vmatprep.subr.bf16.mxu1 %v14133_v12  ;;  %v8680_v39 = vpop.f32.mrb[31].mxu1  ;;  %v10797_v41 = vsel %vm15691_vm5, %v10172_v23, %v8636_v21  ;;  %v14167_v18 = vld [vmem:[#allocation2 + $0x1a48] ss:$408 sps:$4 sm:$0xff]   ;;  %v14172_v12 = vld [vmem:[#allocation2 + $0x1d74] ss:$408 sps:$4 sm:$0xff]  }
 0x29e   :  { %v10799_v48 = vsel %vm15695_vm6, %v10174_v24, %v8677_v22  ;;  %v13137_v42 = vpack.c.bf16 %v10797_v41, %v10796_v25  ;;  %v14175_v38 = vld [vmem:[#allocation2 + $0x1d7c] ss:$408 sps:$4 sm:$0xff]   ;;  %v14170_v13 = vld [vmem:[#allocation2 + $0x1d70] ss:$408 sps:$4 sm:$0xff]   ;;  %v14181_v20 = vld [vmem:[#allocation2 + $0x20ac] ss:$408 sps:$4 sm:$0xff]  }
 0x29f   :  { %v13138_v44 = vpack.c.bf16 %v10799_v48, %v10798_v26  ;;  %9015 = vmatpush1.bf16.msra.mxu0 %v14128_v17  ;;  %v14178_v17 = vld [vmem:[#allocation2 + $0x20a4] ss:$408 sps:$4 sm:$0xff]   ;;  %v14176_v33 = vld [vmem:[#allocation2 + $0x20a0] ss:$408 sps:$4 sm:$0xff]   ;;  %v14184_v22 = vld [vmem:[#allocation2 + $0x23d4] ss:$408 sps:$4 sm:$0xff]  }
 0x2a0   :  { %9056 = vmatpush1.bf16.msra.mxu1 %v14131_v36  ;;  %v11245_v53 = vrot.slane %v13137_v42, %v15270_v43  ;;  %9016 = vmatprep.subr.bf16.mxu0 %v14136_v30  ;;  %v14179_v21 = vld [vmem:[#allocation2 + $0x20a8] ss:$408 sps:$4 sm:$0xff]   ;;  %v14187_v23 = vld [vmem:[#allocation2 + $0x23dc] ss:$408 sps:$4 sm:$0xff]   ;;  %v14185_v35 = vld [vmem:[#allocation2 + $0x23d8] ss:$408 sps:$4 sm:$0xff]  }
 0x2a1   :  { %v11252_v54 = vrot.slane %v13138_v44, %v15270_v43  ;;  %9057 = vmatprep.subr.bf16.mxu1 %v14139_v37  ;;  %v14182_v24 = vld [vmem:[#allocation2 + $0x23d0] ss:$408 sps:$4 sm:$0xff]   ;;  %v14190_v40 = vld [vmem:[#allocation2 + $0x2704] ss:$408 sps:$4 sm:$0xff]   ;;  %v14188_v26 = vld [vmem:[#allocation2 + $0x2700] ss:$408 sps:$4 sm:$0xff]  }
 0x2a2   :  { %v10121_v36 = vld [vmem:[#allocation4 + $0x20] sm:$0xff]  ;;  %v14193_v25 = vld [vmem:[#allocation2 + $0x270c] ss:$408 sps:$4 sm:$0xff]   ;;  %v14191_v29 = vld [vmem:[#allocation2 + $0x2708] ss:$408 sps:$4 sm:$0xff]  }
 0x2a3   :  { %v11254_v49 = vcombine.low %v11245_v53, %v11252_v54  ;;  %9017 = vmatpush1.bf16.msra.mxu0 %v14134_v45  ;;  %vm10134_vm7 = vcmp.ne.f32.partialorder %v10121_v36, 0.0  ;;  %v14196_v30 = vld [vmem:[#allocation2 + $0xd4] ss:$408 sps:$4 sm:$0xff]   ;;  %v14194_v41 = vld [vmem:[#allocation2 + $0xd0] ss:$408 sps:$4 sm:$0xff]  }
 0x2a4   :  { %9058 = vmatpush1.bf16.msra.mxu1 %v14137_v46  ;;  %9018 = vmatprep.subr.bf16.mxu0 %v14142_v57  ;;  %v14199_v37 = vld [vmem:[#allocation2 + $0xdc] ss:$408 sps:$4 sm:$0xff]   ;;  %v15722_v39 = vsel %vm10134_vm7, 1, %v15222_v32  ;;  %v14197_v48 = vld [vmem:[#allocation2 + $0xd8] ss:$408 sps:$4 sm:$0xff]  }
 0x2a5   :  { %v11268_v56 = vrot.slane %v11254_v49, %v15270_v43  ;;  %9059 = vmatprep.subr.bf16.mxu1 %v14145_v47  ;;  %v10389_v42 = vrot.slane %v15722_v39, %v15310_v27  ;;  %v10397_v44 = vrot.slane %v15722_v39, %v15313_v28  ;;  %v10393_v45 = vrot.slane %v15722_v39, %v15316_v31  ;;  %v14202_v46 = vld [vmem:[#allocation2 + $0x404] ss:$408 sps:$4 sm:$0xff]   ;;  %v14200_v57 = vld [vmem:[#allocation2 + $0x400] ss:$408 sps:$4 sm:$0xff]   ;;  %v14242_v49 = vld [vmem:[#allocation2 + $0x1a50] ss:$408 sps:$4 sm:$0xff]  }
 0x2a6   :  { %v14205_v53 = vld [vmem:[#allocation2 + $0x40c] ss:$408 sps:$4 sm:$0xff]   ;;  %v10401_v54 = vrot.slane %v15722_v39, %v15322_v34  ;;  %v14247_v47 = vld [vmem:[#allocation2 + $0x1a5c] ss:$408 sps:$4 sm:$0xff]  }
 0x2a7   :  { %v11269_v59 = vcombine.low %v11261_v55, %v11268_v56  ;;  %9019 = vmatpush1.bf16.msra.mxu0 %v14140_v51  ;;  %vm15734_vm8 = vcmp.eq.s32.totalorder %v10389_v42, 1  ;;  %vm15738_vm9 = vcmp.eq.s32.totalorder %v10397_v44, 1  ;;  %v14203_v51 = vld [vmem:[#allocation2 + $0x408] ss:$408 sps:$4 sm:$0xff]   ;;  %vm15742_vm10 = vcmp.eq.s32.totalorder %v10393_v45, 1 }
 0x2a8   :  { %9060 = vmatpush1.bf16.msra.mxu1 %v14143_v52  ;;  %9020 = vmatprep.subr.bf16.mxu0 %v14148_v58  ;;  %v14208_v55 = vld [vmem:[#allocation2 + $0x734] ss:$408 sps:$4 sm:$0xff]   ;;  %vm15746_vm11 = vcmp.eq.s32.totalorder %v10401_v54, 1  ;;  %v14230_v42 = vld [vmem:[#allocation2 + $0x13f0] ss:$408 sps:$4 sm:$0xff]  }
 0x2a9   :  { %11718 = vst [vmem:[%s16381_s3 + $0x18] sm:$0xff] %v11269_v59  ;;  %9061 = vmatprep.subr.bf16.mxu1 %v14151_v3  ;;  %v14211_v56 = vld [vmem:[#allocation2 + $0x73c] ss:$408 sps:$4 sm:$0xff]   ;;  %v14233_v44 = vld [vmem:[#allocation2 + $0x13f8] ss:$408 sps:$4 sm:$0xff]  }
 0x2aa   :  { %v14238_v45 = vld [vmem:[#allocation2 + $0x1724] ss:$408 sps:$4 sm:$0xff]   ;;  %v14239_v54 = vld [vmem:[#allocation2 + $0x1728] ss:$408 sps:$4 sm:$0xff]  }
 0x2ab   :  { %9021 = vmatpush1.bf16.msra.mxu0 %v14146_v60  ;;  %v14206_v60 = vld [vmem:[#allocation2 + $0x730] ss:$408 sps:$4 sm:$0xff]   ;;  %v14250_v52 = vld [vmem:[#allocation2 + $0x1d84] ss:$408 sps:$4 sm:$0xff]  }
 0x2ac   :  { %9062 = vmatpush1.bf16.msra.mxu1 %v14149_v61  ;;  %9022 = vmatprep.subr.bf16.mxu0 %v14154_v62  ;;  %v14259_v59 = vld [vmem:[#allocation2 + $0x20bc] ss:$408 sps:$4 sm:$0xff]  }
 0x2ad   :  { %9063 = vmatprep.subr.bf16.mxu1 %v14157_v9 }
 0x2af   :  { %9023 = vmatpush1.bf16.msra.mxu0 %v14152_v10 }
 0x2b0   :  { %9064 = vmatpush1.bf16.msra.mxu1 %v14155_v16  ;;  %9024 = vmatprep.subr.bf16.mxu0 %v14160_v2 }
 0x2b1   :  { %9065 = vmatprep.subr.bf16.mxu1 %v14163_v6 }
 0x2b3   :  { %9025 = vmatpush1.bf16.msra.mxu0 %v14158_v7  ;;  %v14209_v7 = vld [vmem:[#allocation2 + $0x738] ss:$408 sps:$4 sm:$0xff]  }
 0x2b4   :  { %9066 = vmatpush1.bf16.msra.mxu1 %v14161_v8  ;;  %9026 = vmatprep.subr.bf16.mxu0 %v14166_v11 }
 0x2b5   :  { %9067 = vmatprep.subr.bf16.mxu1 %v14169_v15 }
 0x2b7   :  { %9027 = vmatpush1.bf16.msra.mxu0 %v14164_v19 }
 0x2b8   :  { %9068 = vmatpush1.bf16.msra.mxu1 %v14167_v18  ;;  %9028 = vmatprep.subr.bf16.mxu0 %v14172_v12  ;;  %v14214_v18 = vld [vmem:[#allocation2 + $0xa64] ss:$408 sps:$4 sm:$0xff]  }
 0x2b9   :  { %9069 = vmatprep.subr.bf16.mxu1 %v14175_v38  ;;  %v14217_v12 = vld [vmem:[#allocation2 + $0xa6c] ss:$408 sps:$4 sm:$0xff]  }
 0x2bb   :  { %9029 = vmatpush1.bf16.msra.mxu0 %v14170_v13 }
 0x2bc   :  { %9070 = vmatpush1.bf16.msra.mxu1 %v14173_v14  ;;  %9030 = vmatprep.subr.bf16.mxu0 %v14178_v17 }
 0x2bd   :  { %9071 = vmatprep.subr.bf16.mxu1 %v14181_v20 }
 0x2bf   :  { %9031 = vmatpush1.bf16.msra.mxu0 %v14176_v33  ;;  %v14212_v33 = vld [vmem:[#allocation2 + $0xa60] ss:$408 sps:$4 sm:$0xff]  }
 0x2c0   :  { %9072 = vmatpush1.bf16.msra.mxu1 %v14179_v21  ;;  %9032 = vmatprep.subr.bf16.mxu0 %v14184_v22  ;;  %v14215_v21 = vld [vmem:[#allocation2 + $0xa68] ss:$408 sps:$4 sm:$0xff]  }
 0x2c1   :  { %9073 = vmatprep.subr.bf16.mxu1 %v14187_v23 }
 0x2c3   :  { %9033 = vmatpush1.bf16.msra.mxu0 %v14182_v24  ;;  %v14220_v24 = vld [vmem:[#allocation2 + $0xd94] ss:$408 sps:$4 sm:$0xff]  }
 0x2c4   :  { %9074 = vmatpush1.bf16.msra.mxu1 %v14185_v35  ;;  %9034 = vmatprep.subr.bf16.mxu0 %v14190_v40  ;;  %v14223_v35 = vld [vmem:[#allocation2 + $0xd9c] ss:$408 sps:$4 sm:$0xff]   ;;  %v14218_v40 = vld [vmem:[#allocation2 + $0xd90] ss:$408 sps:$4 sm:$0xff]  }
 0x2c5   :  { %9075 = vmatprep.subr.bf16.mxu1 %v14193_v25  ;;  %v14221_v25 = vld [vmem:[#allocation2 + $0xd98] ss:$408 sps:$4 sm:$0xff]  }
 0x2c7   :  { %9035 = vmatpush1.bf16.msra.mxu0 %v14188_v26  ;;  %v14226_v26 = vld [vmem:[#allocation2 + $0x10c4] ss:$408 sps:$4 sm:$0xff]  }
 0x2c8   :  { %9076 = vmatpush1.bf16.msra.mxu1 %v14191_v29  ;;  %9092 = vmatprep.subr.bf16.mxu0 %v14196_v30  ;;  %v14229_v29 = vld [vmem:[#allocation2 + $0x10cc] ss:$408 sps:$4 sm:$0xff]   ;;  %v14224_v30 = vld [vmem:[#allocation2 + $0x10c0] ss:$408 sps:$4 sm:$0xff]  }
 0x2c9   :  { %9133 = vmatprep.subr.bf16.mxu1 %v14199_v37  ;;  %v14227_v37 = vld [vmem:[#allocation2 + $0x10c8] ss:$408 sps:$4 sm:$0xff]  }
 0x2ca   :  { %9043 = vmatmul.mubr.bf16.vlgmr.msra.gmra.mrb[48].mxu0 %v15283_v63 }
 0x2cb   :  { %9084 = vmatmul.mubr.bf16.vlgmr.msra.gmra.mrb[48].mxu1 %v15283_v63  ;;  %9093 = vmatpush1.bf16.msra.mxu0 %v14194_v41  ;;  %v14232_v41 = vld [vmem:[#allocation2 + $0x13f4] ss:$408 sps:$4 sm:$0xff]  }
 0x2cc   :  { %9134 = vmatpush1.bf16.msra.mxu1 %v14197_v48  ;;  %9094 = vmatprep.subr.bf16.mxu0 %v14202_v46  ;;  %v14235_v48 = vld [vmem:[#allocation2 + $0x13fc] ss:$408 sps:$4 sm:$0xff]   ;;  %v14241_v46 = vld [vmem:[#allocation2 + $0x172c] ss:$408 sps:$4 sm:$0xff]  }
 0x2cd   :  { %9135 = vmatprep.subr.bf16.mxu1 %v14205_v53  ;;  %v8716_v58 = vpop.f32.mrb[32].mxu0  ;;  %13098 = vmatprep.mubr.msk.bf16.mxu0 %vm8022_vm0, %v15276_v50  ;;  %v14236_v53 = vld [vmem:[#allocation2 + $0x1720] ss:$408 sps:$4 sm:$0xff]  }
 0x2ce   :  { %v8757_v3 = vpop.f32.mrb[32].mxu1  ;;  %13099 = vmatprep.mubr.msk.bf16.mxu1 %vm8022_vm0, %v15276_v50  ;;  %v10175_v61 = vmax.f32 %v8716_v58, 0.0  ;;  %v8718_v9 = vpop.f32.mrb[33].mxu0 }
 0x2cf   :  { %v10177_v62 = vmax.f32 %v8757_v3, 0.0  ;;  %v8759_v10 = vpop.f32.mrb[33].mxu1  ;;  %v10176_v16 = vmax.f32 %v8718_v9, 0.0  ;;  %v8720_v6 = vpop.f32.mrb[34].mxu0  ;;  %9095 = vmatpush1.bf16.msra.mxu0 %v14200_v57  ;;  %v14244_v57 = vld [vmem:[#allocation2 + $0x1a54] ss:$408 sps:$4 sm:$0xff]  }
 0x2d0   :  { %v10178_v2 = vmax.f32 %v8759_v10, 0.0  ;;  %9136 = vmatpush1.bf16.msra.mxu1 %v14203_v51  ;;  %v8761_v8 = vpop.f32.mrb[34].mxu1  ;;  %v10800_v11 = vsel %vm15734_vm8, %v10175_v61, %v8716_v58  ;;  %v8721_v19 = vpop.f32.mrb[35].mxu0  ;;  %9096 = vmatprep.subr.bf16.mxu0 %v14208_v55  ;;  %v14245_v51 = vld [vmem:[#allocation2 + $0x1a58] ss:$408 sps:$4 sm:$0xff]  }
 0x2d1   :  { %v10802_v15 = vsel %vm15738_vm9, %v10177_v62, %v8757_v3  ;;  %9137 = vmatprep.subr.bf16.mxu1 %v14211_v56  ;;  %v8762_v38 = vpop.f32.mrb[35].mxu1  ;;  %v10801_v13 = vsel %vm15742_vm10, %v10176_v16, %v8718_v9  ;;  %v14253_v55 = vld [vmem:[#allocation2 + $0x1d8c] ss:$408 sps:$4 sm:$0xff]   ;;  %v14248_v56 = vld [vmem:[#allocation2 + $0x1d80] ss:$408 sps:$4 sm:$0xff]  }
 0x2d2   :  { %v10803_v14 = vsel %vm15746_vm11, %v10178_v2, %v8759_v10  ;;  %v13139_v17 = vpack.c.bf16 %v10801_v13, %v10800_v11  ;;  %v14251_v58 = vld [vmem:[#allocation2 + $0x1d88] ss:$408 sps:$4 sm:$0xff]   ;;  %v14256_v3 = vld [vmem:[#allocation2 + $0x20b4] ss:$408 sps:$4 sm:$0xff]   ;;  %v14257_v61 = vld [vmem:[#allocation2 + $0x20b8] ss:$408 sps:$4 sm:$0xff]   ;;  %v10413_v38 = vrot.slane %v15722_v39, %v15374_v1  ;;  %v10409_v13 = vrot.slane %v15722_v39, %v15377_v4 }
 0x2d3   :  { %v13140_v20 = vpack.c.bf16 %v10803_v14, %v10802_v15  ;;  %9097 = vmatpush1.bf16.msra.mxu0 %v14206_v60  ;;  %v14254_v60 = vld [vmem:[#allocation2 + $0x20b0] ss:$408 sps:$4 sm:$0xff]   ;;  %v14262_v62 = vld [vmem:[#allocation2 + $0x23e4] ss:$408 sps:$4 sm:$0xff]   ;;  %v14260_v10 = vld [vmem:[#allocation2 + $0x23e0] ss:$408 sps:$4 sm:$0xff]  }
 0x2d4   :  { %9138 = vmatpush1.bf16.msra.mxu1 %v14209_v7  ;;  %v15763_v22 = vrot.slane %v13139_v17, %v15270_v43  ;;  %9098 = vmatprep.subr.bf16.mxu0 %v14214_v18  ;;  %v14265_v9 = vld [vmem:[#allocation2 + $0x23ec] ss:$408 sps:$4 sm:$0xff]   ;;  %v14263_v16 = vld [vmem:[#allocation2 + $0x23e8] ss:$408 sps:$4 sm:$0xff]   ;;  %v14271_v6 = vld [vmem:[#allocation2 + $0x271c] ss:$408 sps:$4 sm:$0xff]  }
 0x2d5   :  { %v15766_v23 = vrot.slane %v13140_v20, %v15270_v43  ;;  %9139 = vmatprep.subr.bf16.mxu1 %v14217_v12  ;;  %v14268_v2 = vld [vmem:[#allocation2 + $0x2714] ss:$408 sps:$4 sm:$0xff]   ;;  %v14266_v7 = vld [vmem:[#allocation2 + $0x2710] ss:$408 sps:$4 sm:$0xff]   ;;  %v14274_v11 = vld [vmem:[#allocation2 + $0xe4] ss:$408 sps:$4 sm:$0xff]   ;;  %v10405_v12 = vrot.slane %v15722_v39, %v15371_v0  ;;  %v10417_v20 = vrot.slane %v15722_v39, %v15380_v5 }
 0x2d6   :  { %v14269_v8 = vld [vmem:[#allocation2 + $0x2718] ss:$408 sps:$4 sm:$0xff]   ;;  %v14277_v15 = vld [vmem:[#allocation2 + $0xec] ss:$408 sps:$4 sm:$0xff]   ;;  %v14275_v18 = vld [vmem:[#allocation2 + $0xe8] ss:$408 sps:$4 sm:$0xff]  }
 0x2d7   :  { %v11302_v36 = vcombine.low %v15763_v22, %v15766_v23  ;;  %9099 = vmatpush1.bf16.msra.mxu0 %v14212_v33  ;;  %v14272_v19 = vld [vmem:[#allocation2 + $0xe0] ss:$408 sps:$4 sm:$0xff]   ;;  %v14280_v14 = vld [vmem:[#allocation2 + $0x414] ss:$408 sps:$4 sm:$0xff]   ;;  %v14278_v33 = vld [vmem:[#allocation2 + $0x410] ss:$408 sps:$4 sm:$0xff]  }
 0x2d8   :  { %9140 = vmatpush1.bf16.msra.mxu1 %v14215_v21  ;;  %9100 = vmatprep.subr.bf16.mxu0 %v14220_v24  ;;  %v14283_v17 = vld [vmem:[#allocation2 + $0x41c] ss:$408 sps:$4 sm:$0xff]   ;;  %vm15780_vm12 = vcmp.eq.s32.totalorder %v10405_v12, 1  ;;  %vm15784_vm13 = vcmp.eq.s32.totalorder %v10413_v38, 1  ;;  %vm15788_vm14 = vcmp.eq.s32.totalorder %v10409_v13, 1  ;;  %vm15792_vm15 = vcmp.eq.s32.totalorder %v10417_v20, 1 }
 0x2d9   :  { %9141 = vmatprep.subr.bf16.mxu1 %v14223_v35  ;;  %v14281_v35 = vld [vmem:[#allocation2 + $0x418] ss:$408 sps:$4 sm:$0xff]   ;;  %v14286_v39 = vld [vmem:[#allocation2 + $0x744] ss:$408 sps:$4 sm:$0xff]  }
 0x2da   :  { %v14302_v38 = vld [vmem:[#allocation2 + $0x10d0] ss:$408 sps:$4 sm:$0xff]   ;;  %v14313_v22 = vld [vmem:[#allocation2 + $0x140c] ss:$408 sps:$4 sm:$0xff]   ;;  %v14308_v23 = vld [vmem:[#allocation2 + $0x1400] ss:$408 sps:$4 sm:$0xff]  }
 0x2db   :  { %9101 = vmatpush1.bf16.msra.mxu0 %v14218_v40  ;;  %v14305_v13 = vld [vmem:[#allocation2 + $0x10d8] ss:$408 sps:$4 sm:$0xff]   ;;  %v14319_v20 = vld [vmem:[#allocation2 + $0x173c] ss:$408 sps:$4 sm:$0xff]  }
 0x2dc   :  { %9142 = vmatpush1.bf16.msra.mxu1 %v14221_v25  ;;  %9102 = vmatprep.subr.bf16.mxu0 %v14226_v26  ;;  %v14289_v25 = vld [vmem:[#allocation2 + $0x74c] ss:$408 sps:$4 sm:$0xff]   ;;  %v14317_v21 = vld [vmem:[#allocation2 + $0x1738] ss:$408 sps:$4 sm:$0xff]  }
 0x2dd   :  { %9143 = vmatprep.subr.bf16.mxu1 %v14229_v29  ;;  %v14322_v24 = vld [vmem:[#allocation2 + $0x1a64] ss:$408 sps:$4 sm:$0xff]   ;;  %v14320_v40 = vld [vmem:[#allocation2 + $0x1a60] ss:$408 sps:$4 sm:$0xff]  }
 0x2df   :  { %9103 = vmatpush1.bf16.msra.mxu0 %v14224_v30  ;;  %v14329_v30 = vld [vmem:[#allocation2 + $0x1d98] ss:$408 sps:$4 sm:$0xff]  }
 0x2e0   :  { %9144 = vmatpush1.bf16.msra.mxu1 %v14227_v37  ;;  %9104 = vmatprep.subr.bf16.mxu0 %v14232_v41  ;;  %v14284_v37 = vld [vmem:[#allocation2 + $0x740] ss:$408 sps:$4 sm:$0xff]  }
 0x2e1   :  { %9145 = vmatprep.subr.bf16.mxu1 %v14235_v48 }
 0x2e3   :  { %9105 = vmatpush1.bf16.msra.mxu0 %v14230_v42 }
 0x2e4   :  { %9146 = vmatpush1.bf16.msra.mxu1 %v14233_v44  ;;  %9106 = vmatprep.subr.bf16.mxu0 %v14238_v45 }
 0x2e5   :  { %9147 = vmatprep.subr.bf16.mxu1 %v14241_v46 }
 0x2e7   :  { %9107 = vmatpush1.bf16.msra.mxu0 %v14236_v53 }
 0x2e8   :  { %9148 = vmatpush1.bf16.msra.mxu1 %v14239_v54  ;;  %9108 = vmatprep.subr.bf16.mxu0 %v14244_v57  ;;  %v14287_v54 = vld [vmem:[#allocation2 + $0x748] ss:$408 sps:$4 sm:$0xff]  }
 0x2e9   :  { %9149 = vmatprep.subr.bf16.mxu1 %v14247_v47 }
 0x2eb   :  { %9109 = vmatpush1.bf16.msra.mxu0 %v14242_v49 }
 0x2ec   :  { %9150 = vmatpush1.bf16.msra.mxu1 %v14245_v51  ;;  %9110 = vmatprep.subr.bf16.mxu0 %v14250_v52  ;;  %v14292_v52 = vld [vmem:[#allocation2 + $0xa74] ss:$408 sps:$4 sm:$0xff]  }
 0x2ed   :  { %9151 = vmatprep.subr.bf16.mxu1 %v14253_v55  ;;  %v14295_v55 = vld [vmem:[#allocation2 + $0xa7c] ss:$408 sps:$4 sm:$0xff]  }
 0x2ef   :  { %9111 = vmatpush1.bf16.msra.mxu0 %v14248_v56 }
 0x2f0   :  { %9152 = vmatpush1.bf16.msra.mxu1 %v14251_v58  ;;  %9112 = vmatprep.subr.bf16.mxu0 %v14256_v3 }
 0x2f1   :  { %9153 = vmatprep.subr.bf16.mxu1 %v14259_v59 }
 0x2f3   :  { %9113 = vmatpush1.bf16.msra.mxu0 %v14254_v60 }
 0x2f4   :  { %9154 = vmatpush1.bf16.msra.mxu1 %v14257_v61  ;;  %9114 = vmatprep.subr.bf16.mxu0 %v14262_v62  ;;  %v14290_v61 = vld [vmem:[#allocation2 + $0xa70] ss:$408 sps:$4 sm:$0xff]  }
 0x2f5   :  { %9155 = vmatprep.subr.bf16.mxu1 %v14265_v9  ;;  %v14293_v62 = vld [vmem:[#allocation2 + $0xa78] ss:$408 sps:$4 sm:$0xff]  }
 0x2f7   :  { %9115 = vmatpush1.bf16.msra.mxu0 %v14260_v10 }
 0x2f8   :  { %9156 = vmatpush1.bf16.msra.mxu1 %v14263_v16  ;;  %9116 = vmatprep.subr.bf16.mxu0 %v14268_v2  ;;  %v14298_v16 = vld [vmem:[#allocation2 + $0xda4] ss:$408 sps:$4 sm:$0xff]  }
 0x2f9   :  { %9157 = vmatprep.subr.bf16.mxu1 %v14271_v6  ;;  %v14301_v2 = vld [vmem:[#allocation2 + $0xdac] ss:$408 sps:$4 sm:$0xff]  }
 0x2fb   :  { %9117 = vmatpush1.bf16.msra.mxu0 %v14266_v7  ;;  %v14296_v7 = vld [vmem:[#allocation2 + $0xda0] ss:$408 sps:$4 sm:$0xff]  }
 0x2fc   :  { %9158 = vmatpush1.bf16.msra.mxu1 %v14269_v8  ;;  %9174 = vmatprep.subr.bf16.mxu0 %v14274_v11  ;;  %v14299_v8 = vld [vmem:[#allocation2 + $0xda8] ss:$408 sps:$4 sm:$0xff]   ;;  %v11310_v11 = vrot.slane %v11302_v36, %v15270_v43 }
 0x2fd   :  { %9215 = vmatprep.subr.bf16.mxu1 %v14277_v15  ;;  %v14311_v36 = vld [vmem:[#allocation2 + $0x1408] ss:$408 sps:$4 sm:$0xff]  }
 0x2fe   :  { %9125 = vmatmul.mubr.bf16.vlgmr.msra.gmra.mrb[52].mxu0 %v15283_v63 }
 0x2ff   :  { %9166 = vmatmul.mubr.bf16.vlgmr.msra.gmra.mrb[52].mxu1 %v15283_v63  ;;  %9175 = vmatpush1.bf16.msra.mxu0 %v14272_v19  ;;  %v14304_v19 = vld [vmem:[#allocation2 + $0x10d4] ss:$408 sps:$4 sm:$0xff]  }
 0x300   :  { %9216 = vmatpush1.bf16.msra.mxu1 %v14275_v18  ;;  %9176 = vmatprep.subr.bf16.mxu0 %v14280_v14  ;;  %v14307_v18 = vld [vmem:[#allocation2 + $0x10dc] ss:$408 sps:$4 sm:$0xff]  }
 0x301   :  { %9217 = vmatprep.subr.bf16.mxu1 %v14283_v17  ;;  %v8798_v26 = vpop.f32.mrb[36].mxu0  ;;  %13100 = vmatprep.mubr.msk.bf16.mxu0 %vm8022_vm0, %v15276_v50  ;;  %v14310_v14 = vld [vmem:[#allocation2 + $0x1404] ss:$408 sps:$4 sm:$0xff]   ;;  %v14316_v17 = vld [vmem:[#allocation2 + $0x1734] ss:$408 sps:$4 sm:$0xff]  }
 0x302   :  { %v8839_v29 = vpop.f32.mrb[36].mxu1  ;;  %13101 = vmatprep.mubr.msk.bf16.mxu1 %vm8022_vm0, %v15276_v50  ;;  %v10179_v41 = vmax.f32 %v8798_v26, 0.0  ;;  %v8800_v42 = vpop.f32.mrb[37].mxu0 }
 0x303   :  { %v10181_v48 = vmax.f32 %v8839_v29, 0.0  ;;  %v8841_v44 = vpop.f32.mrb[37].mxu1  ;;  %v10180_v45 = vmax.f32 %v8800_v42, 0.0  ;;  %v8802_v53 = vpop.f32.mrb[38].mxu0  ;;  %9177 = vmatpush1.bf16.msra.mxu0 %v14278_v33  ;;  %v14314_v33 = vld [vmem:[#allocation2 + $0x1730] ss:$408 sps:$4 sm:$0xff]  }
 0x304   :  { %v10182_v46 = vmax.f32 %v8841_v44, 0.0  ;;  %9218 = vmatpush1.bf16.msra.mxu1 %v14281_v35  ;;  %v8843_v57 = vpop.f32.mrb[38].mxu1  ;;  %v10804_v47 = vsel %vm15780_vm12, %v10179_v41, %v8798_v26  ;;  %v8803_v51 = vpop.f32.mrb[39].mxu0  ;;  %9178 = vmatprep.subr.bf16.mxu0 %v14286_v39  ;;  %v14325_v35 = vld [vmem:[#allocation2 + $0x1a6c] ss:$408 sps:$4 sm:$0xff]  }
 0x305   :  { %v10806_v49 = vsel %vm15784_vm13, %v10181_v48, %v8839_v29  ;;  %9219 = vmatprep.subr.bf16.mxu1 %v14289_v25  ;;  %v8844_v56 = vpop.f32.mrb[39].mxu1  ;;  %v10805_v58 = vsel %vm15788_vm14, %v10180_v45, %v8800_v42  ;;  %v14323_v39 = vld [vmem:[#allocation2 + $0x1a68] ss:$408 sps:$4 sm:$0xff]   ;;  %v14328_v25 = vld [vmem:[#allocation2 + $0x1d94] ss:$408 sps:$4 sm:$0xff]  }
 0x306   :  { %v10807_v3 = vsel %vm15792_vm15, %v10182_v46, %v8841_v44  ;;  %v13141_v59 = vpack.c.bf16 %v10805_v58, %v10804_v47  ;;  %v14331_v26 = vld [vmem:[#allocation2 + $0x1d9c] ss:$408 sps:$4 sm:$0xff]   ;;  %v14326_v29 = vld [vmem:[#allocation2 + $0x1d90] ss:$408 sps:$4 sm:$0xff]   ;;  %v14337_v41 = vld [vmem:[#allocation2 + $0x20cc] ss:$408 sps:$4 sm:$0xff]  }
 0x307   :  { %v13142_v60 = vpack.c.bf16 %v10807_v3, %v10806_v49  ;;  %9179 = vmatpush1.bf16.msra.mxu0 %v14284_v37  ;;  %v14334_v37 = vld [vmem:[#allocation2 + $0x20c4] ss:$408 sps:$4 sm:$0xff]   ;;  %v14332_v48 = vld [vmem:[#allocation2 + $0x20c0] ss:$408 sps:$4 sm:$0xff]   ;;  %v14340_v44 = vld [vmem:[#allocation2 + $0x23f4] ss:$408 sps:$4 sm:$0xff]  }
 0x308   :  { %9220 = vmatpush1.bf16.msra.mxu1 %v14287_v54  ;;  %v11294_v9 = vrot.slane %v13141_v59, %v15270_v43  ;;  %9180 = vmatprep.subr.bf16.mxu0 %v14292_v52  ;;  %v14335_v42 = vld [vmem:[#allocation2 + $0x20c8] ss:$408 sps:$4 sm:$0xff]   ;;  %v14343_v45 = vld [vmem:[#allocation2 + $0x23fc] ss:$408 sps:$4 sm:$0xff]   ;;  %v14341_v53 = vld [vmem:[#allocation2 + $0x23f8] ss:$408 sps:$4 sm:$0xff]  }
 0x309   :  { %v11301_v10 = vrot.slane %v13142_v60, %v15270_v43  ;;  %9221 = vmatprep.subr.bf16.mxu1 %v14295_v55  ;;  %v14338_v46 = vld [vmem:[#allocation2 + $0x23f0] ss:$408 sps:$4 sm:$0xff]   ;;  %v14346_v54 = vld [vmem:[#allocation2 + $0x2724] ss:$408 sps:$4 sm:$0xff]   ;;  %v14344_v49 = vld [vmem:[#allocation2 + $0x2720] ss:$408 sps:$4 sm:$0xff]  }
 0x30a   :  { %v14349_v57 = vld [vmem:[#allocation2 + $0x272c] ss:$408 sps:$4 sm:$0xff]   ;;  %v10122_v47 = vld [vmem:[#allocation4 + $0x28] sm:$0xff]  ;;  %v14347_v51 = vld [vmem:[#allocation2 + $0x2728] ss:$408 sps:$4 sm:$0xff]  }
 0x30b   :  { %v11303_v6 = vcombine.low %v11294_v9, %v11301_v10  ;;  %9181 = vmatpush1.bf16.msra.mxu0 %v14290_v61  ;;  %vm10135_vm1 = vcmp.ne.f32.partialorder %v10122_v47, 0.0  ;;  %v14352_v52 = vld [vmem:[#allocation2 + $0xf4] ss:$408 sps:$4 sm:$0xff]   ;;  %v14350_v58 = vld [vmem:[#allocation2 + $0xf0] ss:$408 sps:$4 sm:$0xff]  }
 0x30c   :  { %9222 = vmatpush1.bf16.msra.mxu1 %v14293_v62  ;;  %9182 = vmatprep.subr.bf16.mxu0 %v14298_v16  ;;  %v14355_v55 = vld [vmem:[#allocation2 + $0xfc] ss:$408 sps:$4 sm:$0xff]   ;;  %v15819_v56 = vsel %vm10135_vm1, 1, %v15222_v32  ;;  %v14353_v3 = vld [vmem:[#allocation2 + $0xf8] ss:$408 sps:$4 sm:$0xff]  }
 0x30d   :  { %v11317_v15 = vrot.slane %v11303_v6, %v15270_v43  ;;  %9223 = vmatprep.subr.bf16.mxu1 %v14301_v2  ;;  %v14358_v59 = vld [vmem:[#allocation2 + $0x424] ss:$408 sps:$4 sm:$0xff]   ;;  %v10421_v61 = vrot.slane %v15819_v56, %v15310_v27  ;;  %v10429_v62 = vrot.slane %v15819_v56, %v15313_v28  ;;  %v10425_v9 = vrot.slane %v15819_v56, %v15316_v31  ;;  %v14356_v16 = vld [vmem:[#allocation2 + $0x420] ss:$408 sps:$4 sm:$0xff]   ;;  %v14364_v6 = vld [vmem:[#allocation2 + $0x754] ss:$408 sps:$4 sm:$0xff]  }
 0x30e   :  { %v14361_v60 = vld [vmem:[#allocation2 + $0x42c] ss:$408 sps:$4 sm:$0xff]   ;;  %v10433_v10 = vrot.slane %v15819_v56, %v15322_v34  ;;  %v14359_v2 = vld [vmem:[#allocation2 + $0x428] ss:$408 sps:$4 sm:$0xff]   ;;  %v14377_v47 = vld [vmem:[#allocation2 + $0xdb8] ss:$408 sps:$4 sm:$0xff]  }
 0x30f   :  { %v11318_v12 = vcombine.low %v11310_v11, %v11317_v15  ;;  %9183 = vmatpush1.bf16.msra.mxu0 %v14296_v7  ;;  %v14367_v7 = vld [vmem:[#allocation2 + $0x75c] ss:$408 sps:$4 sm:$0xff]   ;;  %vm15831_vm2 = vcmp.eq.s32.totalorder %v10421_v61, 1  ;;  %vm15835_vm3 = vcmp.eq.s32.totalorder %v10429_v62, 1  ;;  %vm15839_vm4 = vcmp.eq.s32.totalorder %v10425_v9, 1 }
 0x310   :  { %9224 = vmatpush1.bf16.msra.mxu1 %v14299_v8  ;;  %9184 = vmatprep.subr.bf16.mxu0 %v14304_v19  ;;  %vm15843_vm5 = vcmp.eq.s32.totalorder %v10433_v10, 1  ;;  %v14394_v61 = vld [vmem:[#allocation2 + $0x1744] ss:$408 sps:$4 sm:$0xff]   ;;  %v14392_v9 = vld [vmem:[#allocation2 + $0x1740] ss:$408 sps:$4 sm:$0xff]  }
 0x311   :  { %11719 = vst [vmem:[%s16381_s3 + $0x20] sm:$0xff] %v11318_v12  ;;  %9225 = vmatprep.subr.bf16.mxu1 %v14307_v18  ;;  %v14397_v62 = vld [vmem:[#allocation2 + $0x174c] ss:$408 sps:$4 sm:$0xff]   ;;  %v14395_v10 = vld [vmem:[#allocation2 + $0x1748] ss:$408 sps:$4 sm:$0xff]  }
 0x312   :  { %v14409_v11 = vld [vmem:[#allocation2 + $0x1dac] ss:$408 sps:$4 sm:$0xff]   ;;  %v14407_v19 = vld [vmem:[#allocation2 + $0x1da8] ss:$408 sps:$4 sm:$0xff]   ;;  %v14415_v12 = vld [vmem:[#allocation2 + $0x20dc] ss:$408 sps:$4 sm:$0xff]  }
 0x313   :  { %9185 = vmatpush1.bf16.msra.mxu0 %v14302_v38  ;;  %v14412_v18 = vld [vmem:[#allocation2 + $0x20d4] ss:$408 sps:$4 sm:$0xff]  }
 0x314   :  { %9226 = vmatpush1.bf16.msra.mxu1 %v14305_v13  ;;  %9186 = vmatprep.subr.bf16.mxu0 %v14310_v14 }
 0x315   :  { %9227 = vmatprep.subr.bf16.mxu1 %v14313_v22 }
 0x317   :  { %9187 = vmatpush1.bf16.msra.mxu0 %v14308_v23  ;;  %v14362_v23 = vld [vmem:[#allocation2 + $0x750] ss:$408 sps:$4 sm:$0xff]  }
 0x318   :  { %9228 = vmatpush1.bf16.msra.mxu1 %v14311_v36  ;;  %9188 = vmatprep.subr.bf16.mxu0 %v14316_v17 }
 0x319   :  { %9229 = vmatprep.subr.bf16.mxu1 %v14319_v20 }
 0x31b   :  { %9189 = vmatpush1.bf16.msra.mxu0 %v14314_v33  ;;  %v14365_v33 = vld [vmem:[#allocation2 + $0x758] ss:$408 sps:$4 sm:$0xff]  }
 0x31c   :  { %9230 = vmatpush1.bf16.msra.mxu1 %v14317_v21  ;;  %9190 = vmatprep.subr.bf16.mxu0 %v14322_v24 }
 0x31d   :  { %9231 = vmatprep.subr.bf16.mxu1 %v14325_v35 }
 0x31f   :  { %9191 = vmatpush1.bf16.msra.mxu0 %v14320_v40 }
 0x320   :  { %9232 = vmatpush1.bf16.msra.mxu1 %v14323_v39  ;;  %9192 = vmatprep.subr.bf16.mxu0 %v14328_v25  ;;  %v14370_v39 = vld [vmem:[#allocation2 + $0xa84] ss:$408 sps:$4 sm:$0xff]  }
 0x321   :  { %9233 = vmatprep.subr.bf16.mxu1 %v14331_v26  ;;  %v14373_v25 = vld [vmem:[#allocation2 + $0xa8c] ss:$408 sps:$4 sm:$0xff]  }
 0x323   :  { %9193 = vmatpush1.bf16.msra.mxu0 %v14326_v29 }
 0x324   :  { %9234 = vmatpush1.bf16.msra.mxu1 %v14329_v30  ;;  %9194 = vmatprep.subr.bf16.mxu0 %v14334_v37 }
 0x325   :  { %9235 = vmatprep.subr.bf16.mxu1 %v14337_v41 }
 0x327   :  { %9195 = vmatpush1.bf16.msra.mxu0 %v14332_v48  ;;  %v14368_v48 = vld [vmem:[#allocation2 + $0xa80] ss:$408 sps:$4 sm:$0xff]  }
 0x328   :  { %9236 = vmatpush1.bf16.msra.mxu1 %v14335_v42  ;;  %9196 = vmatprep.subr.bf16.mxu0 %v14340_v44  ;;  %v14371_v42 = vld [vmem:[#allocation2 + $0xa88] ss:$408 sps:$4 sm:$0xff]  }
 0x329   :  { %9237 = vmatprep.subr.bf16.mxu1 %v14343_v45 }
 0x32b   :  { %9197 = vmatpush1.bf16.msra.mxu0 %v14338_v46  ;;  %v14376_v46 = vld [vmem:[#allocation2 + $0xdb4] ss:$408 sps:$4 sm:$0xff]  }
 0x32c   :  { %9238 = vmatpush1.bf16.msra.mxu1 %v14341_v53  ;;  %9198 = vmatprep.subr.bf16.mxu0 %v14346_v54  ;;  %v14379_v53 = vld [vmem:[#allocation2 + $0xdbc] ss:$408 sps:$4 sm:$0xff]  }
 0x32d   :  { %9239 = vmatprep.subr.bf16.mxu1 %v14349_v57  ;;  %v14374_v57 = vld [vmem:[#allocation2 + $0xdb0] ss:$408 sps:$4 sm:$0xff]  }
 0x32f   :  { %9199 = vmatpush1.bf16.msra.mxu0 %v14344_v49  ;;  %v14382_v49 = vld [vmem:[#allocation2 + $0x10e4] ss:$408 sps:$4 sm:$0xff]  }
 0x330   :  { %9240 = vmatpush1.bf16.msra.mxu1 %v14347_v51  ;;  %9256 = vmatprep.subr.bf16.mxu0 %v14352_v52  ;;  %v14385_v51 = vld [vmem:[#allocation2 + $0x10ec] ss:$408 sps:$4 sm:$0xff]   ;;  %v14380_v52 = vld [vmem:[#allocation2 + $0x10e0] ss:$408 sps:$4 sm:$0xff]  }
 0x331   :  { %9297 = vmatprep.subr.bf16.mxu1 %v14355_v55  ;;  %v14383_v55 = vld [vmem:[#allocation2 + $0x10e8] ss:$408 sps:$4 sm:$0xff]  }
 0x332   :  { %9207 = vmatmul.mubr.bf16.vlgmr.msra.gmra.mrb[56].mxu0 %v15283_v63 }
 0x333   :  { %9248 = vmatmul.mubr.bf16.vlgmr.msra.gmra.mrb[56].mxu1 %v15283_v63  ;;  %9257 = vmatpush1.bf16.msra.mxu0 %v14350_v58  ;;  %v14388_v58 = vld [vmem:[#allocation2 + $0x1414] ss:$408 sps:$4 sm:$0xff]  }
 0x334   :  { %9298 = vmatpush1.bf16.msra.mxu1 %v14353_v3  ;;  %9258 = vmatprep.subr.bf16.mxu0 %v14358_v59  ;;  %v14391_v3 = vld [vmem:[#allocation2 + $0x141c] ss:$408 sps:$4 sm:$0xff]   ;;  %v14386_v59 = vld [vmem:[#allocation2 + $0x1410] ss:$408 sps:$4 sm:$0xff]  }
 0x335   :  { %9299 = vmatprep.subr.bf16.mxu1 %v14361_v60  ;;  %v8880_v8 = vpop.f32.mrb[40].mxu0  ;;  %13102 = vmatprep.mubr.msk.bf16.mxu0 %vm8022_vm0, %v15276_v50  ;;  %v14389_v60 = vld [vmem:[#allocation2 + $0x1418] ss:$408 sps:$4 sm:$0xff]  }
 0x336   :  { %v8921_v15 = vpop.f32.mrb[40].mxu1  ;;  %13103 = vmatprep.mubr.msk.bf16.mxu1 %vm8022_vm0, %v15276_v50  ;;  %v10183_v38 = vmax.f32 %v8880_v8, 0.0  ;;  %v8882_v14 = vpop.f32.mrb[41].mxu0 }
 0x337   :  { %v10185_v13 = vmax.f32 %v8921_v15, 0.0  ;;  %v8923_v22 = vpop.f32.mrb[41].mxu1  ;;  %v10184_v36 = vmax.f32 %v8882_v14, 0.0  ;;  %v8884_v20 = vpop.f32.mrb[42].mxu0  ;;  %9259 = vmatpush1.bf16.msra.mxu0 %v14356_v16  ;;  %v14400_v16 = vld [vmem:[#allocation2 + $0x1a74] ss:$408 sps:$4 sm:$0xff]  }
 0x338   :  { %v10186_v17 = vmax.f32 %v8923_v22, 0.0  ;;  %9300 = vmatpush1.bf16.msra.mxu1 %v14359_v2  ;;  %v8925_v21 = vpop.f32.mrb[42].mxu1  ;;  %v10808_v24 = vsel %vm15831_vm2, %v10183_v38, %v8880_v8  ;;  %v8885_v40 = vpop.f32.mrb[43].mxu0  ;;  %9260 = vmatprep.subr.bf16.mxu0 %v14364_v6  ;;  %v14403_v2 = vld [vmem:[#allocation2 + $0x1a7c] ss:$408 sps:$4 sm:$0xff]  }
 0x339   :  { %v10810_v35 = vsel %vm15835_vm3, %v10185_v13, %v8921_v15  ;;  %9301 = vmatprep.subr.bf16.mxu1 %v14367_v7  ;;  %v8926_v26 = vpop.f32.mrb[43].mxu1  ;;  %v10809_v29 = vsel %vm15839_vm4, %v10184_v36, %v8882_v14  ;;  %v14398_v6 = vld [vmem:[#allocation2 + $0x1a70] ss:$408 sps:$4 sm:$0xff]   ;;  %v14406_v8 = vld [vmem:[#allocation2 + $0x1da4] ss:$408 sps:$4 sm:$0xff]  }
 0x33a   :  { %v10811_v30 = vsel %vm15843_vm5, %v10186_v17, %v8923_v22  ;;  %v13143_v37 = vpack.c.bf16 %v10809_v29, %v10808_v24  ;;  %v14401_v7 = vld [vmem:[#allocation2 + $0x1a78] ss:$408 sps:$4 sm:$0xff]   ;;  %v14418_v14 = vld [vmem:[#allocation2 + $0x2404] ss:$408 sps:$4 sm:$0xff]   ;;  %v14419_v36 = vld [vmem:[#allocation2 + $0x2408] ss:$408 sps:$4 sm:$0xff]   ;;  %v10437_v29 = vrot.slane %v15819_v56, %v15371_v0 }
 0x33b   :  { %v13144_v41 = vpack.c.bf16 %v10811_v30, %v10810_v35  ;;  %9261 = vmatpush1.bf16.msra.mxu0 %v14362_v23  ;;  %v14404_v15 = vld [vmem:[#allocation2 + $0x1da0] ss:$408 sps:$4 sm:$0xff]   ;;  %v14410_v38 = vld [vmem:[#allocation2 + $0x20d0] ss:$408 sps:$4 sm:$0xff]   ;;  %v14421_v22 = vld [vmem:[#allocation2 + $0x240c] ss:$408 sps:$4 sm:$0xff]   ;;  %v10445_v30 = vrot.slane %v15819_v56, %v15374_v1 }
 0x33c   :  { %9302 = vmatpush1.bf16.msra.mxu1 %v14365_v33  ;;  %v15860_v44 = vrot.slane %v13143_v37, %v15270_v43  ;;  %9262 = vmatprep.subr.bf16.mxu0 %v14370_v39  ;;  %v14413_v13 = vld [vmem:[#allocation2 + $0x20d8] ss:$408 sps:$4 sm:$0xff]   ;;  %v14424_v17 = vld [vmem:[#allocation2 + $0x2734] ss:$408 sps:$4 sm:$0xff]   ;;  %v14430_v24 = vld [vmem:[#allocation2 + $0x104] ss:$408 sps:$4 sm:$0xff]   ;;  %v10441_v37 = vrot.slane %v15819_v56, %v15377_v4 }
 0x33d   :  { %v15863_v45 = vrot.slane %v13144_v41, %v15270_v43  ;;  %9303 = vmatprep.subr.bf16.mxu1 %v14373_v25  ;;  %v14416_v23 = vld [vmem:[#allocation2 + $0x2400] ss:$408 sps:$4 sm:$0xff]   ;;  %v14427_v20 = vld [vmem:[#allocation2 + $0x273c] ss:$408 sps:$4 sm:$0xff]   ;;  %v14422_v33 = vld [vmem:[#allocation2 + $0x2730] ss:$408 sps:$4 sm:$0xff]   ;;  %v10449_v41 = vrot.slane %v15819_v56, %v15380_v5 }
 0x33e   :  { %v14425_v21 = vld [vmem:[#allocation2 + $0x2738] ss:$408 sps:$4 sm:$0xff]   ;;  %v14433_v35 = vld [vmem:[#allocation2 + $0x10c] ss:$408 sps:$4 sm:$0xff]   ;;  %v14431_v39 = vld [vmem:[#allocation2 + $0x108] ss:$408 sps:$4 sm:$0xff]  }
 0x33f   :  { %v11351_v54 = vcombine.low %v15860_v44, %v15863_v45  ;;  %9263 = vmatpush1.bf16.msra.mxu0 %v14368_v48  ;;  %v14428_v40 = vld [vmem:[#allocation2 + $0x100] ss:$408 sps:$4 sm:$0xff]   ;;  %v14436_v25 = vld [vmem:[#allocation2 + $0x434] ss:$408 sps:$4 sm:$0xff]   ;;  %v14434_v48 = vld [vmem:[#allocation2 + $0x430] ss:$408 sps:$4 sm:$0xff]  }
 0x340   :  { %9304 = vmatpush1.bf16.msra.mxu1 %v14371_v42  ;;  %9264 = vmatprep.subr.bf16.mxu0 %v14376_v46  ;;  %v14439_v26 = vld [vmem:[#allocation2 + $0x43c] ss:$408 sps:$4 sm:$0xff]   ;;  %v14437_v42 = vld [vmem:[#allocation2 + $0x438] ss:$408 sps:$4 sm:$0xff]   ;;  %vm15877_vm6 = vcmp.eq.s32.totalorder %v10437_v29, 1  ;;  %vm15881_vm7 = vcmp.eq.s32.totalorder %v10445_v30, 1 }
 0x341   :  { %9305 = vmatprep.subr.bf16.mxu1 %v14379_v53  ;;  %v14442_v46 = vld [vmem:[#allocation2 + $0x764] ss:$408 sps:$4 sm:$0xff]   ;;  %vm15885_vm8 = vcmp.eq.s32.totalorder %v10441_v37, 1  ;;  %vm15889_vm9 = vcmp.eq.s32.totalorder %v10449_v41, 1  ;;  %v14461_v29 = vld [vmem:[#allocation2 + $0x10f8] ss:$408 sps:$4 sm:$0xff]  }
 0x342   :  { %v14445_v53 = vld [vmem:[#allocation2 + $0x76c] ss:$408 sps:$4 sm:$0xff]   ;;  %v14464_v45 = vld [vmem:[#allocation2 + $0x1420] ss:$408 sps:$4 sm:$0xff]   ;;  %v14475_v41 = vld [vmem:[#allocation2 + $0x175c] ss:$408 sps:$4 sm:$0xff]  }
 0x343   :  { %9265 = vmatpush1.bf16.msra.mxu0 %v14374_v57  ;;  %v14466_v30 = vld [vmem:[#allocation2 + $0x1424] ss:$408 sps:$4 sm:$0xff]   ;;  %v14472_v37 = vld [vmem:[#allocation2 + $0x1754] ss:$408 sps:$4 sm:$0xff]  }
 0x344   :  { %9306 = vmatpush1.bf16.msra.mxu1 %v14377_v47  ;;  %9266 = vmatprep.subr.bf16.mxu0 %v14382_v49  ;;  %v14469_v44 = vld [vmem:[#allocation2 + $0x142c] ss:$408 sps:$4 sm:$0xff]   ;;  %v14479_v47 = vld [vmem:[#allocation2 + $0x1a88] ss:$408 sps:$4 sm:$0xff]   ;;  %v14487_v56 = vld [vmem:[#allocation2 + $0x1dbc] ss:$408 sps:$4 sm:$0xff]  }
 0x345   :  { %9307 = vmatprep.subr.bf16.mxu1 %v14385_v51  ;;  %v14482_v51 = vld [vmem:[#allocation2 + $0x1db0] ss:$408 sps:$4 sm:$0xff]  }
 0x347   :  { %9267 = vmatpush1.bf16.msra.mxu0 %v14380_v52  ;;  %v14485_v52 = vld [vmem:[#allocation2 + $0x1db8] ss:$408 sps:$4 sm:$0xff]  }
 0x348   :  { %9308 = vmatpush1.bf16.msra.mxu1 %v14383_v55  ;;  %9268 = vmatprep.subr.bf16.mxu0 %v14388_v58 }
 0x349   :  { %9309 = vmatprep.subr.bf16.mxu1 %v14391_v3 }
 0x34b   :  { %9269 = vmatpush1.bf16.msra.mxu0 %v14386_v59 }
 0x34c   :  { %9310 = vmatpush1.bf16.msra.mxu1 %v14389_v60  ;;  %9270 = vmatprep.subr.bf16.mxu0 %v14394_v61  ;;  %v14440_v60 = vld [vmem:[#allocation2 + $0x760] ss:$408 sps:$4 sm:$0xff]  }
 0x34d   :  { %9311 = vmatprep.subr.bf16.mxu1 %v14397_v62 }
 0x34f   :  { %9271 = vmatpush1.bf16.msra.mxu0 %v14392_v9 }
 0x350   :  { %9312 = vmatpush1.bf16.msra.mxu1 %v14395_v10  ;;  %9272 = vmatprep.subr.bf16.mxu0 %v14400_v16  ;;  %v14443_v10 = vld [vmem:[#allocation2 + $0x768] ss:$408 sps:$4 sm:$0xff]  }
 0x351   :  { %9313 = vmatprep.subr.bf16.mxu1 %v14403_v2 }
 0x353   :  { %9273 = vmatpush1.bf16.msra.mxu0 %v14398_v6 }
 0x354   :  { %9314 = vmatpush1.bf16.msra.mxu1 %v14401_v7  ;;  %9274 = vmatprep.subr.bf16.mxu0 %v14406_v8  ;;  %v14448_v8 = vld [vmem:[#allocation2 + $0xa94] ss:$408 sps:$4 sm:$0xff]  }
 0x355   :  { %9315 = vmatprep.subr.bf16.mxu1 %v14409_v11  ;;  %v14451_v11 = vld [vmem:[#allocation2 + $0xa9c] ss:$408 sps:$4 sm:$0xff]  }
 0x357   :  { %9275 = vmatpush1.bf16.msra.mxu0 %v14404_v15 }
 0x358   :  { %9316 = vmatpush1.bf16.msra.mxu1 %v14407_v19  ;;  %9276 = vmatprep.subr.bf16.mxu0 %v14412_v18 }
 0x359   :  { %9317 = vmatprep.subr.bf16.mxu1 %v14415_v12 }
 0x35b   :  { %9277 = vmatpush1.bf16.msra.mxu0 %v14410_v38 }
 0x35c   :  { %9318 = vmatpush1.bf16.msra.mxu1 %v14413_v13  ;;  %9278 = vmatprep.subr.bf16.mxu0 %v14418_v14  ;;  %v14446_v13 = vld [vmem:[#allocation2 + $0xa90] ss:$408 sps:$4 sm:$0xff]  }
 0x35d   :  { %9319 = vmatprep.subr.bf16.mxu1 %v14421_v22  ;;  %v14449_v14 = vld [vmem:[#allocation2 + $0xa98] ss:$408 sps:$4 sm:$0xff]  }
 0x35f   :  { %9279 = vmatpush1.bf16.msra.mxu0 %v14416_v23 }
 0x360   :  { %9320 = vmatpush1.bf16.msra.mxu1 %v14419_v36  ;;  %9280 = vmatprep.subr.bf16.mxu0 %v14424_v17  ;;  %v14454_v36 = vld [vmem:[#allocation2 + $0xdc4] ss:$408 sps:$4 sm:$0xff]  }
 0x361   :  { %9321 = vmatprep.subr.bf16.mxu1 %v14427_v20  ;;  %v14457_v17 = vld [vmem:[#allocation2 + $0xdcc] ss:$408 sps:$4 sm:$0xff]  }
 0x363   :  { %9281 = vmatpush1.bf16.msra.mxu0 %v14422_v33  ;;  %v14452_v33 = vld [vmem:[#allocation2 + $0xdc0] ss:$408 sps:$4 sm:$0xff]  }
 0x364   :  { %9322 = vmatpush1.bf16.msra.mxu1 %v14425_v21  ;;  %9338 = vmatprep.subr.bf16.mxu0 %v14430_v24  ;;  %v14455_v21 = vld [vmem:[#allocation2 + $0xdc8] ss:$408 sps:$4 sm:$0xff]   ;;  %v11359_v24 = vrot.slane %v11351_v54, %v15270_v43 }
 0x365   :  { %9379 = vmatprep.subr.bf16.mxu1 %v14433_v35  ;;  %v14467_v54 = vld [vmem:[#allocation2 + $0x1428] ss:$408 sps:$4 sm:$0xff]  }
 0x366   :  { %9289 = vmatmul.mubr.bf16.vlgmr.msra.gmra.mrb[60].mxu0 %v15283_v63 }
 0x367   :  { %9330 = vmatmul.mubr.bf16.vlgmr.msra.gmra.mrb[60].mxu1 %v15283_v63  ;;  %9339 = vmatpush1.bf16.msra.mxu0 %v14428_v40  ;;  %v14460_v40 = vld [vmem:[#allocation2 + $0x10f4] ss:$408 sps:$4 sm:$0xff]  }
 0x368   :  { %9380 = vmatpush1.bf16.msra.mxu1 %v14431_v39  ;;  %9340 = vmatprep.subr.bf16.mxu0 %v14436_v25  ;;  %v14463_v39 = vld [vmem:[#allocation2 + $0x10fc] ss:$408 sps:$4 sm:$0xff]  }
 0x369   :  { %9381 = vmatprep.subr.bf16.mxu1 %v14439_v26  ;;  %v8962_v57 = vpop.f32.mrb[44].mxu0  ;;  %13104 = vmatprep.mubr.msk.bf16.mxu0 %vm8022_vm0, %v15276_v50  ;;  %v14458_v26 = vld [vmem:[#allocation2 + $0x10f0] ss:$408 sps:$4 sm:$0xff]  }
 0x36a   :  { %v9003_v49 = vpop.f32.mrb[44].mxu1  ;;  %13105 = vmatprep.mubr.msk.bf16.mxu1 %vm8022_vm0, %v15276_v50  ;;  %v10187_v55 = vmax.f32 %v8962_v57, 0.0  ;;  %v8964_v3 = vpop.f32.mrb[45].mxu0 }
 0x36b   :  { %v10189_v58 = vmax.f32 %v9003_v49, 0.0  ;;  %v9005_v59 = vpop.f32.mrb[45].mxu1  ;;  %v10188_v61 = vmax.f32 %v8964_v3, 0.0  ;;  %v8966_v9 = vpop.f32.mrb[46].mxu0  ;;  %9341 = vmatpush1.bf16.msra.mxu0 %v14434_v48  ;;  %v14470_v48 = vld [vmem:[#allocation2 + $0x1750] ss:$408 sps:$4 sm:$0xff]  }
 0x36c   :  { %v10190_v62 = vmax.f32 %v9005_v59, 0.0  ;;  %9382 = vmatpush1.bf16.msra.mxu1 %v14437_v42  ;;  %v9007_v16 = vpop.f32.mrb[46].mxu1  ;;  %v10812_v2 = vsel %vm15877_vm6, %v10187_v55, %v8962_v57  ;;  %v8967_v7 = vpop.f32.mrb[47].mxu0  ;;  %9342 = vmatprep.subr.bf16.mxu0 %v14442_v46  ;;  %v14473_v42 = vld [vmem:[#allocation2 + $0x1758] ss:$408 sps:$4 sm:$0xff]  }
 0x36d   :  { %v10814_v6 = vsel %vm15881_vm7, %v10189_v58, %v9003_v49  ;;  %9383 = vmatprep.subr.bf16.mxu1 %v14445_v53  ;;  %v9008_v15 = vpop.f32.mrb[47].mxu1  ;;  %v10813_v19 = vsel %vm15885_vm8, %v10188_v61, %v8964_v3  ;;  %v14478_v46 = vld [vmem:[#allocation2 + $0x1a84] ss:$408 sps:$4 sm:$0xff]   ;;  %v14476_v57 = vld [vmem:[#allocation2 + $0x1a80] ss:$408 sps:$4 sm:$0xff]  }
 0x36e   :  { %v10815_v18 = vsel %vm15889_vm9, %v10190_v62, %v9005_v59  ;;  %v13145_v12 = vpack.c.bf16 %v10813_v19, %v10812_v2  ;;  %v14481_v53 = vld [vmem:[#allocation2 + $0x1a8c] ss:$408 sps:$4 sm:$0xff]   ;;  %v14488_v3 = vld [vmem:[#allocation2 + $0x20e0] ss:$408 sps:$4 sm:$0xff]   ;;  %v14499_v61 = vld [vmem:[#allocation2 + $0x241c] ss:$408 sps:$4 sm:$0xff]  }
 0x36f   :  { %v13146_v38 = vpack.c.bf16 %v10815_v18, %v10814_v6  ;;  %9343 = vmatpush1.bf16.msra.mxu0 %v14440_v60  ;;  %v14484_v49 = vld [vmem:[#allocation2 + $0x1db4] ss:$408 sps:$4 sm:$0xff]   ;;  %v14490_v55 = vld [vmem:[#allocation2 + $0x20e4] ss:$408 sps:$4 sm:$0xff]   ;;  %v14491_v59 = vld [vmem:[#allocation2 + $0x20e8] ss:$408 sps:$4 sm:$0xff]  }
 0x370   :  { %9384 = vmatpush1.bf16.msra.mxu1 %v14443_v10  ;;  %v11343_v22 = vrot.slane %v13145_v12, %v15270_v43  ;;  %9344 = vmatprep.subr.bf16.mxu0 %v14448_v8  ;;  %v14493_v58 = vld [vmem:[#allocation2 + $0x20ec] ss:$408 sps:$4 sm:$0xff]   ;;  %v14494_v62 = vld [vmem:[#allocation2 + $0x2410] ss:$408 sps:$4 sm:$0xff]   ;;  %v14500_v6 = vld [vmem:[#allocation2 + $0x2740] ss:$408 sps:$4 sm:$0xff]  }
 0x371   :  { %v11350_v23 = vrot.slane %v13146_v38, %v15270_v43  ;;  %9385 = vmatprep.subr.bf16.mxu1 %v14451_v11  ;;  %v14496_v60 = vld [vmem:[#allocation2 + $0x2414] ss:$408 sps:$4 sm:$0xff]   ;;  %v14497_v9 = vld [vmem:[#allocation2 + $0x2418] ss:$408 sps:$4 sm:$0xff]   ;;  %v14502_v10 = vld [vmem:[#allocation2 + $0x2744] ss:$408 sps:$4 sm:$0xff]  }
 0x372   :  { %v14505_v16 = vld [vmem:[#allocation2 + $0x274c] ss:$408 sps:$4 sm:$0xff]   ;;  %v14503_v7 = vld [vmem:[#allocation2 + $0x2748] ss:$408 sps:$4 sm:$0xff]   ;;  %v14511_v11 = vld [vmem:[#allocation2 + $0x11c] ss:$408 sps:$4 sm:$0xff]  }
 0x373   :  { %v11352_v20 = vcombine.low %v11343_v22, %v11350_v23  ;;  %9345 = vmatpush1.bf16.msra.mxu0 %v14446_v13  ;;  %v10123_v2 = vld [vmem:[#allocation4 + $0x30] sm:$0xff]  ;;  %v14508_v8 = vld [vmem:[#allocation2 + $0x114] ss:$408 sps:$4 sm:$0xff]   ;;  %v14506_v19 = vld [vmem:[#allocation2 + $0x110] ss:$408 sps:$4 sm:$0xff]  }
 0x374   :  { %9386 = vmatpush1.bf16.msra.mxu1 %v14449_v14  ;;  %9346 = vmatprep.subr.bf16.mxu0 %v14454_v36  ;;  %vm10136_vm10 = vcmp.ne.f32.partialorder %v10123_v2, 0.0  ;;  %v14509_v18 = vld [vmem:[#allocation2 + $0x118] ss:$408 sps:$4 sm:$0xff]   ;;  %v14514_v12 = vld [vmem:[#allocation2 + $0x444] ss:$408 sps:$4 sm:$0xff]  }
 0x375   :  { %v11366_v35 = vrot.slane %v11352_v20, %v15270_v43  ;;  %9387 = vmatprep.subr.bf16.mxu1 %v14457_v17  ;;  %v15916_v15 = vsel %vm10136_vm10, 1, %v15222_v32  ;;  %v14517_v38 = vld [vmem:[#allocation2 + $0x44c] ss:$408 sps:$4 sm:$0xff]   ;;  %v14512_v36 = vld [vmem:[#allocation2 + $0x440] ss:$408 sps:$4 sm:$0xff]  }
 0x376   :  { %v10453_v13 = vrot.slane %v15916_v15, %v15310_v27  ;;  %v10461_v14 = vrot.slane %v15916_v15, %v15313_v28  ;;  %v10457_v22 = vrot.slane %v15916_v15, %v15316_v31  ;;  %v10465_v23 = vrot.slane %v15916_v15, %v15322_v34  ;;  %v14515_v17 = vld [vmem:[#allocation2 + $0x448] ss:$408 sps:$4 sm:$0xff]   ;;  %v14520_v20 = vld [vmem:[#allocation2 + $0x774] ss:$408 sps:$4 sm:$0xff]   ;;  %v14533_v2 = vld [vmem:[#allocation2 + $0xdd8] ss:$408 sps:$4 sm:$0xff]  }
 0x377   :  { %v11367_v25 = vcombine.low %v11359_v24, %v11366_v35  ;;  %9347 = vmatpush1.bf16.msra.mxu0 %v14452_v33  ;;  %v14523_v33 = vld [vmem:[#allocation2 + $0x77c] ss:$408 sps:$4 sm:$0xff]   ;;  %v14565_v24 = vld [vmem:[#allocation2 + $0x1dcc] ss:$408 sps:$4 sm:$0xff]  }
 0x378   :  { %9388 = vmatpush1.bf16.msra.mxu1 %v14455_v21  ;;  %9348 = vmatprep.subr.bf16.mxu0 %v14460_v40  ;;  %vm15928_vm11 = vcmp.eq.s32.totalorder %v10453_v13, 1  ;;  %vm15932_vm12 = vcmp.eq.s32.totalorder %v10461_v14, 1  ;;  %vm15936_vm13 = vcmp.eq.s32.totalorder %v10457_v22, 1  ;;  %vm15940_vm14 = vcmp.eq.s32.totalorder %v10465_v23, 1  ;;  %v14550_v13 = vld [vmem:[#allocation2 + $0x1764] ss:$408 sps:$4 sm:$0xff]  }
 0x379   :  { %11720 = vst [vmem:[%s16381_s3 + $0x28] sm:$0xff] %v11367_v25  ;;  %9389 = vmatprep.subr.bf16.mxu1 %v14463_v39  ;;  %v14553_v14 = vld [vmem:[#allocation2 + $0x176c] ss:$408 sps:$4 sm:$0xff]   ;;  %v14548_v22 = vld [vmem:[#allocation2 + $0x1760] ss:$408 sps:$4 sm:$0xff]  }
 0x37a   :  { %v14551_v23 = vld [vmem:[#allocation2 + $0x1768] ss:$408 sps:$4 sm:$0xff]   ;;  %v14568_v39 = vld [vmem:[#allocation2 + $0x20f4] ss:$408 sps:$4 sm:$0xff]  }
 0x37b   :  { %9349 = vmatpush1.bf16.msra.mxu0 %v14458_v26  ;;  %v14563_v40 = vld [vmem:[#allocation2 + $0x1dc8] ss:$408 sps:$4 sm:$0xff]   ;;  %v14571_v25 = vld [vmem:[#allocation2 + $0x20fc] ss:$408 sps:$4 sm:$0xff]  }
 0x37c   :  { %9390 = vmatpush1.bf16.msra.mxu1 %v14461_v29  ;;  %9350 = vmatprep.subr.bf16.mxu0 %v14466_v30 }
 0x37d   :  { %9391 = vmatprep.subr.bf16.mxu1 %v14469_v44 }
 0x37f   :  { %9351 = vmatpush1.bf16.msra.mxu0 %v14464_v45  ;;  %v14518_v45 = vld [vmem:[#allocation2 + $0x770] ss:$408 sps:$4 sm:$0xff]  }
 0x380   :  { %9392 = vmatpush1.bf16.msra.mxu1 %v14467_v54  ;;  %9352 = vmatprep.subr.bf16.mxu0 %v14472_v37 }
 0x381   :  { %9393 = vmatprep.subr.bf16.mxu1 %v14475_v41 }
 0x383   :  { %9353 = vmatpush1.bf16.msra.mxu0 %v14470_v48  ;;  %v14521_v48 = vld [vmem:[#allocation2 + $0x778] ss:$408 sps:$4 sm:$0xff]  }
 0x384   :  { %9394 = vmatpush1.bf16.msra.mxu1 %v14473_v42  ;;  %9354 = vmatprep.subr.bf16.mxu0 %v14478_v46 }
 0x385   :  { %9395 = vmatprep.subr.bf16.mxu1 %v14481_v53 }
 0x387   :  { %9355 = vmatpush1.bf16.msra.mxu0 %v14476_v57 }
 0x388   :  { %9396 = vmatpush1.bf16.msra.mxu1 %v14479_v47  ;;  %9356 = vmatprep.subr.bf16.mxu0 %v14484_v49  ;;  %v14526_v47 = vld [vmem:[#allocation2 + $0xaa4] ss:$408 sps:$4 sm:$0xff]  }
 0x389   :  { %9397 = vmatprep.subr.bf16.mxu1 %v14487_v56  ;;  %v14529_v49 = vld [vmem:[#allocation2 + $0xaac] ss:$408 sps:$4 sm:$0xff]  }
 0x38b   :  { %9357 = vmatpush1.bf16.msra.mxu0 %v14482_v51 }
 0x38c   :  { %9398 = vmatpush1.bf16.msra.mxu1 %v14485_v52  ;;  %9358 = vmatprep.subr.bf16.mxu0 %v14490_v55 }
 0x38d   :  { %9399 = vmatprep.subr.bf16.mxu1 %v14493_v58 }
 0x38f   :  { %9359 = vmatpush1.bf16.msra.mxu0 %v14488_v3  ;;  %v14524_v3 = vld [vmem:[#allocation2 + $0xaa0] ss:$408 sps:$4 sm:$0xff]  }
 0x390   :  { %9400 = vmatpush1.bf16.msra.mxu1 %v14491_v59  ;;  %9360 = vmatprep.subr.bf16.mxu0 %v14496_v60  ;;  %v14527_v59 = vld [vmem:[#allocation2 + $0xaa8] ss:$408 sps:$4 sm:$0xff]  }
 0x391   :  { %9401 = vmatprep.subr.bf16.mxu1 %v14499_v61 }
 0x393   :  { %9361 = vmatpush1.bf16.msra.mxu0 %v14494_v62  ;;  %v14532_v62 = vld [vmem:[#allocation2 + $0xdd4] ss:$408 sps:$4 sm:$0xff]  }
 0x394   :  { %9402 = vmatpush1.bf16.msra.mxu1 %v14497_v9  ;;  %9362 = vmatprep.subr.bf16.mxu0 %v14502_v10  ;;  %v14535_v9 = vld [vmem:[#allocation2 + $0xddc] ss:$408 sps:$4 sm:$0xff]  }
 0x395   :  { %9403 = vmatprep.subr.bf16.mxu1 %v14505_v16  ;;  %v14530_v16 = vld [vmem:[#allocation2 + $0xdd0] ss:$408 sps:$4 sm:$0xff]  }
 0x397   :  { %9363 = vmatpush1.bf16.msra.mxu0 %v14500_v6  ;;  %v14538_v6 = vld [vmem:[#allocation2 + $0x1104] ss:$408 sps:$4 sm:$0xff]  }
 0x398   :  { %9404 = vmatpush1.bf16.msra.mxu1 %v14503_v7  ;;  %9420 = vmatprep.subr.bf16.mxu0 %v14508_v8  ;;  %v14541_v7 = vld [vmem:[#allocation2 + $0x110c] ss:$408 sps:$4 sm:$0xff]   ;;  %v14536_v8 = vld [vmem:[#allocation2 + $0x1100] ss:$408 sps:$4 sm:$0xff]  }
 0x399   :  { %9461 = vmatprep.subr.bf16.mxu1 %v14511_v11  ;;  %v14539_v11 = vld [vmem:[#allocation2 + $0x1108] ss:$408 sps:$4 sm:$0xff]  }
 0x39a   :  { %9371 = vmatmul.mubr.bf16.vlgmr.msra.gmra.mrb[64].mxu0 %v15283_v63 }
 0x39b   :  { %9412 = vmatmul.mubr.bf16.vlgmr.msra.gmra.mrb[64].mxu1 %v15283_v63  ;;  %9421 = vmatpush1.bf16.msra.mxu0 %v14506_v19  ;;  %v14544_v19 = vld [vmem:[#allocation2 + $0x1434] ss:$408 sps:$4 sm:$0xff]  }
 0x39c   :  { %9462 = vmatpush1.bf16.msra.mxu1 %v14509_v18  ;;  %9422 = vmatprep.subr.bf16.mxu0 %v14514_v12  ;;  %v14547_v18 = vld [vmem:[#allocation2 + $0x143c] ss:$408 sps:$4 sm:$0xff]   ;;  %v14542_v12 = vld [vmem:[#allocation2 + $0x1430] ss:$408 sps:$4 sm:$0xff]  }
 0x39d   :  { %9463 = vmatprep.subr.bf16.mxu1 %v14517_v38  ;;  %v9044_v21 = vpop.f32.mrb[48].mxu0  ;;  %13106 = vmatprep.mubr.msk.bf16.mxu0 %vm8022_vm0, %v15276_v50  ;;  %v14545_v38 = vld [vmem:[#allocation2 + $0x1438] ss:$408 sps:$4 sm:$0xff]  }
 0x39e   :  { %v9085_v35 = vpop.f32.mrb[48].mxu1  ;;  %13107 = vmatprep.mubr.msk.bf16.mxu1 %vm8022_vm0, %v15276_v50  ;;  %v10191_v26 = vmax.f32 %v9044_v21, 0.0  ;;  %v9046_v30 = vpop.f32.mrb[49].mxu0 }
 0x39f   :  { %v10193_v29 = vmax.f32 %v9085_v35, 0.0  ;;  %v9087_v44 = vpop.f32.mrb[49].mxu1  ;;  %v10192_v54 = vmax.f32 %v9046_v30, 0.0  ;;  %v9048_v41 = vpop.f32.mrb[50].mxu0  ;;  %9423 = vmatpush1.bf16.msra.mxu0 %v14512_v36  ;;  %v14556_v36 = vld [vmem:[#allocation2 + $0x1a94] ss:$408 sps:$4 sm:$0xff]  }
 0x3a0   :  { %v10194_v37 = vmax.f32 %v9087_v44, 0.0  ;;  %9464 = vmatpush1.bf16.msra.mxu1 %v14515_v17  ;;  %v9089_v42 = vpop.f32.mrb[50].mxu1  ;;  %v10816_v46 = vsel %vm15928_vm11, %v10191_v26, %v9044_v21  ;;  %v9049_v57 = vpop.f32.mrb[51].mxu0  ;;  %9424 = vmatprep.subr.bf16.mxu0 %v14520_v20  ;;  %v14559_v17 = vld [vmem:[#allocation2 + $0x1a9c] ss:$408 sps:$4 sm:$0xff]  }
 0x3a1   :  { %v10818_v53 = vsel %vm15932_vm12, %v10193_v29, %v9085_v35  ;;  %9465 = vmatprep.subr.bf16.mxu1 %v14523_v33  ;;  %v9090_v56 = vpop.f32.mrb[51].mxu1  ;;  %v10817_v51 = vsel %vm15936_vm13, %v10192_v54, %v9046_v30  ;;  %v14554_v20 = vld [vmem:[#allocation2 + $0x1a90] ss:$408 sps:$4 sm:$0xff]   ;;  %v14562_v21 = vld [vmem:[#allocation2 + $0x1dc4] ss:$408 sps:$4 sm:$0xff]  }
 0x3a2   :  { %v10819_v52 = vsel %vm15940_vm14, %v10194_v37, %v9087_v44  ;;  %v13147_v55 = vpack.c.bf16 %v10817_v51, %v10816_v46  ;;  %v14557_v33 = vld [vmem:[#allocation2 + $0x1a98] ss:$408 sps:$4 sm:$0xff]   ;;  %v14574_v30 = vld [vmem:[#allocation2 + $0x2424] ss:$408 sps:$4 sm:$0xff]   ;;  %v14575_v54 = vld [vmem:[#allocation2 + $0x2428] ss:$408 sps:$4 sm:$0xff]   ;;  %v10469_v51 = vrot.slane %v15916_v15, %v15371_v0 }
 0x3a3   :  { %v13148_v58 = vpack.c.bf16 %v10819_v52, %v10818_v53  ;;  %9425 = vmatpush1.bf16.msra.mxu0 %v14518_v45  ;;  %v14560_v35 = vld [vmem:[#allocation2 + $0x1dc0] ss:$408 sps:$4 sm:$0xff]   ;;  %v14566_v26 = vld [vmem:[#allocation2 + $0x20f0] ss:$408 sps:$4 sm:$0xff]   ;;  %v14577_v44 = vld [vmem:[#allocation2 + $0x242c] ss:$408 sps:$4 sm:$0xff]   ;;  %v10477_v52 = vrot.slane %v15916_v15, %v15374_v1 }
 0x3a4   :  { %9466 = vmatpush1.bf16.msra.mxu1 %v14521_v48  ;;  %v15957_v60 = vrot.slane %v13147_v55, %v15270_v43  ;;  %9426 = vmatprep.subr.bf16.mxu0 %v14526_v47  ;;  %v14569_v29 = vld [vmem:[#allocation2 + $0x20f8] ss:$408 sps:$4 sm:$0xff]   ;;  %v14580_v37 = vld [vmem:[#allocation2 + $0x2754] ss:$408 sps:$4 sm:$0xff]   ;;  %v14586_v46 = vld [vmem:[#allocation2 + $0x124] ss:$408 sps:$4 sm:$0xff]   ;;  %v10473_v55 = vrot.slane %v15916_v15, %v15377_v4 }
 0x3a5   :  { %v15960_v61 = vrot.slane %v13148_v58, %v15270_v43  ;;  %9467 = vmatprep.subr.bf16.mxu1 %v14529_v49  ;;  %v14572_v45 = vld [vmem:[#allocation2 + $0x2420] ss:$408 sps:$4 sm:$0xff]   ;;  %v14583_v41 = vld [vmem:[#allocation2 + $0x275c] ss:$408 sps:$4 sm:$0xff]   ;;  %v14578_v48 = vld [vmem:[#allocation2 + $0x2750] ss:$408 sps:$4 sm:$0xff]   ;;  %v10481_v58 = vrot.slane %v15916_v15, %v15380_v5 }
 0x3a6   :  { %v14581_v42 = vld [vmem:[#allocation2 + $0x2758] ss:$408 sps:$4 sm:$0xff]   ;;  %v14589_v53 = vld [vmem:[#allocation2 + $0x12c] ss:$408 sps:$4 sm:$0xff]   ;;  %v14587_v47 = vld [vmem:[#allocation2 + $0x128] ss:$408 sps:$4 sm:$0xff]  }
 0x3a7   :  { %v11400_v10 = vcombine.low %v15957_v60, %v15960_v61  ;;  %9427 = vmatpush1.bf16.msra.mxu0 %v14524_v3  ;;  %v14584_v57 = vld [vmem:[#allocation2 + $0x120] ss:$408 sps:$4 sm:$0xff]   ;;  %v14592_v49 = vld [vmem:[#allocation2 + $0x454] ss:$408 sps:$4 sm:$0xff]   ;;  %v14590_v3 = vld [vmem:[#allocation2 + $0x450] ss:$408 sps:$4 sm:$0xff]  }
 0x3a8   :  { %9468 = vmatpush1.bf16.msra.mxu1 %v14527_v59  ;;  %9428 = vmatprep.subr.bf16.mxu0 %v14532_v62  ;;  %v14595_v56 = vld [vmem:[#allocation2 + $0x45c] ss:$408 sps:$4 sm:$0xff]   ;;  %v14593_v59 = vld [vmem:[#allocation2 + $0x458] ss:$408 sps:$4 sm:$0xff]   ;;  %vm15974_vm15 = vcmp.eq.s32.totalorder %v10469_v51, 1  ;;  %vm15978_vm1 = vcmp.eq.s32.totalorder %v10477_v52, 1 }
 0x3a9   :  { %9469 = vmatprep.subr.bf16.mxu1 %v14535_v9  ;;  %v14598_v62 = vld [vmem:[#allocation2 + $0x784] ss:$408 sps:$4 sm:$0xff]   ;;  %vm15982_vm2 = vcmp.eq.s32.totalorder %v10473_v55, 1  ;;  %vm15986_vm3 = vcmp.eq.s32.totalorder %v10481_v58, 1  ;;  %v14617_v51 = vld [vmem:[#allocation2 + $0x1118] ss:$408 sps:$4 sm:$0xff]  }
 0x3aa   :  { %v14601_v9 = vld [vmem:[#allocation2 + $0x78c] ss:$408 sps:$4 sm:$0xff]   ;;  %v14620_v61 = vld [vmem:[#allocation2 + $0x1440] ss:$408 sps:$4 sm:$0xff]   ;;  %v14631_v58 = vld [vmem:[#allocation2 + $0x177c] ss:$408 sps:$4 sm:$0xff]  }
 0x3ab   :  { %9429 = vmatpush1.bf16.msra.mxu0 %v14530_v16  ;;  %v14622_v52 = vld [vmem:[#allocation2 + $0x1444] ss:$408 sps:$4 sm:$0xff]   ;;  %v14628_v55 = vld [vmem:[#allocation2 + $0x1774] ss:$408 sps:$4 sm:$0xff]  }
 0x3ac   :  { %9470 = vmatpush1.bf16.msra.mxu1 %v14533_v2  ;;  %9430 = vmatprep.subr.bf16.mxu0 %v14538_v6  ;;  %v14625_v60 = vld [vmem:[#allocation2 + $0x144c] ss:$408 sps:$4 sm:$0xff]   ;;  %v14635_v2 = vld [vmem:[#allocation2 + $0x1aa8] ss:$408 sps:$4 sm:$0xff]   ;;  %v14643_v15 = vld [vmem:[#allocation2 + $0x1ddc] ss:$408 sps:$4 sm:$0xff]  }
 0x3ad   :  { %9471 = vmatprep.subr.bf16.mxu1 %v14541_v7  ;;  %v14638_v7 = vld [vmem:[#allocation2 + $0x1dd0] ss:$408 sps:$4 sm:$0xff]  }
 0x3af   :  { %9431 = vmatpush1.bf16.msra.mxu0 %v14536_v8  ;;  %v14641_v8 = vld [vmem:[#allocation2 + $0x1dd8] ss:$408 sps:$4 sm:$0xff]  }
 0x3b0   :  { %9472 = vmatpush1.bf16.msra.mxu1 %v14539_v11  ;;  %9432 = vmatprep.subr.bf16.mxu0 %v14544_v19 }
 0x3b1   :  { %9473 = vmatprep.subr.bf16.mxu1 %v14547_v18 }
 0x3b3   :  { %9433 = vmatpush1.bf16.msra.mxu0 %v14542_v12 }
 0x3b4   :  { %9474 = vmatpush1.bf16.msra.mxu1 %v14545_v38  ;;  %9434 = vmatprep.subr.bf16.mxu0 %v14550_v13  ;;  %v14596_v38 = vld [vmem:[#allocation2 + $0x780] ss:$408 sps:$4 sm:$0xff]  }
 0x3b5   :  { %9475 = vmatprep.subr.bf16.mxu1 %v14553_v14 }
 0x3b7   :  { %9435 = vmatpush1.bf16.msra.mxu0 %v14548_v22 }
 0x3b8   :  { %9476 = vmatpush1.bf16.msra.mxu1 %v14551_v23  ;;  %9436 = vmatprep.subr.bf16.mxu0 %v14556_v36  ;;  %v14599_v23 = vld [vmem:[#allocation2 + $0x788] ss:$408 sps:$4 sm:$0xff]  }
 0x3b9   :  { %9477 = vmatprep.subr.bf16.mxu1 %v14559_v17 }
 0x3bb   :  { %9437 = vmatpush1.bf16.msra.mxu0 %v14554_v20 }
 0x3bc   :  { %9478 = vmatpush1.bf16.msra.mxu1 %v14557_v33  ;;  %9438 = vmatprep.subr.bf16.mxu0 %v14562_v21  ;;  %v14604_v21 = vld [vmem:[#allocation2 + $0xab4] ss:$408 sps:$4 sm:$0xff]  }
 0x3bd   :  { %9479 = vmatprep.subr.bf16.mxu1 %v14565_v24  ;;  %v14607_v24 = vld [vmem:[#allocation2 + $0xabc] ss:$408 sps:$4 sm:$0xff]  }
 0x3bf   :  { %9439 = vmatpush1.bf16.msra.mxu0 %v14560_v35 }
 0x3c0   :  { %9480 = vmatpush1.bf16.msra.mxu1 %v14563_v40  ;;  %9440 = vmatprep.subr.bf16.mxu0 %v14568_v39 }
 0x3c1   :  { %9481 = vmatprep.subr.bf16.mxu1 %v14571_v25 }
 0x3c3   :  { %9441 = vmatpush1.bf16.msra.mxu0 %v14566_v26 }
 0x3c4   :  { %9482 = vmatpush1.bf16.msra.mxu1 %v14569_v29  ;;  %9442 = vmatprep.subr.bf16.mxu0 %v14574_v30  ;;  %v14602_v29 = vld [vmem:[#allocation2 + $0xab0] ss:$408 sps:$4 sm:$0xff]  }
 0x3c5   :  { %9483 = vmatprep.subr.bf16.mxu1 %v14577_v44  ;;  %v14605_v30 = vld [vmem:[#allocation2 + $0xab8] ss:$408 sps:$4 sm:$0xff]  }
 0x3c7   :  { %9443 = vmatpush1.bf16.msra.mxu0 %v14572_v45 }
 0x3c8   :  { %9484 = vmatpush1.bf16.msra.mxu1 %v14575_v54  ;;  %9444 = vmatprep.subr.bf16.mxu0 %v14580_v37  ;;  %v14610_v54 = vld [vmem:[#allocation2 + $0xde4] ss:$408 sps:$4 sm:$0xff]  }
 0x3c9   :  { %9485 = vmatprep.subr.bf16.mxu1 %v14583_v41  ;;  %v14613_v37 = vld [vmem:[#allocation2 + $0xdec] ss:$408 sps:$4 sm:$0xff]  }
 0x3cb   :  { %9445 = vmatpush1.bf16.msra.mxu0 %v14578_v48  ;;  %v14608_v48 = vld [vmem:[#allocation2 + $0xde0] ss:$408 sps:$4 sm:$0xff]  }
 0x3cc   :  { %9486 = vmatpush1.bf16.msra.mxu1 %v14581_v42  ;;  %9502 = vmatprep.subr.bf16.mxu0 %v14586_v46  ;;  %v14611_v42 = vld [vmem:[#allocation2 + $0xde8] ss:$408 sps:$4 sm:$0xff]   ;;  %v11408_v46 = vrot.slane %v11400_v10, %v15270_v43 }
 0x3cd   :  { %9543 = vmatprep.subr.bf16.mxu1 %v14589_v53  ;;  %v14623_v10 = vld [vmem:[#allocation2 + $0x1448] ss:$408 sps:$4 sm:$0xff]  }
 0x3ce   :  { %9453 = vmatmul.mubr.bf16.vlgmr.msra.gmra.mrb[68].mxu0 %v15283_v63 }
 0x3cf   :  { %9494 = vmatmul.mubr.bf16.vlgmr.msra.gmra.mrb[68].mxu1 %v15283_v63  ;;  %9503 = vmatpush1.bf16.msra.mxu0 %v14584_v57  ;;  %v14616_v57 = vld [vmem:[#allocation2 + $0x1114] ss:$408 sps:$4 sm:$0xff]  }
 0x3d0   :  { %9544 = vmatpush1.bf16.msra.mxu1 %v14587_v47  ;;  %9504 = vmatprep.subr.bf16.mxu0 %v14592_v49  ;;  %v14619_v47 = vld [vmem:[#allocation2 + $0x111c] ss:$408 sps:$4 sm:$0xff]  }
 0x3d1   :  { %9545 = vmatprep.subr.bf16.mxu1 %v14595_v56  ;;  %v9126_v16 = vpop.f32.mrb[52].mxu0  ;;  %13108 = vmatprep.mubr.msk.bf16.mxu0 %vm8022_vm0, %v15276_v50  ;;  %v14614_v56 = vld [vmem:[#allocation2 + $0x1110] ss:$408 sps:$4 sm:$0xff]  }
 0x3d2   :  { %v9167_v6 = vpop.f32.mrb[52].mxu1  ;;  %13109 = vmatprep.mubr.msk.bf16.mxu1 %vm8022_vm0, %v15276_v50  ;;  %v10195_v11 = vmax.f32 %v9126_v16, 0.0  ;;  %v9128_v18 = vpop.f32.mrb[53].mxu0 }
 0x3d3   :  { %v10197_v19 = vmax.f32 %v9167_v6, 0.0  ;;  %v9169_v12 = vpop.f32.mrb[53].mxu1  ;;  %v10196_v13 = vmax.f32 %v9128_v18, 0.0  ;;  %v9130_v22 = vpop.f32.mrb[54].mxu0  ;;  %9505 = vmatpush1.bf16.msra.mxu0 %v14590_v3  ;;  %v14626_v3 = vld [vmem:[#allocation2 + $0x1770] ss:$408 sps:$4 sm:$0xff]  }
 0x3d4   :  { %v10198_v14 = vmax.f32 %v9169_v12, 0.0  ;;  %9546 = vmatpush1.bf16.msra.mxu1 %v14593_v59  ;;  %v9171_v36 = vpop.f32.mrb[54].mxu1  ;;  %v10820_v17 = vsel %vm15974_vm15, %v10195_v11, %v9126_v16  ;;  %v9131_v33 = vpop.f32.mrb[55].mxu0  ;;  %9506 = vmatprep.subr.bf16.mxu0 %v14598_v62  ;;  %v14629_v59 = vld [vmem:[#allocation2 + $0x1778] ss:$408 sps:$4 sm:$0xff]  }
 0x3d5   :  { %v10822_v20 = vsel %vm15978_vm1, %v10197_v19, %v9167_v6  ;;  %9547 = vmatprep.subr.bf16.mxu1 %v14601_v9  ;;  %v9172_v35 = vpop.f32.mrb[55].mxu1  ;;  %v10821_v40 = vsel %vm15982_vm2, %v10196_v13, %v9128_v18  ;;  %v14634_v62 = vld [vmem:[#allocation2 + $0x1aa4] ss:$408 sps:$4 sm:$0xff]   ;;  %v14632_v16 = vld [vmem:[#allocation2 + $0x1aa0] ss:$408 sps:$4 sm:$0xff]  }
 0x3d6   :  { %v10823_v39 = vsel %vm15986_vm3, %v10198_v14, %v9169_v12  ;;  %v13149_v25 = vpack.c.bf16 %v10821_v40, %v10820_v17  ;;  %v14637_v9 = vld [vmem:[#allocation2 + $0x1aac] ss:$408 sps:$4 sm:$0xff]   ;;  %v14644_v18 = vld [vmem:[#allocation2 + $0x2100] ss:$408 sps:$4 sm:$0xff]   ;;  %v14655_v13 = vld [vmem:[#allocation2 + $0x243c] ss:$408 sps:$4 sm:$0xff]  }
 0x3d7   :  { %v13150_v26 = vpack.c.bf16 %v10823_v39, %v10822_v20  ;;  %9507 = vmatpush1.bf16.msra.mxu0 %v14596_v38  ;;  %v14640_v6 = vld [vmem:[#allocation2 + $0x1dd4] ss:$408 sps:$4 sm:$0xff]   ;;  %v14646_v11 = vld [vmem:[#allocation2 + $0x2104] ss:$408 sps:$4 sm:$0xff]   ;;  %v14647_v12 = vld [vmem:[#allocation2 + $0x2108] ss:$408 sps:$4 sm:$0xff]  }
 0x3d8   :  { %9548 = vmatpush1.bf16.msra.mxu1 %v14599_v23  ;;  %v11392_v44 = vrot.slane %v13149_v25, %v15270_v43  ;;  %9508 = vmatprep.subr.bf16.mxu0 %v14604_v21  ;;  %v14649_v19 = vld [vmem:[#allocation2 + $0x210c] ss:$408 sps:$4 sm:$0xff]   ;;  %v14650_v14 = vld [vmem:[#allocation2 + $0x2430] ss:$408 sps:$4 sm:$0xff]   ;;  %v14656_v20 = vld [vmem:[#allocation2 + $0x2760] ss:$408 sps:$4 sm:$0xff]  }
 0x3d9   :  { %v11399_v45 = vrot.slane %v13150_v26, %v15270_v43  ;;  %9549 = vmatprep.subr.bf16.mxu1 %v14607_v24  ;;  %v14652_v38 = vld [vmem:[#allocation2 + $0x2434] ss:$408 sps:$4 sm:$0xff]   ;;  %v14653_v22 = vld [vmem:[#allocation2 + $0x2438] ss:$408 sps:$4 sm:$0xff]   ;;  %v14658_v23 = vld [vmem:[#allocation2 + $0x2764] ss:$408 sps:$4 sm:$0xff]  }
 0x3da   :  { %v14661_v36 = vld [vmem:[#allocation2 + $0x276c] ss:$408 sps:$4 sm:$0xff]   ;;  %v14659_v33 = vld [vmem:[#allocation2 + $0x2768] ss:$408 sps:$4 sm:$0xff]   ;;  %v14667_v24 = vld [vmem:[#allocation2 + $0x13c] ss:$408 sps:$4 sm:$0xff]  }
 0x3db   :  { %v11401_v41 = vcombine.low %v11392_v44, %v11399_v45  ;;  %9509 = vmatpush1.bf16.msra.mxu0 %v14602_v29  ;;  %v10124_v17 = vld [vmem:[#allocation4 + $0x38] sm:$0xff]  ;;  %v14665_v39 = vld [vmem:[#allocation2 + $0x138] ss:$408 sps:$4 sm:$0xff]   ;;  %v14670_v25 = vld [vmem:[#allocation2 + $0x464] ss:$408 sps:$4 sm:$0xff]  }
 0x3dc   :  { %9550 = vmatpush1.bf16.msra.mxu1 %v14605_v30  ;;  %9510 = vmatprep.subr.bf16.mxu0 %v14610_v54  ;;  %vm10137_vm4 = vcmp.ne.f32.partialorder %v10124_v17, 0.0  ;;  %v14664_v21 = vld [vmem:[#allocation2 + $0x134] ss:$408 sps:$4 sm:$0xff]   ;;  %v14662_v40 = vld [vmem:[#allocation2 + $0x130] ss:$408 sps:$4 sm:$0xff]  }
 0x3dd   :  { %v11415_v53 = vrot.slane %v11401_v41, %v15270_v43  ;;  %9551 = vmatprep.subr.bf16.mxu1 %v14613_v37  ;;  %v16013_v35 = vsel %vm10137_vm4, 1, %v15222_v32  ;;  %v14673_v26 = vld [vmem:[#allocation2 + $0x46c] ss:$408 sps:$4 sm:$0xff]   ;;  %v14668_v54 = vld [vmem:[#allocation2 + $0x460] ss:$408 sps:$4 sm:$0xff]  }
 0x3de   :  { %v10485_v29 = vrot.slane %v16013_v35, %v15310_v27  ;;  %v10493_v30 = vrot.slane %v16013_v35, %v15313_v28  ;;  %v10489_v44 = vrot.slane %v16013_v35, %v15316_v31  ;;  %v10497_v45 = vrot.slane %v16013_v35, %v15322_v34  ;;  %v14671_v37 = vld [vmem:[#allocation2 + $0x468] ss:$408 sps:$4 sm:$0xff]   ;;  %v14676_v41 = vld [vmem:[#allocation2 + $0x794] ss:$408 sps:$4 sm:$0xff]   ;;  %v14689_v17 = vld [vmem:[#allocation2 + $0xdf8] ss:$408 sps:$4 sm:$0xff]  }
 0x3df   :  { %v11416_v49 = vcombine.low %v11408_v46, %v11415_v53  ;;  %9511 = vmatpush1.bf16.msra.mxu0 %v14608_v48  ;;  %v14679_v48 = vld [vmem:[#allocation2 + $0x79c] ss:$408 sps:$4 sm:$0xff]   ;;  %v14721_v46 = vld [vmem:[#allocation2 + $0x1dec] ss:$408 sps:$4 sm:$0xff]  }
 0x3e0   :  { %9552 = vmatpush1.bf16.msra.mxu1 %v14611_v42  ;;  %9512 = vmatprep.subr.bf16.mxu0 %v14616_v57  ;;  %vm16025_vm5 = vcmp.eq.s32.totalorder %v10485_v29, 1  ;;  %vm16029_vm6 = vcmp.eq.s32.totalorder %v10493_v30, 1  ;;  %vm16033_vm7 = vcmp.eq.s32.totalorder %v10489_v44, 1  ;;  %vm16037_vm8 = vcmp.eq.s32.totalorder %v10497_v45, 1  ;;  %v14706_v29 = vld [vmem:[#allocation2 + $0x1784] ss:$408 sps:$4 sm:$0xff]  }
 0x3e1   :  { %11721 = vst [vmem:[%s16381_s3 + $0x30] sm:$0xff] %v11416_v49  ;;  %9553 = vmatprep.subr.bf16.mxu1 %v14619_v47  ;;  %v14709_v30 = vld [vmem:[#allocation2 + $0x178c] ss:$408 sps:$4 sm:$0xff]   ;;  %v14704_v44 = vld [vmem:[#allocation2 + $0x1780] ss:$408 sps:$4 sm:$0xff]  }
 0x3e2   :  { %v14707_v45 = vld [vmem:[#allocation2 + $0x1788] ss:$408 sps:$4 sm:$0xff]   ;;  %v14724_v47 = vld [vmem:[#allocation2 + $0x2114] ss:$408 sps:$4 sm:$0xff]  }
 0x3e3   :  { %9513 = vmatpush1.bf16.msra.mxu0 %v14614_v56  ;;  %v14719_v57 = vld [vmem:[#allocation2 + $0x1de8] ss:$408 sps:$4 sm:$0xff]   ;;  %v14727_v49 = vld [vmem:[#allocation2 + $0x211c] ss:$408 sps:$4 sm:$0xff]  }
 0x3e4   :  { %9554 = vmatpush1.bf16.msra.mxu1 %v14617_v51  ;;  %9514 = vmatprep.subr.bf16.mxu0 %v14622_v52 }
 0x3e5   :  { %9555 = vmatprep.subr.bf16.mxu1 %v14625_v60 }
 0x3e7   :  { %9515 = vmatpush1.bf16.msra.mxu0 %v14620_v61  ;;  %v14674_v61 = vld [vmem:[#allocation2 + $0x790] ss:$408 sps:$4 sm:$0xff]  }
 0x3e8   :  { %9556 = vmatpush1.bf16.msra.mxu1 %v14623_v10  ;;  %9516 = vmatprep.subr.bf16.mxu0 %v14628_v55 }
 0x3e9   :  { %9557 = vmatprep.subr.bf16.mxu1 %v14631_v58 }
 0x3eb   :  { %9517 = vmatpush1.bf16.msra.mxu0 %v14626_v3  ;;  %v14677_v3 = vld [vmem:[#allocation2 + $0x798] ss:$408 sps:$4 sm:$0xff]  }
 0x3ec   :  { %9558 = vmatpush1.bf16.msra.mxu1 %v14629_v59  ;;  %9518 = vmatprep.subr.bf16.mxu0 %v14634_v62 }
 0x3ed   :  { %9559 = vmatprep.subr.bf16.mxu1 %v14637_v9 }
 0x3ef   :  { %9519 = vmatpush1.bf16.msra.mxu0 %v14632_v16 }
 0x3f0   :  { %9560 = vmatpush1.bf16.msra.mxu1 %v14635_v2  ;;  %9520 = vmatprep.subr.bf16.mxu0 %v14640_v6  ;;  %v14682_v2 = vld [vmem:[#allocation2 + $0xac4] ss:$408 sps:$4 sm:$0xff]  }
 0x3f1   :  { %9561 = vmatprep.subr.bf16.mxu1 %v14643_v15  ;;  %v14685_v6 = vld [vmem:[#allocation2 + $0xacc] ss:$408 sps:$4 sm:$0xff]  }
 0x3f3   :  { %9521 = vmatpush1.bf16.msra.mxu0 %v14638_v7 }
 0x3f4   :  { %9562 = vmatpush1.bf16.msra.mxu1 %v14641_v8  ;;  %9522 = vmatprep.subr.bf16.mxu0 %v14646_v11 }
 0x3f5   :  { %9563 = vmatprep.subr.bf16.mxu1 %v14649_v19 }
 0x3f7   :  { %9523 = vmatpush1.bf16.msra.mxu0 %v14644_v18  ;;  %v14680_v18 = vld [vmem:[#allocation2 + $0xac0] ss:$408 sps:$4 sm:$0xff]  }
 0x3f8   :  { %9564 = vmatpush1.bf16.msra.mxu1 %v14647_v12  ;;  %9524 = vmatprep.subr.bf16.mxu0 %v14652_v38  ;;  %v14683_v12 = vld [vmem:[#allocation2 + $0xac8] ss:$408 sps:$4 sm:$0xff]  }
 0x3f9   :  { %9565 = vmatprep.subr.bf16.mxu1 %v14655_v13 }
 0x3fb   :  { %9525 = vmatpush1.bf16.msra.mxu0 %v14650_v14  ;;  %v14688_v14 = vld [vmem:[#allocation2 + $0xdf4] ss:$408 sps:$4 sm:$0xff]  }
 0x3fc   :  { %9566 = vmatpush1.bf16.msra.mxu1 %v14653_v22  ;;  %9526 = vmatprep.subr.bf16.mxu0 %v14658_v23  ;;  %v14691_v22 = vld [vmem:[#allocation2 + $0xdfc] ss:$408 sps:$4 sm:$0xff]  }
 0x3fd   :  { %9567 = vmatprep.subr.bf16.mxu1 %v14661_v36  ;;  %v14686_v36 = vld [vmem:[#allocation2 + $0xdf0] ss:$408 sps:$4 sm:$0xff]  }
 0x3ff   :  { %9527 = vmatpush1.bf16.msra.mxu0 %v14656_v20  ;;  %v14694_v20 = vld [vmem:[#allocation2 + $0x1124] ss:$408 sps:$4 sm:$0xff]  }
 0x400   :  { %9568 = vmatpush1.bf16.msra.mxu1 %v14659_v33  ;;  %9584 = vmatprep.subr.bf16.mxu0 %v14664_v21  ;;  %v14697_v33 = vld [vmem:[#allocation2 + $0x112c] ss:$408 sps:$4 sm:$0xff]   ;;  %v14692_v21 = vld [vmem:[#allocation2 + $0x1120] ss:$408 sps:$4 sm:$0xff]  }
 0x401   :  { %9625 = vmatprep.subr.bf16.mxu1 %v14667_v24  ;;  %v14695_v24 = vld [vmem:[#allocation2 + $0x1128] ss:$408 sps:$4 sm:$0xff]  }
 0x402   :  { %9535 = vmatmul.mubr.bf16.vlgmr.msra.gmra.mrb[72].mxu0 %v15283_v63 }
 0x403   :  { %9576 = vmatmul.mubr.bf16.vlgmr.msra.gmra.mrb[72].mxu1 %v15283_v63  ;;  %9585 = vmatpush1.bf16.msra.mxu0 %v14662_v40  ;;  %v14700_v40 = vld [vmem:[#allocation2 + $0x1454] ss:$408 sps:$4 sm:$0xff]  }
 0x404   :  { %9626 = vmatpush1.bf16.msra.mxu1 %v14665_v39  ;;  %9586 = vmatprep.subr.bf16.mxu0 %v14670_v25  ;;  %v14703_v39 = vld [vmem:[#allocation2 + $0x145c] ss:$408 sps:$4 sm:$0xff]   ;;  %v14698_v25 = vld [vmem:[#allocation2 + $0x1450] ss:$408 sps:$4 sm:$0xff]  }
 0x405   :  { %9627 = vmatprep.subr.bf16.mxu1 %v14673_v26  ;;  %v9208_v42 = vpop.f32.mrb[56].mxu0  ;;  %13110 = vmatprep.mubr.msk.bf16.mxu0 %vm8022_vm0, %v15276_v50  ;;  %v14701_v26 = vld [vmem:[#allocation2 + $0x1458] ss:$408 sps:$4 sm:$0xff]  }
 0x406   :  { %v9249_v53 = vpop.f32.mrb[56].mxu1  ;;  %13111 = vmatprep.mubr.msk.bf16.mxu1 %vm8022_vm0, %v15276_v50  ;;  %v10199_v56 = vmax.f32 %v9208_v42, 0.0  ;;  %v9210_v52 = vpop.f32.mrb[57].mxu0 }
 0x407   :  { %v10201_v51 = vmax.f32 %v9249_v53, 0.0  ;;  %v9251_v60 = vpop.f32.mrb[57].mxu1  ;;  %v10200_v10 = vmax.f32 %v9210_v52, 0.0  ;;  %v9212_v58 = vpop.f32.mrb[58].mxu0  ;;  %9587 = vmatpush1.bf16.msra.mxu0 %v14668_v54  ;;  %v14712_v54 = vld [vmem:[#allocation2 + $0x1ab4] ss:$408 sps:$4 sm:$0xff]  }
 0x408   :  { %v10202_v55 = vmax.f32 %v9251_v60, 0.0  ;;  %9628 = vmatpush1.bf16.msra.mxu1 %v14671_v37  ;;  %v9253_v59 = vpop.f32.mrb[58].mxu1  ;;  %v10824_v62 = vsel %vm16025_vm5, %v10199_v56, %v9208_v42  ;;  %v9213_v16 = vpop.f32.mrb[59].mxu0  ;;  %9588 = vmatprep.subr.bf16.mxu0 %v14676_v41  ;;  %v14715_v37 = vld [vmem:[#allocation2 + $0x1abc] ss:$408 sps:$4 sm:$0xff]  }
 0x409   :  { %v10826_v9 = vsel %vm16029_vm6, %v10201_v51, %v9249_v53  ;;  %9629 = vmatprep.subr.bf16.mxu1 %v14679_v48  ;;  %v9254_v15 = vpop.f32.mrb[59].mxu1  ;;  %v10825_v7 = vsel %vm16033_vm7, %v10200_v10, %v9210_v52  ;;  %v14710_v41 = vld [vmem:[#allocation2 + $0x1ab0] ss:$408 sps:$4 sm:$0xff]   ;;  %v14718_v42 = vld [vmem:[#allocation2 + $0x1de4] ss:$408 sps:$4 sm:$0xff]  }
 0x40a   :  { %v10827_v8 = vsel %vm16037_vm8, %v10202_v55, %v9251_v60  ;;  %v13151_v11 = vpack.c.bf16 %v10825_v7, %v10824_v62  ;;  %v14713_v48 = vld [vmem:[#allocation2 + $0x1ab8] ss:$408 sps:$4 sm:$0xff]   ;;  %v14730_v52 = vld [vmem:[#allocation2 + $0x2444] ss:$408 sps:$4 sm:$0xff]   ;;  %v14731_v10 = vld [vmem:[#allocation2 + $0x2448] ss:$408 sps:$4 sm:$0xff]   ;;  %v10501_v7 = vrot.slane %v16013_v35, %v15371_v0 }
 0x40b   :  { %v13152_v19 = vpack.c.bf16 %v10827_v8, %v10826_v9  ;;  %9589 = vmatpush1.bf16.msra.mxu0 %v14674_v61  ;;  %v14716_v53 = vld [vmem:[#allocation2 + $0x1de0] ss:$408 sps:$4 sm:$0xff]   ;;  %v14722_v56 = vld [vmem:[#allocation2 + $0x2110] ss:$408 sps:$4 sm:$0xff]   ;;  %v14733_v60 = vld [vmem:[#allocation2 + $0x244c] ss:$408 sps:$4 sm:$0xff]   ;;  %v10509_v8 = vrot.slane %v16013_v35, %v15374_v1 }
 0x40c   :  { %9630 = vmatpush1.bf16.msra.mxu1 %v14677_v3  ;;  %v16054_v38 = vrot.slane %v13151_v11, %v15270_v43  ;;  %9590 = vmatprep.subr.bf16.mxu0 %v14682_v2  ;;  %v14725_v51 = vld [vmem:[#allocation2 + $0x2118] ss:$408 sps:$4 sm:$0xff]   ;;  %v14736_v55 = vld [vmem:[#allocation2 + $0x2774] ss:$408 sps:$4 sm:$0xff]   ;;  %v14742_v62 = vld [vmem:[#allocation2 + $0x144] ss:$408 sps:$4 sm:$0xff]   ;;  %v10505_v11 = vrot.slane %v16013_v35, %v15377_v4 }
 0x40d   :  { %v16057_v13 = vrot.slane %v13152_v19, %v15270_v43  ;;  %9631 = vmatprep.subr.bf16.mxu1 %v14685_v6  ;;  %v14728_v61 = vld [vmem:[#allocation2 + $0x2440] ss:$408 sps:$4 sm:$0xff]   ;;  %v14739_v58 = vld [vmem:[#allocation2 + $0x277c] ss:$408 sps:$4 sm:$0xff]   ;;  %v14734_v3 = vld [vmem:[#allocation2 + $0x2770] ss:$408 sps:$4 sm:$0xff]   ;;  %v10513_v19 = vrot.slane %v16013_v35, %v15380_v5 }
 0x40e   :  { %v14737_v59 = vld [vmem:[#allocation2 + $0x2778] ss:$408 sps:$4 sm:$0xff]   ;;  %v14745_v9 = vld [vmem:[#allocation2 + $0x14c] ss:$408 sps:$4 sm:$0xff]   ;;  %v14743_v2 = vld [vmem:[#allocation2 + $0x148] ss:$408 sps:$4 sm:$0xff]  }
 0x40f   :  { %v11449_v23 = vcombine.low %v16054_v38, %v16057_v13  ;;  %9591 = vmatpush1.bf16.msra.mxu0 %v14680_v18  ;;  %v14740_v16 = vld [vmem:[#allocation2 + $0x140] ss:$408 sps:$4 sm:$0xff]   ;;  %v14748_v6 = vld [vmem:[#allocation2 + $0x474] ss:$408 sps:$4 sm:$0xff]   ;;  %v14746_v18 = vld [vmem:[#allocation2 + $0x470] ss:$408 sps:$4 sm:$0xff]  }
 0x410   :  { %9632 = vmatpush1.bf16.msra.mxu1 %v14683_v12  ;;  %9592 = vmatprep.subr.bf16.mxu0 %v14688_v14  ;;  %v14751_v15 = vld [vmem:[#allocation2 + $0x47c] ss:$408 sps:$4 sm:$0xff]   ;;  %v14749_v12 = vld [vmem:[#allocation2 + $0x478] ss:$408 sps:$4 sm:$0xff]   ;;  %vm16071_vm9 = vcmp.eq.s32.totalorder %v10501_v7, 1  ;;  %vm16075_vm10 = vcmp.eq.s32.totalorder %v10509_v8, 1 }
 0x411   :  { %9633 = vmatprep.subr.bf16.mxu1 %v14691_v22  ;;  %v14754_v14 = vld [vmem:[#allocation2 + $0x7a4] ss:$408 sps:$4 sm:$0xff]   ;;  %vm16079_vm11 = vcmp.eq.s32.totalorder %v10505_v11, 1  ;;  %vm16083_vm12 = vcmp.eq.s32.totalorder %v10513_v19, 1  ;;  %v14773_v7 = vld [vmem:[#allocation2 + $0x1138] ss:$408 sps:$4 sm:$0xff]  }
 0x412   :  { %v14757_v22 = vld [vmem:[#allocation2 + $0x7ac] ss:$408 sps:$4 sm:$0xff]   ;;  %v14776_v13 = vld [vmem:[#allocation2 + $0x1460] ss:$408 sps:$4 sm:$0xff]   ;;  %v14787_v19 = vld [vmem:[#allocation2 + $0x179c] ss:$408 sps:$4 sm:$0xff]  }
 0x413   :  { %9593 = vmatpush1.bf16.msra.mxu0 %v14686_v36  ;;  %v14778_v8 = vld [vmem:[#allocation2 + $0x1464] ss:$408 sps:$4 sm:$0xff]   ;;  %v14784_v11 = vld [vmem:[#allocation2 + $0x1794] ss:$408 sps:$4 sm:$0xff]  }
 0x414   :  { %9634 = vmatpush1.bf16.msra.mxu1 %v14689_v17  ;;  %9594 = vmatprep.subr.bf16.mxu0 %v14694_v20  ;;  %v14781_v38 = vld [vmem:[#allocation2 + $0x146c] ss:$408 sps:$4 sm:$0xff]   ;;  %v14791_v17 = vld [vmem:[#allocation2 + $0x1ac8] ss:$408 sps:$4 sm:$0xff]   ;;  %v14799_v35 = vld [vmem:[#allocation2 + $0x1dfc] ss:$408 sps:$4 sm:$0xff]  }
 0x415   :  { %9635 = vmatprep.subr.bf16.mxu1 %v14697_v33  ;;  %v14794_v33 = vld [vmem:[#allocation2 + $0x1df0] ss:$408 sps:$4 sm:$0xff]  }
 0x417   :  { %9595 = vmatpush1.bf16.msra.mxu0 %v14692_v21  ;;  %v14797_v21 = vld [vmem:[#allocation2 + $0x1df8] ss:$408 sps:$4 sm:$0xff]  }
 0x418   :  { %9636 = vmatpush1.bf16.msra.mxu1 %v14695_v24  ;;  %9596 = vmatprep.subr.bf16.mxu0 %v14700_v40 }
 0x419   :  { %9637 = vmatprep.subr.bf16.mxu1 %v14703_v39 }
 0x41b   :  { %9597 = vmatpush1.bf16.msra.mxu0 %v14698_v25 }
 0x41c   :  { %9638 = vmatpush1.bf16.msra.mxu1 %v14701_v26  ;;  %9598 = vmatprep.subr.bf16.mxu0 %v14706_v29  ;;  %v14752_v26 = vld [vmem:[#allocation2 + $0x7a0] ss:$408 sps:$4 sm:$0xff]  }
 0x41d   :  { %9639 = vmatprep.subr.bf16.mxu1 %v14709_v30 }
 0x41f   :  { %9599 = vmatpush1.bf16.msra.mxu0 %v14704_v44 }
 0x420   :  { %9640 = vmatpush1.bf16.msra.mxu1 %v14707_v45  ;;  %9600 = vmatprep.subr.bf16.mxu0 %v14712_v54  ;;  %v14755_v45 = vld [vmem:[#allocation2 + $0x7a8] ss:$408 sps:$4 sm:$0xff]  }
 0x421   :  { %9641 = vmatprep.subr.bf16.mxu1 %v14715_v37 }
 0x423   :  { %9601 = vmatpush1.bf16.msra.mxu0 %v14710_v41 }
 0x424   :  { %9642 = vmatpush1.bf16.msra.mxu1 %v14713_v48  ;;  %9602 = vmatprep.subr.bf16.mxu0 %v14718_v42  ;;  %v14760_v42 = vld [vmem:[#allocation2 + $0xad4] ss:$408 sps:$4 sm:$0xff]  }
 0x425   :  { %9643 = vmatprep.subr.bf16.mxu1 %v14721_v46  ;;  %v14763_v46 = vld [vmem:[#allocation2 + $0xadc] ss:$408 sps:$4 sm:$0xff]  }
 0x427   :  { %9603 = vmatpush1.bf16.msra.mxu0 %v14716_v53 }
 0x428   :  { %9644 = vmatpush1.bf16.msra.mxu1 %v14719_v57  ;;  %9604 = vmatprep.subr.bf16.mxu0 %v14724_v47 }
 0x429   :  { %9645 = vmatprep.subr.bf16.mxu1 %v14727_v49 }
 0x42b   :  { %9605 = vmatpush1.bf16.msra.mxu0 %v14722_v56 }
 0x42c   :  { %9646 = vmatpush1.bf16.msra.mxu1 %v14725_v51  ;;  %9606 = vmatprep.subr.bf16.mxu0 %v14730_v52  ;;  %v14758_v51 = vld [vmem:[#allocation2 + $0xad0] ss:$408 sps:$4 sm:$0xff]  }
 0x42d   :  { %9647 = vmatprep.subr.bf16.mxu1 %v14733_v60  ;;  %v14761_v52 = vld [vmem:[#allocation2 + $0xad8] ss:$408 sps:$4 sm:$0xff]  }
 0x42f   :  { %9607 = vmatpush1.bf16.msra.mxu0 %v14728_v61 }
 0x430   :  { %9648 = vmatpush1.bf16.msra.mxu1 %v14731_v10  ;;  %9608 = vmatprep.subr.bf16.mxu0 %v14736_v55  ;;  %v14766_v10 = vld [vmem:[#allocation2 + $0xe04] ss:$408 sps:$4 sm:$0xff]  }
 0x431   :  { %9649 = vmatprep.subr.bf16.mxu1 %v14739_v58  ;;  %v14769_v55 = vld [vmem:[#allocation2 + $0xe0c] ss:$408 sps:$4 sm:$0xff]  }
 0x433   :  { %9609 = vmatpush1.bf16.msra.mxu0 %v14734_v3  ;;  %v14764_v3 = vld [vmem:[#allocation2 + $0xe00] ss:$408 sps:$4 sm:$0xff]  }
 0x434   :  { %9650 = vmatpush1.bf16.msra.mxu1 %v14737_v59  ;;  %9666 = vmatprep.subr.bf16.mxu0 %v14742_v62  ;;  %v14767_v59 = vld [vmem:[#allocation2 + $0xe08] ss:$408 sps:$4 sm:$0xff]   ;;  %v11457_v62 = vrot.slane %v11449_v23, %v15270_v43 }
 0x435   :  { %9707 = vmatprep.subr.bf16.mxu1 %v14745_v9  ;;  %v14779_v23 = vld [vmem:[#allocation2 + $0x1468] ss:$408 sps:$4 sm:$0xff]  }
 0x436   :  { %9617 = vmatmul.mubr.bf16.vlgmr.msra.gmra.mrb[76].mxu0 %v15283_v63 }
 0x437   :  { %9658 = vmatmul.mubr.bf16.vlgmr.msra.gmra.mrb[76].mxu1 %v15283_v63  ;;  %9667 = vmatpush1.bf16.msra.mxu0 %v14740_v16  ;;  %v14772_v16 = vld [vmem:[#allocation2 + $0x1134] ss:$408 sps:$4 sm:$0xff]  }
 0x438   :  { %9708 = vmatpush1.bf16.msra.mxu1 %v14743_v2  ;;  %9668 = vmatprep.subr.bf16.mxu0 %v14748_v6  ;;  %v14775_v2 = vld [vmem:[#allocation2 + $0x113c] ss:$408 sps:$4 sm:$0xff]  }
 0x439   :  { %9709 = vmatprep.subr.bf16.mxu1 %v14751_v15  ;;  %v9290_v36 = vpop.f32.mrb[60].mxu0  ;;  %13112 = vmatprep.mubr.msk.bf16.mxu0 %vm8022_vm0, %v15276_v50  ;;  %v14770_v15 = vld [vmem:[#allocation2 + $0x1130] ss:$408 sps:$4 sm:$0xff]  }
 0x43a   :  { %v9331_v20 = vpop.f32.mrb[60].mxu1  ;;  %13113 = vmatprep.mubr.msk.bf16.mxu1 %vm8022_vm0, %v15276_v50  ;;  %v10203_v24 = vmax.f32 %v9290_v36, 0.0  ;;  %v9292_v39 = vpop.f32.mrb[61].mxu0 }
 0x43b   :  { %v10205_v40 = vmax.f32 %v9331_v20, 0.0  ;;  %v9333_v25 = vpop.f32.mrb[61].mxu1  ;;  %v10204_v29 = vmax.f32 %v9292_v39, 0.0  ;;  %v9294_v44 = vpop.f32.mrb[62].mxu0  ;;  %9669 = vmatpush1.bf16.msra.mxu0 %v14746_v18  ;;  %v14782_v18 = vld [vmem:[#allocation2 + $0x1790] ss:$408 sps:$4 sm:$0xff]  }
 0x43c   :  { %v10206_v30 = vmax.f32 %v9333_v25, 0.0  ;;  %9710 = vmatpush1.bf16.msra.mxu1 %v14749_v12  ;;  %v9335_v54 = vpop.f32.mrb[62].mxu1  ;;  %v10828_v37 = vsel %vm16071_vm9, %v10203_v24, %v9290_v36  ;;  %v9295_v48 = vpop.f32.mrb[63].mxu0  ;;  %9670 = vmatprep.subr.bf16.mxu0 %v14754_v14  ;;  %v14785_v12 = vld [vmem:[#allocation2 + $0x1798] ss:$408 sps:$4 sm:$0xff]  }
 0x43d   :  { %v10830_v41 = vsel %vm16075_vm10, %v10205_v40, %v9331_v20  ;;  %9711 = vmatprep.subr.bf16.mxu1 %v14757_v22  ;;  %v9336_v53 = vpop.f32.mrb[63].mxu1  ;;  %v10829_v57 = vsel %vm16079_vm11, %v10204_v29, %v9292_v39  ;;  %v14790_v14 = vld [vmem:[#allocation2 + $0x1ac4] ss:$408 sps:$4 sm:$0xff]   ;;  %v14788_v36 = vld [vmem:[#allocation2 + $0x1ac0] ss:$408 sps:$4 sm:$0xff]  }
 0x43e   :  { %v10831_v47 = vsel %vm16083_vm12, %v10206_v30, %v9333_v25  ;;  %v13153_v49 = vpack.c.bf16 %v10829_v57, %v10828_v37  ;;  %v14793_v22 = vld [vmem:[#allocation2 + $0x1acc] ss:$408 sps:$4 sm:$0xff]   ;;  %v14800_v39 = vld [vmem:[#allocation2 + $0x2120] ss:$408 sps:$4 sm:$0xff]   ;;  %v14811_v29 = vld [vmem:[#allocation2 + $0x245c] ss:$408 sps:$4 sm:$0xff]  }
 0x43f   :  { %v13154_v56 = vpack.c.bf16 %v10831_v47, %v10830_v41  ;;  %9671 = vmatpush1.bf16.msra.mxu0 %v14752_v26  ;;  %v14796_v20 = vld [vmem:[#allocation2 + $0x1df4] ss:$408 sps:$4 sm:$0xff]   ;;  %v14802_v24 = vld [vmem:[#allocation2 + $0x2124] ss:$408 sps:$4 sm:$0xff]   ;;  %v14803_v25 = vld [vmem:[#allocation2 + $0x2128] ss:$408 sps:$4 sm:$0xff]  }
 0x440   :  { %9712 = vmatpush1.bf16.msra.mxu1 %v14755_v45  ;;  %v11441_v60 = vrot.slane %v13153_v49, %v15270_v43  ;;  %9672 = vmatprep.subr.bf16.mxu0 %v14760_v42  ;;  %v14805_v40 = vld [vmem:[#allocation2 + $0x212c] ss:$408 sps:$4 sm:$0xff]   ;;  %v14806_v30 = vld [vmem:[#allocation2 + $0x2450] ss:$408 sps:$4 sm:$0xff]   ;;  %v14812_v41 = vld [vmem:[#allocation2 + $0x2780] ss:$408 sps:$4 sm:$0xff]  }
 0x441   :  { %v11448_v61 = vrot.slane %v13154_v56, %v15270_v43  ;;  %9713 = vmatprep.subr.bf16.mxu1 %v14763_v46  ;;  %v14808_v26 = vld [vmem:[#allocation2 + $0x2454] ss:$408 sps:$4 sm:$0xff]   ;;  %v14809_v44 = vld [vmem:[#allocation2 + $0x2458] ss:$408 sps:$4 sm:$0xff]   ;;  %v14814_v45 = vld [vmem:[#allocation2 + $0x2784] ss:$408 sps:$4 sm:$0xff]  }
 0x442   :  { %v14817_v54 = vld [vmem:[#allocation2 + $0x278c] ss:$408 sps:$4 sm:$0xff]   ;;  %v10125_v37 = vld [vmem:[#allocation4 + $0x40] sm:$0xff]  ;;  %v14815_v48 = vld [vmem:[#allocation2 + $0x2788] ss:$408 sps:$4 sm:$0xff]  }
 0x443   :  { %v11450_v58 = vcombine.low %v11441_v60, %v11448_v61  ;;  %9673 = vmatpush1.bf16.msra.mxu0 %v14758_v51  ;;  %vm10138_vm13 = vcmp.ne.f32.partialorder %v10125_v37, 0.0  ;;  %v14820_v42 = vld [vmem:[#allocation2 + $0x154] ss:$408 sps:$4 sm:$0xff]   ;;  %v14818_v57 = vld [vmem:[#allocation2 + $0x150] ss:$408 sps:$4 sm:$0xff]  }
 0x444   :  { %9714 = vmatpush1.bf16.msra.mxu1 %v14761_v52  ;;  %9674 = vmatprep.subr.bf16.mxu0 %v14766_v10  ;;  %v14823_v46 = vld [vmem:[#allocation2 + $0x15c] ss:$408 sps:$4 sm:$0xff]   ;;  %v16110_v53 = vsel %vm10138_vm13, 1, %v15222_v32  ;;  %v14821_v47 = vld [vmem:[#allocation2 + $0x158] ss:$408 sps:$4 sm:$0xff]  }
 0x445   :  { %v11464_v9 = vrot.slane %v11450_v58, %v15270_v43  ;;  %9715 = vmatprep.subr.bf16.mxu1 %v14769_v55  ;;  %v14826_v49 = vld [vmem:[#allocation2 + $0x484] ss:$408 sps:$4 sm:$0xff]   ;;  %v10517_v51 = vrot.slane %v16110_v53, %v15310_v27  ;;  %v10525_v52 = vrot.slane %v16110_v53, %v15313_v28  ;;  %v10521_v60 = vrot.slane %v16110_v53, %v15316_v31  ;;  %v14824_v10 = vld [vmem:[#allocation2 + $0x480] ss:$408 sps:$4 sm:$0xff]   ;;  %v14832_v58 = vld [vmem:[#allocation2 + $0x7b4] ss:$408 sps:$4 sm:$0xff]  }
 0x446   :  { %v14829_v56 = vld [vmem:[#allocation2 + $0x48c] ss:$408 sps:$4 sm:$0xff]   ;;  %v10529_v61 = vrot.slane %v16110_v53, %v15322_v34  ;;  %v14827_v55 = vld [vmem:[#allocation2 + $0x488] ss:$408 sps:$4 sm:$0xff]   ;;  %v14845_v37 = vld [vmem:[#allocation2 + $0xe18] ss:$408 sps:$4 sm:$0xff]  }
 0x447   :  { %v11465_v6 = vcombine.low %v11457_v62, %v11464_v9  ;;  %9675 = vmatpush1.bf16.msra.mxu0 %v14764_v3  ;;  %v14835_v3 = vld [vmem:[#allocation2 + $0x7bc] ss:$408 sps:$4 sm:$0xff]   ;;  %vm16122_vm14 = vcmp.eq.s32.totalorder %v10517_v51, 1  ;;  %vm16126_vm15 = vcmp.eq.s32.totalorder %v10525_v52, 1  ;;  %vm16130_vm1 = vcmp.eq.s32.totalorder %v10521_v60, 1 }
 0x448   :  { %9716 = vmatpush1.bf16.msra.mxu1 %v14767_v59  ;;  %9676 = vmatprep.subr.bf16.mxu0 %v14772_v16  ;;  %vm16134_vm2 = vcmp.eq.s32.totalorder %v10529_v61, 1  ;;  %v14862_v51 = vld [vmem:[#allocation2 + $0x17a4] ss:$408 sps:$4 sm:$0xff]   ;;  %v14860_v60 = vld [vmem:[#allocation2 + $0x17a0] ss:$408 sps:$4 sm:$0xff]  }
 0x449   :  { %11722 = vst [vmem:[%s16381_s3 + $0x38] sm:$0xff] %v11465_v6  ;;  %9717 = vmatprep.subr.bf16.mxu1 %v14775_v2  ;;  %v14865_v52 = vld [vmem:[#allocation2 + $0x17ac] ss:$408 sps:$4 sm:$0xff]   ;;  %v14863_v61 = vld [vmem:[#allocation2 + $0x17a8] ss:$408 sps:$4 sm:$0xff]  }
 0x44a   :  { %v14877_v62 = vld [vmem:[#allocation2 + $0x1e0c] ss:$408 sps:$4 sm:$0xff]   ;;  %v14875_v16 = vld [vmem:[#allocation2 + $0x1e08] ss:$408 sps:$4 sm:$0xff]   ;;  %v14883_v6 = vld [vmem:[#allocation2 + $0x213c] ss:$408 sps:$4 sm:$0xff]  }
 0x44b   :  { %9677 = vmatpush1.bf16.msra.mxu0 %v14770_v15  ;;  %v14880_v2 = vld [vmem:[#allocation2 + $0x2134] ss:$408 sps:$4 sm:$0xff]  }
 0x44c   :  { %9718 = vmatpush1.bf16.msra.mxu1 %v14773_v7  ;;  %9678 = vmatprep.subr.bf16.mxu0 %v14778_v8 }
 0x44d   :  { %9719 = vmatprep.subr.bf16.mxu1 %v14781_v38 }
 0x44f   :  { %9679 = vmatpush1.bf16.msra.mxu0 %v14776_v13  ;;  %v14830_v13 = vld [vmem:[#allocation2 + $0x7b0] ss:$408 sps:$4 sm:$0xff]  }
 0x450   :  { %9720 = vmatpush1.bf16.msra.mxu1 %v14779_v23  ;;  %9680 = vmatprep.subr.bf16.mxu0 %v14784_v11 }
 0x451   :  { %9721 = vmatprep.subr.bf16.mxu1 %v14787_v19 }
 0x453   :  { %9681 = vmatpush1.bf16.msra.mxu0 %v14782_v18  ;;  %v14833_v18 = vld [vmem:[#allocation2 + $0x7b8] ss:$408 sps:$4 sm:$0xff]  }
 0x454   :  { %9722 = vmatpush1.bf16.msra.mxu1 %v14785_v12  ;;  %9682 = vmatprep.subr.bf16.mxu0 %v14790_v14 }
 0x455   :  { %9723 = vmatprep.subr.bf16.mxu1 %v14793_v22 }
 0x457   :  { %9683 = vmatpush1.bf16.msra.mxu0 %v14788_v36 }
 0x458   :  { %9724 = vmatpush1.bf16.msra.mxu1 %v14791_v17  ;;  %9684 = vmatprep.subr.bf16.mxu0 %v14796_v20  ;;  %v14838_v17 = vld [vmem:[#allocation2 + $0xae4] ss:$408 sps:$4 sm:$0xff]  }
 0x459   :  { %9725 = vmatprep.subr.bf16.mxu1 %v14799_v35  ;;  %v14841_v20 = vld [vmem:[#allocation2 + $0xaec] ss:$408 sps:$4 sm:$0xff]  }
 0x45b   :  { %9685 = vmatpush1.bf16.msra.mxu0 %v14794_v33 }
 0x45c   :  { %9726 = vmatpush1.bf16.msra.mxu1 %v14797_v21  ;;  %9686 = vmatprep.subr.bf16.mxu0 %v14802_v24 }
 0x45d   :  { %9727 = vmatprep.subr.bf16.mxu1 %v14805_v40 }
 0x45f   :  { %9687 = vmatpush1.bf16.msra.mxu0 %v14800_v39  ;;  %v14836_v39 = vld [vmem:[#allocation2 + $0xae0] ss:$408 sps:$4 sm:$0xff]  }
 0x460   :  { %9728 = vmatpush1.bf16.msra.mxu1 %v14803_v25  ;;  %9688 = vmatprep.subr.bf16.mxu0 %v14808_v26  ;;  %v14839_v25 = vld [vmem:[#allocation2 + $0xae8] ss:$408 sps:$4 sm:$0xff]  }
 0x461   :  { %9729 = vmatprep.subr.bf16.mxu1 %v14811_v29 }
 0x463   :  { %9689 = vmatpush1.bf16.msra.mxu0 %v14806_v30  ;;  %v14844_v30 = vld [vmem:[#allocation2 + $0xe14] ss:$408 sps:$4 sm:$0xff]  }
 0x464   :  { %9730 = vmatpush1.bf16.msra.mxu1 %v14809_v44  ;;  %9690 = vmatprep.subr.bf16.mxu0 %v14814_v45  ;;  %v14847_v44 = vld [vmem:[#allocation2 + $0xe1c] ss:$408 sps:$4 sm:$0xff]  }
 0x465   :  { %9731 = vmatprep.subr.bf16.mxu1 %v14817_v54  ;;  %v14842_v54 = vld [vmem:[#allocation2 + $0xe10] ss:$408 sps:$4 sm:$0xff]  }
 0x467   :  { %9691 = vmatpush1.bf16.msra.mxu0 %v14812_v41  ;;  %v14850_v41 = vld [vmem:[#allocation2 + $0x1144] ss:$408 sps:$4 sm:$0xff]  }
 0x468   :  { %9732 = vmatpush1.bf16.msra.mxu1 %v14815_v48  ;;  %9748 = vmatprep.subr.bf16.mxu0 %v14820_v42  ;;  %v14853_v48 = vld [vmem:[#allocation2 + $0x114c] ss:$408 sps:$4 sm:$0xff]   ;;  %v14848_v42 = vld [vmem:[#allocation2 + $0x1140] ss:$408 sps:$4 sm:$0xff]  }
 0x469   :  { %9789 = vmatprep.subr.bf16.mxu1 %v14823_v46  ;;  %v14851_v46 = vld [vmem:[#allocation2 + $0x1148] ss:$408 sps:$4 sm:$0xff]  }
 0x46a   :  { %9699 = vmatmul.mubr.bf16.vlgmr.msra.gmra.mrb[80].mxu0 %v15283_v63 }
 0x46b   :  { %9740 = vmatmul.mubr.bf16.vlgmr.msra.gmra.mrb[80].mxu1 %v15283_v63  ;;  %9749 = vmatpush1.bf16.msra.mxu0 %v14818_v57  ;;  %v14856_v57 = vld [vmem:[#allocation2 + $0x1474] ss:$408 sps:$4 sm:$0xff]  }
 0x46c   :  { %9790 = vmatpush1.bf16.msra.mxu1 %v14821_v47  ;;  %9750 = vmatprep.subr.bf16.mxu0 %v14826_v49  ;;  %v14859_v47 = vld [vmem:[#allocation2 + $0x147c] ss:$408 sps:$4 sm:$0xff]   ;;  %v14854_v49 = vld [vmem:[#allocation2 + $0x1470] ss:$408 sps:$4 sm:$0xff]  }
 0x46d   :  { %9791 = vmatprep.subr.bf16.mxu1 %v14829_v56  ;;  %v9372_v59 = vpop.f32.mrb[64].mxu0  ;;  %13114 = vmatprep.mubr.msk.bf16.mxu0 %vm8022_vm0, %v15276_v50  ;;  %v14857_v56 = vld [vmem:[#allocation2 + $0x1478] ss:$408 sps:$4 sm:$0xff]  }
 0x46e   :  { %v9413_v9 = vpop.f32.mrb[64].mxu1  ;;  %13115 = vmatprep.mubr.msk.bf16.mxu1 %vm8022_vm0, %v15276_v50  ;;  %v10207_v15 = vmax.f32 %v9372_v59, 0.0  ;;  %v9374_v8 = vpop.f32.mrb[65].mxu0 }
 0x46f   :  { %v10209_v7 = vmax.f32 %v9413_v9, 0.0  ;;  %v9415_v38 = vpop.f32.mrb[65].mxu1  ;;  %v10208_v23 = vmax.f32 %v9374_v8, 0.0  ;;  %v9376_v19 = vpop.f32.mrb[66].mxu0  ;;  %9751 = vmatpush1.bf16.msra.mxu0 %v14824_v10  ;;  %v14868_v10 = vld [vmem:[#allocation2 + $0x1ad4] ss:$408 sps:$4 sm:$0xff]  }
 0x470   :  { %v10210_v11 = vmax.f32 %v9415_v38, 0.0  ;;  %9792 = vmatpush1.bf16.msra.mxu1 %v14827_v55  ;;  %v9417_v12 = vpop.f32.mrb[66].mxu1  ;;  %v10832_v14 = vsel %vm16122_vm14, %v10207_v15, %v9372_v59  ;;  %v9377_v36 = vpop.f32.mrb[67].mxu0  ;;  %9752 = vmatprep.subr.bf16.mxu0 %v14832_v58  ;;  %v14871_v55 = vld [vmem:[#allocation2 + $0x1adc] ss:$408 sps:$4 sm:$0xff]  }
 0x471   :  { %v10834_v22 = vsel %vm16126_vm15, %v10209_v7, %v9413_v9  ;;  %9793 = vmatprep.subr.bf16.mxu1 %v14835_v3  ;;  %v9418_v35 = vpop.f32.mrb[67].mxu1  ;;  %v10833_v33 = vsel %vm16130_vm1, %v10208_v23, %v9374_v8  ;;  %v14866_v58 = vld [vmem:[#allocation2 + $0x1ad0] ss:$408 sps:$4 sm:$0xff]   ;;  %v14874_v59 = vld [vmem:[#allocation2 + $0x1e04] ss:$408 sps:$4 sm:$0xff]  }
 0x472   :  { %v10835_v21 = vsel %vm16134_vm2, %v10210_v11, %v9415_v38  ;;  %v13155_v24 = vpack.c.bf16 %v10833_v33, %v10832_v14  ;;  %v14869_v3 = vld [vmem:[#allocation2 + $0x1ad8] ss:$408 sps:$4 sm:$0xff]   ;;  %v14886_v8 = vld [vmem:[#allocation2 + $0x2464] ss:$408 sps:$4 sm:$0xff]   ;;  %v14887_v23 = vld [vmem:[#allocation2 + $0x2468] ss:$408 sps:$4 sm:$0xff]   ;;  %v10533_v33 = vrot.slane %v16110_v53, %v15371_v0 }
 0x473   :  { %v13156_v40 = vpack.c.bf16 %v10835_v21, %v10834_v22  ;;  %9753 = vmatpush1.bf16.msra.mxu0 %v14830_v13  ;;  %v14872_v9 = vld [vmem:[#allocation2 + $0x1e00] ss:$408 sps:$4 sm:$0xff]   ;;  %v14878_v15 = vld [vmem:[#allocation2 + $0x2130] ss:$408 sps:$4 sm:$0xff]   ;;  %v14889_v38 = vld [vmem:[#allocation2 + $0x246c] ss:$408 sps:$4 sm:$0xff]   ;;  %v10541_v21 = vrot.slane %v16110_v53, %v15374_v1 }
 0x474   :  { %9794 = vmatpush1.bf16.msra.mxu1 %v14833_v18  ;;  %v16151_v26 = vrot.slane %v13155_v24, %v15270_v43  ;;  %9754 = vmatprep.subr.bf16.mxu0 %v14838_v17  ;;  %v14881_v7 = vld [vmem:[#allocation2 + $0x2138] ss:$408 sps:$4 sm:$0xff]   ;;  %v14892_v11 = vld [vmem:[#allocation2 + $0x2794] ss:$408 sps:$4 sm:$0xff]   ;;  %v14898_v14 = vld [vmem:[#allocation2 + $0x164] ss:$408 sps:$4 sm:$0xff]   ;;  %v10537_v24 = vrot.slane %v16110_v53, %v15377_v4 }
 0x475   :  { %v16154_v29 = vrot.slane %v13156_v40, %v15270_v43  ;;  %9795 = vmatprep.subr.bf16.mxu1 %v14841_v20  ;;  %v14884_v13 = vld [vmem:[#allocation2 + $0x2460] ss:$408 sps:$4 sm:$0xff]   ;;  %v14895_v19 = vld [vmem:[#allocation2 + $0x279c] ss:$408 sps:$4 sm:$0xff]   ;;  %v14890_v18 = vld [vmem:[#allocation2 + $0x2790] ss:$408 sps:$4 sm:$0xff]   ;;  %v10545_v40 = vrot.slane %v16110_v53, %v15380_v5 }
 0x476   :  { %v14893_v12 = vld [vmem:[#allocation2 + $0x2798] ss:$408 sps:$4 sm:$0xff]   ;;  %v14901_v22 = vld [vmem:[#allocation2 + $0x16c] ss:$408 sps:$4 sm:$0xff]   ;;  %v14899_v17 = vld [vmem:[#allocation2 + $0x168] ss:$408 sps:$4 sm:$0xff]  }
 0x477   :  { %v11498_v45 = vcombine.low %v16151_v26, %v16154_v29  ;;  %9755 = vmatpush1.bf16.msra.mxu0 %v14836_v39  ;;  %v14896_v36 = vld [vmem:[#allocation2 + $0x160] ss:$408 sps:$4 sm:$0xff]   ;;  %v14904_v20 = vld [vmem:[#allocation2 + $0x494] ss:$408 sps:$4 sm:$0xff]   ;;  %v14902_v39 = vld [vmem:[#allocation2 + $0x490] ss:$408 sps:$4 sm:$0xff]  }
 0x478   :  { %9796 = vmatpush1.bf16.msra.mxu1 %v14839_v25  ;;  %9756 = vmatprep.subr.bf16.mxu0 %v14844_v30  ;;  %v14907_v35 = vld [vmem:[#allocation2 + $0x49c] ss:$408 sps:$4 sm:$0xff]   ;;  %v14905_v25 = vld [vmem:[#allocation2 + $0x498] ss:$408 sps:$4 sm:$0xff]   ;;  %vm16168_vm3 = vcmp.eq.s32.totalorder %v10533_v33, 1  ;;  %vm16172_vm4 = vcmp.eq.s32.totalorder %v10541_v21, 1 }
 0x479   :  { %9797 = vmatprep.subr.bf16.mxu1 %v14847_v44  ;;  %v14910_v30 = vld [vmem:[#allocation2 + $0x7c4] ss:$408 sps:$4 sm:$0xff]   ;;  %vm16176_vm5 = vcmp.eq.s32.totalorder %v10537_v24, 1  ;;  %vm16180_vm6 = vcmp.eq.s32.totalorder %v10545_v40, 1  ;;  %v14929_v33 = vld [vmem:[#allocation2 + $0x1158] ss:$408 sps:$4 sm:$0xff]  }
 0x47a   :  { %v14913_v44 = vld [vmem:[#allocation2 + $0x7cc] ss:$408 sps:$4 sm:$0xff]   ;;  %v14932_v29 = vld [vmem:[#allocation2 + $0x1480] ss:$408 sps:$4 sm:$0xff]   ;;  %v14943_v40 = vld [vmem:[#allocation2 + $0x17bc] ss:$408 sps:$4 sm:$0xff]  }
 0x47b   :  { %9757 = vmatpush1.bf16.msra.mxu0 %v14842_v54  ;;  %v14934_v21 = vld [vmem:[#allocation2 + $0x1484] ss:$408 sps:$4 sm:$0xff]   ;;  %v14940_v24 = vld [vmem:[#allocation2 + $0x17b4] ss:$408 sps:$4 sm:$0xff]  }
 0x47c   :  { %9798 = vmatpush1.bf16.msra.mxu1 %v14845_v37  ;;  %9758 = vmatprep.subr.bf16.mxu0 %v14850_v41  ;;  %v14937_v26 = vld [vmem:[#allocation2 + $0x148c] ss:$408 sps:$4 sm:$0xff]   ;;  %v14947_v37 = vld [vmem:[#allocation2 + $0x1ae8] ss:$408 sps:$4 sm:$0xff]   ;;  %v14955_v53 = vld [vmem:[#allocation2 + $0x1e1c] ss:$408 sps:$4 sm:$0xff]  }
 0x47d   :  { %9799 = vmatprep.subr.bf16.mxu1 %v14853_v48  ;;  %v14950_v48 = vld [vmem:[#allocation2 + $0x1e10] ss:$408 sps:$4 sm:$0xff]  }
 0x47f   :  { %9759 = vmatpush1.bf16.msra.mxu0 %v14848_v42  ;;  %v14953_v42 = vld [vmem:[#allocation2 + $0x1e18] ss:$408 sps:$4 sm:$0xff]  }
 0x480   :  { %9800 = vmatpush1.bf16.msra.mxu1 %v14851_v46  ;;  %9760 = vmatprep.subr.bf16.mxu0 %v14856_v57 }
 0x481   :  { %9801 = vmatprep.subr.bf16.mxu1 %v14859_v47 }
 0x483   :  { %9761 = vmatpush1.bf16.msra.mxu0 %v14854_v49 }
 0x484   :  { %9802 = vmatpush1.bf16.msra.mxu1 %v14857_v56  ;;  %9762 = vmatprep.subr.bf16.mxu0 %v14862_v51  ;;  %v14908_v56 = vld [vmem:[#allocation2 + $0x7c0] ss:$408 sps:$4 sm:$0xff]  }
 0x485   :  { %9803 = vmatprep.subr.bf16.mxu1 %v14865_v52 }
 0x487   :  { %9763 = vmatpush1.bf16.msra.mxu0 %v14860_v60 }
 0x488   :  { %9804 = vmatpush1.bf16.msra.mxu1 %v14863_v61  ;;  %9764 = vmatprep.subr.bf16.mxu0 %v14868_v10  ;;  %v14911_v61 = vld [vmem:[#allocation2 + $0x7c8] ss:$408 sps:$4 sm:$0xff]  }
 0x489   :  { %9805 = vmatprep.subr.bf16.mxu1 %v14871_v55 }
 0x48b   :  { %9765 = vmatpush1.bf16.msra.mxu0 %v14866_v58 }
 0x48c   :  { %9806 = vmatpush1.bf16.msra.mxu1 %v14869_v3  ;;  %9766 = vmatprep.subr.bf16.mxu0 %v14874_v59  ;;  %v14916_v59 = vld [vmem:[#allocation2 + $0xaf4] ss:$408 sps:$4 sm:$0xff]  }
 0x48d   :  { %9807 = vmatprep.subr.bf16.mxu1 %v14877_v62  ;;  %v14919_v62 = vld [vmem:[#allocation2 + $0xafc] ss:$408 sps:$4 sm:$0xff]  }
 0x48f   :  { %9767 = vmatpush1.bf16.msra.mxu0 %v14872_v9 }
 0x490   :  { %9808 = vmatpush1.bf16.msra.mxu1 %v14875_v16  ;;  %9768 = vmatprep.subr.bf16.mxu0 %v14880_v2 }
 0x491   :  { %9809 = vmatprep.subr.bf16.mxu1 %v14883_v6 }
 0x493   :  { %9769 = vmatpush1.bf16.msra.mxu0 %v14878_v15 }
 0x494   :  { %9810 = vmatpush1.bf16.msra.mxu1 %v14881_v7  ;;  %9770 = vmatprep.subr.bf16.mxu0 %v14886_v8  ;;  %v14914_v7 = vld [vmem:[#allocation2 + $0xaf0] ss:$408 sps:$4 sm:$0xff]  }
 0x495   :  { %9811 = vmatprep.subr.bf16.mxu1 %v14889_v38  ;;  %v14917_v8 = vld [vmem:[#allocation2 + $0xaf8] ss:$408 sps:$4 sm:$0xff]  }
 0x497   :  { %9771 = vmatpush1.bf16.msra.mxu0 %v14884_v13 }
 0x498   :  { %9812 = vmatpush1.bf16.msra.mxu1 %v14887_v23  ;;  %9772 = vmatprep.subr.bf16.mxu0 %v14892_v11  ;;  %v14922_v23 = vld [vmem:[#allocation2 + $0xe24] ss:$408 sps:$4 sm:$0xff]  }
 0x499   :  { %9813 = vmatprep.subr.bf16.mxu1 %v14895_v19  ;;  %v14925_v11 = vld [vmem:[#allocation2 + $0xe2c] ss:$408 sps:$4 sm:$0xff]  }
 0x49b   :  { %9773 = vmatpush1.bf16.msra.mxu0 %v14890_v18  ;;  %v14920_v18 = vld [vmem:[#allocation2 + $0xe20] ss:$408 sps:$4 sm:$0xff]  }
 0x49c   :  { %9814 = vmatpush1.bf16.msra.mxu1 %v14893_v12  ;;  %9830 = vmatprep.subr.bf16.mxu0 %v14898_v14  ;;  %v14923_v12 = vld [vmem:[#allocation2 + $0xe28] ss:$408 sps:$4 sm:$0xff]   ;;  %v11506_v14 = vrot.slane %v11498_v45, %v15270_v43 }
 0x49d   :  { %9871 = vmatprep.subr.bf16.mxu1 %v14901_v22  ;;  %v14935_v45 = vld [vmem:[#allocation2 + $0x1488] ss:$408 sps:$4 sm:$0xff]  }
 0x49e   :  { %9781 = vmatmul.mubr.bf16.vlgmr.msra.gmra.mrb[84].mxu0 %v15283_v63 }
 0x49f   :  { %9822 = vmatmul.mubr.bf16.vlgmr.msra.gmra.mrb[84].mxu1 %v15283_v63  ;;  %9831 = vmatpush1.bf16.msra.mxu0 %v14896_v36  ;;  %v14928_v36 = vld [vmem:[#allocation2 + $0x1154] ss:$408 sps:$4 sm:$0xff]  }
 0x4a0   :  { %9872 = vmatpush1.bf16.msra.mxu1 %v14899_v17  ;;  %9832 = vmatprep.subr.bf16.mxu0 %v14904_v20  ;;  %v14931_v17 = vld [vmem:[#allocation2 + $0x115c] ss:$408 sps:$4 sm:$0xff]  }
 0x4a1   :  { %9873 = vmatprep.subr.bf16.mxu1 %v14907_v35  ;;  %v9454_v54 = vpop.f32.mrb[68].mxu0  ;;  %13116 = vmatprep.mubr.msk.bf16.mxu0 %vm8022_vm0, %v15276_v50  ;;  %v14926_v35 = vld [vmem:[#allocation2 + $0x1150] ss:$408 sps:$4 sm:$0xff]  }
 0x4a2   :  { %v9495_v41 = vpop.f32.mrb[68].mxu1  ;;  %13117 = vmatprep.mubr.msk.bf16.mxu1 %vm8022_vm0, %v15276_v50  ;;  %v10211_v46 = vmax.f32 %v9454_v54, 0.0  ;;  %v9456_v47 = vpop.f32.mrb[69].mxu0 }
 0x4a3   :  { %v10213_v57 = vmax.f32 %v9495_v41, 0.0  ;;  %v9497_v49 = vpop.f32.mrb[69].mxu1  ;;  %v10212_v51 = vmax.f32 %v9456_v47, 0.0  ;;  %v9458_v60 = vpop.f32.mrb[70].mxu0  ;;  %9833 = vmatpush1.bf16.msra.mxu0 %v14902_v39  ;;  %v14938_v39 = vld [vmem:[#allocation2 + $0x17b0] ss:$408 sps:$4 sm:$0xff]  }
 0x4a4   :  { %v10214_v52 = vmax.f32 %v9497_v49, 0.0  ;;  %9874 = vmatpush1.bf16.msra.mxu1 %v14905_v25  ;;  %v9499_v10 = vpop.f32.mrb[70].mxu1  ;;  %v10836_v55 = vsel %vm16168_vm3, %v10211_v46, %v9454_v54  ;;  %v9459_v3 = vpop.f32.mrb[71].mxu0  ;;  %9834 = vmatprep.subr.bf16.mxu0 %v14910_v30  ;;  %v14941_v25 = vld [vmem:[#allocation2 + $0x17b8] ss:$408 sps:$4 sm:$0xff]  }
 0x4a5   :  { %v10838_v58 = vsel %vm16172_vm4, %v10213_v57, %v9495_v41  ;;  %9875 = vmatprep.subr.bf16.mxu1 %v14913_v44  ;;  %v9500_v9 = vpop.f32.mrb[71].mxu1  ;;  %v10837_v16 = vsel %vm16176_vm5, %v10212_v51, %v9456_v47  ;;  %v14946_v30 = vld [vmem:[#allocation2 + $0x1ae4] ss:$408 sps:$4 sm:$0xff]   ;;  %v14944_v54 = vld [vmem:[#allocation2 + $0x1ae0] ss:$408 sps:$4 sm:$0xff]  }
 0x4a6   :  { %v10839_v2 = vsel %vm16180_vm6, %v10214_v52, %v9497_v49  ;;  %v13157_v6 = vpack.c.bf16 %v10837_v16, %v10836_v55  ;;  %v14949_v44 = vld [vmem:[#allocation2 + $0x1aec] ss:$408 sps:$4 sm:$0xff]   ;;  %v14956_v47 = vld [vmem:[#allocation2 + $0x2140] ss:$408 sps:$4 sm:$0xff]   ;;  %v14967_v51 = vld [vmem:[#allocation2 + $0x247c] ss:$408 sps:$4 sm:$0xff]  }
 0x4a7   :  { %v13158_v15 = vpack.c.bf16 %v10839_v2, %v10838_v58  ;;  %9835 = vmatpush1.bf16.msra.mxu0 %v14908_v56  ;;  %v14952_v41 = vld [vmem:[#allocation2 + $0x1e14] ss:$408 sps:$4 sm:$0xff]   ;;  %v14958_v46 = vld [vmem:[#allocation2 + $0x2144] ss:$408 sps:$4 sm:$0xff]   ;;  %v14959_v49 = vld [vmem:[#allocation2 + $0x2148] ss:$408 sps:$4 sm:$0xff]  }
 0x4a8   :  { %9876 = vmatpush1.bf16.msra.mxu1 %v14911_v61  ;;  %v11490_v38 = vrot.slane %v13157_v6, %v15270_v43  ;;  %9836 = vmatprep.subr.bf16.mxu0 %v14916_v59  ;;  %v14961_v57 = vld [vmem:[#allocation2 + $0x214c] ss:$408 sps:$4 sm:$0xff]   ;;  %v14962_v52 = vld [vmem:[#allocation2 + $0x2470] ss:$408 sps:$4 sm:$0xff]   ;;  %v10126_v55 = vld [vmem:[#allocation4 + $0x48] sm:$0xff] }
 0x4a9   :  { %v11497_v13 = vrot.slane %v13158_v15, %v15270_v43  ;;  %9877 = vmatprep.subr.bf16.mxu1 %v14919_v62  ;;  %v14964_v56 = vld [vmem:[#allocation2 + $0x2474] ss:$408 sps:$4 sm:$0xff]   ;;  %v14965_v60 = vld [vmem:[#allocation2 + $0x2478] ss:$408 sps:$4 sm:$0xff]   ;;  %v14970_v61 = vld [vmem:[#allocation2 + $0x27a4] ss:$408 sps:$4 sm:$0xff]  }
 0x4aa   :  { %v14973_v10 = vld [vmem:[#allocation2 + $0x27ac] ss:$408 sps:$4 sm:$0xff]   ;;  %v14968_v58 = vld [vmem:[#allocation2 + $0x27a0] ss:$408 sps:$4 sm:$0xff]   ;;  %vm10139_vm7 = vcmp.ne.f32.partialorder %v10126_v55, 0.0 }
 0x4ab   :  { %v11499_v19 = vcombine.low %v11490_v38, %v11497_v13  ;;  %9837 = vmatpush1.bf16.msra.mxu0 %v14914_v7  ;;  %v14971_v3 = vld [vmem:[#allocation2 + $0x27a8] ss:$408 sps:$4 sm:$0xff]   ;;  %v14976_v59 = vld [vmem:[#allocation2 + $0x174] ss:$408 sps:$4 sm:$0xff]   ;;  %v16207_v9 = vsel %vm10139_vm7, 1, %v15222_v32 }
 0x4ac   :  { %9878 = vmatpush1.bf16.msra.mxu1 %v14917_v8  ;;  %9838 = vmatprep.subr.bf16.mxu0 %v14922_v23  ;;  %v14979_v62 = vld [vmem:[#allocation2 + $0x17c] ss:$408 sps:$4 sm:$0xff]   ;;  %v14974_v16 = vld [vmem:[#allocation2 + $0x170] ss:$408 sps:$4 sm:$0xff]   ;;  %v14985_v15 = vld [vmem:[#allocation2 + $0x4ac] ss:$408 sps:$4 sm:$0xff]   ;;  %v10549_v7 = vrot.slane %v16207_v9, %v15310_v27  ;;  %v10557_v8 = vrot.slane %v16207_v9, %v15313_v28  ;;  %v10553_v38 = vrot.slane %v16207_v9, %v15316_v31 }
 0x4ad   :  { %v11513_v22 = vrot.slane %v11499_v19, %v15270_v43  ;;  %9879 = vmatprep.subr.bf16.mxu1 %v14925_v11  ;;  %v14977_v2 = vld [vmem:[#allocation2 + $0x178] ss:$408 sps:$4 sm:$0xff]   ;;  %v14982_v6 = vld [vmem:[#allocation2 + $0x4a4] ss:$408 sps:$4 sm:$0xff]   ;;  %v10561_v13 = vrot.slane %v16207_v9, %v15322_v34  ;;  %v14983_v11 = vld [vmem:[#allocation2 + $0x4a8] ss:$408 sps:$4 sm:$0xff]  }
 0x4ae   :  { %v14980_v23 = vld [vmem:[#allocation2 + $0x4a0] ss:$408 sps:$4 sm:$0xff]   ;;  %v14988_v19 = vld [vmem:[#allocation2 + $0x7d4] ss:$408 sps:$4 sm:$0xff]   ;;  %vm16219_vm8 = vcmp.eq.s32.totalorder %v10549_v7, 1  ;;  %vm16223_vm9 = vcmp.eq.s32.totalorder %v10557_v8, 1 }
 0x4af   :  { %v11514_v20 = vcombine.low %v11506_v14, %v11513_v22  ;;  %9839 = vmatpush1.bf16.msra.mxu0 %v14920_v18  ;;  %v14991_v18 = vld [vmem:[#allocation2 + $0x7dc] ss:$408 sps:$4 sm:$0xff]   ;;  %vm16227_vm10 = vcmp.eq.s32.totalorder %v10553_v38, 1  ;;  %vm16231_vm11 = vcmp.eq.s32.totalorder %v10561_v13, 1  ;;  %v15001_v55 = vld [vmem:[#allocation2 + $0xe38] ss:$408 sps:$4 sm:$0xff]  }
 0x4b0   :  { %9880 = vmatpush1.bf16.msra.mxu1 %v14923_v12  ;;  %9840 = vmatprep.subr.bf16.mxu0 %v14928_v36  ;;  %v15018_v7 = vld [vmem:[#allocation2 + $0x17c4] ss:$408 sps:$4 sm:$0xff]   ;;  %v15016_v38 = vld [vmem:[#allocation2 + $0x17c0] ss:$408 sps:$4 sm:$0xff]  }
 0x4b1   :  { %11723 = vst [vmem:[%s16381_s3 + $0x40] sm:$0xff] %v11514_v20  ;;  %9881 = vmatprep.subr.bf16.mxu1 %v14931_v17  ;;  %v15021_v8 = vld [vmem:[#allocation2 + $0x17cc] ss:$408 sps:$4 sm:$0xff]   ;;  %v15019_v13 = vld [vmem:[#allocation2 + $0x17c8] ss:$408 sps:$4 sm:$0xff]  }
 0x4b2   :  { %v15033_v14 = vld [vmem:[#allocation2 + $0x1e2c] ss:$408 sps:$4 sm:$0xff]   ;;  %v15031_v36 = vld [vmem:[#allocation2 + $0x1e28] ss:$408 sps:$4 sm:$0xff]   ;;  %v15039_v20 = vld [vmem:[#allocation2 + $0x215c] ss:$408 sps:$4 sm:$0xff]  }
 0x4b3   :  { %9841 = vmatpush1.bf16.msra.mxu0 %v14926_v35  ;;  %v15036_v17 = vld [vmem:[#allocation2 + $0x2154] ss:$408 sps:$4 sm:$0xff]  }
 0x4b4   :  { %9882 = vmatpush1.bf16.msra.mxu1 %v14929_v33  ;;  %9842 = vmatprep.subr.bf16.mxu0 %v14934_v21 }
 0x4b5   :  { %9883 = vmatprep.subr.bf16.mxu1 %v14937_v26 }
 0x4b7   :  { %9843 = vmatpush1.bf16.msra.mxu0 %v14932_v29  ;;  %v14986_v29 = vld [vmem:[#allocation2 + $0x7d0] ss:$408 sps:$4 sm:$0xff]  }
 0x4b8   :  { %9884 = vmatpush1.bf16.msra.mxu1 %v14935_v45  ;;  %9844 = vmatprep.subr.bf16.mxu0 %v14940_v24 }
 0x4b9   :  { %9885 = vmatprep.subr.bf16.mxu1 %v14943_v40 }
 0x4bb   :  { %9845 = vmatpush1.bf16.msra.mxu0 %v14938_v39  ;;  %v14989_v39 = vld [vmem:[#allocation2 + $0x7d8] ss:$408 sps:$4 sm:$0xff]  }
 0x4bc   :  { %9886 = vmatpush1.bf16.msra.mxu1 %v14941_v25  ;;  %9846 = vmatprep.subr.bf16.mxu0 %v14946_v30 }
 0x4bd   :  { %9887 = vmatprep.subr.bf16.mxu1 %v14949_v44 }
 0x4bf   :  { %9847 = vmatpush1.bf16.msra.mxu0 %v14944_v54 }
 0x4c0   :  { %9888 = vmatpush1.bf16.msra.mxu1 %v14947_v37  ;;  %9848 = vmatprep.subr.bf16.mxu0 %v14952_v41  ;;  %v14994_v37 = vld [vmem:[#allocation2 + $0xb04] ss:$408 sps:$4 sm:$0xff]  }
 0x4c1   :  { %9889 = vmatprep.subr.bf16.mxu1 %v14955_v53  ;;  %v14997_v41 = vld [vmem:[#allocation2 + $0xb0c] ss:$408 sps:$4 sm:$0xff]  }
 0x4c3   :  { %9849 = vmatpush1.bf16.msra.mxu0 %v14950_v48 }
 0x4c4   :  { %9890 = vmatpush1.bf16.msra.mxu1 %v14953_v42  ;;  %9850 = vmatprep.subr.bf16.mxu0 %v14958_v46 }
 0x4c5   :  { %9891 = vmatprep.subr.bf16.mxu1 %v14961_v57 }
 0x4c7   :  { %9851 = vmatpush1.bf16.msra.mxu0 %v14956_v47  ;;  %v14992_v47 = vld [vmem:[#allocation2 + $0xb00] ss:$408 sps:$4 sm:$0xff]  }
 0x4c8   :  { %9892 = vmatpush1.bf16.msra.mxu1 %v14959_v49  ;;  %9852 = vmatprep.subr.bf16.mxu0 %v14964_v56  ;;  %v14995_v49 = vld [vmem:[#allocation2 + $0xb08] ss:$408 sps:$4 sm:$0xff]  }
 0x4c9   :  { %9893 = vmatprep.subr.bf16.mxu1 %v14967_v51 }
 0x4cb   :  { %9853 = vmatpush1.bf16.msra.mxu0 %v14962_v52  ;;  %v15000_v52 = vld [vmem:[#allocation2 + $0xe34] ss:$408 sps:$4 sm:$0xff]  }
 0x4cc   :  { %9894 = vmatpush1.bf16.msra.mxu1 %v14965_v60  ;;  %9854 = vmatprep.subr.bf16.mxu0 %v14970_v61  ;;  %v15003_v60 = vld [vmem:[#allocation2 + $0xe3c] ss:$408 sps:$4 sm:$0xff]  }
 0x4cd   :  { %9895 = vmatprep.subr.bf16.mxu1 %v14973_v10  ;;  %v14998_v10 = vld [vmem:[#allocation2 + $0xe30] ss:$408 sps:$4 sm:$0xff]  }
 0x4cf   :  { %9855 = vmatpush1.bf16.msra.mxu0 %v14968_v58  ;;  %v15006_v58 = vld [vmem:[#allocation2 + $0x1164] ss:$408 sps:$4 sm:$0xff]  }
 0x4d0   :  { %9896 = vmatpush1.bf16.msra.mxu1 %v14971_v3  ;;  %9912 = vmatprep.subr.bf16.mxu0 %v14976_v59  ;;  %v15009_v3 = vld [vmem:[#allocation2 + $0x116c] ss:$408 sps:$4 sm:$0xff]   ;;  %v15004_v59 = vld [vmem:[#allocation2 + $0x1160] ss:$408 sps:$4 sm:$0xff]  }
 0x4d1   :  { %9953 = vmatprep.subr.bf16.mxu1 %v14979_v62  ;;  %v15007_v62 = vld [vmem:[#allocation2 + $0x1168] ss:$408 sps:$4 sm:$0xff]  }
 0x4d2   :  { %9863 = vmatmul.mubr.bf16.vlgmr.msra.gmra.mrb[88].mxu0 %v15283_v63 }
 0x4d3   :  { %9904 = vmatmul.mubr.bf16.vlgmr.msra.gmra.mrb[88].mxu1 %v15283_v63  ;;  %9913 = vmatpush1.bf16.msra.mxu0 %v14974_v16  ;;  %v15012_v16 = vld [vmem:[#allocation2 + $0x1494] ss:$408 sps:$4 sm:$0xff]  }
 0x4d4   :  { %9954 = vmatpush1.bf16.msra.mxu1 %v14977_v2  ;;  %9914 = vmatprep.subr.bf16.mxu0 %v14982_v6  ;;  %v15015_v2 = vld [vmem:[#allocation2 + $0x149c] ss:$408 sps:$4 sm:$0xff]   ;;  %v15010_v6 = vld [vmem:[#allocation2 + $0x1490] ss:$408 sps:$4 sm:$0xff]  }
 0x4d5   :  { %9955 = vmatprep.subr.bf16.mxu1 %v14985_v15  ;;  %v9536_v12 = vpop.f32.mrb[72].mxu0  ;;  %13118 = vmatprep.mubr.msk.bf16.mxu0 %vm8022_vm0, %v15276_v50  ;;  %v15013_v15 = vld [vmem:[#allocation2 + $0x1498] ss:$408 sps:$4 sm:$0xff]  }
 0x4d6   :  { %v9577_v22 = vpop.f32.mrb[72].mxu1  ;;  %13119 = vmatprep.mubr.msk.bf16.mxu1 %vm8022_vm0, %v15276_v50  ;;  %v10215_v35 = vmax.f32 %v9536_v12, 0.0  ;;  %v9538_v21 = vpop.f32.mrb[73].mxu0 }
 0x4d7   :  { %v10217_v33 = vmax.f32 %v9577_v22, 0.0  ;;  %v9579_v26 = vpop.f32.mrb[73].mxu1  ;;  %v10216_v45 = vmax.f32 %v9538_v21, 0.0  ;;  %v9540_v40 = vpop.f32.mrb[74].mxu0  ;;  %9915 = vmatpush1.bf16.msra.mxu0 %v14980_v23  ;;  %v15024_v23 = vld [vmem:[#allocation2 + $0x1af4] ss:$408 sps:$4 sm:$0xff]  }
 0x4d8   :  { %v10218_v24 = vmax.f32 %v9579_v26, 0.0  ;;  %9956 = vmatpush1.bf16.msra.mxu1 %v14983_v11  ;;  %v9581_v25 = vpop.f32.mrb[74].mxu1  ;;  %v10840_v30 = vsel %vm16219_vm8, %v10215_v35, %v9536_v12  ;;  %v9541_v54 = vpop.f32.mrb[75].mxu0  ;;  %9916 = vmatprep.subr.bf16.mxu0 %v14988_v19  ;;  %v15027_v11 = vld [vmem:[#allocation2 + $0x1afc] ss:$408 sps:$4 sm:$0xff]  }
 0x4d9   :  { %v10842_v44 = vsel %vm16223_vm9, %v10217_v33, %v9577_v22  ;;  %9957 = vmatprep.subr.bf16.mxu1 %v14991_v18  ;;  %v9582_v53 = vpop.f32.mrb[75].mxu1  ;;  %v10841_v48 = vsel %vm16227_vm10, %v10216_v45, %v9538_v21  ;;  %v15022_v19 = vld [vmem:[#allocation2 + $0x1af0] ss:$408 sps:$4 sm:$0xff]   ;;  %v15030_v12 = vld [vmem:[#allocation2 + $0x1e24] ss:$408 sps:$4 sm:$0xff]  }
 0x4da   :  { %v10843_v42 = vsel %vm16231_vm11, %v10218_v24, %v9579_v26  ;;  %v13159_v46 = vpack.c.bf16 %v10841_v48, %v10840_v30  ;;  %v15025_v18 = vld [vmem:[#allocation2 + $0x1af8] ss:$408 sps:$4 sm:$0xff]   ;;  %v15042_v21 = vld [vmem:[#allocation2 + $0x2484] ss:$408 sps:$4 sm:$0xff]   ;;  %v15043_v45 = vld [vmem:[#allocation2 + $0x2488] ss:$408 sps:$4 sm:$0xff]   ;;  %v10565_v48 = vrot.slane %v16207_v9, %v15371_v0 }
 0x4db   :  { %v13160_v57 = vpack.c.bf16 %v10843_v42, %v10842_v44  ;;  %9917 = vmatpush1.bf16.msra.mxu0 %v14986_v29  ;;  %v15028_v22 = vld [vmem:[#allocation2 + $0x1e20] ss:$408 sps:$4 sm:$0xff]   ;;  %v15034_v35 = vld [vmem:[#allocation2 + $0x2150] ss:$408 sps:$4 sm:$0xff]   ;;  %v15045_v26 = vld [vmem:[#allocation2 + $0x248c] ss:$408 sps:$4 sm:$0xff]   ;;  %v10573_v42 = vrot.slane %v16207_v9, %v15374_v1 }
 0x4dc   :  { %9958 = vmatpush1.bf16.msra.mxu1 %v14989_v39  ;;  %v16248_v56 = vrot.slane %v13159_v46, %v15270_v43  ;;  %9918 = vmatprep.subr.bf16.mxu0 %v14994_v37  ;;  %v15037_v33 = vld [vmem:[#allocation2 + $0x2158] ss:$408 sps:$4 sm:$0xff]   ;;  %v15048_v24 = vld [vmem:[#allocation2 + $0x27b4] ss:$408 sps:$4 sm:$0xff]   ;;  %v15054_v30 = vld [vmem:[#allocation2 + $0x184] ss:$408 sps:$4 sm:$0xff]   ;;  %v10569_v46 = vrot.slane %v16207_v9, %v15377_v4 }
 0x4dd   :  { %v16251_v51 = vrot.slane %v13160_v57, %v15270_v43  ;;  %9959 = vmatprep.subr.bf16.mxu1 %v14997_v41  ;;  %v15040_v29 = vld [vmem:[#allocation2 + $0x2480] ss:$408 sps:$4 sm:$0xff]   ;;  %v15051_v40 = vld [vmem:[#allocation2 + $0x27bc] ss:$408 sps:$4 sm:$0xff]   ;;  %v15046_v39 = vld [vmem:[#allocation2 + $0x27b0] ss:$408 sps:$4 sm:$0xff]   ;;  %v10577_v57 = vrot.slane %v16207_v9, %v15380_v5 }
 0x4de   :  { %v15049_v25 = vld [vmem:[#allocation2 + $0x27b8] ss:$408 sps:$4 sm:$0xff]   ;;  %v15057_v44 = vld [vmem:[#allocation2 + $0x18c] ss:$408 sps:$4 sm:$0xff]   ;;  %v15055_v37 = vld [vmem:[#allocation2 + $0x188] ss:$408 sps:$4 sm:$0xff]  }
 0x4df   :  { %v11547_v61 = vcombine.low %v16248_v56, %v16251_v51  ;;  %9919 = vmatpush1.bf16.msra.mxu0 %v14992_v47  ;;  %v15052_v54 = vld [vmem:[#allocation2 + $0x180] ss:$408 sps:$4 sm:$0xff]   ;;  %v15060_v41 = vld [vmem:[#allocation2 + $0x4b4] ss:$408 sps:$4 sm:$0xff]   ;;  %v15058_v47 = vld [vmem:[#allocation2 + $0x4b0] ss:$408 sps:$4 sm:$0xff]  }
 0x4e0   :  { %9960 = vmatpush1.bf16.msra.mxu1 %v14995_v49  ;;  %9920 = vmatprep.subr.bf16.mxu0 %v15000_v52  ;;  %v15063_v53 = vld [vmem:[#allocation2 + $0x4bc] ss:$408 sps:$4 sm:$0xff]   ;;  %v15061_v49 = vld [vmem:[#allocation2 + $0x4b8] ss:$408 sps:$4 sm:$0xff]   ;;  %vm16265_vm12 = vcmp.eq.s32.totalorder %v10565_v48, 1  ;;  %vm16269_vm13 = vcmp.eq.s32.totalorder %v10573_v42, 1 }
 0x4e1   :  { %9961 = vmatprep.subr.bf16.mxu1 %v15003_v60  ;;  %v15066_v52 = vld [vmem:[#allocation2 + $0x7e4] ss:$408 sps:$4 sm:$0xff]   ;;  %vm16273_vm14 = vcmp.eq.s32.totalorder %v10569_v46, 1  ;;  %vm16277_vm15 = vcmp.eq.s32.totalorder %v10577_v57, 1  ;;  %v15085_v48 = vld [vmem:[#allocation2 + $0x1178] ss:$408 sps:$4 sm:$0xff]  }
 0x4e2   :  { %v15069_v60 = vld [vmem:[#allocation2 + $0x7ec] ss:$408 sps:$4 sm:$0xff]   ;;  %v15088_v51 = vld [vmem:[#allocation2 + $0x14a0] ss:$408 sps:$4 sm:$0xff]   ;;  %v15099_v57 = vld [vmem:[#allocation2 + $0x17dc] ss:$408 sps:$4 sm:$0xff]  }
 0x4e3   :  { %9921 = vmatpush1.bf16.msra.mxu0 %v14998_v10  ;;  %v15090_v42 = vld [vmem:[#allocation2 + $0x14a4] ss:$408 sps:$4 sm:$0xff]   ;;  %v15096_v46 = vld [vmem:[#allocation2 + $0x17d4] ss:$408 sps:$4 sm:$0xff]  }
 0x4e4   :  { %9962 = vmatpush1.bf16.msra.mxu1 %v15001_v55  ;;  %9922 = vmatprep.subr.bf16.mxu0 %v15006_v58  ;;  %v15093_v56 = vld [vmem:[#allocation2 + $0x14ac] ss:$408 sps:$4 sm:$0xff]   ;;  %v15103_v55 = vld [vmem:[#allocation2 + $0x1b08] ss:$408 sps:$4 sm:$0xff]   ;;  %v15111_v9 = vld [vmem:[#allocation2 + $0x1e3c] ss:$408 sps:$4 sm:$0xff]  }
 0x4e5   :  { %9963 = vmatprep.subr.bf16.mxu1 %v15009_v3  ;;  %v15106_v3 = vld [vmem:[#allocation2 + $0x1e30] ss:$408 sps:$4 sm:$0xff]  }
 0x4e7   :  { %9923 = vmatpush1.bf16.msra.mxu0 %v15004_v59  ;;  %v15109_v59 = vld [vmem:[#allocation2 + $0x1e38] ss:$408 sps:$4 sm:$0xff]  }
 0x4e8   :  { %9964 = vmatpush1.bf16.msra.mxu1 %v15007_v62  ;;  %9924 = vmatprep.subr.bf16.mxu0 %v15012_v16 }
 0x4e9   :  { %9965 = vmatprep.subr.bf16.mxu1 %v15015_v2 }
 0x4eb   :  { %9925 = vmatpush1.bf16.msra.mxu0 %v15010_v6 }
 0x4ec   :  { %9966 = vmatpush1.bf16.msra.mxu1 %v15013_v15  ;;  %9926 = vmatprep.subr.bf16.mxu0 %v15018_v7  ;;  %v15064_v15 = vld [vmem:[#allocation2 + $0x7e0] ss:$408 sps:$4 sm:$0xff]  }
 0x4ed   :  { %9967 = vmatprep.subr.bf16.mxu1 %v15021_v8 }
 0x4ef   :  { %9927 = vmatpush1.bf16.msra.mxu0 %v15016_v38 }
 0x4f0   :  { %9968 = vmatpush1.bf16.msra.mxu1 %v15019_v13  ;;  %9928 = vmatprep.subr.bf16.mxu0 %v15024_v23  ;;  %v15067_v13 = vld [vmem:[#allocation2 + $0x7e8] ss:$408 sps:$4 sm:$0xff]  }
 0x4f1   :  { %9969 = vmatprep.subr.bf16.mxu1 %v15027_v11 }
 0x4f3   :  { %9929 = vmatpush1.bf16.msra.mxu0 %v15022_v19 }
 0x4f4   :  { %9970 = vmatpush1.bf16.msra.mxu1 %v15025_v18  ;;  %9930 = vmatprep.subr.bf16.mxu0 %v15030_v12  ;;  %v15072_v12 = vld [vmem:[#allocation2 + $0xb14] ss:$408 sps:$4 sm:$0xff]  }
 0x4f5   :  { %9971 = vmatprep.subr.bf16.mxu1 %v15033_v14  ;;  %v15075_v14 = vld [vmem:[#allocation2 + $0xb1c] ss:$408 sps:$4 sm:$0xff]  }
 0x4f7   :  { %9931 = vmatpush1.bf16.msra.mxu0 %v15028_v22 }
 0x4f8   :  { %9972 = vmatpush1.bf16.msra.mxu1 %v15031_v36  ;;  %9932 = vmatprep.subr.bf16.mxu0 %v15036_v17 }
 0x4f9   :  { %9973 = vmatprep.subr.bf16.mxu1 %v15039_v20 }
 0x4fb   :  { %9933 = vmatpush1.bf16.msra.mxu0 %v15034_v35 }
 0x4fc   :  { %9974 = vmatpush1.bf16.msra.mxu1 %v15037_v33  ;;  %9934 = vmatprep.subr.bf16.mxu0 %v15042_v21  ;;  %v15070_v33 = vld [vmem:[#allocation2 + $0xb10] ss:$408 sps:$4 sm:$0xff]  }
 0x4fd   :  { %9975 = vmatprep.subr.bf16.mxu1 %v15045_v26  ;;  %v15073_v21 = vld [vmem:[#allocation2 + $0xb18] ss:$408 sps:$4 sm:$0xff]  }
 0x4ff   :  { %9935 = vmatpush1.bf16.msra.mxu0 %v15040_v29 }
 0x500   :  { %9976 = vmatpush1.bf16.msra.mxu1 %v15043_v45  ;;  %9936 = vmatprep.subr.bf16.mxu0 %v15048_v24  ;;  %v15078_v45 = vld [vmem:[#allocation2 + $0xe44] ss:$408 sps:$4 sm:$0xff]  }
 0x501   :  { %9977 = vmatprep.subr.bf16.mxu1 %v15051_v40  ;;  %v15081_v24 = vld [vmem:[#allocation2 + $0xe4c] ss:$408 sps:$4 sm:$0xff]  }
 0x503   :  { %9937 = vmatpush1.bf16.msra.mxu0 %v15046_v39  ;;  %v15076_v39 = vld [vmem:[#allocation2 + $0xe40] ss:$408 sps:$4 sm:$0xff]  }
 0x504   :  { %9978 = vmatpush1.bf16.msra.mxu1 %v15049_v25  ;;  %9994 = vmatprep.subr.bf16.mxu0 %v15054_v30  ;;  %v15079_v25 = vld [vmem:[#allocation2 + $0xe48] ss:$408 sps:$4 sm:$0xff]   ;;  %v11555_v30 = vrot.slane %v11547_v61, %v15270_v43 }
 0x505   :  { %10035 = vmatprep.subr.bf16.mxu1 %v15057_v44  ;;  %v15091_v61 = vld [vmem:[#allocation2 + $0x14a8] ss:$408 sps:$4 sm:$0xff]  }
 0x506   :  { %9945 = vmatmul.mubr.bf16.vlgmr.msra.gmra.mrb[92].mxu0 %v15283_v63 }
 0x507   :  { %9986 = vmatmul.mubr.bf16.vlgmr.msra.gmra.mrb[92].mxu1 %v15283_v63  ;;  %9995 = vmatpush1.bf16.msra.mxu0 %v15052_v54  ;;  %v15084_v54 = vld [vmem:[#allocation2 + $0x1174] ss:$408 sps:$4 sm:$0xff]  }
 0x508   :  { %10036 = vmatpush1.bf16.msra.mxu1 %v15055_v37  ;;  %9996 = vmatprep.subr.bf16.mxu0 %v15060_v41  ;;  %v15087_v37 = vld [vmem:[#allocation2 + $0x117c] ss:$408 sps:$4 sm:$0xff]  }
 0x509   :  { %10037 = vmatprep.subr.bf16.mxu1 %v15063_v53  ;;  %v9618_v10 = vpop.f32.mrb[76].mxu0  ;;  %13120 = vmatprep.mubr.msk.bf16.mxu0 %vm8022_vm0, %v15276_v50  ;;  %v15082_v53 = vld [vmem:[#allocation2 + $0x1170] ss:$408 sps:$4 sm:$0xff]  }
 0x50a   :  { %v9659_v58 = vpop.f32.mrb[76].mxu1  ;;  %13121 = vmatprep.mubr.msk.bf16.mxu1 %vm8022_vm0, %v15276_v50  ;;  %v10219_v62 = vmax.f32 %v9618_v10, 0.0  ;;  %v9620_v2 = vpop.f32.mrb[77].mxu0 }
 0x50b   :  { %v10221_v16 = vmax.f32 %v9659_v58, 0.0  ;;  %v9661_v6 = vpop.f32.mrb[77].mxu1  ;;  %v10220_v7 = vmax.f32 %v9620_v2, 0.0  ;;  %v9622_v38 = vpop.f32.mrb[78].mxu0  ;;  %9997 = vmatpush1.bf16.msra.mxu0 %v15058_v47  ;;  %v15094_v47 = vld [vmem:[#allocation2 + $0x17d0] ss:$408 sps:$4 sm:$0xff]  }
 0x50c   :  { %v10222_v8 = vmax.f32 %v9661_v6, 0.0  ;;  %10038 = vmatpush1.bf16.msra.mxu1 %v15061_v49  ;;  %v9663_v23 = vpop.f32.mrb[78].mxu1  ;;  %v10844_v11 = vsel %vm16265_vm12, %v10219_v62, %v9618_v10  ;;  %v9623_v18 = vpop.f32.mrb[79].mxu0  ;;  %9998 = vmatprep.subr.bf16.mxu0 %v15066_v52  ;;  %v15097_v49 = vld [vmem:[#allocation2 + $0x17d8] ss:$408 sps:$4 sm:$0xff]  }
 0x50d   :  { %v10846_v19 = vsel %vm16269_vm13, %v10221_v16, %v9659_v58  ;;  %10039 = vmatprep.subr.bf16.mxu1 %v15069_v60  ;;  %v9664_v22 = vpop.f32.mrb[79].mxu1  ;;  %v10845_v36 = vsel %vm16273_vm14, %v10220_v7, %v9620_v2  ;;  %v15102_v52 = vld [vmem:[#allocation2 + $0x1b04] ss:$408 sps:$4 sm:$0xff]   ;;  %v15100_v10 = vld [vmem:[#allocation2 + $0x1b00] ss:$408 sps:$4 sm:$0xff]  }
 0x50e   :  { %v10847_v17 = vsel %vm16277_vm15, %v10222_v8, %v9661_v6  ;;  %v13161_v20 = vpack.c.bf16 %v10845_v36, %v10844_v11  ;;  %v15105_v60 = vld [vmem:[#allocation2 + $0x1b0c] ss:$408 sps:$4 sm:$0xff]   ;;  %v15112_v2 = vld [vmem:[#allocation2 + $0x2160] ss:$408 sps:$4 sm:$0xff]   ;;  %v15123_v7 = vld [vmem:[#allocation2 + $0x249c] ss:$408 sps:$4 sm:$0xff]  }
 0x50f   :  { %v13162_v35 = vpack.c.bf16 %v10847_v17, %v10846_v19  ;;  %9999 = vmatpush1.bf16.msra.mxu0 %v15064_v15  ;;  %v15108_v58 = vld [vmem:[#allocation2 + $0x1e34] ss:$408 sps:$4 sm:$0xff]   ;;  %v15114_v62 = vld [vmem:[#allocation2 + $0x2164] ss:$408 sps:$4 sm:$0xff]   ;;  %v15115_v6 = vld [vmem:[#allocation2 + $0x2168] ss:$408 sps:$4 sm:$0xff]  }
 0x510   :  { %10040 = vmatpush1.bf16.msra.mxu1 %v15067_v13  ;;  %v11539_v26 = vrot.slane %v13161_v20, %v15270_v43  ;;  %10000 = vmatprep.subr.bf16.mxu0 %v15072_v12  ;;  %v15117_v16 = vld [vmem:[#allocation2 + $0x216c] ss:$408 sps:$4 sm:$0xff]   ;;  %v15118_v8 = vld [vmem:[#allocation2 + $0x2490] ss:$408 sps:$4 sm:$0xff]   ;;  %v15124_v19 = vld [vmem:[#allocation2 + $0x27c0] ss:$408 sps:$4 sm:$0xff]  }
 0x511   :  { %v11546_v29 = vrot.slane %v13162_v35, %v15270_v43  ;;  %10041 = vmatprep.subr.bf16.mxu1 %v15075_v14  ;;  %v15120_v15 = vld [vmem:[#allocation2 + $0x2494] ss:$408 sps:$4 sm:$0xff]   ;;  %v15121_v38 = vld [vmem:[#allocation2 + $0x2498] ss:$408 sps:$4 sm:$0xff]   ;;  %v15126_v13 = vld [vmem:[#allocation2 + $0x27c4] ss:$408 sps:$4 sm:$0xff]  }
 0x512   :  { %v15129_v23 = vld [vmem:[#allocation2 + $0x27cc] ss:$408 sps:$4 sm:$0xff]   ;;  %v15127_v18 = vld [vmem:[#allocation2 + $0x27c8] ss:$408 sps:$4 sm:$0xff]  }
 0x513   :  { %v11548_v40 = vcombine.low %v11539_v26, %v11546_v29  ;;  %10001 = vmatpush1.bf16.msra.mxu0 %v15070_v33  ;;  %v10127_v11 = vld [vmem:[#allocation4 + $0x50] sm:$0xff]  ;;  %v15132_v12 = vld [vmem:[#allocation2 + $0x194] ss:$408 sps:$4 sm:$0xff]   ;;  %v15130_v22 = vld [vmem:[#allocation2 + $0x190] ss:$408 sps:$4 sm:$0xff]  }
 0x514   :  { %10042 = vmatpush1.bf16.msra.mxu1 %v15073_v21  ;;  %10002 = vmatprep.subr.bf16.mxu0 %v15078_v45  ;;  %vm10140_vm1 = vcmp.ne.f32.partialorder %v10127_v11, 0.0  ;;  %v15135_v36 = vld [vmem:[#allocation2 + $0x4c4] ss:$408 sps:$4 sm:$0xff]   ;;  %v15133_v21 = vld [vmem:[#allocation2 + $0x4c0] ss:$408 sps:$4 sm:$0xff]  }
 0x515   :  { %v11562_v44 = vrot.slane %v11548_v40, %v15270_v43  ;;  %10043 = vmatprep.subr.bf16.mxu1 %v15081_v24  ;;  %v16304_v14 = vsel %vm10140_vm1, 1, %v15222_v32  ;;  %v15138_v26 = vld [vmem:[#allocation2 + $0x7f4] ss:$408 sps:$4 sm:$0xff]  }
 0x516   :  { %v10581_v17 = vrot.slane %v16304_v14, %v15310_v27  ;;  %v10589_v20 = vrot.slane %v16304_v14, %v15313_v28  ;;  %v10585_v35 = vrot.slane %v16304_v14, %v15316_v31  ;;  %v10593_v33 = vrot.slane %v16304_v14, %v15322_v34  ;;  %v15168_v11 = vld [vmem:[#allocation2 + $0x27d4] ss:$408 sps:$4 sm:$0xff]  }
 0x517   :  { %v11563_v41 = vcombine.low %v11555_v30, %v11562_v44  ;;  %10003 = vmatpush1.bf16.msra.mxu0 %v15076_v39 }
 0x518   :  { %10044 = vmatpush1.bf16.msra.mxu1 %v15079_v25  ;;  %10004 = vmatprep.subr.bf16.mxu0 %v15084_v54  ;;  %vm10746_vm2 = vcmp.eq.s32.totalorder %v10581_v17, 1  ;;  %vm10748_vm3 = vcmp.eq.s32.totalorder %v10589_v20, 1  ;;  %vm10747_vm4 = vcmp.eq.s32.totalorder %v10585_v35, 1  ;;  %vm10749_vm5 = vcmp.eq.s32.totalorder %v10593_v33, 1 }
 0x519   :  { %11724 = vst [vmem:[%s16381_s3 + $0x48] sm:$0xff] %v11563_v41  ;;  %10045 = vmatprep.subr.bf16.mxu1 %v15087_v37  ;;  %v15136_v37 = vld [vmem:[#allocation2 + $0x7f0] ss:$408 sps:$4 sm:$0xff]  }
 0x51b   :  { %10005 = vmatpush1.bf16.msra.mxu0 %v15082_v53 }
 0x51c   :  { %10046 = vmatpush1.bf16.msra.mxu1 %v15085_v48  ;;  %10006 = vmatprep.subr.bf16.mxu0 %v15090_v42  ;;  %v15141_v42 = vld [vmem:[#allocation2 + $0xb24] ss:$408 sps:$4 sm:$0xff]  }
 0x51d   :  { %10047 = vmatprep.subr.bf16.mxu1 %v15093_v56 }
 0x51f   :  { %10007 = vmatpush1.bf16.msra.mxu0 %v15088_v51 }
 0x520   :  { %10048 = vmatpush1.bf16.msra.mxu1 %v15091_v61  ;;  %10008 = vmatprep.subr.bf16.mxu0 %v15096_v46 }
 0x521   :  { %10049 = vmatprep.subr.bf16.mxu1 %v15099_v57 }
 0x523   :  { %10009 = vmatpush1.bf16.msra.mxu0 %v15094_v47  ;;  %v15139_v47 = vld [vmem:[#allocation2 + $0xb20] ss:$408 sps:$4 sm:$0xff]  }
 0x524   :  { %10050 = vmatpush1.bf16.msra.mxu1 %v15097_v49  ;;  %10010 = vmatprep.subr.bf16.mxu0 %v15102_v52 }
 0x525   :  { %10051 = vmatprep.subr.bf16.mxu1 %v15105_v60  ;;  %v15144_v60 = vld [vmem:[#allocation2 + $0xe54] ss:$408 sps:$4 sm:$0xff]  }
 0x527   :  { %10011 = vmatpush1.bf16.msra.mxu0 %v15100_v10 }
 0x528   :  { %10052 = vmatpush1.bf16.msra.mxu1 %v15103_v55  ;;  %10012 = vmatprep.subr.bf16.mxu0 %v15108_v58  ;;  %v15142_v55 = vld [vmem:[#allocation2 + $0xe50] ss:$408 sps:$4 sm:$0xff]   ;;  %v15147_v58 = vld [vmem:[#allocation2 + $0x1184] ss:$408 sps:$4 sm:$0xff]  }
 0x529   :  { %10053 = vmatprep.subr.bf16.mxu1 %v15111_v9  ;;  %v15145_v9 = vld [vmem:[#allocation2 + $0x1180] ss:$408 sps:$4 sm:$0xff]  }
 0x52b   :  { %10013 = vmatpush1.bf16.msra.mxu0 %v15106_v3  ;;  %v15150_v3 = vld [vmem:[#allocation2 + $0x14b4] ss:$408 sps:$4 sm:$0xff]  }
 0x52c   :  { %10054 = vmatpush1.bf16.msra.mxu1 %v15109_v59  ;;  %10014 = vmatprep.subr.bf16.mxu0 %v15114_v62  ;;  %v15148_v59 = vld [vmem:[#allocation2 + $0x14b0] ss:$408 sps:$4 sm:$0xff]   ;;  %v15153_v62 = vld [vmem:[#allocation2 + $0x17e4] ss:$408 sps:$4 sm:$0xff]  }
 0x52d   :  { %10055 = vmatprep.subr.bf16.mxu1 %v15117_v16  ;;  %v15151_v16 = vld [vmem:[#allocation2 + $0x17e0] ss:$408 sps:$4 sm:$0xff]  }
 0x52f   :  { %10015 = vmatpush1.bf16.msra.mxu0 %v15112_v2  ;;  %v15156_v2 = vld [vmem:[#allocation2 + $0x1b14] ss:$408 sps:$4 sm:$0xff]  }
 0x530   :  { %10056 = vmatpush1.bf16.msra.mxu1 %v15115_v6  ;;  %10016 = vmatprep.subr.bf16.mxu0 %v15120_v15  ;;  %v15154_v6 = vld [vmem:[#allocation2 + $0x1b10] ss:$408 sps:$4 sm:$0xff]   ;;  %v15159_v15 = vld [vmem:[#allocation2 + $0x1e44] ss:$408 sps:$4 sm:$0xff]  }
 0x531   :  { %10057 = vmatprep.subr.bf16.mxu1 %v15123_v7  ;;  %v15157_v7 = vld [vmem:[#allocation2 + $0x1e40] ss:$408 sps:$4 sm:$0xff]  }
 0x533   :  { %10017 = vmatpush1.bf16.msra.mxu0 %v15118_v8  ;;  %v15162_v8 = vld [vmem:[#allocation2 + $0x2174] ss:$408 sps:$4 sm:$0xff]  }
 0x534   :  { %10058 = vmatpush1.bf16.msra.mxu1 %v15121_v38  ;;  %10018 = vmatprep.subr.bf16.mxu0 %v15126_v13  ;;  %v15160_v38 = vld [vmem:[#allocation2 + $0x2170] ss:$408 sps:$4 sm:$0xff]   ;;  %v15165_v13 = vld [vmem:[#allocation2 + $0x24a4] ss:$408 sps:$4 sm:$0xff]  }
 0x535   :  { %10059 = vmatprep.subr.bf16.mxu1 %v15129_v23  ;;  %v15163_v23 = vld [vmem:[#allocation2 + $0x24a0] ss:$408 sps:$4 sm:$0xff]  }
 0x537   :  { %10019 = vmatpush1.bf16.msra.mxu0 %v15124_v19  ;;  %v15166_v19 = vld [vmem:[#allocation2 + $0x27d0] ss:$408 sps:$4 sm:$0xff]  }
 0x538   :  { %10060 = vmatpush1.bf16.msra.mxu1 %v15127_v18  ;;  %10076 = vmatprep.subr.bf16.mxu0 %v15132_v12  ;;  %v10597_v18 = vrot.slane %v16304_v14, %v15371_v0  ;;  %v10605_v12 = vrot.slane %v16304_v14, %v15374_v1 }
 0x53a   :  { %10027 = vmatmul.mubr.bf16.vlgmr.msra.gmra.mrb[96].mxu0 %v15283_v63  ;;  %vm10752_vm6 = vcmp.eq.s32.totalorder %v10605_v12, 1 }
 0x53b   :  { %10068 = vmatmul.mubr.bf16.vlgmr.msra.gmra.mrb[96].mxu1 %v15283_v63  ;;  %10077 = vmatpush1.bf16.msra.mxu0 %v15130_v22  ;;  %v10601_v22 = vrot.slane %v16304_v14, %v15377_v4 }
 0x53c   :  { %13122 = vmatprep.mubr.msk.bf16.mxu0 %vm8022_vm0, %v15276_v50  ;;  %10078 = vmatprep.subr.bf16.mxu0 %v15135_v36  ;;  %v10609_v36 = vrot.slane %v16304_v14, %v15380_v5  ;;  %vm10750_vm0 = vcmp.eq.s32.totalorder %v10597_v18, 1 }
 0x53d   :  { %v9700_v29 = vpop.f32.mrb[80].mxu0  ;;  %vm10751_vm7 = vcmp.eq.s32.totalorder %v10601_v22, 1 }
 0x53e   :  { %v9741_v45 = vpop.f32.mrb[80].mxu1  ;;  %v10223_v24 = vmax.f32 %v9700_v29, 0.0  ;;  %v9702_v39 = vpop.f32.mrb[81].mxu0  ;;  %vm10753_vm8 = vcmp.eq.s32.totalorder %v10609_v36, 1 }
 0x53f   :  { %v10225_v40 = vmax.f32 %v9741_v45, 0.0  ;;  %v9743_v25 = vpop.f32.mrb[81].mxu1  ;;  %v10224_v30 = vmax.f32 %v9702_v39, 0.0  ;;  %v9704_v54 = vpop.f32.mrb[82].mxu0  ;;  %10079 = vmatpush1.bf16.msra.mxu0 %v15133_v21 }
 0x540   :  { %v10226_v44 = vmax.f32 %v9743_v25, 0.0  ;;  %v9745_v41 = vpop.f32.mrb[82].mxu1  ;;  %v10848_v53 = vsel %vm10746_vm2, %v10223_v24, %v9700_v29  ;;  %v9705_v48 = vpop.f32.mrb[83].mxu0  ;;  %10080 = vmatprep.subr.bf16.mxu0 %v15138_v26 }
 0x541   :  { %v10850_v50 = vsel %vm10748_vm3, %v10225_v40, %v9741_v45  ;;  %v9746_v56 = vpop.f32.mrb[83].mxu1  ;;  %v10849_v51 = vsel %vm10747_vm4, %v10224_v30, %v9702_v39 }
 0x542   :  { %v10851_v61 = vsel %vm10749_vm5, %v10226_v44, %v9743_v25  ;;  %v13163_v46 = vpack.c.bf16 %v10849_v51, %v10848_v53  ;;  %v10128_v51 = vld [vmem:[#allocation4 + $0x58] sm:$0xff] }
 0x543   :  { %v13164_v57 = vpack.c.bf16 %v10851_v61, %v10850_v50  ;;  %10081 = vmatpush1.bf16.msra.mxu0 %v15136_v37  ;;  %vm10141_vm9 = vcmp.ne.f32.partialorder %v10128_v51, 0.0 }
 0x544   :  { %v16319_v49 = vrot.slane %v13163_v46, %v15270_v43  ;;  %10082 = vmatprep.subr.bf16.mxu0 %v15141_v42  ;;  %v10256_v61 = vsel %vm10141_vm9, 1, %v15222_v32 }
 0x545   :  { %v16322_v52 = vrot.slane %v13164_v57, %v15270_v43  ;;  %v10613_v46 = vrot.slane %v10256_v61, %v15310_v27  ;;  %v10621_v57 = vrot.slane %v10256_v61, %v15313_v28  ;;  %v10629_v12 = vrot.slane %v10256_v61, %v15371_v0 }
 0x546   :  { %v10637_v22 = vrot.slane %v10256_v61, %v15374_v1  ;;  %v10633_v36 = vrot.slane %v10256_v61, %v15377_v4 }
 0x547   :  { %v11596_v10 = vcombine.low %v16319_v49, %v16322_v52  ;;  %10083 = vmatpush1.bf16.msra.mxu0 %v15139_v47  ;;  %v10617_v47 = vrot.slane %v10256_v61, %v15316_v31  ;;  %v10625_v49 = vrot.slane %v10256_v61, %v15322_v34  ;;  %vm10754_vm10 = vcmp.eq.s32.totalorder %v10613_v46, 1 }
 0x548   :  { %10084 = vmatprep.subr.bf16.mxu0 %v15144_v60  ;;  %vm10756_vm11 = vcmp.eq.s32.totalorder %v10621_v57, 1  ;;  %vm10758_vm14 = vcmp.eq.s32.totalorder %v10629_v12, 1  ;;  %vm10760_vm15 = vcmp.eq.s32.totalorder %v10637_v22, 1  ;;  %vm10759_vm1 = vcmp.eq.s32.totalorder %v10633_v36, 1 }
 0x549   :  { %v11604_v48 = vrot.slane %v11596_v10, %v15270_v43  ;;  %vm10755_vm12 = vcmp.eq.s32.totalorder %v10617_v47, 1  ;;  %vm10757_vm13 = vcmp.eq.s32.totalorder %v10625_v49, 1 }
 0x54b   :  { %10085 = vmatpush1.bf16.msra.mxu0 %v15142_v55 }
 0x54c   :  { %10086 = vmatprep.subr.bf16.mxu0 %v15147_v58 }
 0x54f   :  { %10087 = vmatpush1.bf16.msra.mxu0 %v15145_v9 }
 0x550   :  { %10088 = vmatprep.subr.bf16.mxu0 %v15150_v3 }
 0x553   :  { %10089 = vmatpush1.bf16.msra.mxu0 %v15148_v59 }
 0x554   :  { %10090 = vmatprep.subr.bf16.mxu0 %v15153_v62 }
 0x557   :  { %10091 = vmatpush1.bf16.msra.mxu0 %v15151_v16 }
 0x558   :  { %10092 = vmatprep.subr.bf16.mxu0 %v15156_v2 }
 0x55b   :  { %10093 = vmatpush1.bf16.msra.mxu0 %v15154_v6 }
 0x55c   :  { %10094 = vmatprep.subr.bf16.mxu0 %v15159_v15 }
 0x55f   :  { %10095 = vmatpush1.bf16.msra.mxu0 %v15157_v7 }
 0x560   :  { %10096 = vmatprep.subr.bf16.mxu0 %v15162_v8 }
 0x563   :  { %10097 = vmatpush1.bf16.msra.mxu0 %v15160_v38 }
 0x564   :  { %10098 = vmatprep.subr.bf16.mxu0 %v15165_v13 }
 0x567   :  { %10099 = vmatpush1.bf16.msra.mxu0 %v15163_v23 }
 0x568   :  { %10100 = vmatprep.subr.bf16.mxu0 %v15168_v11 }
 0x56b   :  { %10101 = vmatpush1.bf16.msra.mxu0 %v15166_v19 }
 0x56e   :  { %10109 = vmatmul.mubr.bf16.vlgmr.msra.gmra.mrb[100].mxu0 %v15283_v63 }
 0x571   :  { %v9782_v17 = vpop.f32.mrb[84].mxu0 }
 0x572   :  { %v9823_v20 = vpop.f32.mrb[84].mxu1  ;;  %v10227_v35 = vmax.f32 %v9782_v17, 0.0  ;;  %v9784_v21 = vpop.f32.mrb[85].mxu0 }
 0x573   :  { %v10229_v33 = vmax.f32 %v9823_v20, 0.0  ;;  %v9825_v26 = vpop.f32.mrb[85].mxu1  ;;  %v10228_v29 = vmax.f32 %v9784_v21, 0.0  ;;  %v9786_v24 = vpop.f32.mrb[86].mxu0 }
 0x574   :  { %v10230_v45 = vmax.f32 %v9825_v26, 0.0  ;;  %v9827_v63 = vpop.f32.mrb[86].mxu1  ;;  %v10852_v40 = vsel %vm10750_vm0, %v10227_v35, %v9782_v17  ;;  %v9787_v25 = vpop.f32.mrb[87].mxu0  ;;  %v10641_v17 = vrot.slane %v10256_v61, %v15380_v5 }
 0x575   :  { %v10854_v39 = vsel %vm10752_vm6, %v10229_v33, %v9823_v20  ;;  %v9828_v30 = vpop.f32.mrb[87].mxu1  ;;  %v10853_v44 = vsel %vm10751_vm7, %v10228_v29, %v9784_v21  ;;  %vm11727_vm7 = vcmask 1040384  }
 0x576   :  { %v10855_v14 = vsel %vm10753_vm8, %v10230_v45, %v9825_v26  ;;  %v13165_v54 = vpack.c.bf16 %v10853_v44, %v10852_v40  ;;  %vm10761_vm2 = vcmp.eq.s32.totalorder %v10641_v17, 1  ;;  %vm11728_vm8 = vcmask 1041409  }
 0x577   :  { %v13166_v37 = vpack.c.bf16 %v10855_v14, %v10854_v39  ;;  %vm11729_vm9 = vmor %vm11728_vm8, %vm11727_vm7 }
 0x578   :  { %v11588_v41 = vrot.slane %v13165_v54, %v15270_v43 }
 0x579   :  { %v11595_v53 = vrot.slane %v13166_v37, %v15270_v43 }
 0x57b   :  { %v11597_v50 = vcombine.low %v11588_v41, %v11595_v53 }
 0x57d   :  { %v11611_v42 = vrot.slane %v11597_v50, %v15270_v43 }
 0x57f   :  { %v11612_v56 = vcombine.low %v11604_v48, %v11611_v42 }
 0x581   :  { %11725 = vst [vmem:[%s16381_s3 + $0x50] sm:$0xff] %v11612_v56  ;;  %v10129_v56 = vld [vmem:[#allocation4 + $0x60] sm:$0x3f] }
 0x582   :  { %vm10142_vm3 = vcmp.ne.f32.partialorder %v10129_v56, 0.0 }
 0x583   :  { %v10257_v51 = vsel %vm10142_vm3, 1, %v15222_v32  ;;  %vm11736_vm3 = vcmask 62469  }
 0x584   :  { %v10645_v61 = vrot.slane %v10257_v51, %v15310_v27  ;;  %v10653_v46 = vrot.slane %v10257_v51, %v15313_v28  ;;  %v10649_v57 = vrot.slane %v10257_v51, %v15316_v31  ;;  %v10657_v47 = vrot.slane %v10257_v51, %v15322_v34 }
 0x586   :  { %vm10762_vm4 = vcmp.eq.s32.totalorder %v10645_v61, 1  ;;  %vm10764_vm5 = vcmp.eq.s32.totalorder %v10653_v46, 1  ;;  %vm10763_vm0 = vcmp.eq.s32.totalorder %v10649_v57, 1  ;;  %vm10765_vm6 = vcmp.eq.s32.totalorder %v10657_v47, 1 }
 0x5a5   :  { %v9864_v52 = vpop.f32.mrb[88].mxu0 }
 0x5a6   :  { %v9905_v60 = vpop.f32.mrb[88].mxu1  ;;  %v10231_v10 = vmax.f32 %v9864_v52, 0.0  ;;  %v9866_v58 = vpop.f32.mrb[89].mxu0 }
 0x5a7   :  { %v10233_v55 = vmax.f32 %v9905_v60, 0.0  ;;  %v9907_v9 = vpop.f32.mrb[89].mxu1  ;;  %v10232_v3 = vmax.f32 %v9866_v58, 0.0  ;;  %v9868_v62 = vpop.f32.mrb[90].mxu0 }
 0x5a8   :  { %v10234_v59 = vmax.f32 %v9907_v9, 0.0  ;;  %v9909_v16 = vpop.f32.mrb[90].mxu1  ;;  %v10856_v2 = vsel %vm10754_vm10, %v10231_v10, %v9864_v52  ;;  %v9869_v15 = vpop.f32.mrb[91].mxu0  ;;  %vm11730_vm10 = vcmask 1042434  }
 0x5a9   :  { %v10858_v6 = vsel %vm10756_vm11, %v10233_v55, %v9905_v60  ;;  %v9910_v7 = vpop.f32.mrb[91].mxu1  ;;  %v10857_v8 = vsel %vm10755_vm12, %v10232_v3, %v9866_v58 }
 0x5aa   :  { %v10859_v38 = vsel %vm10757_vm13, %v10234_v59, %v9907_v9  ;;  %v13167_v13 = vpack.c.bf16 %v10857_v8, %v10856_v2  ;;  %vm11731_vm13 = vmor %vm11730_vm10, %vm11729_vm9 }
 0x5ab   :  { %v13168_v23 = vpack.c.bf16 %v10859_v38, %v10858_v6  ;;  %v10661_v38 = vrot.slane %v10257_v51, %v15371_v0 }
 0x5ac   :  { %v11623_v11 = vrot.slane %v13167_v13, %v15270_v43  ;;  %v10665_v13 = vrot.slane %v10257_v51, %v15377_v4 }
 0x5ad   :  { %v11630_v19 = vrot.slane %v13168_v23, %v15270_v43  ;;  %vm10766_vm11 = vcmp.eq.s32.totalorder %v10661_v38, 1 }
 0x5ae   :  { %vm10767_vm12 = vcmp.eq.s32.totalorder %v10665_v13, 1 }
 0x5af   :  { %v11645_v18 = vcombine.low %v11623_v11, %v11630_v19 }
 0x5b1   :  { %v11653_v50 = vrot.slane %v11645_v18, %v15270_v43 }
 0x5d9   :  { %v9946_v20 = vpop.f32.mrb[92].mxu0 }
 0x5da   :  { %v9987_v35 = vpop.f32.mrb[92].mxu1  ;;  %v10235_v33 = vmax.f32 %v9946_v20, 0.0  ;;  %v9948_v26 = vpop.f32.mrb[93].mxu0 }
 0x5db   :  { %v10237_v21 = vmax.f32 %v9987_v35, 0.0  ;;  %v9989_v29 = vpop.f32.mrb[93].mxu1  ;;  %v10236_v45 = vmax.f32 %v9948_v26, 0.0  ;;  %v9950_v63 = vpop.f32.mrb[94].mxu0 }
 0x5dc   :  { %v10238_v24 = vmax.f32 %v9989_v29, 0.0  ;;  %v9991_v40 = vpop.f32.mrb[94].mxu1  ;;  %v10860_v39 = vsel %vm10758_vm14, %v10235_v33, %v9946_v20  ;;  %v9951_v25 = vpop.f32.mrb[95].mxu0  ;;  %vm11732_vm14 = vcmask 1043459  }
 0x5dd   :  { %v10862_v1 = vsel %vm10760_vm15, %v10237_v21, %v9987_v35  ;;  %v9992_v30 = vpop.f32.mrb[95].mxu1  ;;  %v10861_v44 = vsel %vm10759_vm1, %v10236_v45, %v9948_v26  ;;  %vm11733_vm15 = vmor %vm11732_vm14, %vm11731_vm13  ;;  %vm11734_vm1 = vcmask 1044484  }
 0x5de   :  { %v10863_v5 = vsel %vm10761_vm2, %v10238_v24, %v9989_v29  ;;  %v13169_v14 = vpack.c.bf16 %v10861_v44, %v10860_v39  ;;  %vm11735_vm2 = vmor %vm11734_vm1, %vm11733_vm15 }
 0x5df   :  { %v13170_v54 = vpack.c.bf16 %v10863_v5, %v10862_v1 }
 0x5e0   :  { %v11637_v37 = vrot.slane %v13169_v14, %v15270_v43 }
 0x5e1   :  { %v11644_v41 = vrot.slane %v13170_v54, %v15270_v43 }
 0x5e3   :  { %v11646_v53 = vcombine.low %v11637_v37, %v11644_v41 }
 0x5e5   :  { %v11660_v48 = vrot.slane %v11646_v53, %v15270_v43 }
 0x5e7   :  { %v11661_v42 = vcombine.low %v11653_v50, %v11660_v48 }
 0x5e9   :  { %11726 = vst [vmem:[%s16381_s3 + $0x58] sm:$0xff] %v11661_v42 }
 0x60d   :  { %v10028_v49 = vpop.f32.mrb[96].mxu0 }
 0x60e   :  { %v10069_v52 = vpop.f32.mrb[96].mxu1  ;;  %v10239_v60 = vmax.f32 %v10028_v49, 0.0  ;;  %v10030_v55 = vpop.f32.mrb[97].mxu0 }
 0x60f   :  { %v10241_v10 = vmax.f32 %v10069_v52, 0.0  ;;  %v10071_v58 = vpop.f32.mrb[97].mxu1  ;;  %v10240_v9 = vmax.f32 %v10030_v55, 0.0  ;;  %v10032_v3 = vpop.f32.mrb[98].mxu0 }
 0x610   :  { %v10242_v32 = vmax.f32 %v10071_v58, 0.0  ;;  %v10073_v27 = vpop.f32.mrb[98].mxu1  ;;  %v10864_v59 = vsel %vm10762_vm4, %v10239_v60, %v10028_v49  ;;  %v10033_v62 = vpop.f32.mrb[99].mxu0  ;;  %vm11737_vm4 = vmor %vm11736_vm3, %vm11735_vm2 }
 0x611   :  { %v10866_v28 = vsel %vm10764_vm5, %v10241_v10, %v10069_v52  ;;  %v10074_v31 = vpop.f32.mrb[99].mxu1  ;;  %v10865_v16 = vsel %vm10763_vm0, %v10240_v9, %v10030_v55 }
 0x612   :  { %v10867_v34 = vsel %vm10765_vm6, %v10242_v32, %v10071_v58  ;;  %v13171_v2 = vpack.c.bf16 %v10865_v16, %v10864_v59 }
 0x613   :  { %v13172_v6 = vpack.c.bf16 %v10867_v34, %v10866_v28 }
 0x614   :  { %v11671_v15 = vrot.slane %v13171_v2, %v15270_v43 }
 0x615   :  { %v11678_v7 = vrot.slane %v13172_v6, %v15270_v43 }
 0x617   :  { %v11686_v8 = vcombine.low %v11671_v15, %v11678_v7 }
 0x619   :  { %v11693_v4 = vrot.slane %v11686_v8, %v15270_v43 }
 0x641   :  { %v10110_v23 = vpop.f32.mrb[100].mxu0 }
 0x642   :  { %v10243_v11 = vmax.f32 %v10110_v23, 0.0  ;;  %v10112_v19 = vpop.f32.mrb[101].mxu0 }
 0x643   :  { %v10244_v18 = vmax.f32 %v10112_v19, 0.0  ;;  %v10114_v12 = vpop.f32.mrb[102].mxu0 }
 0x644   :  { %v10868_v22 = vsel %vm10766_vm11, %v10243_v11, %v10110_v23  ;;  %v10115_v36 = vpop.f32.mrb[103].mxu0 }
 0x645   :  { %v10869_v17 = vsel %vm10767_vm12, %v10244_v18, %v10112_v19 }
 0x646   :  { %v13173_v20 = vpack.c.bf16 %v10869_v17, %v10868_v22 }
 0x648   :  { %v11685_v0 = vrot.slane %v13173_v20, %v15270_v43 }
 0x64a   :  { %v11700_v35 = vrot.slane %v11685_v0, %v15270_v43 }
 0x64c   :  { %v11701_v33 = vcombine.low %v11693_v4, %v11700_v35 }
 0x64e   :  { %11738 = vst.msk [vmem:[%s16381_s3 + $0x60] sm:$0x3f] %vm11737_vm4, %v11701_v33 }
 0x64f   :  { %11743 = vsyncpa [#allocation3], 1 }
 0x650   :  { %11744 = vsyncpa [#allocation5], 1 }

// kernel: cgan_generator_forward.7
= control target key start
LH: loop header
LB: loop body
LE: loop exit
PB: predicated region body
PF: predicated region fallthrough
CT: control target
= control target key end

     0   :  { %v3145_v0 = vmov 0   ;;  %v3146_v40 = vmov 0.0   ;;  %vm3147_vm0 = vmmov 0   ;;  %vm1064_vm1 = vcmask 523264   ;;  %s4105_s1 = inlined_call_operand.vmem [shape: bf16[576,4], index: 1, kind: input, shape index: {}]   ;;  %s4106_s0 = inlined_call_operand.vmem [shape: bf16[392,576], index: 0, kind: input, shape index: {}]   ;;  %s4107_s2 = inlined_call_operand.vmem [shape: f32[392,4], index: 2, kind: output, shape index: {}]  }
   0x1   :  { %1140 = vmatprep.subr.bf16.mxu1 %v3145_v0  ;;  %1372 = vmatprep.subr.bf16.mxu0 %v3145_v0  ;;  %v2740_v1 = vld [vmem:[%s4105_s1] sm:$0xff]   ;;  %v2742_v3 = vld [vmem:[%s4105_s1 + $0x8] sm:$0xff]   ;;  %v2744_v5 = vld [vmem:[%s4105_s1 + $0x10] sm:$0xff]   ;;  %vm2130_vm2 = vcmask 31744  }
   0x2   :  { %v3171_v2 = vld [vmem:[%s4105_s1 + $0x80] sm:$0xff]   ;;  %1141 = vmatpush1.bf16.msra.mxu1 %v2740_v1  ;;  %v3181_v4 = vld [vmem:[%s4105_s1 + $0x88] sm:$0xff]   ;;  %v3192_v6 = vld [vmem:[%s4105_s1 + $0x90] sm:$0xff]  }
   0x3   :  { %1373 = vmatpush1.bf16.msra.mxu0 %v3171_v2  ;;  %1142 = vmatprep.subr.bf16.mxu1 %v3145_v0  ;;  %v2746_v7 = vld [vmem:[%s4105_s1 + $0x18] sm:$0xff]   ;;  %v2748_v9 = vld [vmem:[%s4105_s1 + $0x20] sm:$0xff]   ;;  %v2750_v11 = vld [vmem:[%s4105_s1 + $0x28] sm:$0xff]  }
   0x4   :  { %1374 = vmatprep.subr.bf16.mxu0 %v3145_v0  ;;  %v3203_v8 = vld [vmem:[%s4105_s1 + $0x98] sm:$0xff]   ;;  %v3214_v10 = vld [vmem:[%s4105_s1 + $0xa0] sm:$0xff]   ;;  %v3225_v12 = vld [vmem:[%s4105_s1 + $0xa8] sm:$0xff]  }
   0x5   :  { %v2752_v13 = vld [vmem:[%s4105_s1 + $0x30] sm:$0xff]   ;;  %v2754_v15 = vld [vmem:[%s4105_s1 + $0x38] sm:$0xff]   ;;  %v2756_v17 = vld [vmem:[%s4105_s1 + $0x40] sm:$0xff]  }
   0x6   :  { %1143 = vmatpush1.bf16.msra.mxu1 %v2742_v3  ;;  %v3236_v14 = vld [vmem:[%s4105_s1 + $0xb0] sm:$0xff]   ;;  %v3247_v16 = vld [vmem:[%s4105_s1 + $0xb8] sm:$0xff]   ;;  %v3258_v18 = vld [vmem:[%s4105_s1 + $0xc0] sm:$0xff]  }
   0x7   :  { %1375 = vmatpush1.bf16.msra.mxu0 %v3181_v4  ;;  %1144 = vmatprep.subr.bf16.mxu1 %v3145_v0  ;;  %v2774_v19 = vld [vmem:[%s4106_s0 + $0x4] ss:$20 sps:$4 sm:$0xff]   ;;  %v2758_v20 = vld [vmem:[%s4105_s1 + $0x48] sm:$0xff]   ;;  %v2760_v23 = vld [vmem:[%s4105_s1 + $0x50] sm:$0xff]  }
   0x8   :  { %1376 = vmatprep.subr.bf16.mxu0 %v3145_v0  ;;  %v2777_v21 = vld [vmem:[%s4106_s0 + $0xc] ss:$20 sps:$4 sm:$0xff]   ;;  %1172 = vmatprep.mubr.bf16.mxu1 %v2774_v19  ;;  %v3286_v24 = vld [vmem:[%s4105_s1 + $0xd0] sm:$0xff]   ;;  %v2762_v25 = vld [vmem:[%s4105_s1 + $0x58] sm:$0xff]  }
   0x9   :  { %v3275_v22 = vld [vmem:[%s4105_s1 + $0xc8] sm:$0xff]   ;;  %1404 = vmatprep.mubr.bf16.mxu0 %v2777_v21  ;;  %v3297_v26 = vld [vmem:[%s4105_s1 + $0xd8] sm:$0xff]   ;;  %v2764_v27 = vld [vmem:[%s4105_s1 + $0x60] sm:$0xff]  }
   0xa   :  { %1145 = vmatpush1.bf16.msra.mxu1 %v2744_v5  ;;  %v3308_v28 = vld [vmem:[%s4105_s1 + $0xe0] sm:$0xff]   ;;  %v2766_v29 = vld [vmem:[%s4105_s1 + $0x68] sm:$0xff]   ;;  %v2768_v31 = vld [vmem:[%s4105_s1 + $0x70] sm:$0xff]  }
   0xb   :  { %1377 = vmatpush1.bf16.msra.mxu0 %v3192_v6  ;;  %1146 = vmatprep.subr.bf16.mxu1 %v3145_v0  ;;  %v3319_v30 = vld [vmem:[%s4105_s1 + $0xe8] sm:$0xff]   ;;  %v3330_v32 = vld [vmem:[%s4105_s1 + $0xf0] sm:$0xff]   ;;  %v2770_v33 = vld [vmem:[%s4105_s1 + $0x78] sm:$0xff]  }
   0xc   :  { %1378 = vmatprep.subr.bf16.mxu0 %v3145_v0  ;;  %v3341_v34 = vld [vmem:[%s4105_s1 + $0xf8] sm:$0xff]   ;;  %v2772_v35 = vld [vmem:[%s4106_s0] ss:$20 sps:$4 sm:$0xff]   ;;  %v2797_v41 = vld [vmem:[%s4105_s1 + $0x108] sm:$0xff]  }
   0xd   :  { %v2775_v36 = vld [vmem:[%s4106_s0 + $0x8] ss:$20 sps:$4 sm:$0xff]   ;;  %v2778_v37 = vld [vmem:[%s4105_s1 + $0x100] sm:$0xff]   ;;  %v2816_v46 = vld [vmem:[%s4105_s1 + $0x110] sm:$0xff]  }
   0xe   :  { %1147 = vmatpush1.bf16.msra.mxu1 %v2746_v7  ;;  %v2779_v38 = vld [vmem:[%s4106_s0 + $0x2c] ss:$20 sps:$4 sm:$0xff]   ;;  %v2781_v39 = vld [vmem:[%s4106_s0 + $0x34] ss:$20 sps:$4 sm:$0xff]   ;;  %v2784_v43 = vld [vmem:[%s4106_s0 + $0x30] ss:$20 sps:$4 sm:$0xff]  }
   0xf   :  { %1379 = vmatpush1.bf16.msra.mxu0 %v3203_v8  ;;  %1148 = vmatprep.subr.bf16.mxu1 %v3145_v0  ;;  %v2783_v42 = vld [vmem:[%s4106_s0 + $0x28] ss:$20 sps:$4 sm:$0xff]   ;;  %v2789_v48 = vld [vmem:[%s4106_s0 + $0x50] ss:$20 sps:$4 sm:$0xff]   ;;  %v2790_v49 = vld [vmem:[%s4106_s0 + $0x58] ss:$20 sps:$4 sm:$0xff]  }
  0x10   :  { %1380 = vmatprep.subr.bf16.mxu0 %v3145_v0  ;;  %v2785_v44 = vld [vmem:[%s4106_s0 + $0x54] ss:$20 sps:$4 sm:$0xff]   ;;  %v2787_v45 = vld [vmem:[%s4106_s0 + $0x5c] ss:$20 sps:$4 sm:$0xff]   ;;  %v2793_v51 = vld [vmem:[%s4106_s0 + $0x84] ss:$20 sps:$4 sm:$0xff]  }
  0x11   :  { %v2839_v47 = vld [vmem:[%s4105_s1 + $0x118] sm:$0xff]   ;;  %v2796_v53 = vld [vmem:[%s4106_s0 + $0x80] ss:$20 sps:$4 sm:$0xff]   ;;  %v2809_v61 = vld [vmem:[%s4106_s0 + $0xd0] ss:$20 sps:$4 sm:$0xff]  }
  0x12   :  { %1149 = vmatpush1.bf16.msra.mxu1 %v2748_v9  ;;  %v2791_v50 = vld [vmem:[%s4106_s0 + $0x7c] ss:$20 sps:$4 sm:$0xff]   ;;  %v2795_v52 = vld [vmem:[%s4106_s0 + $0x78] ss:$20 sps:$4 sm:$0xff]   ;;  %v2802_v56 = vld [vmem:[%s4106_s0 + $0xa0] ss:$20 sps:$4 sm:$0xff]  }
  0x13   :  { %1381 = vmatpush1.bf16.msra.mxu0 %v3214_v10  ;;  %1150 = vmatprep.subr.bf16.mxu1 %v3145_v0  ;;  %v2798_v54 = vld [vmem:[%s4106_s0 + $0xa4] ss:$20 sps:$4 sm:$0xff]   ;;  %v2800_v55 = vld [vmem:[%s4106_s0 + $0xac] ss:$20 sps:$4 sm:$0xff]   ;;  %v2803_v57 = vld [vmem:[%s4106_s0 + $0xa8] ss:$20 sps:$4 sm:$0xff]  }
  0x14   :  { %1382 = vmatprep.subr.bf16.mxu0 %v3145_v0  ;;  %v2804_v58 = vld [vmem:[%s4106_s0 + $0xcc] ss:$20 sps:$4 sm:$0xff]   ;;  %v2806_v59 = vld [vmem:[%s4106_s0 + $0xd4] ss:$20 sps:$4 sm:$0xff]   ;;  %v2812_v63 = vld [vmem:[%s4106_s0 + $0xfc] ss:$20 sps:$4 sm:$0xff]  }
  0x15   :  { %v2808_v60 = vld [vmem:[%s4106_s0 + $0xc8] ss:$20 sps:$4 sm:$0xff]   ;;  %v2814_v1 = vld [vmem:[%s4106_s0 + $0xf0] ss:$20 sps:$4 sm:$0xff]   ;;  %v2821_v5 = vld [vmem:[%s4106_s0 + $0x118] ss:$20 sps:$4 sm:$0xff]  }
  0x16   :  { %1151 = vmatpush1.bf16.msra.mxu1 %v2750_v11  ;;  %v2810_v62 = vld [vmem:[%s4106_s0 + $0xf4] ss:$20 sps:$4 sm:$0xff]   ;;  %v2817_v3 = vld [vmem:[%s4106_s0 + $0x11c] ss:$20 sps:$4 sm:$0xff]   ;;  %v2823_v7 = vld [vmem:[%s4106_s0 + $0x144] ss:$20 sps:$4 sm:$0xff]  }
  0x17   :  { %1383 = vmatpush1.bf16.msra.mxu0 %v3225_v12  ;;  %1152 = vmatprep.subr.bf16.mxu1 %v3145_v0  ;;  %v2827_v9 = vld [vmem:[%s4106_s0 + $0x140] ss:$20 sps:$4 sm:$0xff]   ;;  %v2844_v19 = vld [vmem:[%s4106_s0 + $0x1c4] ss:$20 sps:$4 sm:$0xff]  }
  0x18   :  { %1384 = vmatprep.subr.bf16.mxu0 %v3145_v0  ;;  %v2829_v11 = vld [vmem:[%s4106_s0 + $0x16c] ss:$20 sps:$4 sm:$0xff]  }
  0x19   :  { %v2847_v21 = vld [vmem:[%s4106_s0 + $0x1c0] ss:$20 sps:$4 sm:$0xff]  }
  0x1a   :  { %1153 = vmatpush1.bf16.msra.mxu1 %v2752_v13  ;;  %v2834_v13 = vld [vmem:[%s4106_s0 + $0x170] ss:$20 sps:$4 sm:$0xff]  }
  0x1b   :  { %1385 = vmatpush1.bf16.msra.mxu0 %v3236_v14  ;;  %1154 = vmatprep.subr.bf16.mxu1 %v3145_v0 }
  0x1c   :  { %1386 = vmatprep.subr.bf16.mxu0 %v3145_v0 }
  0x1e   :  { %1155 = vmatpush1.bf16.msra.mxu1 %v2754_v15  ;;  %v2837_v15 = vld [vmem:[%s4106_s0 + $0x19c] ss:$20 sps:$4 sm:$0xff]  }
  0x1f   :  { %1387 = vmatpush1.bf16.msra.mxu0 %v3247_v16  ;;  %1156 = vmatprep.subr.bf16.mxu1 %v3145_v0 }
  0x20   :  { %1388 = vmatprep.subr.bf16.mxu0 %v3145_v0 }
  0x22   :  { %1157 = vmatpush1.bf16.msra.mxu1 %v2756_v17  ;;  %v2841_v17 = vld [vmem:[%s4106_s0 + $0x198] ss:$20 sps:$4 sm:$0xff]  }
  0x23   :  { %1389 = vmatpush1.bf16.msra.mxu0 %v3258_v18  ;;  %1158 = vmatprep.subr.bf16.mxu1 %v3145_v0 }
  0x24   :  { %1390 = vmatprep.subr.bf16.mxu0 %v3145_v0 }
  0x26   :  { %1159 = vmatpush1.bf16.msra.mxu1 %v2758_v20  ;;  %v2846_v20 = vld [vmem:[%s4106_s0 + $0x1b8] ss:$20 sps:$4 sm:$0xff]  }
  0x27   :  { %1391 = vmatpush1.bf16.msra.mxu0 %v3275_v22  ;;  %1160 = vmatprep.subr.bf16.mxu1 %v3145_v0 }
  0x28   :  { %1392 = vmatprep.subr.bf16.mxu0 %v3145_v0 }
  0x2a   :  { %1161 = vmatpush1.bf16.msra.mxu1 %v2760_v23  ;;  %v2850_v23 = vld [vmem:[%s4106_s0 + $0x1ec] ss:$20 sps:$4 sm:$0xff]  }
  0x2b   :  { %1393 = vmatpush1.bf16.msra.mxu0 %v3286_v24  ;;  %1162 = vmatprep.subr.bf16.mxu1 %v3145_v0 }
  0x2c   :  { %1394 = vmatprep.subr.bf16.mxu0 %v3145_v0 }
  0x2e   :  { %1163 = vmatpush1.bf16.msra.mxu1 %v2762_v25  ;;  %v2853_v25 = vld [vmem:[%s4106_s0 + $0x1e8] ss:$20 sps:$4 sm:$0xff]  }
  0x2f   :  { %1395 = vmatpush1.bf16.msra.mxu0 %v3297_v26  ;;  %1164 = vmatprep.subr.bf16.mxu1 %v3145_v0 }
  0x30   :  { %1396 = vmatprep.subr.bf16.mxu0 %v3145_v0 }
  0x32   :  { %1165 = vmatpush1.bf16.msra.mxu1 %v2764_v27  ;;  %v2856_v27 = vld [vmem:[%s4106_s0 + $0x208] ss:$20 sps:$4 sm:$0xff]  }
  0x33   :  { %1397 = vmatpush1.bf16.msra.mxu0 %v3308_v28  ;;  %1166 = vmatprep.subr.bf16.mxu1 %v3145_v0 }
  0x34   :  { %1398 = vmatprep.subr.bf16.mxu0 %v3145_v0 }
  0x36   :  { %1167 = vmatpush1.bf16.msra.mxu1 %v2766_v29  ;;  %v2858_v29 = vld [vmem:[%s4106_s0 + $0x234] ss:$20 sps:$4 sm:$0xff]  }
  0x37   :  { %1399 = vmatpush1.bf16.msra.mxu0 %v3319_v30  ;;  %1168 = vmatprep.subr.bf16.mxu1 %v3145_v0 }
  0x38   :  { %1400 = vmatprep.subr.bf16.mxu0 %v3145_v0 }
  0x3a   :  { %1169 = vmatpush1.bf16.msra.mxu1 %v2768_v31  ;;  %v2861_v31 = vld [vmem:[%s4106_s0 + $0x38] ss:$20 sps:$4 sm:$0xff]  }
  0x3b   :  { %1401 = vmatpush1.bf16.msra.mxu0 %v3330_v32  ;;  %1170 = vmatprep.subr.bf16.mxu1 %v3145_v0 }
  0x3c   :  { %1402 = vmatprep.subr.bf16.mxu0 %v3145_v0 }
  0x3e   :  { %1171 = vmatpush1.bf16.msra.mxu1 %v2770_v33  ;;  %v2864_v33 = vld [vmem:[%s4106_s0 + $0x258] ss:$20 sps:$4 sm:$0xff]  }
  0x3f   :  { %1403 = vmatpush1.bf16.msra.mxu0 %v3341_v34  ;;  %2556 = vmatprep.subr.bf16.mxu1 %v3145_v0 }
  0x40   :  { %2448 = vmatprep.subr.bf16.mxu0 %v3146_v40 }
  0x41   :  { %1173 = vmatmul.mubr.bf16.vlgmr.msra.gmra.mrb[0].mxu1 %v2772_v35  ;;  %v2866_v35 = vld [vmem:[%s4106_s0 + $0x284] ss:$20 sps:$4 sm:$0xff]  }
  0x42   :  { %1405 = vmatmul.mubr.bf16.vlgmr.msra.gmra.mrb[0].mxu0 %v2775_v36  ;;  %1180 = vmatprep.mubr.bf16.mxu1 %v2779_v38  ;;  %v2868_v36 = vld [vmem:[%s4106_s0 + $0x280] ss:$20 sps:$4 sm:$0xff]  }
  0x43   :  { %2449 = vmatpush3.bf16.msra.mxu0 %v2778_v37  ;;  %1412 = vmatprep.mubr.bf16.mxu0 %v2781_v39  ;;  %v2869_v37 = vld [vmem:[%s4106_s0 + $0x88] ss:$20 sps:$4 sm:$0xff]   ;;  %v2870_v38 = vld [vmem:[%s4106_s0 + $0x2ac] ss:$20 sps:$4 sm:$0xff]  }
  0x44   :  { %2572 = vmatpush1.bf16.msra.mxu1 %v3171_v2  ;;  %2450 = vmatprep.subr.bf16.mxu0 %v3146_v40  ;;  %v2815_v2 = vld [vmem:[%s4106_s0 + $0xf8] ss:$20 sps:$4 sm:$0xff]   ;;  %v2872_v39 = vld [vmem:[%s4106_s0 + $0x2a8] ss:$20 sps:$4 sm:$0xff]  }
  0x45   :  { %2557 = vmatprep.subr.bf16.mxu1 %v3145_v0 }
  0x47   :  { %2451 = vmatpush3.bf16.msra.mxu0 %v2797_v41  ;;  %v2873_v41 = vld [vmem:[%s4106_s0 + $0xb0] ss:$20 sps:$4 sm:$0xff]  }
  0x48   :  { %2573 = vmatpush1.bf16.msra.mxu1 %v3181_v4  ;;  %2452 = vmatprep.subr.bf16.mxu0 %v3146_v40  ;;  %v2819_v4 = vld [vmem:[%s4106_s0 + $0x124] ss:$20 sps:$4 sm:$0xff]  }
  0x49   :  { %1181 = vmatmul.mubr.bf16.gmra.mrb[4].mxu1 %v2783_v42  ;;  %2558 = vmatprep.subr.bf16.mxu1 %v3145_v0  ;;  %v2874_v42 = vld [vmem:[%s4106_s0 + $0x2d4] ss:$20 sps:$4 sm:$0xff]  }
  0x4a   :  { %1413 = vmatmul.mubr.bf16.gmra.mrb[4].mxu0 %v2784_v43  ;;  %1188 = vmatprep.mubr.bf16.mxu1 %v2785_v44  ;;  %v2876_v43 = vld [vmem:[%s4106_s0 + $0x2d0] ss:$20 sps:$4 sm:$0xff]   ;;  %v2877_v44 = vld [vmem:[%s4106_s0 + $0xd8] ss:$20 sps:$4 sm:$0xff]  }
  0x4b   :  { %1420 = vmatprep.mubr.bf16.mxu0 %v2787_v45  ;;  %2453 = vmatpush3.bf16.msra.mxu0 %v2816_v46  ;;  %v2878_v45 = vld [vmem:[%s4106_s0 + $0x2fc] ss:$20 sps:$4 sm:$0xff]   ;;  %v2880_v46 = vld [vmem:[%s4106_s0 + $0x2f8] ss:$20 sps:$4 sm:$0xff]  }
  0x4c   :  { %2574 = vmatpush1.bf16.msra.mxu1 %v3192_v6  ;;  %2454 = vmatprep.subr.bf16.mxu0 %v3146_v40  ;;  %v2822_v6 = vld [vmem:[%s4106_s0 + $0x120] ss:$20 sps:$4 sm:$0xff]  }
  0x4d   :  { %2559 = vmatprep.subr.bf16.mxu1 %v3145_v0 }
  0x4f   :  { %2455 = vmatpush3.bf16.msra.mxu0 %v2839_v47  ;;  %v2881_v47 = vld [vmem:[%s4106_s0 + $0x100] ss:$20 sps:$4 sm:$0xff]  }
  0x50   :  { %2575 = vmatpush1.bf16.msra.mxu1 %v3203_v8  ;;  %v2825_v8 = vld [vmem:[%s4106_s0 + $0x14c] ss:$20 sps:$4 sm:$0xff]  }
  0x51   :  { %1189 = vmatmul.mubr.bf16.gmra.mrb[8].mxu1 %v2789_v48  ;;  %2560 = vmatprep.subr.bf16.mxu1 %v3145_v0  ;;  %v2882_v48 = vld [vmem:[%s4106_s0 + $0x324] ss:$20 sps:$4 sm:$0xff]  }
  0x52   :  { %1421 = vmatmul.mubr.bf16.gmra.mrb[8].mxu0 %v2790_v49  ;;  %1196 = vmatprep.mubr.bf16.mxu1 %v2791_v50  ;;  %v2884_v49 = vld [vmem:[%s4106_s0 + $0x320] ss:$20 sps:$4 sm:$0xff]   ;;  %v2885_v50 = vld [vmem:[%s4106_s0 + $0x128] ss:$20 sps:$4 sm:$0xff]  }
  0x53   :  { %1428 = vmatprep.mubr.bf16.mxu0 %v2793_v51  ;;  %v2886_v51 = vld [vmem:[%s4106_s0 + $0x34c] ss:$20 sps:$4 sm:$0xff]  }
  0x54   :  { %2576 = vmatpush1.bf16.msra.mxu1 %v3214_v10  ;;  %v2828_v10 = vld [vmem:[%s4106_s0 + $0x148] ss:$20 sps:$4 sm:$0xff]  }
  0x55   :  { %2561 = vmatprep.subr.bf16.mxu1 %v3145_v0 }
  0x58   :  { %2577 = vmatpush1.bf16.msra.mxu1 %v3225_v12  ;;  %v2831_v12 = vld [vmem:[%s4106_s0 + $0x174] ss:$20 sps:$4 sm:$0xff]  }
  0x59   :  { %1197 = vmatmul.mubr.bf16.gmra.mrb[12].mxu1 %v2795_v52  ;;  %2562 = vmatprep.subr.bf16.mxu1 %v3145_v0  ;;  %v2888_v52 = vld [vmem:[%s4106_s0 + $0x348] ss:$20 sps:$4 sm:$0xff]  }
  0x5a   :  { %1429 = vmatmul.mubr.bf16.gmra.mrb[12].mxu0 %v2796_v53  ;;  %1204 = vmatprep.mubr.bf16.mxu1 %v2798_v54  ;;  %v2889_v53 = vld [vmem:[%s4106_s0 + $0x150] ss:$20 sps:$4 sm:$0xff]   ;;  %v2890_v54 = vld [vmem:[%s4106_s0 + $0x374] ss:$20 sps:$4 sm:$0xff]  }
  0x5b   :  { %1436 = vmatprep.mubr.bf16.mxu0 %v2800_v55  ;;  %v2892_v55 = vld [vmem:[%s4106_s0 + $0x370] ss:$20 sps:$4 sm:$0xff]  }
  0x5c   :  { %2578 = vmatpush1.bf16.msra.mxu1 %v3236_v14  ;;  %v2835_v14 = vld [vmem:[%s4106_s0 + $0x194] ss:$20 sps:$4 sm:$0xff]  }
  0x5d   :  { %2563 = vmatprep.subr.bf16.mxu1 %v3145_v0 }
  0x60   :  { %2579 = vmatpush1.bf16.msra.mxu1 %v3247_v16  ;;  %v2840_v16 = vld [vmem:[%s4106_s0 + $0x190] ss:$20 sps:$4 sm:$0xff]  }
  0x61   :  { %1205 = vmatmul.mubr.bf16.gmra.mrb[16].mxu1 %v2802_v56  ;;  %2564 = vmatprep.subr.bf16.mxu1 %v3145_v0  ;;  %v2893_v56 = vld [vmem:[%s4106_s0 + $0x178] ss:$20 sps:$4 sm:$0xff]  }
  0x62   :  { %1437 = vmatmul.mubr.bf16.gmra.mrb[16].mxu0 %v2803_v57  ;;  %1212 = vmatprep.mubr.bf16.mxu1 %v2804_v58  ;;  %v2894_v57 = vld [vmem:[%s4106_s0 + $0x39c] ss:$20 sps:$4 sm:$0xff]   ;;  %v156_v58 = vld [vmem:[%s4106_s0 + $0x3c0] sm:$0xff] }
  0x63   :  { %1444 = vmatprep.mubr.bf16.mxu0 %v2806_v59  ;;  %v2896_v59 = vld [vmem:[%s4106_s0 + $0x398] ss:$20 sps:$4 sm:$0xff]  }
  0x64   :  { %2580 = vmatpush1.bf16.msra.mxu1 %v3258_v18  ;;  %v2842_v18 = vld [vmem:[%s4106_s0 + $0x1bc] ss:$20 sps:$4 sm:$0xff]  }
  0x65   :  { %2565 = vmatprep.subr.bf16.mxu1 %v3145_v0 }
  0x68   :  { %2581 = vmatpush1.bf16.msra.mxu1 %v3275_v22  ;;  %v2848_v22 = vld [vmem:[%s4106_s0 + $0x1e4] ss:$20 sps:$4 sm:$0xff]  }
  0x69   :  { %1213 = vmatmul.mubr.bf16.gmra.mrb[20].mxu1 %v2808_v60  ;;  %2566 = vmatprep.subr.bf16.mxu1 %v3145_v0  ;;  %v2897_v60 = vld [vmem:[%s4106_s0 + $0x1a0] ss:$20 sps:$4 sm:$0xff]  }
  0x6a   :  { %1445 = vmatmul.mubr.bf16.gmra.mrb[20].mxu0 %v2809_v61  ;;  %1220 = vmatprep.mubr.bf16.mxu1 %v2810_v62  ;;  %v2305_v61 = vcombine.high %v156_v58, %v156_v58  ;;  %v2304_v62 = vcombine.low %v156_v58, %v156_v58  ;;  %v2939_v58 = vld [vmem:[%s4106_s0 + $0x378] ss:$20 sps:$4 sm:$0xff]  }
  0x6b   :  { %1452 = vmatprep.mubr.bf16.mxu0 %v2812_v63  ;;  %v2900_v63 = vld [vmem:[%s4106_s0 + $0x1c8] ss:$20 sps:$4 sm:$0xff]  }
  0x6c   :  { %2582 = vmatpush1.bf16.msra.mxu1 %v3286_v24  ;;  %v2852_v24 = vld [vmem:[%s4106_s0 + $0x1e0] ss:$20 sps:$4 sm:$0xff]  }
  0x6d   :  { %2567 = vmatprep.subr.bf16.mxu1 %v3145_v0 }
  0x70   :  { %2583 = vmatpush1.bf16.msra.mxu1 %v3297_v26  ;;  %v2854_v26 = vld [vmem:[%s4106_s0 + $0x20c] ss:$20 sps:$4 sm:$0xff]  }
  0x71   :  { %1221 = vmatmul.mubr.bf16.gmra.mrb[24].mxu1 %v2814_v1  ;;  %2568 = vmatprep.subr.bf16.mxu1 %v3145_v0  ;;  %v2903_v1 = vld [vmem:[%s4106_s0 + $0x214] ss:$20 sps:$4 sm:$0xff]  }
  0x72   :  { %1453 = vmatmul.mubr.bf16.gmra.mrb[24].mxu0 %v2815_v2  ;;  %1228 = vmatprep.mubr.bf16.mxu1 %v2817_v3  ;;  %v2901_v2 = vld [vmem:[%s4106_s0 + $0x210] ss:$20 sps:$4 sm:$0xff]  }
  0x73   :  { %1460 = vmatprep.mubr.bf16.mxu0 %v2819_v4  ;;  %v2904_v3 = vld [vmem:[%s4106_s0 + $0x1f0] ss:$20 sps:$4 sm:$0xff]  }
  0x74   :  { %2584 = vmatpush1.bf16.msra.mxu1 %v3308_v28  ;;  %v2857_v28 = vld [vmem:[%s4106_s0 + $0x10] ss:$20 sps:$4 sm:$0xff]  }
  0x75   :  { %2569 = vmatprep.subr.bf16.mxu1 %v3145_v0  ;;  %v2905_v4 = vld [vmem:[%s4106_s0 + $0x23c] ss:$20 sps:$4 sm:$0xff]  }
  0x78   :  { %2585 = vmatpush1.bf16.msra.mxu1 %v3319_v30  ;;  %v2860_v30 = vld [vmem:[%s4106_s0 + $0x230] ss:$20 sps:$4 sm:$0xff]  }
  0x79   :  { %1229 = vmatmul.mubr.bf16.gmra.mrb[28].mxu1 %v2821_v5  ;;  %2570 = vmatprep.subr.bf16.mxu1 %v3145_v0  ;;  %v2907_v5 = vld [vmem:[%s4106_s0 + $0x238] ss:$20 sps:$4 sm:$0xff]  }
  0x7a   :  { %1461 = vmatmul.mubr.bf16.gmra.mrb[28].mxu0 %v2822_v6  ;;  %1236 = vmatprep.mubr.bf16.mxu1 %v2823_v7  ;;  %v2908_v6 = vld [vmem:[%s4106_s0 + $0x218] ss:$20 sps:$4 sm:$0xff]  }
  0x7b   :  { %1468 = vmatprep.mubr.bf16.mxu0 %v2825_v8  ;;  %v2909_v7 = vld [vmem:[%s4106_s0 + $0x264] ss:$20 sps:$4 sm:$0xff]  }
  0x7c   :  { %2586 = vmatpush1.bf16.msra.mxu1 %v3330_v32  ;;  %v2862_v32 = vld [vmem:[%s4106_s0 + $0x25c] ss:$20 sps:$4 sm:$0xff]  }
  0x7d   :  { %2571 = vmatprep.subr.bf16.mxu1 %v3145_v0  ;;  %v2833_v0 = vld [vmem:[%s4106_s0 + $0x168] ss:$20 sps:$4 sm:$0xff]  }
  0x80   :  { %2587 = vmatpush1.bf16.msra.mxu1 %v3341_v34  ;;  %v2865_v34 = vld [vmem:[%s4106_s0 + $0x60] ss:$20 sps:$4 sm:$0xff]  }
  0x81   :  { %1237 = vmatmul.mubr.bf16.gmra.mrb[32].mxu1 %v2827_v9  ;;  %v2911_v9 = vld [vmem:[%s4106_s0 + $0x260] ss:$20 sps:$4 sm:$0xff]  }
  0x82   :  { %1469 = vmatmul.mubr.bf16.gmra.mrb[32].mxu0 %v2828_v10  ;;  %1244 = vmatprep.mubr.bf16.mxu1 %v2829_v11  ;;  %v2912_v11 = vld [vmem:[%s4106_s0 + $0x240] ss:$20 sps:$4 sm:$0xff]  }
  0x83   :  { %1476 = vmatprep.mubr.bf16.mxu0 %v2831_v12 }
  0x89   :  { %1245 = vmatmul.mubr.bf16.gmra.mrb[36].mxu1 %v2833_v0  ;;  %v2913_v0 = vld [vmem:[%s4106_s0 + $0x28c] ss:$20 sps:$4 sm:$0xff]  }
  0x8a   :  { %1477 = vmatmul.mubr.bf16.gmra.mrb[36].mxu0 %v2834_v13  ;;  %1252 = vmatprep.mubr.bf16.mxu1 %v2835_v14 }
  0x8b   :  { %1484 = vmatprep.mubr.bf16.mxu0 %v2837_v15  ;;  %v2915_v15 = vld [vmem:[%s4106_s0 + $0x288] ss:$20 sps:$4 sm:$0xff]  }
  0x91   :  { %1253 = vmatmul.mubr.bf16.gmra.mrb[40].mxu1 %v2840_v16 }
  0x92   :  { %1485 = vmatmul.mubr.bf16.gmra.mrb[40].mxu0 %v2841_v17  ;;  %1260 = vmatprep.mubr.bf16.mxu1 %v2842_v18  ;;  %v2916_v17 = vld [vmem:[%s4106_s0 + $0x268] ss:$20 sps:$4 sm:$0xff]  }
  0x93   :  { %1492 = vmatprep.mubr.bf16.mxu0 %v2844_v19  ;;  %v2917_v19 = vld [vmem:[%s4106_s0 + $0x2b4] ss:$20 sps:$4 sm:$0xff]  }
  0x99   :  { %1261 = vmatmul.mubr.bf16.gmra.mrb[44].mxu1 %v2846_v20 }
  0x9a   :  { %1493 = vmatmul.mubr.bf16.gmra.mrb[44].mxu0 %v2847_v21  ;;  %1268 = vmatprep.mubr.bf16.mxu1 %v2848_v22  ;;  %v2919_v22 = vld [vmem:[%s4106_s0 + $0x2b0] ss:$20 sps:$4 sm:$0xff]  }
  0x9b   :  { %1500 = vmatprep.mubr.bf16.mxu0 %v2850_v23 }
  0xa1   :  { %1269 = vmatmul.mubr.bf16.gmra.mrb[48].mxu1 %v2852_v24  ;;  %v2920_v24 = vld [vmem:[%s4106_s0 + $0x290] ss:$20 sps:$4 sm:$0xff]  }
  0xa2   :  { %1501 = vmatmul.mubr.bf16.gmra.mrb[48].mxu0 %v2853_v25  ;;  %1276 = vmatprep.mubr.bf16.mxu1 %v2854_v26  ;;  %v2921_v26 = vld [vmem:[%s4106_s0 + $0x2dc] ss:$20 sps:$4 sm:$0xff]  }
  0xa3   :  { %2456 = vmatprep.mubr.msk.bf16.mxu0 %vm3147_vm0, %v3146_v40 }
  0xa9   :  { %1277 = vmatmul.mubr.bf16.gmra.mrb[52].mxu1 %v2856_v27 }
  0xaa   :  { %2457 = vmatmul.mubr.msk.bf16.vlgmr.msra.gmra.mrb[0].mxu0 %vm1064_vm1, %v2857_v28  ;;  %1284 = vmatprep.mubr.bf16.mxu1 %v2858_v29  ;;  %v2923_v29 = vld [vmem:[%s4106_s0 + $0x2d8] ss:$20 sps:$4 sm:$0xff]  }
  0xab   :  { %2460 = vmatprep.mubr.msk.bf16.mxu0 %vm3147_vm0, %v3146_v40 }
  0xb1   :  { %1285 = vmatmul.mubr.bf16.gmra.mrb[56].mxu1 %v2860_v30 }
  0xb2   :  { %2461 = vmatmul.mubr.msk.bf16.gmra.mrb[4].mxu0 %vm1064_vm1, %v2861_v31  ;;  %1292 = vmatprep.mubr.bf16.mxu1 %v2862_v32  ;;  %v2924_v31 = vld [vmem:[%s4106_s0 + $0x2b8] ss:$20 sps:$4 sm:$0xff]  }
  0xb3   :  { %2464 = vmatprep.mubr.msk.bf16.mxu0 %vm3147_vm0, %v3146_v40 }
  0xb9   :  { %1293 = vmatmul.mubr.bf16.gmra.mrb[60].mxu1 %v2864_v33  ;;  %v2925_v33 = vld [vmem:[%s4106_s0 + $0x304] ss:$20 sps:$4 sm:$0xff]  }
  0xba   :  { %2465 = vmatmul.mubr.msk.bf16.gmra.mrb[8].mxu0 %vm1064_vm1, %v2865_v34  ;;  %1300 = vmatprep.mubr.bf16.mxu1 %v2866_v35 }
  0xbb   :  { %2468 = vmatprep.mubr.msk.bf16.mxu0 %vm3147_vm0, %v3146_v40 }
  0xc1   :  { %1301 = vmatmul.mubr.bf16.gmra.mrb[64].mxu1 %v2868_v36  ;;  %v2927_v36 = vld [vmem:[%s4106_s0 + $0x300] ss:$20 sps:$4 sm:$0xff]  }
  0xc2   :  { %2469 = vmatmul.mubr.msk.bf16.gmra.mrb[12].mxu0 %vm1064_vm1, %v2869_v37  ;;  %1308 = vmatprep.mubr.bf16.mxu1 %v2870_v38  ;;  %v2928_v38 = vld [vmem:[%s4106_s0 + $0x2e0] ss:$20 sps:$4 sm:$0xff]  }
  0xc3   :  { %2472 = vmatprep.mubr.msk.bf16.mxu0 %vm3147_vm0, %v3146_v40 }
  0xc9   :  { %1309 = vmatmul.mubr.bf16.gmra.mrb[68].mxu1 %v2872_v39 }
  0xca   :  { %2473 = vmatmul.mubr.msk.bf16.gmra.mrb[16].mxu0 %vm1064_vm1, %v2873_v41  ;;  %1316 = vmatprep.mubr.bf16.mxu1 %v2874_v42  ;;  %v2929_v41 = vld [vmem:[%s4106_s0 + $0x32c] ss:$20 sps:$4 sm:$0xff]  }
  0xcb   :  { %2476 = vmatprep.mubr.msk.bf16.mxu0 %vm3147_vm0, %v3146_v40 }
  0xd1   :  { %1317 = vmatmul.mubr.bf16.gmra.mrb[72].mxu1 %v2876_v43 }
  0xd2   :  { %2477 = vmatmul.mubr.msk.bf16.gmra.mrb[20].mxu0 %vm1064_vm1, %v2877_v44  ;;  %1324 = vmatprep.mubr.bf16.mxu1 %v2878_v45  ;;  %v2931_v44 = vld [vmem:[%s4106_s0 + $0x328] ss:$20 sps:$4 sm:$0xff]  }
  0xd3   :  { %2480 = vmatprep.mubr.msk.bf16.mxu0 %vm3147_vm0, %v3146_v40 }
  0xd9   :  { %1325 = vmatmul.mubr.bf16.gmra.mrb[76].mxu1 %v2880_v46  ;;  %v2932_v46 = vld [vmem:[%s4106_s0 + $0x308] ss:$20 sps:$4 sm:$0xff]  }
  0xda   :  { %2481 = vmatmul.mubr.msk.bf16.gmra.mrb[24].mxu0 %vm1064_vm1, %v2881_v47  ;;  %1332 = vmatprep.mubr.bf16.mxu1 %v2882_v48  ;;  %v2933_v48 = vld [vmem:[%s4106_s0 + $0x354] ss:$20 sps:$4 sm:$0xff]  }
  0xdb   :  { %2484 = vmatprep.mubr.msk.bf16.mxu0 %vm3147_vm0, %v3146_v40 }
  0xe1   :  { %1333 = vmatmul.mubr.bf16.gmra.mrb[80].mxu1 %v2884_v49 }
  0xe2   :  { %2485 = vmatmul.mubr.msk.bf16.gmra.mrb[28].mxu0 %vm1064_vm1, %v2885_v50  ;;  %1340 = vmatprep.mubr.bf16.mxu1 %v2886_v51  ;;  %v2935_v51 = vld [vmem:[%s4106_s0 + $0x350] ss:$20 sps:$4 sm:$0xff]  }
  0xe3   :  { %2488 = vmatprep.mubr.msk.bf16.mxu0 %vm3147_vm0, %v3146_v40 }
  0xe9   :  { %1341 = vmatmul.mubr.bf16.gmra.mrb[84].mxu1 %v2888_v52 }
  0xea   :  { %2489 = vmatmul.mubr.msk.bf16.gmra.mrb[32].mxu0 %vm1064_vm1, %v2889_v53  ;;  %1348 = vmatprep.mubr.bf16.mxu1 %v2890_v54  ;;  %v2936_v53 = vld [vmem:[%s4106_s0 + $0x330] ss:$20 sps:$4 sm:$0xff]  }
  0xeb   :  { %2492 = vmatprep.mubr.msk.bf16.mxu0 %vm3147_vm0, %v3146_v40 }
  0xf1   :  { %1349 = vmatmul.mubr.bf16.gmra.mrb[88].mxu1 %v2892_v55  ;;  %v2937_v55 = vld [vmem:[%s4106_s0 + $0x37c] ss:$20 sps:$4 sm:$0xff]  }
  0xf2   :  { %2493 = vmatmul.mubr.msk.bf16.gmra.mrb[36].mxu0 %vm1064_vm1, %v2893_v56  ;;  %1356 = vmatprep.mubr.bf16.mxu1 %v2894_v57 }
  0xf3   :  { %2496 = vmatprep.mubr.msk.bf16.mxu0 %vm3147_vm0, %v3146_v40 }
  0xf9   :  { %1357 = vmatmul.mubr.bf16.gmra.mrb[92].mxu1 %v2896_v59 }
  0xfa   :  { %2497 = vmatmul.mubr.msk.bf16.gmra.mrb[40].mxu0 %vm1064_vm1, %v2897_v60  ;;  %1364 = vmatprep.mubr.bf16.mxu1 %v2305_v61  ;;  %v2940_v60 = vld [vmem:[%s4106_s0 + $0x358] ss:$20 sps:$4 sm:$0xff]  }
  0xfb   :  { %2500 = vmatprep.mubr.msk.bf16.mxu0 %vm3147_vm0, %v3146_v40 }
 0x101   :  { %1365 = vmatmul.mubr.bf16.gmra.mrb[96].mxu1 %v2304_v62  ;;  %v2941_v62 = vld [vmem:[%s4106_s0 + $0x3a4] ss:$20 sps:$4 sm:$0xff]  }
 0x102   :  { %2501 = vmatmul.mubr.msk.bf16.gmra.mrb[44].mxu0 %vm1064_vm1, %v2900_v63  ;;  %1508 = vmatprep.mubr.bf16.mxu1 %v2903_v1  ;;  %v157_v1 = vld [vmem:[%s4106_s0 + $0x3c8] sm:$0xff] }
 0x103   :  { %2504 = vmatprep.mubr.msk.bf16.mxu0 %vm3147_vm0, %v3146_v40 }
 0x109   :  { %1509 = vmatmul.mubr.bf16.vlgmr.msra.gmra.mrb[52].mxu1 %v2901_v2 }
 0x10a   :  { %2505 = vmatmul.mubr.msk.bf16.gmra.mrb[48].mxu0 %vm1064_vm1, %v2904_v3  ;;  %1516 = vmatprep.mubr.bf16.mxu1 %v2905_v4  ;;  %v2943_v3 = vld [vmem:[%s4106_s0 + $0x3a0] ss:$20 sps:$4 sm:$0xff]  }
 0x10b   :  { %2508 = vmatprep.mubr.msk.bf16.mxu0 %vm3147_vm0, %v3146_v40 }
 0x111   :  { %1517 = vmatmul.mubr.bf16.gmra.mrb[56].mxu1 %v2907_v5  ;;  %v2944_v5 = vld [vmem:[%s4106_s0 + $0x380] ss:$20 sps:$4 sm:$0xff]  }
 0x112   :  { %2509 = vmatmul.mubr.msk.bf16.gmra.mrb[52].mxu0 %vm1064_vm1, %v2908_v6  ;;  %1524 = vmatprep.mubr.bf16.mxu1 %v2909_v7  ;;  %v2307_v7 = vcombine.high %v157_v1, %v157_v1 }
 0x113   :  { %2512 = vmatprep.mubr.msk.bf16.mxu0 %vm3147_vm0, %v3146_v40 }
 0x114   :  { %v3713_v8 = vpop.f32.mrb[0].mxu1 }
 0x115   :  { %v1176_v10 = vpop.f32.mrb[1].mxu1 }
 0x116   :  { %v3721_v12 = vpop.f32.mrb[2].mxu1 }
 0x117   :  { %v1179_v13 = vpop.f32.mrb[3].mxu1 }
 0x118   :  { %v2947_v13 = vld [vmem:[%s4106_s0 + $0x3a8] ss:$20 sps:$4 sm:$0xff]  }
 0x119   :  { %1525 = vmatmul.mubr.bf16.gmra.mrb[60].mxu1 %v2911_v9 }
 0x11a   :  { %2513 = vmatmul.mubr.msk.bf16.gmra.mrb[56].mxu0 %vm1064_vm1, %v2912_v11  ;;  %1532 = vmatprep.mubr.bf16.mxu1 %v2913_v0  ;;  %v2306_v11 = vcombine.low %v157_v1, %v157_v1 }
 0x11b   :  { %2516 = vmatprep.mubr.msk.bf16.mxu0 %vm3147_vm0, %v3146_v40 }
 0x11c   :  { %v3729_v14 = vpop.f32.mrb[4].mxu1 }
 0x11d   :  { %v1184_v16 = vpop.f32.mrb[5].mxu1 }
 0x11e   :  { %v3737_v18 = vpop.f32.mrb[6].mxu1 }
 0x11f   :  { %v1187_v20 = vpop.f32.mrb[7].mxu1 }
 0x120   :  { %v2948_v20 = vld [vmem:[%s4106_s0 + $0x3d0] ss:$0 sps:$4 sm:$0xff]  }
 0x121   :  { %1533 = vmatmul.mubr.bf16.gmra.mrb[64].mxu1 %v2915_v15 }
 0x122   :  { %2517 = vmatmul.mubr.msk.bf16.gmra.mrb[60].mxu0 %vm1064_vm1, %v2916_v17  ;;  %1540 = vmatprep.mubr.bf16.mxu1 %v2917_v19 }
 0x123   :  { %2520 = vmatprep.mubr.msk.bf16.mxu0 %vm3147_vm0, %v3146_v40 }
 0x124   :  { %v3745_v21 = vpop.f32.mrb[8].mxu1 }
 0x125   :  { %v1192_v23 = vpop.f32.mrb[9].mxu1 }
 0x126   :  { %v3753_v25 = vpop.f32.mrb[10].mxu1 }
 0x127   :  { %v1195_v27 = vpop.f32.mrb[11].mxu1 }
 0x129   :  { %1541 = vmatmul.mubr.bf16.gmra.mrb[68].mxu1 %v2919_v22 }
 0x12a   :  { %2521 = vmatmul.mubr.msk.bf16.gmra.mrb[64].mxu0 %vm1064_vm1, %v2920_v24  ;;  %1548 = vmatprep.mubr.bf16.mxu1 %v2921_v26 }
 0x12b   :  { %2524 = vmatprep.mubr.msk.bf16.mxu0 %vm3147_vm0, %v3146_v40 }
 0x12c   :  { %v3761_v28 = vpop.f32.mrb[12].mxu1 }
 0x12d   :  { %v1200_v30 = vpop.f32.mrb[13].mxu1 }
 0x12e   :  { %v3769_v32 = vpop.f32.mrb[14].mxu1 }
 0x12f   :  { %v1203_v34 = vpop.f32.mrb[15].mxu1 }
 0x131   :  { %1549 = vmatmul.mubr.bf16.gmra.mrb[72].mxu1 %v2923_v29 }
 0x132   :  { %2525 = vmatmul.mubr.msk.bf16.gmra.mrb[68].mxu0 %vm1064_vm1, %v2924_v31  ;;  %1556 = vmatprep.mubr.bf16.mxu1 %v2925_v33 }
 0x133   :  { %2528 = vmatprep.mubr.msk.bf16.mxu0 %vm3147_vm0, %v3146_v40 }
 0x134   :  { %v3777_v35 = vpop.f32.mrb[16].mxu1 }
 0x135   :  { %v1208_v37 = vpop.f32.mrb[17].mxu1 }
 0x136   :  { %v3785_v39 = vpop.f32.mrb[18].mxu1 }
 0x137   :  { %v1211_v42 = vpop.f32.mrb[19].mxu1 }
 0x139   :  { %1557 = vmatmul.mubr.bf16.gmra.mrb[76].mxu1 %v2927_v36 }
 0x13a   :  { %2529 = vmatmul.mubr.msk.bf16.gmra.mrb[72].mxu0 %vm1064_vm1, %v2928_v38  ;;  %1564 = vmatprep.mubr.bf16.mxu1 %v2929_v41 }
 0x13b   :  { %2532 = vmatprep.mubr.msk.bf16.mxu0 %vm3147_vm0, %v3146_v40 }
 0x13c   :  { %v3793_v43 = vpop.f32.mrb[20].mxu1 }
 0x13d   :  { %v1216_v45 = vpop.f32.mrb[21].mxu1 }
 0x13e   :  { %v3801_v47 = vpop.f32.mrb[22].mxu1 }
 0x13f   :  { %v1219_v49 = vpop.f32.mrb[23].mxu1 }
 0x141   :  { %1565 = vmatmul.mubr.bf16.gmra.mrb[80].mxu1 %v2931_v44 }
 0x142   :  { %2533 = vmatmul.mubr.msk.bf16.gmra.mrb[76].mxu0 %vm1064_vm1, %v2932_v46  ;;  %1572 = vmatprep.mubr.bf16.mxu1 %v2933_v48 }
 0x143   :  { %2536 = vmatprep.mubr.msk.bf16.mxu0 %vm3147_vm0, %v3146_v40 }
 0x144   :  { %v3809_v50 = vpop.f32.mrb[24].mxu1 }
 0x145   :  { %v1224_v52 = vpop.f32.mrb[25].mxu1 }
 0x146   :  { %v3817_v54 = vpop.f32.mrb[26].mxu1 }
 0x147   :  { %v1227_v56 = vpop.f32.mrb[27].mxu1 }
 0x149   :  { %1573 = vmatmul.mubr.bf16.gmra.mrb[84].mxu1 %v2935_v51 }
 0x14a   :  { %2537 = vmatmul.mubr.msk.bf16.gmra.mrb[80].mxu0 %vm1064_vm1, %v2936_v53  ;;  %1580 = vmatprep.mubr.bf16.mxu1 %v2937_v55 }
 0x14b   :  { %2540 = vmatprep.mubr.msk.bf16.mxu0 %vm3147_vm0, %v3146_v40 }
 0x14c   :  { %v3825_v57 = vpop.f32.mrb[28].mxu1 }
 0x14d   :  { %v1232_v59 = vpop.f32.mrb[29].mxu1 }
 0x14e   :  { %v3833_v61 = vpop.f32.mrb[30].mxu1 }
 0x14f   :  { %v1235_v63 = vpop.f32.mrb[31].mxu1 }
 0x151   :  { %1581 = vmatmul.mubr.bf16.gmra.mrb[88].mxu1 %v2939_v58 }
 0x152   :  { %2541 = vmatmul.mubr.msk.bf16.gmra.mrb[84].mxu0 %vm1064_vm1, %v2940_v60  ;;  %1588 = vmatprep.mubr.bf16.mxu1 %v2941_v62 }
 0x153   :  { %2544 = vmatprep.mubr.msk.bf16.mxu0 %vm3147_vm0, %v3146_v40 }
 0x154   :  { %v3844_v2 = vpop.f32.mrb[32].mxu1 }
 0x155   :  { %v1240_v4 = vpop.f32.mrb[33].mxu1 }
 0x156   :  { %v3852_v6 = vpop.f32.mrb[34].mxu1 }
 0x157   :  { %v1243_v9 = vpop.f32.mrb[35].mxu1 }
 0x159   :  { %1589 = vmatmul.mubr.bf16.gmra.mrb[92].mxu1 %v2943_v3 }
 0x15a   :  { %2545 = vmatmul.mubr.msk.bf16.gmra.mrb[88].mxu0 %vm1064_vm1, %v2944_v5  ;;  %1596 = vmatprep.mubr.bf16.mxu1 %v2307_v7 }
 0x15b   :  { %2548 = vmatprep.mubr.msk.bf16.mxu0 %vm3147_vm0, %v3146_v40 }
 0x15c   :  { %v3857_v10 = vpop.f32.mrb[36].mxu1 }
 0x15d   :  { %v1248_v0 = vpop.f32.mrb[37].mxu1 }
 0x15e   :  { %v3862_v15 = vpop.f32.mrb[38].mxu1 }
 0x15f   :  { %v1251_v16 = vpop.f32.mrb[39].mxu1 }
 0x161   :  { %1597 = vmatmul.mubr.bf16.gmra.mrb[96].mxu1 %v2306_v11 }
 0x162   :  { %2549 = vmatmul.mubr.msk.bf16.gmra.mrb[92].mxu0 %vm1064_vm1, %v2947_v13 }
 0x163   :  { %2552 = vmatprep.mubr.msk.bf16.mxu0 %vm3147_vm0, %v3146_v40 }
 0x164   :  { %v3867_v17 = vpop.f32.mrb[40].mxu1 }
 0x165   :  { %v1256_v19 = vpop.f32.mrb[41].mxu1 }
 0x166   :  { %v3872_v22 = vpop.f32.mrb[42].mxu1 }
 0x167   :  { %v1259_v23 = vpop.f32.mrb[43].mxu1 }
 0x16a   :  { %2553 = vmatmul.mubr.msk.bf16.gmra.mrb[96].mxu0 %vm1064_vm1, %v2948_v20 }
 0x16c   :  { %v3875_v24 = vpop.f32.mrb[44].mxu1 }
 0x16d   :  { %v1264_v26 = vpop.f32.mrb[45].mxu1 }
 0x16e   :  { %v3877_v27 = vpop.f32.mrb[46].mxu1 }
 0x16f   :  { %v1267_v29 = vpop.f32.mrb[47].mxu1 }
 0x174   :  { %v3879_v30 = vpop.f32.mrb[48].mxu1 }
 0x175   :  { %v1272_v40 = vpop.f32.mrb[49].mxu1 }
 0x176   :  { %v3881_v31 = vpop.f32.mrb[50].mxu1 }
 0x177   :  { %v1275_v33 = vpop.f32.mrb[51].mxu1 }
 0x17d   :  { %v1638_v34 = vpop.f32.mrb[0].mxu0 }
 0x17e   :  { %v2588_v36 = vadd.f32 %v1638_v34, %v3713_v8  ;;  %v2458_v37 = vpop.f32.mrb[1].mxu0 }
 0x17f   :  { %v1641_v38 = vpop.f32.mrb[2].mxu0 }
 0x180   :  { %v2370_v41 = vmul.f32 -1.442695, %v2588_v36  ;;  %v2589_v42 = vadd.f32 %v1641_v38, %v3721_v12  ;;  %v2459_v44 = vpop.f32.mrb[3].mxu0 }
 0x182   :  { %2949 = vpow2.f32 %v2370_v41  ;;  %v2371_v45 = vmul.f32 -1.442695, %v2589_v42 }
 0x184   :  { %2951 = vpow2.f32 %v2371_v45 }
 0x185   :  { %v1646_v46 = vpop.f32.mrb[4].mxu0 }
 0x186   :  { %v2590_v48 = vadd.f32 %v1646_v46, %v3729_v14  ;;  %v2462_v49 = vpop.f32.mrb[5].mxu0 }
 0x187   :  { %v1649_v51 = vpop.f32.mrb[6].mxu0 }
 0x188   :  { %v2372_v52 = vmul.f32 -1.442695, %v2590_v48  ;;  %v2591_v53 = vadd.f32 %v1649_v51, %v3737_v18  ;;  %v2463_v55 = vpop.f32.mrb[7].mxu0 }
 0x18a   :  { %2953 = vpow2.f32 %v2372_v52  ;;  %v2373_v8 = vmul.f32 -1.442695, %v2591_v53 }
 0x18c   :  { %v2950_v56 = vpop.eup %2949  ;;  %2955 = vpow2.f32 %v2373_v8 }
 0x18d   :  { %v1983_v58 = vadd.f32 1.0, %v2950_v56  ;;  %v1654_v59 = vpop.f32.mrb[8].mxu0 }
 0x18e   :  { %v2952_v12 = vpop.eup %2951  ;;  %v2592_v60 = vadd.f32 %v1654_v59, %v3745_v21  ;;  %v2466_v62 = vpop.f32.mrb[9].mxu0 }
 0x18f   :  { %2957 = vrcp.f32 %v1983_v58  ;;  %v1984_v63 = vadd.f32 1.0, %v2952_v12  ;;  %v1657_v1 = vpop.f32.mrb[10].mxu0 }
 0x190   :  { %v2374_v14 = vmul.f32 -1.442695, %v2592_v60  ;;  %v2593_v3 = vadd.f32 %v1657_v1, %v3753_v25  ;;  %v2467_v4 = vpop.f32.mrb[11].mxu0 }
 0x191   :  { %2959 = vrcp.f32 %v1984_v63 }
 0x192   :  { %2961 = vpow2.f32 %v2374_v14  ;;  %v2375_v18 = vmul.f32 -1.442695, %v2593_v3 }
 0x194   :  { %v2954_v5 = vpop.eup %2953  ;;  %2963 = vpow2.f32 %v2375_v18 }
 0x195   :  { %v1985_v7 = vadd.f32 1.0, %v2954_v5  ;;  %v1662_v9 = vpop.f32.mrb[12].mxu0 }
 0x196   :  { %v2956_v11 = vpop.eup %2955  ;;  %v2594_v0 = vadd.f32 %v1662_v9, %v3761_v28  ;;  %v2470_v13 = vpop.f32.mrb[13].mxu0 }
 0x197   :  { %2965 = vrcp.f32 %v1985_v7  ;;  %v1986_v21 = vadd.f32 1.0, %v2956_v11  ;;  %v1665_v16 = vpop.f32.mrb[14].mxu0 }
 0x198   :  { %v2376_v19 = vmul.f32 -1.442695, %v2594_v0  ;;  %v2595_v20 = vadd.f32 %v1665_v16, %v3769_v32  ;;  %v2471_v25 = vpop.f32.mrb[15].mxu0 }
 0x199   :  { %v2958_v23 = vpop.eup %2957  ;;  %2967 = vrcp.f32 %v1986_v21 }
 0x19a   :  { %2131 = vst.msk [vmem:[%s4107_s2] sm:$0xff] %vm2130_vm2, %v2958_v23  ;;  %2969 = vpow2.f32 %v2376_v19  ;;  %v2377_v26 = vmul.f32 -1.442695, %v2595_v20 }
 0x19b   :  { %v2960_v29 = vpop.eup %2959 }
 0x19c   :  { %v2962_v28 = vpop.eup %2961  ;;  %2132 = vst.msk [vmem:[%s4107_s2 + $0x8] sm:$0xff] %vm2130_vm2, %v2960_v29  ;;  %2971 = vpow2.f32 %v2377_v26 }
 0x19d   :  { %v1987_v40 = vadd.f32 1.0, %v2962_v28  ;;  %v1670_v32 = vpop.f32.mrb[16].mxu0 }
 0x19e   :  { %v2964_v33 = vpop.eup %2963  ;;  %v2596_v34 = vadd.f32 %v1670_v32, %v3777_v35  ;;  %v2474_v36 = vpop.f32.mrb[17].mxu0 }
 0x19f   :  { %2973 = vrcp.f32 %v1987_v40  ;;  %v1988_v37 = vadd.f32 1.0, %v2964_v33  ;;  %v1673_v38 = vpop.f32.mrb[18].mxu0 }
 0x1a0   :  { %v2378_v41 = vmul.f32 -1.442695, %v2596_v34  ;;  %v2597_v42 = vadd.f32 %v1673_v38, %v3785_v39  ;;  %v2475_v44 = vpop.f32.mrb[19].mxu0 }
 0x1a1   :  { %v2966_v45 = vpop.eup %2965  ;;  %2975 = vrcp.f32 %v1988_v37 }
 0x1a2   :  { %2133 = vst.msk [vmem:[%s4107_s2 + $0x10] sm:$0xff] %vm2130_vm2, %v2966_v45  ;;  %2977 = vpow2.f32 %v2378_v41  ;;  %v2379_v46 = vmul.f32 -1.442695, %v2597_v42 }
 0x1a3   :  { %v2968_v48 = vpop.eup %2967 }
 0x1a4   :  { %v2970_v49 = vpop.eup %2969  ;;  %2134 = vst.msk [vmem:[%s4107_s2 + $0x18] sm:$0xff] %vm2130_vm2, %v2968_v48  ;;  %2979 = vpow2.f32 %v2379_v46 }
 0x1a5   :  { %v1989_v35 = vadd.f32 1.0, %v2970_v49  ;;  %v1678_v39 = vpop.f32.mrb[20].mxu0 }
 0x1a6   :  { %v2972_v51 = vpop.eup %2971  ;;  %v2598_v52 = vadd.f32 %v1678_v39, %v3793_v43  ;;  %v2478_v53 = vpop.f32.mrb[21].mxu0 }
 0x1a7   :  { %2981 = vrcp.f32 %v1989_v35  ;;  %v1990_v55 = vadd.f32 1.0, %v2972_v51  ;;  %v1681_v8 = vpop.f32.mrb[22].mxu0 }
 0x1a8   :  { %v2380_v56 = vmul.f32 -1.442695, %v2598_v52  ;;  %v2599_v58 = vadd.f32 %v1681_v8, %v3801_v47  ;;  %v2479_v59 = vpop.f32.mrb[23].mxu0 }
 0x1a9   :  { %v2974_v12 = vpop.eup %2973  ;;  %2983 = vrcp.f32 %v1990_v55 }
 0x1aa   :  { %2135 = vst.msk [vmem:[%s4107_s2 + $0x20] sm:$0xff] %vm2130_vm2, %v2974_v12  ;;  %2985 = vpow2.f32 %v2380_v56  ;;  %v2381_v60 = vmul.f32 -1.442695, %v2599_v58 }
 0x1ab   :  { %v2976_v62 = vpop.eup %2975 }
 0x1ac   :  { %v2978_v63 = vpop.eup %2977  ;;  %2136 = vst.msk [vmem:[%s4107_s2 + $0x28] sm:$0xff] %vm2130_vm2, %v2976_v62  ;;  %2987 = vpow2.f32 %v2381_v60 }
 0x1ad   :  { %v1991_v43 = vadd.f32 1.0, %v2978_v63  ;;  %v1686_v47 = vpop.f32.mrb[24].mxu0 }
 0x1ae   :  { %v2980_v1 = vpop.eup %2979  ;;  %v2600_v14 = vadd.f32 %v1686_v47, %v3809_v50  ;;  %v2482_v3 = vpop.f32.mrb[25].mxu0 }
 0x1af   :  { %2989 = vrcp.f32 %v1991_v43  ;;  %v1992_v4 = vadd.f32 1.0, %v2980_v1  ;;  %v1689_v18 = vpop.f32.mrb[26].mxu0 }
 0x1b0   :  { %v2382_v5 = vmul.f32 -1.442695, %v2600_v14  ;;  %v2601_v7 = vadd.f32 %v1689_v18, %v3817_v54  ;;  %v2483_v9 = vpop.f32.mrb[27].mxu0 }
 0x1b1   :  { %v2982_v11 = vpop.eup %2981  ;;  %2991 = vrcp.f32 %v1992_v4 }
 0x1b2   :  { %2137 = vst.msk [vmem:[%s4107_s2 + $0x30] sm:$0xff] %vm2130_vm2, %v2982_v11  ;;  %2993 = vpow2.f32 %v2382_v5  ;;  %v2383_v0 = vmul.f32 -1.442695, %v2601_v7 }
 0x1b3   :  { %v2984_v13 = vpop.eup %2983 }
 0x1b4   :  { %v2986_v21 = vpop.eup %2985  ;;  %2138 = vst.msk [vmem:[%s4107_s2 + $0x38] sm:$0xff] %vm2130_vm2, %v2984_v13  ;;  %2995 = vpow2.f32 %v2383_v0 }
 0x1b5   :  { %v1993_v50 = vadd.f32 1.0, %v2986_v21  ;;  %v1694_v54 = vpop.f32.mrb[28].mxu0 }
 0x1b6   :  { %v2988_v16 = vpop.eup %2987  ;;  %v2602_v19 = vadd.f32 %v1694_v54, %v3825_v57  ;;  %v2486_v20 = vpop.f32.mrb[29].mxu0 }
 0x1b7   :  { %2997 = vrcp.f32 %v1993_v50  ;;  %v1994_v25 = vadd.f32 1.0, %v2988_v16  ;;  %v1697_v23 = vpop.f32.mrb[30].mxu0 }
 0x1b8   :  { %v2384_v26 = vmul.f32 -1.442695, %v2602_v19  ;;  %v2603_v29 = vadd.f32 %v1697_v23, %v3833_v61  ;;  %v2487_v28 = vpop.f32.mrb[31].mxu0 }
 0x1b9   :  { %v2990_v40 = vpop.eup %2989  ;;  %2999 = vrcp.f32 %v1994_v25 }
 0x1ba   :  { %2139 = vst.msk [vmem:[%s4107_s2 + $0x40] sm:$0xff] %vm2130_vm2, %v2990_v40  ;;  %3001 = vpow2.f32 %v2384_v26  ;;  %v2385_v32 = vmul.f32 -1.442695, %v2603_v29 }
 0x1bb   :  { %v2992_v33 = vpop.eup %2991 }
 0x1bc   :  { %v2994_v34 = vpop.eup %2993  ;;  %2140 = vst.msk [vmem:[%s4107_s2 + $0x48] sm:$0xff] %vm2130_vm2, %v2992_v33  ;;  %3003 = vpow2.f32 %v2385_v32 }
 0x1bd   :  { %v1995_v57 = vadd.f32 1.0, %v2994_v34  ;;  %v1702_v61 = vpop.f32.mrb[32].mxu0 }
 0x1be   :  { %v2996_v36 = vpop.eup %2995  ;;  %v2604_v37 = vadd.f32 %v1702_v61, %v3844_v2  ;;  %v2490_v38 = vpop.f32.mrb[33].mxu0 }
 0x1bf   :  { %3005 = vrcp.f32 %v1995_v57  ;;  %v1996_v41 = vadd.f32 1.0, %v2996_v36  ;;  %v1705_v42 = vpop.f32.mrb[34].mxu0 }
 0x1c0   :  { %v2386_v44 = vmul.f32 -1.442695, %v2604_v37  ;;  %v2605_v45 = vadd.f32 %v1705_v42, %v3852_v6  ;;  %v2491_v46 = vpop.f32.mrb[35].mxu0 }
 0x1c1   :  { %v2998_v48 = vpop.eup %2997  ;;  %3007 = vrcp.f32 %v1996_v41 }
 0x1c2   :  { %2141 = vst.msk [vmem:[%s4107_s2 + $0x50] sm:$0xff] %vm2130_vm2, %v2998_v48  ;;  %3009 = vpow2.f32 %v2386_v44  ;;  %v2387_v49 = vmul.f32 -1.442695, %v2605_v45 }
 0x1c3   :  { %v3000_v35 = vpop.eup %2999 }
 0x1c4   :  { %v3002_v39 = vpop.eup %3001  ;;  %2142 = vst.msk [vmem:[%s4107_s2 + $0x58] sm:$0xff] %vm2130_vm2, %v3000_v35  ;;  %3011 = vpow2.f32 %v2387_v49 }
 0x1c5   :  { %v1997_v2 = vadd.f32 1.0, %v3002_v39  ;;  %v1710_v6 = vpop.f32.mrb[36].mxu0 }
 0x1c6   :  { %v3004_v51 = vpop.eup %3003  ;;  %v2606_v52 = vadd.f32 %v1710_v6, %v3857_v10  ;;  %v2494_v53 = vpop.f32.mrb[37].mxu0 }
 0x1c7   :  { %3013 = vrcp.f32 %v1997_v2  ;;  %v1998_v55 = vadd.f32 1.0, %v3004_v51  ;;  %v1713_v8 = vpop.f32.mrb[38].mxu0 }
 0x1c8   :  { %v2388_v56 = vmul.f32 -1.442695, %v2606_v52  ;;  %v2607_v58 = vadd.f32 %v1713_v8, %v3862_v15  ;;  %v2495_v59 = vpop.f32.mrb[39].mxu0 }
 0x1c9   :  { %v3006_v12 = vpop.eup %3005  ;;  %3015 = vrcp.f32 %v1998_v55 }
 0x1ca   :  { %2143 = vst.msk [vmem:[%s4107_s2 + $0x60] sm:$0xff] %vm2130_vm2, %v3006_v12  ;;  %3017 = vpow2.f32 %v2388_v56  ;;  %v2389_v60 = vmul.f32 -1.442695, %v2607_v58 }
 0x1cb   :  { %v3008_v62 = vpop.eup %3007 }
 0x1cc   :  { %v3010_v63 = vpop.eup %3009  ;;  %2144 = vst.msk [vmem:[%s4107_s2 + $0x68] sm:$0xff] %vm2130_vm2, %v3008_v62  ;;  %3019 = vpow2.f32 %v2389_v60 }
 0x1cd   :  { %v1999_v10 = vadd.f32 1.0, %v3010_v63  ;;  %v1718_v15 = vpop.f32.mrb[40].mxu0 }
 0x1ce   :  { %v3012_v43 = vpop.eup %3011  ;;  %v2608_v47 = vadd.f32 %v1718_v15, %v3867_v17  ;;  %v2498_v1 = vpop.f32.mrb[41].mxu0 }
 0x1cf   :  { %3021 = vrcp.f32 %v1999_v10  ;;  %v2000_v14 = vadd.f32 1.0, %v3012_v43  ;;  %v1721_v3 = vpop.f32.mrb[42].mxu0 }
 0x1d0   :  { %v2390_v4 = vmul.f32 -1.442695, %v2608_v47  ;;  %v2609_v18 = vadd.f32 %v1721_v3, %v3872_v22  ;;  %v2499_v5 = vpop.f32.mrb[43].mxu0 }
 0x1d1   :  { %v3014_v7 = vpop.eup %3013  ;;  %3023 = vrcp.f32 %v2000_v14 }
 0x1d2   :  { %2145 = vst.msk [vmem:[%s4107_s2 + $0x70] sm:$0xff] %vm2130_vm2, %v3014_v7  ;;  %3025 = vpow2.f32 %v2390_v4  ;;  %v2391_v9 = vmul.f32 -1.442695, %v2609_v18 }
 0x1d3   :  { %v3016_v11 = vpop.eup %3015 }
 0x1d4   :  { %v3018_v0 = vpop.eup %3017  ;;  %2146 = vst.msk [vmem:[%s4107_s2 + $0x78] sm:$0xff] %vm2130_vm2, %v3016_v11  ;;  %3027 = vpow2.f32 %v2391_v9 }
 0x1d5   :  { %v2001_v17 = vadd.f32 1.0, %v3018_v0  ;;  %v1726_v22 = vpop.f32.mrb[44].mxu0 }
 0x1d6   :  { %v3020_v13 = vpop.eup %3019  ;;  %v2610_v21 = vadd.f32 %v1726_v22, %v3875_v24  ;;  %v2502_v50 = vpop.f32.mrb[45].mxu0 }
 0x1d7   :  { %3029 = vrcp.f32 %v2001_v17  ;;  %v2002_v54 = vadd.f32 1.0, %v3020_v13  ;;  %v1729_v16 = vpop.f32.mrb[46].mxu0 }
 0x1d8   :  { %v2392_v19 = vmul.f32 -1.442695, %v2610_v21  ;;  %v2611_v20 = vadd.f32 %v1729_v16, %v3877_v27  ;;  %v2503_v25 = vpop.f32.mrb[47].mxu0 }
 0x1d9   :  { %v3022_v23 = vpop.eup %3021  ;;  %3031 = vrcp.f32 %v2002_v54 }
 0x1da   :  { %2147 = vst.msk [vmem:[%s4107_s2 + $0x80] sm:$0xff] %vm2130_vm2, %v3022_v23  ;;  %3033 = vpow2.f32 %v2392_v19  ;;  %v2393_v26 = vmul.f32 -1.442695, %v2611_v20 }
 0x1db   :  { %v3024_v29 = vpop.eup %3023 }
 0x1dc   :  { %v3026_v28 = vpop.eup %3025  ;;  %2148 = vst.msk [vmem:[%s4107_s2 + $0x88] sm:$0xff] %vm2130_vm2, %v3024_v29  ;;  %3035 = vpow2.f32 %v2393_v26  ;;  %v1510_v24 = vpop.f32.mrb[52].mxu1 }
 0x1dd   :  { %v2003_v27 = vadd.f32 1.0, %v3026_v28  ;;  %v1734_v40 = vpop.f32.mrb[48].mxu0  ;;  %v1512_v32 = vpop.f32.mrb[53].mxu1 }
 0x1de   :  { %v3028_v33 = vpop.eup %3027  ;;  %v2612_v34 = vadd.f32 %v1734_v40, %v3879_v30  ;;  %v2506_v57 = vpop.f32.mrb[49].mxu0 }
 0x1df   :  { %v1513_v61 = vpop.f32.mrb[54].mxu1  ;;  %3037 = vrcp.f32 %v2003_v27  ;;  %v2004_v36 = vadd.f32 1.0, %v3028_v33  ;;  %v1737_v37 = vpop.f32.mrb[50].mxu0 }
 0x1e0   :  { %v1515_v38 = vpop.f32.mrb[55].mxu1  ;;  %v2394_v41 = vmul.f32 -1.442695, %v2612_v34  ;;  %v2613_v42 = vadd.f32 %v1737_v37, %v3881_v31  ;;  %v2507_v44 = vpop.f32.mrb[51].mxu0 }
 0x1e1   :  { %v3030_v45 = vpop.eup %3029  ;;  %3039 = vrcp.f32 %v2004_v36 }
 0x1e2   :  { %2149 = vst.msk [vmem:[%s4107_s2 + $0x90] sm:$0xff] %vm2130_vm2, %v3030_v45  ;;  %3041 = vpow2.f32 %v2394_v41  ;;  %v2395_v46 = vmul.f32 -1.442695, %v2613_v42 }
 0x1e3   :  { %v3032_v30 = vpop.eup %3031 }
 0x1e4   :  { %v3034_v48 = vpop.eup %3033  ;;  %2150 = vst.msk [vmem:[%s4107_s2 + $0x98] sm:$0xff] %vm2130_vm2, %v3032_v30  ;;  %3043 = vpow2.f32 %v2395_v46  ;;  %v1518_v49 = vpop.f32.mrb[56].mxu1 }
 0x1e5   :  { %v2005_v31 = vadd.f32 1.0, %v3034_v48  ;;  %v1742_v35 = vpop.f32.mrb[52].mxu0  ;;  %v1520_v39 = vpop.f32.mrb[57].mxu1 }
 0x1e6   :  { %v3036_v2 = vpop.eup %3035  ;;  %v2614_v6 = vadd.f32 %v1742_v35, %v1510_v24  ;;  %v2510_v51 = vpop.f32.mrb[53].mxu0 }
 0x1e7   :  { %v1521_v52 = vpop.f32.mrb[58].mxu1  ;;  %3045 = vrcp.f32 %v2005_v31  ;;  %v2006_v53 = vadd.f32 1.0, %v3036_v2  ;;  %v1745_v55 = vpop.f32.mrb[54].mxu0 }
 0x1e8   :  { %v1523_v8 = vpop.f32.mrb[59].mxu1  ;;  %v2396_v56 = vmul.f32 -1.442695, %v2614_v6  ;;  %v2615_v58 = vadd.f32 %v1745_v55, %v1513_v61  ;;  %v2511_v59 = vpop.f32.mrb[55].mxu0 }
 0x1e9   :  { %v3038_v12 = vpop.eup %3037  ;;  %3047 = vrcp.f32 %v2006_v53 }
 0x1ea   :  { %2151 = vst.msk [vmem:[%s4107_s2 + $0xa0] sm:$0xff] %vm2130_vm2, %v3038_v12  ;;  %3049 = vpow2.f32 %v2396_v56  ;;  %v2397_v60 = vmul.f32 -1.442695, %v2615_v58 }
 0x1eb   :  { %v3040_v62 = vpop.eup %3039 }
 0x1ec   :  { %v3042_v63 = vpop.eup %3041  ;;  %2152 = vst.msk [vmem:[%s4107_s2 + $0xa8] sm:$0xff] %vm2130_vm2, %v3040_v62  ;;  %3051 = vpow2.f32 %v2397_v60  ;;  %v1526_v10 = vpop.f32.mrb[60].mxu1 }
 0x1ed   :  { %v2007_v15 = vadd.f32 1.0, %v3042_v63  ;;  %v1750_v43 = vpop.f32.mrb[56].mxu0  ;;  %v1528_v47 = vpop.f32.mrb[61].mxu1 }
 0x1ee   :  { %v3044_v1 = vpop.eup %3043  ;;  %v2616_v14 = vadd.f32 %v1750_v43, %v1518_v49  ;;  %v2514_v3 = vpop.f32.mrb[57].mxu0 }
 0x1ef   :  { %v1529_v4 = vpop.f32.mrb[62].mxu1  ;;  %3053 = vrcp.f32 %v2007_v15  ;;  %v2008_v18 = vadd.f32 1.0, %v3044_v1  ;;  %v1753_v5 = vpop.f32.mrb[58].mxu0 }
 0x1f0   :  { %v1531_v7 = vpop.f32.mrb[63].mxu1  ;;  %v2398_v9 = vmul.f32 -1.442695, %v2616_v14  ;;  %v2617_v11 = vadd.f32 %v1753_v5, %v1521_v52  ;;  %v2515_v0 = vpop.f32.mrb[59].mxu0 }
 0x1f1   :  { %v3046_v17 = vpop.eup %3045  ;;  %3055 = vrcp.f32 %v2008_v18 }
 0x1f2   :  { %2153 = vst.msk [vmem:[%s4107_s2 + $0xb0] sm:$0xff] %vm2130_vm2, %v3046_v17  ;;  %3057 = vpow2.f32 %v2398_v9  ;;  %v2399_v22 = vmul.f32 -1.442695, %v2617_v11 }
 0x1f3   :  { %v3048_v13 = vpop.eup %3047 }
 0x1f4   :  { %v3050_v21 = vpop.eup %3049  ;;  %2154 = vst.msk [vmem:[%s4107_s2 + $0xb8] sm:$0xff] %vm2130_vm2, %v3048_v13  ;;  %3059 = vpow2.f32 %v2399_v22  ;;  %v1534_v50 = vpop.f32.mrb[64].mxu1 }
 0x1f5   :  { %v2009_v54 = vadd.f32 1.0, %v3050_v21  ;;  %v1758_v16 = vpop.f32.mrb[60].mxu0  ;;  %v1536_v19 = vpop.f32.mrb[65].mxu1 }
 0x1f6   :  { %v3052_v20 = vpop.eup %3051  ;;  %v2618_v25 = vadd.f32 %v1758_v16, %v1526_v10  ;;  %v2518_v23 = vpop.f32.mrb[61].mxu0 }
 0x1f7   :  { %v1537_v26 = vpop.f32.mrb[66].mxu1  ;;  %3061 = vrcp.f32 %v2009_v54  ;;  %v2010_v29 = vadd.f32 1.0, %v3052_v20  ;;  %v1761_v28 = vpop.f32.mrb[62].mxu0 }
 0x1f8   :  { %v1539_v24 = vpop.f32.mrb[67].mxu1  ;;  %v2400_v27 = vmul.f32 -1.442695, %v2618_v25  ;;  %v2619_v40 = vadd.f32 %v1761_v28, %v1529_v4  ;;  %v2519_v32 = vpop.f32.mrb[63].mxu0 }
 0x1f9   :  { %v3054_v33 = vpop.eup %3053  ;;  %3063 = vrcp.f32 %v2010_v29 }
 0x1fa   :  { %2155 = vst.msk [vmem:[%s4107_s2 + $0xc0] sm:$0xff] %vm2130_vm2, %v3054_v33  ;;  %3065 = vpow2.f32 %v2400_v27  ;;  %v2401_v34 = vmul.f32 -1.442695, %v2619_v40 }
 0x1fb   :  { %v3056_v57 = vpop.eup %3055 }
 0x1fc   :  { %v3058_v61 = vpop.eup %3057  ;;  %2156 = vst.msk [vmem:[%s4107_s2 + $0xc8] sm:$0xff] %vm2130_vm2, %v3056_v57  ;;  %3067 = vpow2.f32 %v2401_v34  ;;  %v1542_v36 = vpop.f32.mrb[68].mxu1 }
 0x1fd   :  { %v2011_v37 = vadd.f32 1.0, %v3058_v61  ;;  %v1766_v38 = vpop.f32.mrb[64].mxu0  ;;  %v1544_v41 = vpop.f32.mrb[69].mxu1 }
 0x1fe   :  { %v3060_v42 = vpop.eup %3059  ;;  %v2620_v44 = vadd.f32 %v1766_v38, %v1534_v50  ;;  %v2522_v45 = vpop.f32.mrb[65].mxu0 }
 0x1ff   :  { %v1545_v46 = vpop.f32.mrb[70].mxu1  ;;  %3069 = vrcp.f32 %v2011_v37  ;;  %v2012_v30 = vadd.f32 1.0, %v3060_v42  ;;  %v1769_v48 = vpop.f32.mrb[66].mxu0 }
 0x200   :  { %v1547_v49 = vpop.f32.mrb[71].mxu1  ;;  %v2402_v31 = vmul.f32 -1.442695, %v2620_v44  ;;  %v2621_v35 = vadd.f32 %v1769_v48, %v1537_v26  ;;  %v2523_v39 = vpop.f32.mrb[67].mxu0 }
 0x201   :  { %v3062_v2 = vpop.eup %3061  ;;  %3071 = vrcp.f32 %v2012_v30 }
 0x202   :  { %2157 = vst.msk [vmem:[%s4107_s2 + $0xd0] sm:$0xff] %vm2130_vm2, %v3062_v2  ;;  %3073 = vpow2.f32 %v2402_v31  ;;  %v2403_v6 = vmul.f32 -1.442695, %v2621_v35 }
 0x203   :  { %v3064_v51 = vpop.eup %3063 }
 0x204   :  { %v3066_v52 = vpop.eup %3065  ;;  %2158 = vst.msk [vmem:[%s4107_s2 + $0xd8] sm:$0xff] %vm2130_vm2, %v3064_v51  ;;  %3075 = vpow2.f32 %v2403_v6  ;;  %v1550_v53 = vpop.f32.mrb[72].mxu1 }
 0x205   :  { %v2013_v55 = vadd.f32 1.0, %v3066_v52  ;;  %v1774_v8 = vpop.f32.mrb[68].mxu0  ;;  %v1552_v56 = vpop.f32.mrb[73].mxu1 }
 0x206   :  { %v3068_v58 = vpop.eup %3067  ;;  %v2622_v59 = vadd.f32 %v1774_v8, %v1542_v36  ;;  %v2526_v12 = vpop.f32.mrb[69].mxu0 }
 0x207   :  { %v1553_v60 = vpop.f32.mrb[74].mxu1  ;;  %3077 = vrcp.f32 %v2013_v55  ;;  %v2014_v62 = vadd.f32 1.0, %v3068_v58  ;;  %v1777_v63 = vpop.f32.mrb[70].mxu0 }
 0x208   :  { %v1555_v10 = vpop.f32.mrb[75].mxu1  ;;  %v2404_v15 = vmul.f32 -1.442695, %v2622_v59  ;;  %v2623_v43 = vadd.f32 %v1777_v63, %v1545_v46  ;;  %v2527_v47 = vpop.f32.mrb[71].mxu0 }
 0x209   :  { %v3070_v1 = vpop.eup %3069  ;;  %3079 = vrcp.f32 %v2014_v62 }
 0x20a   :  { %2159 = vst.msk [vmem:[%s4107_s2 + $0xe0] sm:$0xff] %vm2130_vm2, %v3070_v1  ;;  %3081 = vpow2.f32 %v2404_v15  ;;  %v2405_v14 = vmul.f32 -1.442695, %v2623_v43 }
 0x20b   :  { %v3072_v3 = vpop.eup %3071 }
 0x20c   :  { %v3074_v4 = vpop.eup %3073  ;;  %2160 = vst.msk [vmem:[%s4107_s2 + $0xe8] sm:$0xff] %vm2130_vm2, %v3072_v3  ;;  %3083 = vpow2.f32 %v2405_v14  ;;  %v1558_v18 = vpop.f32.mrb[76].mxu1 }
 0x20d   :  { %v2015_v5 = vadd.f32 1.0, %v3074_v4  ;;  %v1782_v7 = vpop.f32.mrb[72].mxu0  ;;  %v1560_v9 = vpop.f32.mrb[77].mxu1 }
 0x20e   :  { %v3076_v11 = vpop.eup %3075  ;;  %v2624_v0 = vadd.f32 %v1782_v7, %v1550_v53  ;;  %v2530_v17 = vpop.f32.mrb[73].mxu0 }
 0x20f   :  { %v1561_v22 = vpop.f32.mrb[78].mxu1  ;;  %3085 = vrcp.f32 %v2015_v5  ;;  %v2016_v13 = vadd.f32 1.0, %v3076_v11  ;;  %v1785_v21 = vpop.f32.mrb[74].mxu0 }
 0x210   :  { %v1563_v50 = vpop.f32.mrb[79].mxu1  ;;  %v2406_v54 = vmul.f32 -1.442695, %v2624_v0  ;;  %v2625_v16 = vadd.f32 %v1785_v21, %v1553_v60  ;;  %v2531_v19 = vpop.f32.mrb[75].mxu0 }
 0x211   :  { %v3078_v20 = vpop.eup %3077  ;;  %3087 = vrcp.f32 %v2016_v13 }
 0x212   :  { %2161 = vst.msk [vmem:[%s4107_s2 + $0xf0] sm:$0xff] %vm2130_vm2, %v3078_v20  ;;  %3089 = vpow2.f32 %v2406_v54  ;;  %v2407_v25 = vmul.f32 -1.442695, %v2625_v16 }
 0x213   :  { %v3080_v23 = vpop.eup %3079 }
 0x214   :  { %v3082_v26 = vpop.eup %3081  ;;  %2162 = vst.msk [vmem:[%s4107_s2 + $0xf8] sm:$0xff] %vm2130_vm2, %v3080_v23  ;;  %3091 = vpow2.f32 %v2407_v25  ;;  %v1566_v29 = vpop.f32.mrb[80].mxu1 }
 0x215   :  { %v2017_v28 = vadd.f32 1.0, %v3082_v26  ;;  %v1790_v24 = vpop.f32.mrb[76].mxu0  ;;  %v1568_v27 = vpop.f32.mrb[81].mxu1 }
 0x216   :  { %v3084_v40 = vpop.eup %3083  ;;  %v2626_v32 = vadd.f32 %v1790_v24, %v1558_v18  ;;  %v2534_v33 = vpop.f32.mrb[77].mxu0 }
 0x217   :  { %v1569_v34 = vpop.f32.mrb[82].mxu1  ;;  %3093 = vrcp.f32 %v2017_v28  ;;  %v2018_v57 = vadd.f32 1.0, %v3084_v40  ;;  %v1793_v61 = vpop.f32.mrb[78].mxu0 }
 0x218   :  { %v1571_v36 = vpop.f32.mrb[83].mxu1  ;;  %v2408_v37 = vmul.f32 -1.442695, %v2626_v32  ;;  %v2627_v38 = vadd.f32 %v1793_v61, %v1561_v22  ;;  %v2535_v41 = vpop.f32.mrb[79].mxu0 }
 0x219   :  { %v3086_v42 = vpop.eup %3085  ;;  %3095 = vrcp.f32 %v2018_v57 }
 0x21a   :  { %2163 = vst.msk [vmem:[%s4107_s2 + $0x100] sm:$0xff] %vm2130_vm2, %v3086_v42  ;;  %3097 = vpow2.f32 %v2408_v37  ;;  %v2409_v44 = vmul.f32 -1.442695, %v2627_v38 }
 0x21b   :  { %v3088_v45 = vpop.eup %3087 }
 0x21c   :  { %v3090_v46 = vpop.eup %3089  ;;  %2164 = vst.msk [vmem:[%s4107_s2 + $0x108] sm:$0xff] %vm2130_vm2, %v3088_v45  ;;  %3099 = vpow2.f32 %v2409_v44  ;;  %v1574_v30 = vpop.f32.mrb[84].mxu1 }
 0x21d   :  { %v2019_v48 = vadd.f32 1.0, %v3090_v46  ;;  %v1798_v49 = vpop.f32.mrb[80].mxu0  ;;  %v1576_v31 = vpop.f32.mrb[85].mxu1 }
 0x21e   :  { %v3092_v35 = vpop.eup %3091  ;;  %v2628_v39 = vadd.f32 %v1798_v49, %v1566_v29  ;;  %v2538_v2 = vpop.f32.mrb[81].mxu0 }
 0x21f   :  { %v1577_v6 = vpop.f32.mrb[86].mxu1  ;;  %3101 = vrcp.f32 %v2019_v48  ;;  %v2020_v51 = vadd.f32 1.0, %v3092_v35  ;;  %v1801_v52 = vpop.f32.mrb[82].mxu0 }
 0x220   :  { %v1579_v53 = vpop.f32.mrb[87].mxu1  ;;  %v2410_v55 = vmul.f32 -1.442695, %v2628_v39  ;;  %v2629_v8 = vadd.f32 %v1801_v52, %v1569_v34  ;;  %v2539_v56 = vpop.f32.mrb[83].mxu0 }
 0x221   :  { %v3094_v58 = vpop.eup %3093  ;;  %3103 = vrcp.f32 %v2020_v51 }
 0x222   :  { %2165 = vst.msk [vmem:[%s4107_s2 + $0x110] sm:$0xff] %vm2130_vm2, %v3094_v58  ;;  %3105 = vpow2.f32 %v2410_v55  ;;  %v2411_v59 = vmul.f32 -1.442695, %v2629_v8 }
 0x223   :  { %v3096_v12 = vpop.eup %3095 }
 0x224   :  { %v3098_v60 = vpop.eup %3097  ;;  %2166 = vst.msk [vmem:[%s4107_s2 + $0x118] sm:$0xff] %vm2130_vm2, %v3096_v12  ;;  %3107 = vpow2.f32 %v2411_v59  ;;  %v1582_v62 = vpop.f32.mrb[88].mxu1 }
 0x225   :  { %v2021_v63 = vadd.f32 1.0, %v3098_v60  ;;  %v1806_v10 = vpop.f32.mrb[84].mxu0  ;;  %v1584_v15 = vpop.f32.mrb[89].mxu1 }
 0x226   :  { %v3100_v43 = vpop.eup %3099  ;;  %v2630_v47 = vadd.f32 %v1806_v10, %v1574_v30  ;;  %v2542_v1 = vpop.f32.mrb[85].mxu0 }
 0x227   :  { %v1585_v14 = vpop.f32.mrb[90].mxu1  ;;  %3109 = vrcp.f32 %v2021_v63  ;;  %v2022_v3 = vadd.f32 1.0, %v3100_v43  ;;  %v1809_v4 = vpop.f32.mrb[86].mxu0 }
 0x228   :  { %v1587_v18 = vpop.f32.mrb[91].mxu1  ;;  %v2412_v5 = vmul.f32 -1.442695, %v2630_v47  ;;  %v2631_v7 = vadd.f32 %v1809_v4, %v1577_v6  ;;  %v2543_v9 = vpop.f32.mrb[87].mxu0 }
 0x229   :  { %v3102_v11 = vpop.eup %3101  ;;  %3111 = vrcp.f32 %v2022_v3 }
 0x22a   :  { %2167 = vst.msk [vmem:[%s4107_s2 + $0x120] sm:$0xff] %vm2130_vm2, %v3102_v11  ;;  %3113 = vpow2.f32 %v2412_v5  ;;  %v2413_v0 = vmul.f32 -1.442695, %v2631_v7 }
 0x22b   :  { %v3104_v17 = vpop.eup %3103 }
 0x22c   :  { %v3106_v22 = vpop.eup %3105  ;;  %2168 = vst.msk [vmem:[%s4107_s2 + $0x128] sm:$0xff] %vm2130_vm2, %v3104_v17  ;;  %3115 = vpow2.f32 %v2413_v0  ;;  %v1590_v13 = vpop.f32.mrb[92].mxu1 }
 0x22d   :  { %v2023_v21 = vadd.f32 1.0, %v3106_v22  ;;  %v1814_v50 = vpop.f32.mrb[88].mxu0  ;;  %v1592_v54 = vpop.f32.mrb[93].mxu1 }
 0x22e   :  { %v3108_v16 = vpop.eup %3107  ;;  %v2632_v19 = vadd.f32 %v1814_v50, %v1582_v62  ;;  %v2546_v20 = vpop.f32.mrb[89].mxu0 }
 0x22f   :  { %v1593_v25 = vpop.f32.mrb[94].mxu1  ;;  %3117 = vrcp.f32 %v2023_v21  ;;  %v2024_v23 = vadd.f32 1.0, %v3108_v16  ;;  %v1817_v26 = vpop.f32.mrb[90].mxu0 }
 0x230   :  { %v1595_v29 = vpop.f32.mrb[95].mxu1  ;;  %v2414_v28 = vmul.f32 -1.442695, %v2632_v19  ;;  %v2633_v24 = vadd.f32 %v1817_v26, %v1585_v14  ;;  %v2547_v27 = vpop.f32.mrb[91].mxu0 }
 0x231   :  { %v3110_v40 = vpop.eup %3109  ;;  %3119 = vrcp.f32 %v2024_v23 }
 0x232   :  { %2169 = vst.msk [vmem:[%s4107_s2 + $0x130] sm:$0xff] %vm2130_vm2, %v3110_v40  ;;  %3121 = vpow2.f32 %v2414_v28  ;;  %v2415_v32 = vmul.f32 -1.442695, %v2633_v24 }
 0x233   :  { %v3112_v33 = vpop.eup %3111 }
 0x234   :  { %v3114_v34 = vpop.eup %3113  ;;  %2170 = vst.msk [vmem:[%s4107_s2 + $0x138] sm:$0xff] %vm2130_vm2, %v3112_v33  ;;  %3123 = vpow2.f32 %v2415_v32  ;;  %v1598_v57 = vpop.f32.mrb[96].mxu1 }
 0x235   :  { %v2025_v61 = vadd.f32 1.0, %v3114_v34  ;;  %v1822_v36 = vpop.f32.mrb[92].mxu0  ;;  %v1600_v37 = vpop.f32.mrb[97].mxu1 }
 0x236   :  { %v3116_v38 = vpop.eup %3115  ;;  %v2634_v41 = vadd.f32 %v1822_v36, %v1590_v13  ;;  %v2550_v42 = vpop.f32.mrb[93].mxu0 }
 0x237   :  { %v1601_v44 = vpop.f32.mrb[98].mxu1  ;;  %3125 = vrcp.f32 %v2025_v61  ;;  %v2026_v45 = vadd.f32 1.0, %v3116_v38  ;;  %v1825_v46 = vpop.f32.mrb[94].mxu0 }
 0x238   :  { %v1602_v30 = vpop.f32.mrb[99].mxu1  ;;  %v2416_v48 = vmul.f32 -1.442695, %v2634_v41  ;;  %v2635_v49 = vadd.f32 %v1825_v46, %v1593_v25  ;;  %v2551_v31 = vpop.f32.mrb[95].mxu0 }
 0x239   :  { %v3118_v35 = vpop.eup %3117  ;;  %3127 = vrcp.f32 %v2026_v45 }
 0x23a   :  { %2171 = vst.msk [vmem:[%s4107_s2 + $0x140] sm:$0xff] %vm2130_vm2, %v3118_v35  ;;  %3129 = vpow2.f32 %v2416_v48  ;;  %v2417_v39 = vmul.f32 -1.442695, %v2635_v49 }
 0x23b   :  { %v3120_v2 = vpop.eup %3119 }
 0x23c   :  { %v3122_v6 = vpop.eup %3121  ;;  %2172 = vst.msk [vmem:[%s4107_s2 + $0x148] sm:$0xff] %vm2130_vm2, %v3120_v2  ;;  %3131 = vpow2.f32 %v2417_v39 }
 0x23d   :  { %v2027_v51 = vadd.f32 1.0, %v3122_v6  ;;  %v1830_v52 = vpop.f32.mrb[96].mxu0 }
 0x23e   :  { %v3124_v53 = vpop.eup %3123  ;;  %v2636_v55 = vadd.f32 %v1830_v52, %v1598_v57  ;;  %v2554_v8 = vpop.f32.mrb[97].mxu0 }
 0x23f   :  { %3133 = vrcp.f32 %v2027_v51  ;;  %v2028_v56 = vadd.f32 1.0, %v3124_v53  ;;  %v1833_v58 = vpop.f32.mrb[98].mxu0 }
 0x240   :  { %v2418_v59 = vmul.f32 -1.442695, %v2636_v55  ;;  %v2555_v12 = vpop.f32.mrb[99].mxu0 }
 0x241   :  { %v3126_v60 = vpop.eup %3125  ;;  %3135 = vrcp.f32 %v2028_v56 }
 0x242   :  { %2173 = vst.msk [vmem:[%s4107_s2 + $0x150] sm:$0xff] %vm2130_vm2, %v3126_v60  ;;  %3137 = vpow2.f32 %v2418_v59 }
 0x243   :  { %v3128_v62 = vpop.eup %3127 }
 0x244   :  { %v3130_v63 = vpop.eup %3129  ;;  %2174 = vst.msk [vmem:[%s4107_s2 + $0x158] sm:$0xff] %vm2130_vm2, %v3128_v62 }
 0x245   :  { %v2029_v10 = vadd.f32 1.0, %v3130_v63 }
 0x246   :  { %v3132_v15 = vpop.eup %3131 }
 0x247   :  { %3139 = vrcp.f32 %v2029_v10  ;;  %v2030_v43 = vadd.f32 1.0, %v3132_v15 }
 0x249   :  { %v3134_v47 = vpop.eup %3133  ;;  %3141 = vrcp.f32 %v2030_v43 }
 0x24a   :  { %2175 = vst.msk [vmem:[%s4107_s2 + $0x160] sm:$0xff] %vm2130_vm2, %v3134_v47 }
 0x24b   :  { %v3136_v1 = vpop.eup %3135 }
 0x24c   :  { %v3138_v14 = vpop.eup %3137  ;;  %2176 = vst.msk [vmem:[%s4107_s2 + $0x168] sm:$0xff] %vm2130_vm2, %v3136_v1 }
 0x24d   :  { %v2031_v3 = vadd.f32 1.0, %v3138_v14 }
 0x24f   :  { %3143 = vrcp.f32 %v2031_v3 }
 0x251   :  { %v3140_v4 = vpop.eup %3139 }
 0x252   :  { %2177 = vst.msk [vmem:[%s4107_s2 + $0x170] sm:$0xff] %vm2130_vm2, %v3140_v4 }
 0x253   :  { %v3142_v18 = vpop.eup %3141 }
 0x254   :  { %2178 = vst.msk [vmem:[%s4107_s2 + $0x178] sm:$0xff] %vm2130_vm2, %v3142_v18 }
 0x259   :  { %v3144_v5 = vpop.eup %3143 }
 0x25a   :  { %2179 = vst.msk [vmem:[%s4107_s2 + $0x180] sm:$0xff] %vm2130_vm2, %v3144_v5 }

</bundles_post_ra>
